<compile_context>
chip_gen: v7x
topology: tpu7x:2x2x1
jax: 0.10.0
libtpu: 0.0.40
codegen_flags: <defaults>
</compile_context>

<pallas_src>
import jax
import jax.numpy as jnp
from jax.experimental import pallas as pl
from jax.experimental.pallas import tpu as pltpu


def _round_up(x, m):
    return -(-x // m) * m


# ------------------------- fused forward kernel ----------------------------
def fused_kernel(x_ref,
                 wih1f_ref, whh1f_ref, b1f_ref, wih1b_ref, whh1b_ref, b1b_ref,
                 wih2f_ref, whh2f_ref, b2f_ref, wih2b_ref, whh2b_ref, b2b_ref,
                 w1_ref, fb1_ref, w2_ref, fb2_ref,
                 out_ref,
                 gx_ref, seq1_ref, seq2_ref, h_ref, c_ref):
    """Whole post-embedding forward.

    x_ref:            [T, Bp, Ep]   time-major embedded input (lane-padded)
    wih*_ref:         [Inp, 4Hp]    input->gates weights (gate blocks lane-aligned)
    whh*_ref:         [Hp, 4Hp]     hidden->gates weights
    b*_ref:           [1, 4Hp]      combined bias (b_ih + b_hh)
    w1_ref/fb1_ref:   [2Hp, Hp] / [1, Hp]    fc1
    w2_ref/fb2_ref:   [Hp, 2]  / [1, 2]      fc2
    out_ref:          [Bp, 2]
    gx_ref:           [T, Bp, 4Hp]  precomputed input projection (reused per direction)
    seq1_ref/seq2_ref:[T, Bp, 2Hp]  layer outputs (fwd in cols 0:Hp, bwd in Hp:2Hp)
    h_ref/c_ref:      [Bp, Hp]      recurrent state scratch
    """
    T, Bp, _ = x_ref.shape
    Hp = whh1f_ref.shape[0]

    def run_direction(in_ref, wih_ref, whh_ref, b_ref, out_seq_ref, col_off, reverse):
        in_dim = in_ref.shape[-1]
        # Hoisted input projection: one MXU matmul for the whole sequence,
        # off the serial critical path.
        x2d = in_ref[...].reshape(T * Bp, in_dim)
        gx = (jnp.dot(x2d, wih_ref[...], preferred_element_type=jnp.float32)
              + b_ref[...])
        gx_ref[...] = gx.reshape(T, Bp, 4 * Hp)
        h_ref[...] = jnp.zeros_like(h_ref)
        c_ref[...] = jnp.zeros_like(c_ref)

        def step(i, carry):
            t = (T - 1 - i) if reverse else i
            h_prev = h_ref[...]
            c_prev = c_ref[...]
            # Recurrence: only the small hidden matmul + elementwise gate math.
            gates = gx_ref[t] + jnp.dot(h_prev, whh_ref[...],
                                        preferred_element_type=jnp.float32)
            i_g = jax.nn.sigmoid(gates[:, 0 * Hp:1 * Hp])   # lane-aligned gate blocks
            f_g = jax.nn.sigmoid(gates[:, 1 * Hp:2 * Hp])
            g_g = jnp.tanh(gates[:, 2 * Hp:3 * Hp])
            o_g = jax.nn.sigmoid(gates[:, 3 * Hp:4 * Hp])
            c_new = f_g * c_prev + i_g * g_g
            h_new = o_g * jnp.tanh(c_new)
            h_ref[...] = h_new
            c_ref[...] = c_new
            out_seq_ref[t, :, col_off:col_off + Hp] = h_new  # lane-tile aligned store
            return carry

        jax.lax.fori_loop(0, T, step, 0, unroll=True)

    # Layer 1 (input = embeddings): fwd then bwd, both into seq1 (no concat needed).
    run_direction(x_ref, wih1f_ref, whh1f_ref, b1f_ref, seq1_ref, 0, False)
    run_direction(x_ref, wih1b_ref, whh1b_ref, b1b_ref, seq1_ref, Hp, True)
    # Layer 2 (input = layer-1 output): fwd then bwd, both into seq2.
    run_direction(seq1_ref, wih2f_ref, whh2f_ref, b2f_ref, seq2_ref, 0, False)
    run_direction(seq1_ref, wih2b_ref, whh2b_ref, b2b_ref, seq2_ref, Hp, True)

    # Head: relu(fc1(x)) -> mean over sequence (== avg_pool2d((T,1))) -> fc2,
    # as flat 2-D matmuls so the MXU sees >= 8 sublane rows per push.
    h2d = seq2_ref[...].reshape(T * Bp, 2 * Hp)
    f1 = jnp.maximum(
        jnp.dot(h2d, w1_ref[...], preferred_element_type=jnp.float32) + fb1_ref[...],
        0.0)
    m = jnp.mean(f1.reshape(T, Bp, -1), axis=0)             # mean over time axis
    out_ref[...] = (jnp.dot(m, w2_ref[...], preferred_element_type=jnp.float32)
                    + fb2_ref[...])


def run_fused(x_emb_tbe, params):
    T, Bp, _ = x_emb_tbe.shape
    Hp = params['lstm'][0]['fwd'][1].shape[0]
    l1f, l1b = params['lstm'][0]['fwd'], params['lstm'][0]['bwd']
    l2f, l2b = params['lstm'][1]['fwd'], params['lstm'][1]['bwd']
    args = (x_emb_tbe, *l1f, *l1b, *l2f, *l2b,
            params['fc1_w'], params['fc1_b'], params['fc2_w'], params['fc2_b'])
    return pl.pallas_call(
        fused_kernel,
        out_shape=jax.ShapeDtypeStruct((Bp, 2), jnp.float32),
        in_specs=[pl.BlockSpec(memory_space=pltpu.MemorySpace.VMEM)] * len(args),
        out_specs=pl.BlockSpec(memory_space=pltpu.MemorySpace.VMEM),
        scratch_shapes=[
            pltpu.VMEM((T, Bp, 4 * Hp), jnp.float32),   # gates_x (reused per direction)
            pltpu.VMEM((T, Bp, 2 * Hp), jnp.float32),   # layer-1 output
            pltpu.VMEM((T, Bp, 2 * Hp), jnp.float32),   # layer-2 output
            pltpu.VMEM((Bp, Hp), jnp.float32),          # h state
            pltpu.VMEM((Bp, Hp), jnp.float32),          # c state
        ],
    )(*args)


# --------------------------- parameters / model -----------------------------
def init_params(key, max_words, emb_size, hid_size):
    """PyTorch-equivalent init, stored pre-transposed and zero-padded to
    TPU-friendly shapes (hidden/emb -> multiples of 128 lanes; padding is inert)."""
    H = hid_size
    Hp = _round_up(hid_size, 128)
    Ep = _round_up(emb_size, 128)

    keys = jax.random.split(key, 32)
    ki = iter(keys)

    def uniform(k, shape, bound):
        return jax.random.uniform(k, shape, jnp.float32, -bound, bound)

    def pad_gate_weight(w, in_chunks, in_pad):
        # w: PyTorch layout [4H, in_size] (gate order i,f,g,o). Returns [in_pad, 4*Hp]
        # with each gate block transposed into its own lane-aligned column block.
        out = jnp.zeros((in_pad, 4 * Hp), jnp.float32)
        for g in range(4):
            blk = w[g * H:(g + 1) * H, :].T                # [in_size, H]
            for src, dst, ln in in_chunks:
                out = out.at[dst:dst + ln, g * Hp:g * Hp + H].set(blk[src:src + ln, :])
        return out

    def pad_gate_bias(b):
        out = jnp.zeros((1, 4 * Hp), jnp.float32)
        for g in range(4):
            out = out.at[0, g * Hp:g * Hp + H].set(b[g * H:(g + 1) * H])
        return out

    params = {}
    # nn.Embedding default init ~ N(0, 1); padded columns are zero.
    emb = jax.random.normal(next(ki), (max_words, emb_size), jnp.float32)
    params['embedding'] = (jnp.zeros((max_words, Ep), jnp.float32)
                           .at[:, :emb_size].set(emb))

    lstm_bound = 1.0 / (H ** 0.5)
    lstm = []
    for layer in range(2):
        if layer == 0:
            in_size, in_pad = emb_size, Ep
            in_chunks = [(0, 0, emb_size)]
        else:
            in_size, in_pad = 2 * H, 2 * Hp
            in_chunks = [(0, 0, H), (H, Hp, H)]            # fwd block, bwd block
        layer_p = {}
        for d in ('fwd', 'bwd'):
            w_ih = uniform(next(ki), (4 * H, in_size), lstm_bound)
            w_hh = uniform(next(ki), (4 * H, H), lstm_bound)
            b_ih = uniform(next(ki), (4 * H,), lstm_bound)
            b_hh = uniform(next(ki), (4 * H,), lstm_bound)
            layer_p[d] = (pad_gate_weight(w_ih, in_chunks, in_pad),
                          pad_gate_weight(w_hh, [(0, 0, H)], Hp),
                          pad_gate_bias(b_ih + b_hh))
        lstm.append(layer_p)
    params['lstm'] = lstm

    fc1_bound = 1.0 / ((2 * H) ** 0.5)
    fc2_bound = 1.0 / (H ** 0.5)
    fc1_w = uniform(next(ki), (H, 2 * H), fc1_bound)       # PyTorch [out, in]
    fc1_b = uniform(next(ki), (H,), fc1_bound)
    fc2_w = uniform(next(ki), (2, H), fc2_bound)
    fc2_b = uniform(next(ki), (2,), fc2_bound)

    w1t = fc1_w.T                                          # [2H, H]
    params['fc1_w'] = (jnp.zeros((2 * Hp, Hp), jnp.float32)
                       .at[0:H, 0:H].set(w1t[0:H])
                       .at[Hp:Hp + H, 0:H].set(w1t[H:2 * H]))
    params['fc1_b'] = jnp.zeros((1, Hp), jnp.float32).at[0, :H].set(fc1_b)
    params['fc2_w'] = jnp.zeros((Hp, 2), jnp.float32).at[:H, :].set(fc2_w.T)
    params['fc2_b'] = fc2_b.reshape(1, 2)
    return params


def model_forward(params, x_ids):
    """x_ids: [B, T] int32 token ids -> [B, 2] logits."""
    B, T = x_ids.shape
    Bp = _round_up(max(B, 8), 8)                            # sublane-pad the batch
    ids = jnp.pad(x_ids, ((0, Bp - B), (0, 0)))             # padded rows are independent
    # Embedding lookup straight into time-major layout (transpose the tiny id
    # matrix instead of round-tripping float activations through a transpose).
    x_emb = jnp.take(params['embedding'], ids.T, axis=0)    # [T, Bp, Ep]
    # TODO(synk): nn.Dropout is a no-op in eval mode; training-mode dropout not implemented.
    out = run_fused(x_emb, params)                          # [Bp, 2]
    return out[:B]


if __name__ == "__main__":
    max_words, emb_size, hid_size, dropout = 100, 32, 32, 0.5
    bs, maxlen = 2, 8

    key = jax.random.PRNGKey(0)
    kp, kx = jax.random.split(key)
    params = init_params(kp, max_words, emb_size, hid_size)
    x = jax.random.randint(kx, (bs, maxlen), 0, max_words, dtype=jnp.int32)

    fwd = jax.jit(model_forward)
    out = fwd(params, x)
    jax.block_until_ready(out)
    assert out.shape == (bs, 2), out.shape
    print("KERNEL_OK")
</pallas_src>

<mosaic_0001>
module attributes {stable_mosaic.version = 11 : i64} {
  func.func @fused_kernel(%arg0: memref<8x8x128xf32, #tpu.memory_space<vmem>>, %arg1: memref<128x512xf32, #tpu.memory_space<vmem>>, %arg2: memref<128x512xf32, #tpu.memory_space<vmem>>, %arg3: memref<1x512xf32, #tpu.memory_space<vmem>>, %arg4: memref<128x512xf32, #tpu.memory_space<vmem>>, %arg5: memref<128x512xf32, #tpu.memory_space<vmem>>, %arg6: memref<1x512xf32, #tpu.memory_space<vmem>>, %arg7: memref<256x512xf32, #tpu.memory_space<vmem>>, %arg8: memref<128x512xf32, #tpu.memory_space<vmem>>, %arg9: memref<1x512xf32, #tpu.memory_space<vmem>>, %arg10: memref<256x512xf32, #tpu.memory_space<vmem>>, %arg11: memref<128x512xf32, #tpu.memory_space<vmem>>, %arg12: memref<1x512xf32, #tpu.memory_space<vmem>>, %arg13: memref<256x128xf32, #tpu.memory_space<vmem>>, %arg14: memref<1x128xf32, #tpu.memory_space<vmem>>, %arg15: memref<128x2xf32, #tpu.memory_space<vmem>>, %arg16: memref<1x2xf32, #tpu.memory_space<vmem>>, %arg17: memref<8x2xf32, #tpu.memory_space<vmem>>, %arg18: memref<8x8x512xf32, #tpu.memory_space<vmem>>, %arg19: memref<8x8x256xf32, #tpu.memory_space<vmem>>, %arg20: memref<8x8x256xf32, #tpu.memory_space<vmem>>, %arg21: memref<8x128xf32, #tpu.memory_space<vmem>>, %arg22: memref<8x128xf32, #tpu.memory_space<vmem>>) attributes {dimension_semantics = [], scalar_prefetch = 0 : i64, scratch_operands = 5 : i64, tpu.core_type = #tpu.core_type<tc>} {
    %c0 = arith.constant 0 : index
    %c0_0 = arith.constant 0 : index
    %c0_1 = arith.constant 0 : index
    %0 = vector.load %arg0[%c0, %c0_0, %c0_1] : memref<8x8x128xf32, #tpu.memory_space<vmem>>, vector<8x8x128xf32>
    %1 = vector.shape_cast %0 : vector<8x8x128xf32> to vector<64x128xf32>
    %c0_2 = arith.constant 0 : index
    %c0_3 = arith.constant 0 : index
    %2 = vector.load %arg1[%c0_2, %c0_3] : memref<128x512xf32, #tpu.memory_space<vmem>>, vector<128x512xf32>
    %cst = arith.constant dense<0.000000e+00> : vector<64x512xf32>
    %3 = tpu.matmul %1, %2, %cst {dimension_numbers = #tpu.dot_dimension_numbers<[1], [0], [0], [1], [0, 0, 1, 1], [], []>} : vector<64x128xf32>, vector<128x512xf32>, vector<64x512xf32> -> vector<64x512xf32>
    %c0_4 = arith.constant 0 : index
    %c0_5 = arith.constant 0 : index
    %4 = vector.load %arg3[%c0_4, %c0_5] : memref<1x512xf32, #tpu.memory_space<vmem>>, vector<1x512xf32>
    %5 = vector.broadcast %4 : vector<1x512xf32> to vector<64x512xf32>
    %6 = arith.addf %3, %5 : vector<64x512xf32>
    %7 = vector.shape_cast %6 : vector<64x512xf32> to vector<8x8x512xf32>
    %c0_6 = arith.constant 0 : index
    %c0_7 = arith.constant 0 : index
    %c0_8 = arith.constant 0 : index
    %8 = vector.load %arg18[%c0_6, %c0_7, %c0_8] : memref<8x8x512xf32, #tpu.memory_space<vmem>>, vector<8x8x512xf32>
    tpu.vector_store %arg18[%c0_6, %c0_7, %c0_8], %7 {strides = array<i32>} : memref<8x8x512xf32, #tpu.memory_space<vmem>>, vector<8x8x512xf32>,
    %cst_9 = arith.constant 0.000000e+00 : f32
    %9 = vector.broadcast %cst_9 : f32 to vector<8x128xf32>
    %c0_10 = arith.constant 0 : index
    %c0_11 = arith.constant 0 : index
    %10 = vector.load %arg21[%c0_10, %c0_11] : memref<8x128xf32, #tpu.memory_space<vmem>>, vector<8x128xf32>
    tpu.vector_store %arg21[%c0_10, %c0_11], %9 {strides = array<i32>} : memref<8x128xf32, #tpu.memory_space<vmem>>, vector<8x128xf32>,
    %cst_12 = arith.constant 0.000000e+00 : f32
    %11 = vector.broadcast %cst_12 : f32 to vector<8x128xf32>
    %c0_13 = arith.constant 0 : index
    %c0_14 = arith.constant 0 : index
    %12 = vector.load %arg22[%c0_13, %c0_14] : memref<8x128xf32, #tpu.memory_space<vmem>>, vector<8x128xf32>
    tpu.vector_store %arg22[%c0_13, %c0_14], %11 {strides = array<i32>} : memref<8x128xf32, #tpu.memory_space<vmem>>, vector<8x128xf32>,
    %c0_i32 = arith.constant 0 : i32
    %c0_15 = arith.constant 0 : index
    %c0_16 = arith.constant 0 : index
    %13 = vector.load %arg21[%c0_15, %c0_16] : memref<8x128xf32, #tpu.memory_space<vmem>>, vector<8x128xf32>
    %c0_17 = arith.constant 0 : index
    %c0_18 = arith.constant 0 : index
    %14 = vector.load %arg22[%c0_17, %c0_18] : memref<8x128xf32, #tpu.memory_space<vmem>>, vector<8x128xf32>
    %15 = arith.index_cast %c0_i32 : i32 to index
    %c0_19 = arith.constant 0 : index
    %c0_20 = arith.constant 0 : index
    %16 = vector.load %arg18[%15, %c0_19, %c0_20] : memref<8x8x512xf32, #tpu.memory_space<vmem>>, vector<1x8x512xf32>
    %17 = vector.shape_cast %16 : vector<1x8x512xf32> to vector<8x512xf32>
    %c0_21 = arith.constant 0 : index
    %c0_22 = arith.constant 0 : index
    %18 = vector.load %arg2[%c0_21, %c0_22] : memref<128x512xf32, #tpu.memory_space<vmem>>, vector<128x512xf32>
    %cst_23 = arith.constant dense<0.000000e+00> : vector<8x512xf32>
    %19 = tpu.matmul %13, %18, %cst_23 {dimension_numbers = #tpu.dot_dimension_numbers<[1], [0], [0], [1], [0, 0, 1, 1], [], []>} : vector<8x128xf32>, vector<128x512xf32>, vector<8x512xf32> -> vector<8x512xf32>
    %20 = arith.addf %17, %19 : vector<8x512xf32>
    %21 = vector.extract_strided_slice %20 {offsets = [0, 0], sizes = [8, 128], strides = [1, 1]} : vector<8x512xf32> to vector<8x128xf32>
    %22 = arith.negf %21 : vector<8x128xf32>
    %23 = math.exp %22 : vector<8x128xf32>
    %cst_24 = arith.constant 1.000000e+00 : f32
    %24 = vector.broadcast %cst_24 : f32 to vector<8x128xf32>
    %25 = arith.addf %24, %23 : vector<8x128xf32>
    %26 = arith.divf %24, %25 : vector<8x128xf32>
    %27 = vector.extract_strided_slice %20 {offsets = [0, 128], sizes = [8, 128], strides = [1, 1]} : vector<8x512xf32> to vector<8x128xf32>
    %28 = arith.negf %27 : vector<8x128xf32>
    %29 = math.exp %28 : vector<8x128xf32>
    %cst_25 = arith.constant 1.000000e+00 : f32
    %30 = vector.broadcast %cst_25 : f32 to vector<8x128xf32>
    %31 = arith.addf %30, %29 : vector<8x128xf32>
    %32 = arith.divf %30, %31 : vector<8x128xf32>
    %33 = vector.extract_strided_slice %20 {offsets = [0, 256], sizes = [8, 128], strides = [1, 1]} : vector<8x512xf32> to vector<8x128xf32>
    %34 = math.tanh %33 : vector<8x128xf32>
    %35 = vector.extract_strided_slice %20 {offsets = [0, 384], sizes = [8, 128], strides = [1, 1]} : vector<8x512xf32> to vector<8x128xf32>
    %36 = arith.negf %35 : vector<8x128xf32>
    %37 = math.exp %36 : vector<8x128xf32>
    %cst_26 = arith.constant 1.000000e+00 : f32
    %38 = vector.broadcast %cst_26 : f32 to vector<8x128xf32>
    %39 = arith.addf %38, %37 : vector<8x128xf32>
    %40 = arith.divf %38, %39 : vector<8x128xf32>
    %41 = arith.mulf %32, %14 : vector<8x128xf32>
    %42 = arith.mulf %26, %34 : vector<8x128xf32>
    %43 = arith.addf %41, %42 : vector<8x128xf32>
    %44 = math.tanh %43 : vector<8x128xf32>
    %45 = arith.mulf %40, %44 : vector<8x128xf32>
    %c0_27 = arith.constant 0 : index
    %c0_28 = arith.constant 0 : index
    %46 = vector.load %arg21[%c0_27, %c0_28] : memref<8x128xf32, #tpu.memory_space<vmem>>, vector<8x128xf32>
    tpu.vector_store %arg21[%c0_27, %c0_28], %45 {strides = array<i32>} : memref<8x128xf32, #tpu.memory_space<vmem>>, vector<8x128xf32>,
    %c0_29 = arith.constant 0 : index
    %c0_30 = arith.constant 0 : index
    %47 = vector.load %arg22[%c0_29, %c0_30] : memref<8x128xf32, #tpu.memory_space<vmem>>, vector<8x128xf32>
    tpu.vector_store %arg22[%c0_29, %c0_30], %43 {strides = array<i32>} : memref<8x128xf32, #tpu.memory_space<vmem>>, vector<8x128xf32>,
    %48 = arith.index_cast %c0_i32 : i32 to index
    %c0_31 = arith.constant 0 : index
    %c0_32 = arith.constant 0 : index
    %49 = vector.load %arg19[%48, %c0_31, %c0_32] : memref<8x8x256xf32, #tpu.memory_space<vmem>>, vector<1x8x128xf32>
    %50 = vector.shape_cast %49 : vector<1x8x128xf32> to vector<8x128xf32>
    %51 = vector.shape_cast %45 : vector<8x128xf32> to vector<1x8x128xf32>
    tpu.vector_store %arg19[%48, %c0_31, %c0_32], %51 {strides = array<i32>} : memref<8x8x256xf32, #tpu.memory_space<vmem>>, vector<1x8x128xf32>,
    %c1_i32 = arith.constant 1 : i32
    %c0_33 = arith.constant 0 : index
    %c0_34 = arith.constant 0 : index
    %52 = vector.load %arg21[%c0_33, %c0_34] : memref<8x128xf32, #tpu.memory_space<vmem>>, vector<8x128xf32>
    %c0_35 = arith.constant 0 : index
    %c0_36 = arith.constant 0 : index
    %53 = vector.load %arg22[%c0_35, %c0_36] : memref<8x128xf32, #tpu.memory_space<vmem>>, vector<8x128xf32>
    %54 = arith.index_cast %c1_i32 : i32 to index
    %c0_37 = arith.constant 0 : index
    %c0_38 = arith.constant 0 : index
    %55 = vector.load %arg18[%54, %c0_37, %c0_38] : memref<8x8x512xf32, #tpu.memory_space<vmem>>, vector<1x8x512xf32>
    %56 = vector.shape_cast %55 : vector<1x8x512xf32> to vector<8x512xf32>
    %c0_39 = arith.constant 0 : index
    %c0_40 = arith.constant 0 : index
    %57 = vector.load %arg2[%c0_39, %c0_40] : memref<128x512xf32, #tpu.memory_space<vmem>>, vector<128x512xf32>
    %cst_41 = arith.constant dense<0.000000e+00> : vector<8x512xf32>
    %58 = tpu.matmul %52, %57, %cst_41 {dimension_numbers = #tpu.dot_dimension_numbers<[1], [0], [0], [1], [0, 0, 1, 1], [], []>} : vector<8x128xf32>, vector<128x512xf32>, vector<8x512xf32> -> vector<8x512xf32>
    %59 = arith.addf %56, %58 : vector<8x512xf32>
    %60 = vector.extract_strided_slice %59 {offsets = [0, 0], sizes = [8, 128], strides = [1, 1]} : vector<8x512xf32> to vector<8x128xf32>
    %61 = arith.negf %60 : vector<8x128xf32>
    %62 = math.exp %61 : vector<8x128xf32>
    %cst_42 = arith.constant 1.000000e+00 : f32
    %63 = vector.broadcast %cst_42 : f32 to vector<8x128xf32>
    %64 = arith.addf %63, %62 : vector<8x128xf32>
    %65 = arith.divf %63, %64 : vector<8x128xf32>
    %66 = vector.extract_strided_slice %59 {offsets = [0, 128], sizes = [8, 128], strides = [1, 1]} : vector<8x512xf32> to vector<8x128xf32>
    %67 = arith.negf %66 : vector<8x128xf32>
    %68 = math.exp %67 : vector<8x128xf32>
    %cst_43 = arith.constant 1.000000e+00 : f32
    %69 = vector.broadcast %cst_43 : f32 to vector<8x128xf32>
    %70 = arith.addf %69, %68 : vector<8x128xf32>
    %71 = arith.divf %69, %70 : vector<8x128xf32>
    %72 = vector.extract_strided_slice %59 {offsets = [0, 256], sizes = [8, 128], strides = [1, 1]} : vector<8x512xf32> to vector<8x128xf32>
    %73 = math.tanh %72 : vector<8x128xf32>
    %74 = vector.extract_strided_slice %59 {offsets = [0, 384], sizes = [8, 128], strides = [1, 1]} : vector<8x512xf32> to vector<8x128xf32>
    %75 = arith.negf %74 : vector<8x128xf32>
    %76 = math.exp %75 : vector<8x128xf32>
    %cst_44 = arith.constant 1.000000e+00 : f32
    %77 = vector.broadcast %cst_44 : f32 to vector<8x128xf32>
    %78 = arith.addf %77, %76 : vector<8x128xf32>
    %79 = arith.divf %77, %78 : vector<8x128xf32>
    %80 = arith.mulf %71, %53 : vector<8x128xf32>
    %81 = arith.mulf %65, %73 : vector<8x128xf32>
    %82 = arith.addf %80, %81 : vector<8x128xf32>
    %83 = math.tanh %82 : vector<8x128xf32>
    %84 = arith.mulf %79, %83 : vector<8x128xf32>
    %c0_45 = arith.constant 0 : index
    %c0_46 = arith.constant 0 : index
    %85 = vector.load %arg21[%c0_45, %c0_46] : memref<8x128xf32, #tpu.memory_space<vmem>>, vector<8x128xf32>
    tpu.vector_store %arg21[%c0_45, %c0_46], %84 {strides = array<i32>} : memref<8x128xf32, #tpu.memory_space<vmem>>, vector<8x128xf32>,
    %c0_47 = arith.constant 0 : index
    %c0_48 = arith.constant 0 : index
    %86 = vector.load %arg22[%c0_47, %c0_48] : memref<8x128xf32, #tpu.memory_space<vmem>>, vector<8x128xf32>
    tpu.vector_store %arg22[%c0_47, %c0_48], %82 {strides = array<i32>} : memref<8x128xf32, #tpu.memory_space<vmem>>, vector<8x128xf32>,
    %87 = arith.index_cast %c1_i32 : i32 to index
    %c0_49 = arith.constant 0 : index
    %c0_50 = arith.constant 0 : index
    %88 = vector.load %arg19[%87, %c0_49, %c0_50] : memref<8x8x256xf32, #tpu.memory_space<vmem>>, vector<1x8x128xf32>
    %89 = vector.shape_cast %88 : vector<1x8x128xf32> to vector<8x128xf32>
    %90 = vector.shape_cast %84 : vector<8x128xf32> to vector<1x8x128xf32>
    tpu.vector_store %arg19[%87, %c0_49, %c0_50], %90 {strides = array<i32>} : memref<8x8x256xf32, #tpu.memory_space<vmem>>, vector<1x8x128xf32>,
    %c2_i32 = arith.constant 2 : i32
    %c0_51 = arith.constant 0 : index
    %c0_52 = arith.constant 0 : index
    %91 = vector.load %arg21[%c0_51, %c0_52] : memref<8x128xf32, #tpu.memory_space<vmem>>, vector<8x128xf32>
    %c0_53 = arith.constant 0 : index
    %c0_54 = arith.constant 0 : index
    %92 = vector.load %arg22[%c0_53, %c0_54] : memref<8x128xf32, #tpu.memory_space<vmem>>, vector<8x128xf32>
    %93 = arith.index_cast %c2_i32 : i32 to index
    %c0_55 = arith.constant 0 : index
    %c0_56 = arith.constant 0 : index
    %94 = vector.load %arg18[%93, %c0_55, %c0_56] : memref<8x8x512xf32, #tpu.memory_space<vmem>>, vector<1x8x512xf32>
    %95 = vector.shape_cast %94 : vector<1x8x512xf32> to vector<8x512xf32>
    %c0_57 = arith.constant 0 : index
    %c0_58 = arith.constant 0 : index
    %96 = vector.load %arg2[%c0_57, %c0_58] : memref<128x512xf32, #tpu.memory_space<vmem>>, vector<128x512xf32>
    %cst_59 = arith.constant dense<0.000000e+00> : vector<8x512xf32>
    %97 = tpu.matmul %91, %96, %cst_59 {dimension_numbers = #tpu.dot_dimension_numbers<[1], [0], [0], [1], [0, 0, 1, 1], [], []>} : vector<8x128xf32>, vector<128x512xf32>, vector<8x512xf32> -> vector<8x512xf32>
    %98 = arith.addf %95, %97 : vector<8x512xf32>
    %99 = vector.extract_strided_slice %98 {offsets = [0, 0], sizes = [8, 128], strides = [1, 1]} : vector<8x512xf32> to vector<8x128xf32>
    %100 = arith.negf %99 : vector<8x128xf32>
    %101 = math.exp %100 : vector<8x128xf32>
    %cst_60 = arith.constant 1.000000e+00 : f32
    %102 = vector.broadcast %cst_60 : f32 to vector<8x128xf32>
    %103 = arith.addf %102, %101 : vector<8x128xf32>
    %104 = arith.divf %102, %103 : vector<8x128xf32>
    %105 = vector.extract_strided_slice %98 {offsets = [0, 128], sizes = [8, 128], strides = [1, 1]} : vector<8x512xf32> to vector<8x128xf32>
    %106 = arith.negf %105 : vector<8x128xf32>
    %107 = math.exp %106 : vector<8x128xf32>
    %cst_61 = arith.constant 1.000000e+00 : f32
    %108 = vector.broadcast %cst_61 : f32 to vector<8x128xf32>
    %109 = arith.addf %108, %107 : vector<8x128xf32>
    %110 = arith.divf %108, %109 : vector<8x128xf32>
    %111 = vector.extract_strided_slice %98 {offsets = [0, 256], sizes = [8, 128], strides = [1, 1]} : vector<8x512xf32> to vector<8x128xf32>
    %112 = math.tanh %111 : vector<8x128xf32>
    %113 = vector.extract_strided_slice %98 {offsets = [0, 384], sizes = [8, 128], strides = [1, 1]} : vector<8x512xf32> to vector<8x128xf32>
    %114 = arith.negf %113 : vector<8x128xf32>
    %115 = math.exp %114 : vector<8x128xf32>
    %cst_62 = arith.constant 1.000000e+00 : f32
    %116 = vector.broadcast %cst_62 : f32 to vector<8x128xf32>
    %117 = arith.addf %116, %115 : vector<8x128xf32>
    %118 = arith.divf %116, %117 : vector<8x128xf32>
    %119 = arith.mulf %110, %92 : vector<8x128xf32>
    %120 = arith.mulf %104, %112 : vector<8x128xf32>
    %121 = arith.addf %119, %120 : vector<8x128xf32>
    %122 = math.tanh %121 : vector<8x128xf32>
    %123 = arith.mulf %118, %122 : vector<8x128xf32>
    %c0_63 = arith.constant 0 : index
    %c0_64 = arith.constant 0 : index
    %124 = vector.load %arg21[%c0_63, %c0_64] : memref<8x128xf32, #tpu.memory_space<vmem>>, vector<8x128xf32>
    tpu.vector_store %arg21[%c0_63, %c0_64], %123 {strides = array<i32>} : memref<8x128xf32, #tpu.memory_space<vmem>>, vector<8x128xf32>,
    %c0_65 = arith.constant 0 : index
    %c0_66 = arith.constant 0 : index
    %125 = vector.load %arg22[%c0_65, %c0_66] : memref<8x128xf32, #tpu.memory_space<vmem>>, vector<8x128xf32>
    tpu.vector_store %arg22[%c0_65, %c0_66], %121 {strides = array<i32>} : memref<8x128xf32, #tpu.memory_space<vmem>>, vector<8x128xf32>,
    %126 = arith.index_cast %c2_i32 : i32 to index
    %c0_67 = arith.constant 0 : index
    %c0_68 = arith.constant 0 : index
    %127 = vector.load %arg19[%126, %c0_67, %c0_68] : memref<8x8x256xf32, #tpu.memory_space<vmem>>, vector<1x8x128xf32>
    %128 = vector.shape_cast %127 : vector<1x8x128xf32> to vector<8x128xf32>
    %129 = vector.shape_cast %123 : vector<8x128xf32> to vector<1x8x128xf32>
    tpu.vector_store %arg19[%126, %c0_67, %c0_68], %129 {strides = array<i32>} : memref<8x8x256xf32, #tpu.memory_space<vmem>>, vector<1x8x128xf32>,
    %c3_i32 = arith.constant 3 : i32
    %c0_69 = arith.constant 0 : index
    %c0_70 = arith.constant 0 : index
    %130 = vector.load %arg21[%c0_69, %c0_70] : memref<8x128xf32, #tpu.memory_space<vmem>>, vector<8x128xf32>
    %c0_71 = arith.constant 0 : index
    %c0_72 = arith.constant 0 : index
    %131 = vector.load %arg22[%c0_71, %c0_72] : memref<8x128xf32, #tpu.memory_space<vmem>>, vector<8x128xf32>
    %132 = arith.index_cast %c3_i32 : i32 to index
    %c0_73 = arith.constant 0 : index
    %c0_74 = arith.constant 0 : index
    %133 = vector.load %arg18[%132, %c0_73, %c0_74] : memref<8x8x512xf32, #tpu.memory_space<vmem>>, vector<1x8x512xf32>
    %134 = vector.shape_cast %133 : vector<1x8x512xf32> to vector<8x512xf32>
    %c0_75 = arith.constant 0 : index
    %c0_76 = arith.constant 0 : index
    %135 = vector.load %arg2[%c0_75, %c0_76] : memref<128x512xf32, #tpu.memory_space<vmem>>, vector<128x512xf32>
    %cst_77 = arith.constant dense<0.000000e+00> : vector<8x512xf32>
    %136 = tpu.matmul %130, %135, %cst_77 {dimension_numbers = #tpu.dot_dimension_numbers<[1], [0], [0], [1], [0, 0, 1, 1], [], []>} : vector<8x128xf32>, vector<128x512xf32>, vector<8x512xf32> -> vector<8x512xf32>
    %137 = arith.addf %134, %136 : vector<8x512xf32>
    %138 = vector.extract_strided_slice %137 {offsets = [0, 0], sizes = [8, 128], strides = [1, 1]} : vector<8x512xf32> to vector<8x128xf32>
    %139 = arith.negf %138 : vector<8x128xf32>
    %140 = math.exp %139 : vector<8x128xf32>
    %cst_78 = arith.constant 1.000000e+00 : f32
    %141 = vector.broadcast %cst_78 : f32 to vector<8x128xf32>
    %142 = arith.addf %141, %140 : vector<8x128xf32>
    %143 = arith.divf %141, %142 : vector<8x128xf32>
    %144 = vector.extract_strided_slice %137 {offsets = [0, 128], sizes = [8, 128], strides = [1, 1]} : vector<8x512xf32> to vector<8x128xf32>
    %145 = arith.negf %144 : vector<8x128xf32>
    %146 = math.exp %145 : vector<8x128xf32>
    %cst_79 = arith.constant 1.000000e+00 : f32
    %147 = vector.broadcast %cst_79 : f32 to vector<8x128xf32>
    %148 = arith.addf %147, %146 : vector<8x128xf32>
    %149 = arith.divf %147, %148 : vector<8x128xf32>
    %150 = vector.extract_strided_slice %137 {offsets = [0, 256], sizes = [8, 128], strides = [1, 1]} : vector<8x512xf32> to vector<8x128xf32>
    %151 = math.tanh %150 : vector<8x128xf32>
    %152 = vector.extract_strided_slice %137 {offsets = [0, 384], sizes = [8, 128], strides = [1, 1]} : vector<8x512xf32> to vector<8x128xf32>
    %153 = arith.negf %152 : vector<8x128xf32>
    %154 = math.exp %153 : vector<8x128xf32>
    %cst_80 = arith.constant 1.000000e+00 : f32
    %155 = vector.broadcast %cst_80 : f32 to vector<8x128xf32>
    %156 = arith.addf %155, %154 : vector<8x128xf32>
    %157 = arith.divf %155, %156 : vector<8x128xf32>
    %158 = arith.mulf %149, %131 : vector<8x128xf32>
    %159 = arith.mulf %143, %151 : vector<8x128xf32>
    %160 = arith.addf %158, %159 : vector<8x128xf32>
    %161 = math.tanh %160 : vector<8x128xf32>
    %162 = arith.mulf %157, %161 : vector<8x128xf32>
    %c0_81 = arith.constant 0 : index
    %c0_82 = arith.constant 0 : index
    %163 = vector.load %arg21[%c0_81, %c0_82] : memref<8x128xf32, #tpu.memory_space<vmem>>, vector<8x128xf32>
    tpu.vector_store %arg21[%c0_81, %c0_82], %162 {strides = array<i32>} : memref<8x128xf32, #tpu.memory_space<vmem>>, vector<8x128xf32>,
    %c0_83 = arith.constant 0 : index
    %c0_84 = arith.constant 0 : index
    %164 = vector.load %arg22[%c0_83, %c0_84] : memref<8x128xf32, #tpu.memory_space<vmem>>, vector<8x128xf32>
    tpu.vector_store %arg22[%c0_83, %c0_84], %160 {strides = array<i32>} : memref<8x128xf32, #tpu.memory_space<vmem>>, vector<8x128xf32>,
    %165 = arith.index_cast %c3_i32 : i32 to index
    %c0_85 = arith.constant 0 : index
    %c0_86 = arith.constant 0 : index
    %166 = vector.load %arg19[%165, %c0_85, %c0_86] : memref<8x8x256xf32, #tpu.memory_space<vmem>>, vector<1x8x128xf32>
    %167 = vector.shape_cast %166 : vector<1x8x128xf32> to vector<8x128xf32>
    %168 = vector.shape_cast %162 : vector<8x128xf32> to vector<1x8x128xf32>
    tpu.vector_store %arg19[%165, %c0_85, %c0_86], %168 {strides = array<i32>} : memref<8x8x256xf32, #tpu.memory_space<vmem>>, vector<1x8x128xf32>,
    %c4_i32 = arith.constant 4 : i32
    %c0_87 = arith.constant 0 : index
    %c0_88 = arith.constant 0 : index
    %169 = vector.load %arg21[%c0_87, %c0_88] : memref<8x128xf32, #tpu.memory_space<vmem>>, vector<8x128xf32>
    %c0_89 = arith.constant 0 : index
    %c0_90 = arith.constant 0 : index
    %170 = vector.load %arg22[%c0_89, %c0_90] : memref<8x128xf32, #tpu.memory_space<vmem>>, vector<8x128xf32>
    %171 = arith.index_cast %c4_i32 : i32 to index
    %c0_91 = arith.constant 0 : index
    %c0_92 = arith.constant 0 : index
    %172 = vector.load %arg18[%171, %c0_91, %c0_92] : memref<8x8x512xf32, #tpu.memory_space<vmem>>, vector<1x8x512xf32>
    %173 = vector.shape_cast %172 : vector<1x8x512xf32> to vector<8x512xf32>
    %c0_93 = arith.constant 0 : index
    %c0_94 = arith.constant 0 : index
    %174 = vector.load %arg2[%c0_93, %c0_94] : memref<128x512xf32, #tpu.memory_space<vmem>>, vector<128x512xf32>
    %cst_95 = arith.constant dense<0.000000e+00> : vector<8x512xf32>
    %175 = tpu.matmul %169, %174, %cst_95 {dimension_numbers = #tpu.dot_dimension_numbers<[1], [0], [0], [1], [0, 0, 1, 1], [], []>} : vector<8x128xf32>, vector<128x512xf32>, vector<8x512xf32> -> vector<8x512xf32>
    %176 = arith.addf %173, %175 : vector<8x512xf32>
    %177 = vector.extract_strided_slice %176 {offsets = [0, 0], sizes = [8, 128], strides = [1, 1]} : vector<8x512xf32> to vector<8x128xf32>
    %178 = arith.negf %177 : vector<8x128xf32>
    %179 = math.exp %178 : vector<8x128xf32>
    %cst_96 = arith.constant 1.000000e+00 : f32
    %180 = vector.broadcast %cst_96 : f32 to vector<8x128xf32>
    %181 = arith.addf %180, %179 : vector<8x128xf32>
    %182 = arith.divf %180, %181 : vector<8x128xf32>
    %183 = vector.extract_strided_slice %176 {offsets = [0, 128], sizes = [8, 128], strides = [1, 1]} : vector<8x512xf32> to vector<8x128xf32>
    %184 = arith.negf %183 : vector<8x128xf32>
    %185 = math.exp %184 : vector<8x128xf32>
    %cst_97 = arith.constant 1.000000e+00 : f32
    %186 = vector.broadcast %cst_97 : f32 to vector<8x128xf32>
    %187 = arith.addf %186, %185 : vector<8x128xf32>
    %188 = arith.divf %186, %187 : vector<8x128xf32>
    %189 = vector.extract_strided_slice %176 {offsets = [0, 256], sizes = [8, 128], strides = [1, 1]} : vector<8x512xf32> to vector<8x128xf32>
    %190 = math.tanh %189 : vector<8x128xf32>
    %191 = vector.extract_strided_slice %176 {offsets = [0, 384], sizes = [8, 128], strides = [1, 1]} : vector<8x512xf32> to vector<8x128xf32>
    %192 = arith.negf %191 : vector<8x128xf32>
    %193 = math.exp %192 : vector<8x128xf32>
    %cst_98 = arith.constant 1.000000e+00 : f32
    %194 = vector.broadcast %cst_98 : f32 to vector<8x128xf32>
    %195 = arith.addf %194, %193 : vector<8x128xf32>
    %196 = arith.divf %194, %195 : vector<8x128xf32>
    %197 = arith.mulf %188, %170 : vector<8x128xf32>
    %198 = arith.mulf %182, %190 : vector<8x128xf32>
    %199 = arith.addf %197, %198 : vector<8x128xf32>
    %200 = math.tanh %199 : vector<8x128xf32>
    %201 = arith.mulf %196, %200 : vector<8x128xf32>
    %c0_99 = arith.constant 0 : index
    %c0_100 = arith.constant 0 : index
    %202 = vector.load %arg21[%c0_99, %c0_100] : memref<8x128xf32, #tpu.memory_space<vmem>>, vector<8x128xf32>
    tpu.vector_store %arg21[%c0_99, %c0_100], %201 {strides = array<i32>} : memref<8x128xf32, #tpu.memory_space<vmem>>, vector<8x128xf32>,
    %c0_101 = arith.constant 0 : index
    %c0_102 = arith.constant 0 : index
    %203 = vector.load %arg22[%c0_101, %c0_102] : memref<8x128xf32, #tpu.memory_space<vmem>>, vector<8x128xf32>
    tpu.vector_store %arg22[%c0_101, %c0_102], %199 {strides = array<i32>} : memref<8x128xf32, #tpu.memory_space<vmem>>, vector<8x128xf32>,
    %204 = arith.index_cast %c4_i32 : i32 to index
    %c0_103 = arith.constant 0 : index
    %c0_104 = arith.constant 0 : index
    %205 = vector.load %arg19[%204, %c0_103, %c0_104] : memref<8x8x256xf32, #tpu.memory_space<vmem>>, vector<1x8x128xf32>
    %206 = vector.shape_cast %205 : vector<1x8x128xf32> to vector<8x128xf32>
    %207 = vector.shape_cast %201 : vector<8x128xf32> to vector<1x8x128xf32>
    tpu.vector_store %arg19[%204, %c0_103, %c0_104], %207 {strides = array<i32>} : memref<8x8x256xf32, #tpu.memory_space<vmem>>, vector<1x8x128xf32>,
    %c5_i32 = arith.constant 5 : i32
    %c0_105 = arith.constant 0 : index
    %c0_106 = arith.constant 0 : index
    %208 = vector.load %arg21[%c0_105, %c0_106] : memref<8x128xf32, #tpu.memory_space<vmem>>, vector<8x128xf32>
    %c0_107 = arith.constant 0 : index
    %c0_108 = arith.constant 0 : index
    %209 = vector.load %arg22[%c0_107, %c0_108] : memref<8x128xf32, #tpu.memory_space<vmem>>, vector<8x128xf32>
    %210 = arith.index_cast %c5_i32 : i32 to index
    %c0_109 = arith.constant 0 : index
    %c0_110 = arith.constant 0 : index
    %211 = vector.load %arg18[%210, %c0_109, %c0_110] : memref<8x8x512xf32, #tpu.memory_space<vmem>>, vector<1x8x512xf32>
    %212 = vector.shape_cast %211 : vector<1x8x512xf32> to vector<8x512xf32>
    %c0_111 = arith.constant 0 : index
    %c0_112 = arith.constant 0 : index
    %213 = vector.load %arg2[%c0_111, %c0_112] : memref<128x512xf32, #tpu.memory_space<vmem>>, vector<128x512xf32>
    %cst_113 = arith.constant dense<0.000000e+00> : vector<8x512xf32>
    %214 = tpu.matmul %208, %213, %cst_113 {dimension_numbers = #tpu.dot_dimension_numbers<[1], [0], [0], [1], [0, 0, 1, 1], [], []>} : vector<8x128xf32>, vector<128x512xf32>, vector<8x512xf32> -> vector<8x512xf32>
    %215 = arith.addf %212, %214 : vector<8x512xf32>
    %216 = vector.extract_strided_slice %215 {offsets = [0, 0], sizes = [8, 128], strides = [1, 1]} : vector<8x512xf32> to vector<8x128xf32>
    %217 = arith.negf %216 : vector<8x128xf32>
    %218 = math.exp %217 : vector<8x128xf32>
    %cst_114 = arith.constant 1.000000e+00 : f32
    %219 = vector.broadcast %cst_114 : f32 to vector<8x128xf32>
    %220 = arith.addf %219, %218 : vector<8x128xf32>
    %221 = arith.divf %219, %220 : vector<8x128xf32>
    %222 = vector.extract_strided_slice %215 {offsets = [0, 128], sizes = [8, 128], strides = [1, 1]} : vector<8x512xf32> to vector<8x128xf32>
    %223 = arith.negf %222 : vector<8x128xf32>
    %224 = math.exp %223 : vector<8x128xf32>
    %cst_115 = arith.constant 1.000000e+00 : f32
    %225 = vector.broadcast %cst_115 : f32 to vector<8x128xf32>
    %226 = arith.addf %225, %224 : vector<8x128xf32>
    %227 = arith.divf %225, %226 : vector<8x128xf32>
    %228 = vector.extract_strided_slice %215 {offsets = [0, 256], sizes = [8, 128], strides = [1, 1]} : vector<8x512xf32> to vector<8x128xf32>
    %229 = math.tanh %228 : vector<8x128xf32>
    %230 = vector.extract_strided_slice %215 {offsets = [0, 384], sizes = [8, 128], strides = [1, 1]} : vector<8x512xf32> to vector<8x128xf32>
    %231 = arith.negf %230 : vector<8x128xf32>
    %232 = math.exp %231 : vector<8x128xf32>
    %cst_116 = arith.constant 1.000000e+00 : f32
    %233 = vector.broadcast %cst_116 : f32 to vector<8x128xf32>
    %234 = arith.addf %233, %232 : vector<8x128xf32>
    %235 = arith.divf %233, %234 : vector<8x128xf32>
    %236 = arith.mulf %227, %209 : vector<8x128xf32>
    %237 = arith.mulf %221, %229 : vector<8x128xf32>
    %238 = arith.addf %236, %237 : vector<8x128xf32>
    %239 = math.tanh %238 : vector<8x128xf32>
    %240 = arith.mulf %235, %239 : vector<8x128xf32>
    %c0_117 = arith.constant 0 : index
    %c0_118 = arith.constant 0 : index
    %241 = vector.load %arg21[%c0_117, %c0_118] : memref<8x128xf32, #tpu.memory_space<vmem>>, vector<8x128xf32>
    tpu.vector_store %arg21[%c0_117, %c0_118], %240 {strides = array<i32>} : memref<8x128xf32, #tpu.memory_space<vmem>>, vector<8x128xf32>,
    %c0_119 = arith.constant 0 : index
    %c0_120 = arith.constant 0 : index
    %242 = vector.load %arg22[%c0_119, %c0_120] : memref<8x128xf32, #tpu.memory_space<vmem>>, vector<8x128xf32>
    tpu.vector_store %arg22[%c0_119, %c0_120], %238 {strides = array<i32>} : memref<8x128xf32, #tpu.memory_space<vmem>>, vector<8x128xf32>,
    %243 = arith.index_cast %c5_i32 : i32 to index
    %c0_121 = arith.constant 0 : index
    %c0_122 = arith.constant 0 : index
    %244 = vector.load %arg19[%243, %c0_121, %c0_122] : memref<8x8x256xf32, #tpu.memory_space<vmem>>, vector<1x8x128xf32>
    %245 = vector.shape_cast %244 : vector<1x8x128xf32> to vector<8x128xf32>
    %246 = vector.shape_cast %240 : vector<8x128xf32> to vector<1x8x128xf32>
    tpu.vector_store %arg19[%243, %c0_121, %c0_122], %246 {strides = array<i32>} : memref<8x8x256xf32, #tpu.memory_space<vmem>>, vector<1x8x128xf32>,
    %c6_i32 = arith.constant 6 : i32
    %c0_123 = arith.constant 0 : index
    %c0_124 = arith.constant 0 : index
    %247 = vector.load %arg21[%c0_123, %c0_124] : memref<8x128xf32, #tpu.memory_space<vmem>>, vector<8x128xf32>
    %c0_125 = arith.constant 0 : index
    %c0_126 = arith.constant 0 : index
    %248 = vector.load %arg22[%c0_125, %c0_126] : memref<8x128xf32, #tpu.memory_space<vmem>>, vector<8x128xf32>
    %249 = arith.index_cast %c6_i32 : i32 to index
    %c0_127 = arith.constant 0 : index
    %c0_128 = arith.constant 0 : index
    %250 = vector.load %arg18[%249, %c0_127, %c0_128] : memref<8x8x512xf32, #tpu.memory_space<vmem>>, vector<1x8x512xf32>
    %251 = vector.shape_cast %250 : vector<1x8x512xf32> to vector<8x512xf32>
    %c0_129 = arith.constant 0 : index
    %c0_130 = arith.constant 0 : index
    %252 = vector.load %arg2[%c0_129, %c0_130] : memref<128x512xf32, #tpu.memory_space<vmem>>, vector<128x512xf32>
    %cst_131 = arith.constant dense<0.000000e+00> : vector<8x512xf32>
    %253 = tpu.matmul %247, %252, %cst_131 {dimension_numbers = #tpu.dot_dimension_numbers<[1], [0], [0], [1], [0, 0, 1, 1], [], []>} : vector<8x128xf32>, vector<128x512xf32>, vector<8x512xf32> -> vector<8x512xf32>
    %254 = arith.addf %251, %253 : vector<8x512xf32>
    %255 = vector.extract_strided_slice %254 {offsets = [0, 0], sizes = [8, 128], strides = [1, 1]} : vector<8x512xf32> to vector<8x128xf32>
    %256 = arith.negf %255 : vector<8x128xf32>
    %257 = math.exp %256 : vector<8x128xf32>
    %cst_132 = arith.constant 1.000000e+00 : f32
    %258 = vector.broadcast %cst_132 : f32 to vector<8x128xf32>
    %259 = arith.addf %258, %257 : vector<8x128xf32>
    %260 = arith.divf %258, %259 : vector<8x128xf32>
    %261 = vector.extract_strided_slice %254 {offsets = [0, 128], sizes = [8, 128], strides = [1, 1]} : vector<8x512xf32> to vector<8x128xf32>
    %262 = arith.negf %261 : vector<8x128xf32>
    %263 = math.exp %262 : vector<8x128xf32>
    %cst_133 = arith.constant 1.000000e+00 : f32
    %264 = vector.broadcast %cst_133 : f32 to vector<8x128xf32>
    %265 = arith.addf %264, %263 : vector<8x128xf32>
    %266 = arith.divf %264, %265 : vector<8x128xf32>
    %267 = vector.extract_strided_slice %254 {offsets = [0, 256], sizes = [8, 128], strides = [1, 1]} : vector<8x512xf32> to vector<8x128xf32>
    %268 = math.tanh %267 : vector<8x128xf32>
    %269 = vector.extract_strided_slice %254 {offsets = [0, 384], sizes = [8, 128], strides = [1, 1]} : vector<8x512xf32> to vector<8x128xf32>
    %270 = arith.negf %269 : vector<8x128xf32>
    %271 = math.exp %270 : vector<8x128xf32>
    %cst_134 = arith.constant 1.000000e+00 : f32
    %272 = vector.broadcast %cst_134 : f32 to vector<8x128xf32>
    %273 = arith.addf %272, %271 : vector<8x128xf32>
    %274 = arith.divf %272, %273 : vector<8x128xf32>
    %275 = arith.mulf %266, %248 : vector<8x128xf32>
    %276 = arith.mulf %260, %268 : vector<8x128xf32>
    %277 = arith.addf %275, %276 : vector<8x128xf32>
    %278 = math.tanh %277 : vector<8x128xf32>
    %279 = arith.mulf %274, %278 : vector<8x128xf32>
    %c0_135 = arith.constant 0 : index
    %c0_136 = arith.constant 0 : index
    %280 = vector.load %arg21[%c0_135, %c0_136] : memref<8x128xf32, #tpu.memory_space<vmem>>, vector<8x128xf32>
    tpu.vector_store %arg21[%c0_135, %c0_136], %279 {strides = array<i32>} : memref<8x128xf32, #tpu.memory_space<vmem>>, vector<8x128xf32>,
    %c0_137 = arith.constant 0 : index
    %c0_138 = arith.constant 0 : index
    %281 = vector.load %arg22[%c0_137, %c0_138] : memref<8x128xf32, #tpu.memory_space<vmem>>, vector<8x128xf32>
    tpu.vector_store %arg22[%c0_137, %c0_138], %277 {strides = array<i32>} : memref<8x128xf32, #tpu.memory_space<vmem>>, vector<8x128xf32>,
    %282 = arith.index_cast %c6_i32 : i32 to index
    %c0_139 = arith.constant 0 : index
    %c0_140 = arith.constant 0 : index
    %283 = vector.load %arg19[%282, %c0_139, %c0_140] : memref<8x8x256xf32, #tpu.memory_space<vmem>>, vector<1x8x128xf32>
    %284 = vector.shape_cast %283 : vector<1x8x128xf32> to vector<8x128xf32>
    %285 = vector.shape_cast %279 : vector<8x128xf32> to vector<1x8x128xf32>
    tpu.vector_store %arg19[%282, %c0_139, %c0_140], %285 {strides = array<i32>} : memref<8x8x256xf32, #tpu.memory_space<vmem>>, vector<1x8x128xf32>,
    %c7_i32 = arith.constant 7 : i32
    %c0_141 = arith.constant 0 : index
    %c0_142 = arith.constant 0 : index
    %286 = vector.load %arg21[%c0_141, %c0_142] : memref<8x128xf32, #tpu.memory_space<vmem>>, vector<8x128xf32>
    %c0_143 = arith.constant 0 : index
    %c0_144 = arith.constant 0 : index
    %287 = vector.load %arg22[%c0_143, %c0_144] : memref<8x128xf32, #tpu.memory_space<vmem>>, vector<8x128xf32>
    %288 = arith.index_cast %c7_i32 : i32 to index
    %c0_145 = arith.constant 0 : index
    %c0_146 = arith.constant 0 : index
    %289 = vector.load %arg18[%288, %c0_145, %c0_146] : memref<8x8x512xf32, #tpu.memory_space<vmem>>, vector<1x8x512xf32>
    %290 = vector.shape_cast %289 : vector<1x8x512xf32> to vector<8x512xf32>
    %c0_147 = arith.constant 0 : index
    %c0_148 = arith.constant 0 : index
    %291 = vector.load %arg2[%c0_147, %c0_148] : memref<128x512xf32, #tpu.memory_space<vmem>>, vector<128x512xf32>
    %cst_149 = arith.constant dense<0.000000e+00> : vector<8x512xf32>
    %292 = tpu.matmul %286, %291, %cst_149 {dimension_numbers = #tpu.dot_dimension_numbers<[1], [0], [0], [1], [0, 0, 1, 1], [], []>} : vector<8x128xf32>, vector<128x512xf32>, vector<8x512xf32> -> vector<8x512xf32>
    %293 = arith.addf %290, %292 : vector<8x512xf32>
    %294 = vector.extract_strided_slice %293 {offsets = [0, 0], sizes = [8, 128], strides = [1, 1]} : vector<8x512xf32> to vector<8x128xf32>
    %295 = arith.negf %294 : vector<8x128xf32>
    %296 = math.exp %295 : vector<8x128xf32>
    %cst_150 = arith.constant 1.000000e+00 : f32
    %297 = vector.broadcast %cst_150 : f32 to vector<8x128xf32>
    %298 = arith.addf %297, %296 : vector<8x128xf32>
    %299 = arith.divf %297, %298 : vector<8x128xf32>
    %300 = vector.extract_strided_slice %293 {offsets = [0, 128], sizes = [8, 128], strides = [1, 1]} : vector<8x512xf32> to vector<8x128xf32>
    %301 = arith.negf %300 : vector<8x128xf32>
    %302 = math.exp %301 : vector<8x128xf32>
    %cst_151 = arith.constant 1.000000e+00 : f32
    %303 = vector.broadcast %cst_151 : f32 to vector<8x128xf32>
    %304 = arith.addf %303, %302 : vector<8x128xf32>
    %305 = arith.divf %303, %304 : vector<8x128xf32>
    %306 = vector.extract_strided_slice %293 {offsets = [0, 256], sizes = [8, 128], strides = [1, 1]} : vector<8x512xf32> to vector<8x128xf32>
    %307 = math.tanh %306 : vector<8x128xf32>
    %308 = vector.extract_strided_slice %293 {offsets = [0, 384], sizes = [8, 128], strides = [1, 1]} : vector<8x512xf32> to vector<8x128xf32>
    %309 = arith.negf %308 : vector<8x128xf32>
    %310 = math.exp %309 : vector<8x128xf32>
    %cst_152 = arith.constant 1.000000e+00 : f32
    %311 = vector.broadcast %cst_152 : f32 to vector<8x128xf32>
    %312 = arith.addf %311, %310 : vector<8x128xf32>
    %313 = arith.divf %311, %312 : vector<8x128xf32>
    %314 = arith.mulf %305, %287 : vector<8x128xf32>
    %315 = arith.mulf %299, %307 : vector<8x128xf32>
    %316 = arith.addf %314, %315 : vector<8x128xf32>
    %317 = math.tanh %316 : vector<8x128xf32>
    %318 = arith.mulf %313, %317 : vector<8x128xf32>
    %c0_153 = arith.constant 0 : index
    %c0_154 = arith.constant 0 : index
    %319 = vector.load %arg21[%c0_153, %c0_154] : memref<8x128xf32, #tpu.memory_space<vmem>>, vector<8x128xf32>
    tpu.vector_store %arg21[%c0_153, %c0_154], %318 {strides = array<i32>} : memref<8x128xf32, #tpu.memory_space<vmem>>, vector<8x128xf32>,
    %c0_155 = arith.constant 0 : index
    %c0_156 = arith.constant 0 : index
    %320 = vector.load %arg22[%c0_155, %c0_156] : memref<8x128xf32, #tpu.memory_space<vmem>>, vector<8x128xf32>
    tpu.vector_store %arg22[%c0_155, %c0_156], %316 {strides = array<i32>} : memref<8x128xf32, #tpu.memory_space<vmem>>, vector<8x128xf32>,
    %321 = arith.index_cast %c7_i32 : i32 to index
    %c0_157 = arith.constant 0 : index
    %c0_158 = arith.constant 0 : index
    %322 = vector.load %arg19[%321, %c0_157, %c0_158] : memref<8x8x256xf32, #tpu.memory_space<vmem>>, vector<1x8x128xf32>
    %323 = vector.shape_cast %322 : vector<1x8x128xf32> to vector<8x128xf32>
    %324 = vector.shape_cast %318 : vector<8x128xf32> to vector<1x8x128xf32>
    tpu.vector_store %arg19[%321, %c0_157, %c0_158], %324 {strides = array<i32>} : memref<8x8x256xf32, #tpu.memory_space<vmem>>, vector<1x8x128xf32>,
    %c8_i32 = arith.constant 8 : i32
    %c0_159 = arith.constant 0 : index
    %c0_160 = arith.constant 0 : index
    %c0_161 = arith.constant 0 : index
    %325 = vector.load %arg0[%c0_159, %c0_160, %c0_161] : memref<8x8x128xf32, #tpu.memory_space<vmem>>, vector<8x8x128xf32>
    %326 = vector.shape_cast %325 : vector<8x8x128xf32> to vector<64x128xf32>
    %c0_162 = arith.constant 0 : index
    %c0_163 = arith.constant 0 : index
    %327 = vector.load %arg4[%c0_162, %c0_163] : memref<128x512xf32, #tpu.memory_space<vmem>>, vector<128x512xf32>
    %cst_164 = arith.constant dense<0.000000e+00> : vector<64x512xf32>
    %328 = tpu.matmul %326, %327, %cst_164 {dimension_numbers = #tpu.dot_dimension_numbers<[1], [0], [0], [1], [0, 0, 1, 1], [], []>} : vector<64x128xf32>, vector<128x512xf32>, vector<64x512xf32> -> vector<64x512xf32>
    %c0_165 = arith.constant 0 : index
    %c0_166 = arith.constant 0 : index
    %329 = vector.load %arg6[%c0_165, %c0_166] : memref<1x512xf32, #tpu.memory_space<vmem>>, vector<1x512xf32>
    %330 = vector.broadcast %329 : vector<1x512xf32> to vector<64x512xf32>
    %331 = arith.addf %328, %330 : vector<64x512xf32>
    %332 = vector.shape_cast %331 : vector<64x512xf32> to vector<8x8x512xf32>
    %c0_167 = arith.constant 0 : index
    %c0_168 = arith.constant 0 : index
    %c0_169 = arith.constant 0 : index
    %333 = vector.load %arg18[%c0_167, %c0_168, %c0_169] : memref<8x8x512xf32, #tpu.memory_space<vmem>>, vector<8x8x512xf32>
    tpu.vector_store %arg18[%c0_167, %c0_168, %c0_169], %332 {strides = array<i32>} : memref<8x8x512xf32, #tpu.memory_space<vmem>>, vector<8x8x512xf32>,
    %cst_170 = arith.constant 0.000000e+00 : f32
    %334 = vector.broadcast %cst_170 : f32 to vector<8x128xf32>
    %c0_171 = arith.constant 0 : index
    %c0_172 = arith.constant 0 : index
    %335 = vector.load %arg21[%c0_171, %c0_172] : memref<8x128xf32, #tpu.memory_space<vmem>>, vector<8x128xf32>
    tpu.vector_store %arg21[%c0_171, %c0_172], %334 {strides = array<i32>} : memref<8x128xf32, #tpu.memory_space<vmem>>, vector<8x128xf32>,
    %cst_173 = arith.constant 0.000000e+00 : f32
    %336 = vector.broadcast %cst_173 : f32 to vector<8x128xf32>
    %c0_174 = arith.constant 0 : index
    %c0_175 = arith.constant 0 : index
    %337 = vector.load %arg22[%c0_174, %c0_175] : memref<8x128xf32, #tpu.memory_space<vmem>>, vector<8x128xf32>
    tpu.vector_store %arg22[%c0_174, %c0_175], %336 {strides = array<i32>} : memref<8x128xf32, #tpu.memory_space<vmem>>, vector<8x128xf32>,
    %c0_i32_176 = arith.constant 0 : i32
    %c7_i32_177 = arith.constant 7 : i32
    %338 = arith.subi %c7_i32_177, %c0_i32_176 : i32
    %c0_178 = arith.constant 0 : index
    %c0_179 = arith.constant 0 : index
    %339 = vector.load %arg21[%c0_178, %c0_179] : memref<8x128xf32, #tpu.memory_space<vmem>>, vector<8x128xf32>
    %c0_180 = arith.constant 0 : index
    %c0_181 = arith.constant 0 : index
    %340 = vector.load %arg22[%c0_180, %c0_181] : memref<8x128xf32, #tpu.memory_space<vmem>>, vector<8x128xf32>
    %341 = arith.index_cast %338 : i32 to index
    %c0_182 = arith.constant 0 : index
    %c0_183 = arith.constant 0 : index
    %342 = vector.load %arg18[%341, %c0_182, %c0_183] : memref<8x8x512xf32, #tpu.memory_space<vmem>>, vector<1x8x512xf32>
    %343 = vector.shape_cast %342 : vector<1x8x512xf32> to vector<8x512xf32>
    %c0_184 = arith.constant 0 : index
    %c0_185 = arith.constant 0 : index
    %344 = vector.load %arg5[%c0_184, %c0_185] : memref<128x512xf32, #tpu.memory_space<vmem>>, vector<128x512xf32>
    %cst_186 = arith.constant dense<0.000000e+00> : vector<8x512xf32>
    %345 = tpu.matmul %339, %344, %cst_186 {dimension_numbers = #tpu.dot_dimension_numbers<[1], [0], [0], [1], [0, 0, 1, 1], [], []>} : vector<8x128xf32>, vector<128x512xf32>, vector<8x512xf32> -> vector<8x512xf32>
    %346 = arith.addf %343, %345 : vector<8x512xf32>
    %347 = vector.extract_strided_slice %346 {offsets = [0, 0], sizes = [8, 128], strides = [1, 1]} : vector<8x512xf32> to vector<8x128xf32>
    %348 = arith.negf %347 : vector<8x128xf32>
    %349 = math.exp %348 : vector<8x128xf32>
    %cst_187 = arith.constant 1.000000e+00 : f32
    %350 = vector.broadcast %cst_187 : f32 to vector<8x128xf32>
    %351 = arith.addf %350, %349 : vector<8x128xf32>
    %352 = arith.divf %350, %351 : vector<8x128xf32>
    %353 = vector.extract_strided_slice %346 {offsets = [0, 128], sizes = [8, 128], strides = [1, 1]} : vector<8x512xf32> to vector<8x128xf32>
    %354 = arith.negf %353 : vector<8x128xf32>
    %355 = math.exp %354 : vector<8x128xf32>
    %cst_188 = arith.constant 1.000000e+00 : f32
    %356 = vector.broadcast %cst_188 : f32 to vector<8x128xf32>
    %357 = arith.addf %356, %355 : vector<8x128xf32>
    %358 = arith.divf %356, %357 : vector<8x128xf32>
    %359 = vector.extract_strided_slice %346 {offsets = [0, 256], sizes = [8, 128], strides = [1, 1]} : vector<8x512xf32> to vector<8x128xf32>
    %360 = math.tanh %359 : vector<8x128xf32>
    %361 = vector.extract_strided_slice %346 {offsets = [0, 384], sizes = [8, 128], strides = [1, 1]} : vector<8x512xf32> to vector<8x128xf32>
    %362 = arith.negf %361 : vector<8x128xf32>
    %363 = math.exp %362 : vector<8x128xf32>
    %cst_189 = arith.constant 1.000000e+00 : f32
    %364 = vector.broadcast %cst_189 : f32 to vector<8x128xf32>
    %365 = arith.addf %364, %363 : vector<8x128xf32>
    %366 = arith.divf %364, %365 : vector<8x128xf32>
    %367 = arith.mulf %358, %340 : vector<8x128xf32>
    %368 = arith.mulf %352, %360 : vector<8x128xf32>
    %369 = arith.addf %367, %368 : vector<8x128xf32>
    %370 = math.tanh %369 : vector<8x128xf32>
    %371 = arith.mulf %366, %370 : vector<8x128xf32>
    %c0_190 = arith.constant 0 : index
    %c0_191 = arith.constant 0 : index
    %372 = vector.load %arg21[%c0_190, %c0_191] : memref<8x128xf32, #tpu.memory_space<vmem>>, vector<8x128xf32>
    tpu.vector_store %arg21[%c0_190, %c0_191], %371 {strides = array<i32>} : memref<8x128xf32, #tpu.memory_space<vmem>>, vector<8x128xf32>,
    %c0_192 = arith.constant 0 : index
    %c0_193 = arith.constant 0 : index
    %373 = vector.load %arg22[%c0_192, %c0_193] : memref<8x128xf32, #tpu.memory_space<vmem>>, vector<8x128xf32>
    tpu.vector_store %arg22[%c0_192, %c0_193], %369 {strides = array<i32>} : memref<8x128xf32, #tpu.memory_space<vmem>>, vector<8x128xf32>,
    %374 = arith.index_cast %338 : i32 to index
    %c0_194 = arith.constant 0 : index
    %c128 = arith.constant 128 : index
    %375 = vector.load %arg19[%374, %c0_194, %c128] : memref<8x8x256xf32, #tpu.memory_space<vmem>>, vector<1x8x128xf32>
    %376 = vector.shape_cast %375 : vector<1x8x128xf32> to vector<8x128xf32>
    %377 = vector.shape_cast %371 : vector<8x128xf32> to vector<1x8x128xf32>
    tpu.vector_store %arg19[%374, %c0_194, %c128], %377 {strides = array<i32>} : memref<8x8x256xf32, #tpu.memory_space<vmem>>, vector<1x8x128xf32>,
    %c1_i32_195 = arith.constant 1 : i32
    %c7_i32_196 = arith.constant 7 : i32
    %378 = arith.subi %c7_i32_196, %c1_i32_195 : i32
    %c0_197 = arith.constant 0 : index
    %c0_198 = arith.constant 0 : index
    %379 = vector.load %arg21[%c0_197, %c0_198] : memref<8x128xf32, #tpu.memory_space<vmem>>, vector<8x128xf32>
    %c0_199 = arith.constant 0 : index
    %c0_200 = arith.constant 0 : index
    %380 = vector.load %arg22[%c0_199, %c0_200] : memref<8x128xf32, #tpu.memory_space<vmem>>, vector<8x128xf32>
    %381 = arith.index_cast %378 : i32 to index
    %c0_201 = arith.constant 0 : index
    %c0_202 = arith.constant 0 : index
    %382 = vector.load %arg18[%381, %c0_201, %c0_202] : memref<8x8x512xf32, #tpu.memory_space<vmem>>, vector<1x8x512xf32>
    %383 = vector.shape_cast %382 : vector<1x8x512xf32> to vector<8x512xf32>
    %c0_203 = arith.constant 0 : index
    %c0_204 = arith.constant 0 : index
    %384 = vector.load %arg5[%c0_203, %c0_204] : memref<128x512xf32, #tpu.memory_space<vmem>>, vector<128x512xf32>
    %cst_205 = arith.constant dense<0.000000e+00> : vector<8x512xf32>
    %385 = tpu.matmul %379, %384, %cst_205 {dimension_numbers = #tpu.dot_dimension_numbers<[1], [0], [0], [1], [0, 0, 1, 1], [], []>} : vector<8x128xf32>, vector<128x512xf32>, vector<8x512xf32> -> vector<8x512xf32>
    %386 = arith.addf %383, %385 : vector<8x512xf32>
    %387 = vector.extract_strided_slice %386 {offsets = [0, 0], sizes = [8, 128], strides = [1, 1]} : vector<8x512xf32> to vector<8x128xf32>
    %388 = arith.negf %387 : vector<8x128xf32>
    %389 = math.exp %388 : vector<8x128xf32>
    %cst_206 = arith.constant 1.000000e+00 : f32
    %390 = vector.broadcast %cst_206 : f32 to vector<8x128xf32>
    %391 = arith.addf %390, %389 : vector<8x128xf32>
    %392 = arith.divf %390, %391 : vector<8x128xf32>
    %393 = vector.extract_strided_slice %386 {offsets = [0, 128], sizes = [8, 128], strides = [1, 1]} : vector<8x512xf32> to vector<8x128xf32>
    %394 = arith.negf %393 : vector<8x128xf32>
    %395 = math.exp %394 : vector<8x128xf32>
    %cst_207 = arith.constant 1.000000e+00 : f32
    %396 = vector.broadcast %cst_207 : f32 to vector<8x128xf32>
    %397 = arith.addf %396, %395 : vector<8x128xf32>
    %398 = arith.divf %396, %397 : vector<8x128xf32>
    %399 = vector.extract_strided_slice %386 {offsets = [0, 256], sizes = [8, 128], strides = [1, 1]} : vector<8x512xf32> to vector<8x128xf32>
    %400 = math.tanh %399 : vector<8x128xf32>
    %401 = vector.extract_strided_slice %386 {offsets = [0, 384], sizes = [8, 128], strides = [1, 1]} : vector<8x512xf32> to vector<8x128xf32>
    %402 = arith.negf %401 : vector<8x128xf32>
    %403 = math.exp %402 : vector<8x128xf32>
    %cst_208 = arith.constant 1.000000e+00 : f32
    %404 = vector.broadcast %cst_208 : f32 to vector<8x128xf32>
    %405 = arith.addf %404, %403 : vector<8x128xf32>
    %406 = arith.divf %404, %405 : vector<8x128xf32>
    %407 = arith.mulf %398, %380 : vector<8x128xf32>
    %408 = arith.mulf %392, %400 : vector<8x128xf32>
    %409 = arith.addf %407, %408 : vector<8x128xf32>
    %410 = math.tanh %409 : vector<8x128xf32>
    %411 = arith.mulf %406, %410 : vector<8x128xf32>
    %c0_209 = arith.constant 0 : index
    %c0_210 = arith.constant 0 : index
    %412 = vector.load %arg21[%c0_209, %c0_210] : memref<8x128xf32, #tpu.memory_space<vmem>>, vector<8x128xf32>
    tpu.vector_store %arg21[%c0_209, %c0_210], %411 {strides = array<i32>} : memref<8x128xf32, #tpu.memory_space<vmem>>, vector<8x128xf32>,
    %c0_211 = arith.constant 0 : index
    %c0_212 = arith.constant 0 : index
    %413 = vector.load %arg22[%c0_211, %c0_212] : memref<8x128xf32, #tpu.memory_space<vmem>>, vector<8x128xf32>
    tpu.vector_store %arg22[%c0_211, %c0_212], %409 {strides = array<i32>} : memref<8x128xf32, #tpu.memory_space<vmem>>, vector<8x128xf32>,
    %414 = arith.index_cast %378 : i32 to index
    %c0_213 = arith.constant 0 : index
    %c128_214 = arith.constant 128 : index
    %415 = vector.load %arg19[%414, %c0_213, %c128_214] : memref<8x8x256xf32, #tpu.memory_space<vmem>>, vector<1x8x128xf32>
    %416 = vector.shape_cast %415 : vector<1x8x128xf32> to vector<8x128xf32>
    %417 = vector.shape_cast %411 : vector<8x128xf32> to vector<1x8x128xf32>
    tpu.vector_store %arg19[%414, %c0_213, %c128_214], %417 {strides = array<i32>} : memref<8x8x256xf32, #tpu.memory_space<vmem>>, vector<1x8x128xf32>,
    %c2_i32_215 = arith.constant 2 : i32
    %c7_i32_216 = arith.constant 7 : i32
    %418 = arith.subi %c7_i32_216, %c2_i32_215 : i32
    %c0_217 = arith.constant 0 : index
    %c0_218 = arith.constant 0 : index
    %419 = vector.load %arg21[%c0_217, %c0_218] : memref<8x128xf32, #tpu.memory_space<vmem>>, vector<8x128xf32>
    %c0_219 = arith.constant 0 : index
    %c0_220 = arith.constant 0 : index
    %420 = vector.load %arg22[%c0_219, %c0_220] : memref<8x128xf32, #tpu.memory_space<vmem>>, vector<8x128xf32>
    %421 = arith.index_cast %418 : i32 to index
    %c0_221 = arith.constant 0 : index
    %c0_222 = arith.constant 0 : index
    %422 = vector.load %arg18[%421, %c0_221, %c0_222] : memref<8x8x512xf32, #tpu.memory_space<vmem>>, vector<1x8x512xf32>
    %423 = vector.shape_cast %422 : vector<1x8x512xf32> to vector<8x512xf32>
    %c0_223 = arith.constant 0 : index
    %c0_224 = arith.constant 0 : index
    %424 = vector.load %arg5[%c0_223, %c0_224] : memref<128x512xf32, #tpu.memory_space<vmem>>, vector<128x512xf32>
    %cst_225 = arith.constant dense<0.000000e+00> : vector<8x512xf32>
    %425 = tpu.matmul %419, %424, %cst_225 {dimension_numbers = #tpu.dot_dimension_numbers<[1], [0], [0], [1], [0, 0, 1, 1], [], []>} : vector<8x128xf32>, vector<128x512xf32>, vector<8x512xf32> -> vector<8x512xf32>
    %426 = arith.addf %423, %425 : vector<8x512xf32>
    %427 = vector.extract_strided_slice %426 {offsets = [0, 0], sizes = [8, 128], strides = [1, 1]} : vector<8x512xf32> to vector<8x128xf32>
    %428 = arith.negf %427 : vector<8x128xf32>
    %429 = math.exp %428 : vector<8x128xf32>
    %cst_226 = arith.constant 1.000000e+00 : f32
    %430 = vector.broadcast %cst_226 : f32 to vector<8x128xf32>
    %431 = arith.addf %430, %429 : vector<8x128xf32>
    %432 = arith.divf %430, %431 : vector<8x128xf32>
    %433 = vector.extract_strided_slice %426 {offsets = [0, 128], sizes = [8, 128], strides = [1, 1]} : vector<8x512xf32> to vector<8x128xf32>
    %434 = arith.negf %433 : vector<8x128xf32>
    %435 = math.exp %434 : vector<8x128xf32>
    %cst_227 = arith.constant 1.000000e+00 : f32
    %436 = vector.broadcast %cst_227 : f32 to vector<8x128xf32>
    %437 = arith.addf %436, %435 : vector<8x128xf32>
    %438 = arith.divf %436, %437 : vector<8x128xf32>
    %439 = vector.extract_strided_slice %426 {offsets = [0, 256], sizes = [8, 128], strides = [1, 1]} : vector<8x512xf32> to vector<8x128xf32>
    %440 = math.tanh %439 : vector<8x128xf32>
    %441 = vector.extract_strided_slice %426 {offsets = [0, 384], sizes = [8, 128], strides = [1, 1]} : vector<8x512xf32> to vector<8x128xf32>
    %442 = arith.negf %441 : vector<8x128xf32>
    %443 = math.exp %442 : vector<8x128xf32>
    %cst_228 = arith.constant 1.000000e+00 : f32
    %444 = vector.broadcast %cst_228 : f32 to vector<8x128xf32>
    %445 = arith.addf %444, %443 : vector<8x128xf32>
    %446 = arith.divf %444, %445 : vector<8x128xf32>
    %447 = arith.mulf %438, %420 : vector<8x128xf32>
    %448 = arith.mulf %432, %440 : vector<8x128xf32>
    %449 = arith.addf %447, %448 : vector<8x128xf32>
    %450 = math.tanh %449 : vector<8x128xf32>
    %451 = arith.mulf %446, %450 : vector<8x128xf32>
    %c0_229 = arith.constant 0 : index
    %c0_230 = arith.constant 0 : index
    %452 = vector.load %arg21[%c0_229, %c0_230] : memref<8x128xf32, #tpu.memory_space<vmem>>, vector<8x128xf32>
    tpu.vector_store %arg21[%c0_229, %c0_230], %451 {strides = array<i32>} : memref<8x128xf32, #tpu.memory_space<vmem>>, vector<8x128xf32>,
    %c0_231 = arith.constant 0 : index
    %c0_232 = arith.constant 0 : index
    %453 = vector.load %arg22[%c0_231, %c0_232] : memref<8x128xf32, #tpu.memory_space<vmem>>, vector<8x128xf32>
    tpu.vector_store %arg22[%c0_231, %c0_232], %449 {strides = array<i32>} : memref<8x128xf32, #tpu.memory_space<vmem>>, vector<8x128xf32>,
    %454 = arith.index_cast %418 : i32 to index
    %c0_233 = arith.constant 0 : index
    %c128_234 = arith.constant 128 : index
    %455 = vector.load %arg19[%454, %c0_233, %c128_234] : memref<8x8x256xf32, #tpu.memory_space<vmem>>, vector<1x8x128xf32>
    %456 = vector.shape_cast %455 : vector<1x8x128xf32> to vector<8x128xf32>
    %457 = vector.shape_cast %451 : vector<8x128xf32> to vector<1x8x128xf32>
    tpu.vector_store %arg19[%454, %c0_233, %c128_234], %457 {strides = array<i32>} : memref<8x8x256xf32, #tpu.memory_space<vmem>>, vector<1x8x128xf32>,
    %c3_i32_235 = arith.constant 3 : i32
    %c7_i32_236 = arith.constant 7 : i32
    %458 = arith.subi %c7_i32_236, %c3_i32_235 : i32
    %c0_237 = arith.constant 0 : index
    %c0_238 = arith.constant 0 : index
    %459 = vector.load %arg21[%c0_237, %c0_238] : memref<8x128xf32, #tpu.memory_space<vmem>>, vector<8x128xf32>
    %c0_239 = arith.constant 0 : index
    %c0_240 = arith.constant 0 : index
    %460 = vector.load %arg22[%c0_239, %c0_240] : memref<8x128xf32, #tpu.memory_space<vmem>>, vector<8x128xf32>
    %461 = arith.index_cast %458 : i32 to index
    %c0_241 = arith.constant 0 : index
    %c0_242 = arith.constant 0 : index
    %462 = vector.load %arg18[%461, %c0_241, %c0_242] : memref<8x8x512xf32, #tpu.memory_space<vmem>>, vector<1x8x512xf32>
    %463 = vector.shape_cast %462 : vector<1x8x512xf32> to vector<8x512xf32>
    %c0_243 = arith.constant 0 : index
    %c0_244 = arith.constant 0 : index
    %464 = vector.load %arg5[%c0_243, %c0_244] : memref<128x512xf32, #tpu.memory_space<vmem>>, vector<128x512xf32>
    %cst_245 = arith.constant dense<0.000000e+00> : vector<8x512xf32>
    %465 = tpu.matmul %459, %464, %cst_245 {dimension_numbers = #tpu.dot_dimension_numbers<[1], [0], [0], [1], [0, 0, 1, 1], [], []>} : vector<8x128xf32>, vector<128x512xf32>, vector<8x512xf32> -> vector<8x512xf32>
    %466 = arith.addf %463, %465 : vector<8x512xf32>
    %467 = vector.extract_strided_slice %466 {offsets = [0, 0], sizes = [8, 128], strides = [1, 1]} : vector<8x512xf32> to vector<8x128xf32>
    %468 = arith.negf %467 : vector<8x128xf32>
    %469 = math.exp %468 : vector<8x128xf32>
    %cst_246 = arith.constant 1.000000e+00 : f32
    %470 = vector.broadcast %cst_246 : f32 to vector<8x128xf32>
    %471 = arith.addf %470, %469 : vector<8x128xf32>
    %472 = arith.divf %470, %471 : vector<8x128xf32>
    %473 = vector.extract_strided_slice %466 {offsets = [0, 128], sizes = [8, 128], strides = [1, 1]} : vector<8x512xf32> to vector<8x128xf32>
    %474 = arith.negf %473 : vector<8x128xf32>
    %475 = math.exp %474 : vector<8x128xf32>
    %cst_247 = arith.constant 1.000000e+00 : f32
    %476 = vector.broadcast %cst_247 : f32 to vector<8x128xf32>
    %477 = arith.addf %476, %475 : vector<8x128xf32>
    %478 = arith.divf %476, %477 : vector<8x128xf32>
    %479 = vector.extract_strided_slice %466 {offsets = [0, 256], sizes = [8, 128], strides = [1, 1]} : vector<8x512xf32> to vector<8x128xf32>
    %480 = math.tanh %479 : vector<8x128xf32>
    %481 = vector.extract_strided_slice %466 {offsets = [0, 384], sizes = [8, 128], strides = [1, 1]} : vector<8x512xf32> to vector<8x128xf32>
    %482 = arith.negf %481 : vector<8x128xf32>
    %483 = math.exp %482 : vector<8x128xf32>
    %cst_248 = arith.constant 1.000000e+00 : f32
    %484 = vector.broadcast %cst_248 : f32 to vector<8x128xf32>
    %485 = arith.addf %484, %483 : vector<8x128xf32>
    %486 = arith.divf %484, %485 : vector<8x128xf32>
    %487 = arith.mulf %478, %460 : vector<8x128xf32>
    %488 = arith.mulf %472, %480 : vector<8x128xf32>
    %489 = arith.addf %487, %488 : vector<8x128xf32>
    %490 = math.tanh %489 : vector<8x128xf32>
    %491 = arith.mulf %486, %490 : vector<8x128xf32>
    %c0_249 = arith.constant 0 : index
    %c0_250 = arith.constant 0 : index
    %492 = vector.load %arg21[%c0_249, %c0_250] : memref<8x128xf32, #tpu.memory_space<vmem>>, vector<8x128xf32>
    tpu.vector_store %arg21[%c0_249, %c0_250], %491 {strides = array<i32>} : memref<8x128xf32, #tpu.memory_space<vmem>>, vector<8x128xf32>,
    %c0_251 = arith.constant 0 : index
    %c0_252 = arith.constant 0 : index
    %493 = vector.load %arg22[%c0_251, %c0_252] : memref<8x128xf32, #tpu.memory_space<vmem>>, vector<8x128xf32>
    tpu.vector_store %arg22[%c0_251, %c0_252], %489 {strides = array<i32>} : memref<8x128xf32, #tpu.memory_space<vmem>>, vector<8x128xf32>,
    %494 = arith.index_cast %458 : i32 to index
    %c0_253 = arith.constant 0 : index
    %c128_254 = arith.constant 128 : index
    %495 = vector.load %arg19[%494, %c0_253, %c128_254] : memref<8x8x256xf32, #tpu.memory_space<vmem>>, vector<1x8x128xf32>
    %496 = vector.shape_cast %495 : vector<1x8x128xf32> to vector<8x128xf32>
    %497 = vector.shape_cast %491 : vector<8x128xf32> to vector<1x8x128xf32>
    tpu.vector_store %arg19[%494, %c0_253, %c128_254], %497 {strides = array<i32>} : memref<8x8x256xf32, #tpu.memory_space<vmem>>, vector<1x8x128xf32>,
    %c4_i32_255 = arith.constant 4 : i32
    %c7_i32_256 = arith.constant 7 : i32
    %498 = arith.subi %c7_i32_256, %c4_i32_255 : i32
    %c0_257 = arith.constant 0 : index
    %c0_258 = arith.constant 0 : index
    %499 = vector.load %arg21[%c0_257, %c0_258] : memref<8x128xf32, #tpu.memory_space<vmem>>, vector<8x128xf32>
    %c0_259 = arith.constant 0 : index
    %c0_260 = arith.constant 0 : index
    %500 = vector.load %arg22[%c0_259, %c0_260] : memref<8x128xf32, #tpu.memory_space<vmem>>, vector<8x128xf32>
    %501 = arith.index_cast %498 : i32 to index
    %c0_261 = arith.constant 0 : index
    %c0_262 = arith.constant 0 : index
    %502 = vector.load %arg18[%501, %c0_261, %c0_262] : memref<8x8x512xf32, #tpu.memory_space<vmem>>, vector<1x8x512xf32>
    %503 = vector.shape_cast %502 : vector<1x8x512xf32> to vector<8x512xf32>
    %c0_263 = arith.constant 0 : index
    %c0_264 = arith.constant 0 : index
    %504 = vector.load %arg5[%c0_263, %c0_264] : memref<128x512xf32, #tpu.memory_space<vmem>>, vector<128x512xf32>
    %cst_265 = arith.constant dense<0.000000e+00> : vector<8x512xf32>
    %505 = tpu.matmul %499, %504, %cst_265 {dimension_numbers = #tpu.dot_dimension_numbers<[1], [0], [0], [1], [0, 0, 1, 1], [], []>} : vector<8x128xf32>, vector<128x512xf32>, vector<8x512xf32> -> vector<8x512xf32>
    %506 = arith.addf %503, %505 : vector<8x512xf32>
    %507 = vector.extract_strided_slice %506 {offsets = [0, 0], sizes = [8, 128], strides = [1, 1]} : vector<8x512xf32> to vector<8x128xf32>
    %508 = arith.negf %507 : vector<8x128xf32>
    %509 = math.exp %508 : vector<8x128xf32>
    %cst_266 = arith.constant 1.000000e+00 : f32
    %510 = vector.broadcast %cst_266 : f32 to vector<8x128xf32>
    %511 = arith.addf %510, %509 : vector<8x128xf32>
    %512 = arith.divf %510, %511 : vector<8x128xf32>
    %513 = vector.extract_strided_slice %506 {offsets = [0, 128], sizes = [8, 128], strides = [1, 1]} : vector<8x512xf32> to vector<8x128xf32>
    %514 = arith.negf %513 : vector<8x128xf32>
    %515 = math.exp %514 : vector<8x128xf32>
    %cst_267 = arith.constant 1.000000e+00 : f32
    %516 = vector.broadcast %cst_267 : f32 to vector<8x128xf32>
    %517 = arith.addf %516, %515 : vector<8x128xf32>
    %518 = arith.divf %516, %517 : vector<8x128xf32>
    %519 = vector.extract_strided_slice %506 {offsets = [0, 256], sizes = [8, 128], strides = [1, 1]} : vector<8x512xf32> to vector<8x128xf32>
    %520 = math.tanh %519 : vector<8x128xf32>
    %521 = vector.extract_strided_slice %506 {offsets = [0, 384], sizes = [8, 128], strides = [1, 1]} : vector<8x512xf32> to vector<8x128xf32>
    %522 = arith.negf %521 : vector<8x128xf32>
    %523 = math.exp %522 : vector<8x128xf32>
    %cst_268 = arith.constant 1.000000e+00 : f32
    %524 = vector.broadcast %cst_268 : f32 to vector<8x128xf32>
    %525 = arith.addf %524, %523 : vector<8x128xf32>
    %526 = arith.divf %524, %525 : vector<8x128xf32>
    %527 = arith.mulf %518, %500 : vector<8x128xf32>
    %528 = arith.mulf %512, %520 : vector<8x128xf32>
    %529 = arith.addf %527, %528 : vector<8x128xf32>
    %530 = math.tanh %529 : vector<8x128xf32>
    %531 = arith.mulf %526, %530 : vector<8x128xf32>
    %c0_269 = arith.constant 0 : index
    %c0_270 = arith.constant 0 : index
    %532 = vector.load %arg21[%c0_269, %c0_270] : memref<8x128xf32, #tpu.memory_space<vmem>>, vector<8x128xf32>
    tpu.vector_store %arg21[%c0_269, %c0_270], %531 {strides = array<i32>} : memref<8x128xf32, #tpu.memory_space<vmem>>, vector<8x128xf32>,
    %c0_271 = arith.constant 0 : index
    %c0_272 = arith.constant 0 : index
    %533 = vector.load %arg22[%c0_271, %c0_272] : memref<8x128xf32, #tpu.memory_space<vmem>>, vector<8x128xf32>
    tpu.vector_store %arg22[%c0_271, %c0_272], %529 {strides = array<i32>} : memref<8x128xf32, #tpu.memory_space<vmem>>, vector<8x128xf32>,
    %534 = arith.index_cast %498 : i32 to index
    %c0_273 = arith.constant 0 : index
    %c128_274 = arith.constant 128 : index
    %535 = vector.load %arg19[%534, %c0_273, %c128_274] : memref<8x8x256xf32, #tpu.memory_space<vmem>>, vector<1x8x128xf32>
    %536 = vector.shape_cast %535 : vector<1x8x128xf32> to vector<8x128xf32>
    %537 = vector.shape_cast %531 : vector<8x128xf32> to vector<1x8x128xf32>
    tpu.vector_store %arg19[%534, %c0_273, %c128_274], %537 {strides = array<i32>} : memref<8x8x256xf32, #tpu.memory_space<vmem>>, vector<1x8x128xf32>,
    %c5_i32_275 = arith.constant 5 : i32
    %c7_i32_276 = arith.constant 7 : i32
    %538 = arith.subi %c7_i32_276, %c5_i32_275 : i32
    %c0_277 = arith.constant 0 : index
    %c0_278 = arith.constant 0 : index
    %539 = vector.load %arg21[%c0_277, %c0_278] : memref<8x128xf32, #tpu.memory_space<vmem>>, vector<8x128xf32>
    %c0_279 = arith.constant 0 : index
    %c0_280 = arith.constant 0 : index
    %540 = vector.load %arg22[%c0_279, %c0_280] : memref<8x128xf32, #tpu.memory_space<vmem>>, vector<8x128xf32>
    %541 = arith.index_cast %538 : i32 to index
    %c0_281 = arith.constant 0 : index
    %c0_282 = arith.constant 0 : index
    %542 = vector.load %arg18[%541, %c0_281, %c0_282] : memref<8x8x512xf32, #tpu.memory_space<vmem>>, vector<1x8x512xf32>
    %543 = vector.shape_cast %542 : vector<1x8x512xf32> to vector<8x512xf32>
    %c0_283 = arith.constant 0 : index
    %c0_284 = arith.constant 0 : index
    %544 = vector.load %arg5[%c0_283, %c0_284] : memref<128x512xf32, #tpu.memory_space<vmem>>, vector<128x512xf32>
    %cst_285 = arith.constant dense<0.000000e+00> : vector<8x512xf32>
    %545 = tpu.matmul %539, %544, %cst_285 {dimension_numbers = #tpu.dot_dimension_numbers<[1], [0], [0], [1], [0, 0, 1, 1], [], []>} : vector<8x128xf32>, vector<128x512xf32>, vector<8x512xf32> -> vector<8x512xf32>
    %546 = arith.addf %543, %545 : vector<8x512xf32>
    %547 = vector.extract_strided_slice %546 {offsets = [0, 0], sizes = [8, 128], strides = [1, 1]} : vector<8x512xf32> to vector<8x128xf32>
    %548 = arith.negf %547 : vector<8x128xf32>
    %549 = math.exp %548 : vector<8x128xf32>
    %cst_286 = arith.constant 1.000000e+00 : f32
    %550 = vector.broadcast %cst_286 : f32 to vector<8x128xf32>
    %551 = arith.addf %550, %549 : vector<8x128xf32>
    %552 = arith.divf %550, %551 : vector<8x128xf32>
    %553 = vector.extract_strided_slice %546 {offsets = [0, 128], sizes = [8, 128], strides = [1, 1]} : vector<8x512xf32> to vector<8x128xf32>
    %554 = arith.negf %553 : vector<8x128xf32>
    %555 = math.exp %554 : vector<8x128xf32>
    %cst_287 = arith.constant 1.000000e+00 : f32
    %556 = vector.broadcast %cst_287 : f32 to vector<8x128xf32>
    %557 = arith.addf %556, %555 : vector<8x128xf32>
    %558 = arith.divf %556, %557 : vector<8x128xf32>
    %559 = vector.extract_strided_slice %546 {offsets = [0, 256], sizes = [8, 128], strides = [1, 1]} : vector<8x512xf32> to vector<8x128xf32>
    %560 = math.tanh %559 : vector<8x128xf32>
    %561 = vector.extract_strided_slice %546 {offsets = [0, 384], sizes = [8, 128], strides = [1, 1]} : vector<8x512xf32> to vector<8x128xf32>
    %562 = arith.negf %561 : vector<8x128xf32>
    %563 = math.exp %562 : vector<8x128xf32>
    %cst_288 = arith.constant 1.000000e+00 : f32
    %564 = vector.broadcast %cst_288 : f32 to vector<8x128xf32>
    %565 = arith.addf %564, %563 : vector<8x128xf32>
    %566 = arith.divf %564, %565 : vector<8x128xf32>
    %567 = arith.mulf %558, %540 : vector<8x128xf32>
    %568 = arith.mulf %552, %560 : vector<8x128xf32>
    %569 = arith.addf %567, %568 : vector<8x128xf32>
    %570 = math.tanh %569 : vector<8x128xf32>
    %571 = arith.mulf %566, %570 : vector<8x128xf32>
    %c0_289 = arith.constant 0 : index
    %c0_290 = arith.constant 0 : index
    %572 = vector.load %arg21[%c0_289, %c0_290] : memref<8x128xf32, #tpu.memory_space<vmem>>, vector<8x128xf32>
    tpu.vector_store %arg21[%c0_289, %c0_290], %571 {strides = array<i32>} : memref<8x128xf32, #tpu.memory_space<vmem>>, vector<8x128xf32>,
    %c0_291 = arith.constant 0 : index
    %c0_292 = arith.constant 0 : index
    %573 = vector.load %arg22[%c0_291, %c0_292] : memref<8x128xf32, #tpu.memory_space<vmem>>, vector<8x128xf32>
    tpu.vector_store %arg22[%c0_291, %c0_292], %569 {strides = array<i32>} : memref<8x128xf32, #tpu.memory_space<vmem>>, vector<8x128xf32>,
    %574 = arith.index_cast %538 : i32 to index
    %c0_293 = arith.constant 0 : index
    %c128_294 = arith.constant 128 : index
    %575 = vector.load %arg19[%574, %c0_293, %c128_294] : memref<8x8x256xf32, #tpu.memory_space<vmem>>, vector<1x8x128xf32>
    %576 = vector.shape_cast %575 : vector<1x8x128xf32> to vector<8x128xf32>
    %577 = vector.shape_cast %571 : vector<8x128xf32> to vector<1x8x128xf32>
    tpu.vector_store %arg19[%574, %c0_293, %c128_294], %577 {strides = array<i32>} : memref<8x8x256xf32, #tpu.memory_space<vmem>>, vector<1x8x128xf32>,
    %c6_i32_295 = arith.constant 6 : i32
    %c7_i32_296 = arith.constant 7 : i32
    %578 = arith.subi %c7_i32_296, %c6_i32_295 : i32
    %c0_297 = arith.constant 0 : index
    %c0_298 = arith.constant 0 : index
    %579 = vector.load %arg21[%c0_297, %c0_298] : memref<8x128xf32, #tpu.memory_space<vmem>>, vector<8x128xf32>
    %c0_299 = arith.constant 0 : index
    %c0_300 = arith.constant 0 : index
    %580 = vector.load %arg22[%c0_299, %c0_300] : memref<8x128xf32, #tpu.memory_space<vmem>>, vector<8x128xf32>
    %581 = arith.index_cast %578 : i32 to index
    %c0_301 = arith.constant 0 : index
    %c0_302 = arith.constant 0 : index
    %582 = vector.load %arg18[%581, %c0_301, %c0_302] : memref<8x8x512xf32, #tpu.memory_space<vmem>>, vector<1x8x512xf32>
    %583 = vector.shape_cast %582 : vector<1x8x512xf32> to vector<8x512xf32>
    %c0_303 = arith.constant 0 : index
    %c0_304 = arith.constant 0 : index
    %584 = vector.load %arg5[%c0_303, %c0_304] : memref<128x512xf32, #tpu.memory_space<vmem>>, vector<128x512xf32>
    %cst_305 = arith.constant dense<0.000000e+00> : vector<8x512xf32>
    %585 = tpu.matmul %579, %584, %cst_305 {dimension_numbers = #tpu.dot_dimension_numbers<[1], [0], [0], [1], [0, 0, 1, 1], [], []>} : vector<8x128xf32>, vector<128x512xf32>, vector<8x512xf32> -> vector<8x512xf32>
    %586 = arith.addf %583, %585 : vector<8x512xf32>
    %587 = vector.extract_strided_slice %586 {offsets = [0, 0], sizes = [8, 128], strides = [1, 1]} : vector<8x512xf32> to vector<8x128xf32>
    %588 = arith.negf %587 : vector<8x128xf32>
    %589 = math.exp %588 : vector<8x128xf32>
    %cst_306 = arith.constant 1.000000e+00 : f32
    %590 = vector.broadcast %cst_306 : f32 to vector<8x128xf32>
    %591 = arith.addf %590, %589 : vector<8x128xf32>
    %592 = arith.divf %590, %591 : vector<8x128xf32>
    %593 = vector.extract_strided_slice %586 {offsets = [0, 128], sizes = [8, 128], strides = [1, 1]} : vector<8x512xf32> to vector<8x128xf32>
    %594 = arith.negf %593 : vector<8x128xf32>
    %595 = math.exp %594 : vector<8x128xf32>
    %cst_307 = arith.constant 1.000000e+00 : f32
    %596 = vector.broadcast %cst_307 : f32 to vector<8x128xf32>
    %597 = arith.addf %596, %595 : vector<8x128xf32>
    %598 = arith.divf %596, %597 : vector<8x128xf32>
    %599 = vector.extract_strided_slice %586 {offsets = [0, 256], sizes = [8, 128], strides = [1, 1]} : vector<8x512xf32> to vector<8x128xf32>
    %600 = math.tanh %599 : vector<8x128xf32>
    %601 = vector.extract_strided_slice %586 {offsets = [0, 384], sizes = [8, 128], strides = [1, 1]} : vector<8x512xf32> to vector<8x128xf32>
    %602 = arith.negf %601 : vector<8x128xf32>
    %603 = math.exp %602 : vector<8x128xf32>
    %cst_308 = arith.constant 1.000000e+00 : f32
    %604 = vector.broadcast %cst_308 : f32 to vector<8x128xf32>
    %605 = arith.addf %604, %603 : vector<8x128xf32>
    %606 = arith.divf %604, %605 : vector<8x128xf32>
    %607 = arith.mulf %598, %580 : vector<8x128xf32>
    %608 = arith.mulf %592, %600 : vector<8x128xf32>
    %609 = arith.addf %607, %608 : vector<8x128xf32>
    %610 = math.tanh %609 : vector<8x128xf32>
    %611 = arith.mulf %606, %610 : vector<8x128xf32>
    %c0_309 = arith.constant 0 : index
    %c0_310 = arith.constant 0 : index
    %612 = vector.load %arg21[%c0_309, %c0_310] : memref<8x128xf32, #tpu.memory_space<vmem>>, vector<8x128xf32>
    tpu.vector_store %arg21[%c0_309, %c0_310], %611 {strides = array<i32>} : memref<8x128xf32, #tpu.memory_space<vmem>>, vector<8x128xf32>,
    %c0_311 = arith.constant 0 : index
    %c0_312 = arith.constant 0 : index
    %613 = vector.load %arg22[%c0_311, %c0_312] : memref<8x128xf32, #tpu.memory_space<vmem>>, vector<8x128xf32>
    tpu.vector_store %arg22[%c0_311, %c0_312], %609 {strides = array<i32>} : memref<8x128xf32, #tpu.memory_space<vmem>>, vector<8x128xf32>,
    %614 = arith.index_cast %578 : i32 to index
    %c0_313 = arith.constant 0 : index
    %c128_314 = arith.constant 128 : index
    %615 = vector.load %arg19[%614, %c0_313, %c128_314] : memref<8x8x256xf32, #tpu.memory_space<vmem>>, vector<1x8x128xf32>
    %616 = vector.shape_cast %615 : vector<1x8x128xf32> to vector<8x128xf32>
    %617 = vector.shape_cast %611 : vector<8x128xf32> to vector<1x8x128xf32>
    tpu.vector_store %arg19[%614, %c0_313, %c128_314], %617 {strides = array<i32>} : memref<8x8x256xf32, #tpu.memory_space<vmem>>, vector<1x8x128xf32>,
    %c7_i32_315 = arith.constant 7 : i32
    %c7_i32_316 = arith.constant 7 : i32
    %618 = arith.subi %c7_i32_316, %c7_i32_315 : i32
    %c0_317 = arith.constant 0 : index
    %c0_318 = arith.constant 0 : index
    %619 = vector.load %arg21[%c0_317, %c0_318] : memref<8x128xf32, #tpu.memory_space<vmem>>, vector<8x128xf32>
    %c0_319 = arith.constant 0 : index
    %c0_320 = arith.constant 0 : index
    %620 = vector.load %arg22[%c0_319, %c0_320] : memref<8x128xf32, #tpu.memory_space<vmem>>, vector<8x128xf32>
    %621 = arith.index_cast %618 : i32 to index
    %c0_321 = arith.constant 0 : index
    %c0_322 = arith.constant 0 : index
    %622 = vector.load %arg18[%621, %c0_321, %c0_322] : memref<8x8x512xf32, #tpu.memory_space<vmem>>, vector<1x8x512xf32>
    %623 = vector.shape_cast %622 : vector<1x8x512xf32> to vector<8x512xf32>
    %c0_323 = arith.constant 0 : index
    %c0_324 = arith.constant 0 : index
    %624 = vector.load %arg5[%c0_323, %c0_324] : memref<128x512xf32, #tpu.memory_space<vmem>>, vector<128x512xf32>
    %cst_325 = arith.constant dense<0.000000e+00> : vector<8x512xf32>
    %625 = tpu.matmul %619, %624, %cst_325 {dimension_numbers = #tpu.dot_dimension_numbers<[1], [0], [0], [1], [0, 0, 1, 1], [], []>} : vector<8x128xf32>, vector<128x512xf32>, vector<8x512xf32> -> vector<8x512xf32>
    %626 = arith.addf %623, %625 : vector<8x512xf32>
    %627 = vector.extract_strided_slice %626 {offsets = [0, 0], sizes = [8, 128], strides = [1, 1]} : vector<8x512xf32> to vector<8x128xf32>
    %628 = arith.negf %627 : vector<8x128xf32>
    %629 = math.exp %628 : vector<8x128xf32>
    %cst_326 = arith.constant 1.000000e+00 : f32
    %630 = vector.broadcast %cst_326 : f32 to vector<8x128xf32>
    %631 = arith.addf %630, %629 : vector<8x128xf32>
    %632 = arith.divf %630, %631 : vector<8x128xf32>
    %633 = vector.extract_strided_slice %626 {offsets = [0, 128], sizes = [8, 128], strides = [1, 1]} : vector<8x512xf32> to vector<8x128xf32>
    %634 = arith.negf %633 : vector<8x128xf32>
    %635 = math.exp %634 : vector<8x128xf32>
    %cst_327 = arith.constant 1.000000e+00 : f32
    %636 = vector.broadcast %cst_327 : f32 to vector<8x128xf32>
    %637 = arith.addf %636, %635 : vector<8x128xf32>
    %638 = arith.divf %636, %637 : vector<8x128xf32>
    %639 = vector.extract_strided_slice %626 {offsets = [0, 256], sizes = [8, 128], strides = [1, 1]} : vector<8x512xf32> to vector<8x128xf32>
    %640 = math.tanh %639 : vector<8x128xf32>
    %641 = vector.extract_strided_slice %626 {offsets = [0, 384], sizes = [8, 128], strides = [1, 1]} : vector<8x512xf32> to vector<8x128xf32>
    %642 = arith.negf %641 : vector<8x128xf32>
    %643 = math.exp %642 : vector<8x128xf32>
    %cst_328 = arith.constant 1.000000e+00 : f32
    %644 = vector.broadcast %cst_328 : f32 to vector<8x128xf32>
    %645 = arith.addf %644, %643 : vector<8x128xf32>
    %646 = arith.divf %644, %645 : vector<8x128xf32>
    %647 = arith.mulf %638, %620 : vector<8x128xf32>
    %648 = arith.mulf %632, %640 : vector<8x128xf32>
    %649 = arith.addf %647, %648 : vector<8x128xf32>
    %650 = math.tanh %649 : vector<8x128xf32>
    %651 = arith.mulf %646, %650 : vector<8x128xf32>
    %c0_329 = arith.constant 0 : index
    %c0_330 = arith.constant 0 : index
    %652 = vector.load %arg21[%c0_329, %c0_330] : memref<8x128xf32, #tpu.memory_space<vmem>>, vector<8x128xf32>
    tpu.vector_store %arg21[%c0_329, %c0_330], %651 {strides = array<i32>} : memref<8x128xf32, #tpu.memory_space<vmem>>, vector<8x128xf32>,
    %c0_331 = arith.constant 0 : index
    %c0_332 = arith.constant 0 : index
    %653 = vector.load %arg22[%c0_331, %c0_332] : memref<8x128xf32, #tpu.memory_space<vmem>>, vector<8x128xf32>
    tpu.vector_store %arg22[%c0_331, %c0_332], %649 {strides = array<i32>} : memref<8x128xf32, #tpu.memory_space<vmem>>, vector<8x128xf32>,
    %654 = arith.index_cast %618 : i32 to index
    %c0_333 = arith.constant 0 : index
    %c128_334 = arith.constant 128 : index
    %655 = vector.load %arg19[%654, %c0_333, %c128_334] : memref<8x8x256xf32, #tpu.memory_space<vmem>>, vector<1x8x128xf32>
    %656 = vector.shape_cast %655 : vector<1x8x128xf32> to vector<8x128xf32>
    %657 = vector.shape_cast %651 : vector<8x128xf32> to vector<1x8x128xf32>
    tpu.vector_store %arg19[%654, %c0_333, %c128_334], %657 {strides = array<i32>} : memref<8x8x256xf32, #tpu.memory_space<vmem>>, vector<1x8x128xf32>,
    %c8_i32_335 = arith.constant 8 : i32
    %c0_336 = arith.constant 0 : index
    %c0_337 = arith.constant 0 : index
    %c0_338 = arith.constant 0 : index
    %658 = vector.load %arg19[%c0_336, %c0_337, %c0_338] : memref<8x8x256xf32, #tpu.memory_space<vmem>>, vector<8x8x256xf32>
    %659 = vector.shape_cast %658 : vector<8x8x256xf32> to vector<64x256xf32>
    %c0_339 = arith.constant 0 : index
    %c0_340 = arith.constant 0 : index
    %660 = vector.load %arg7[%c0_339, %c0_340] : memref<256x512xf32, #tpu.memory_space<vmem>>, vector<256x512xf32>
    %cst_341 = arith.constant dense<0.000000e+00> : vector<64x512xf32>
    %661 = tpu.matmul %659, %660, %cst_341 {dimension_numbers = #tpu.dot_dimension_numbers<[1], [0], [0], [1], [0, 0, 1, 1], [], []>} : vector<64x256xf32>, vector<256x512xf32>, vector<64x512xf32> -> vector<64x512xf32>
    %c0_342 = arith.constant 0 : index
    %c0_343 = arith.constant 0 : index
    %662 = vector.load %arg9[%c0_342, %c0_343] : memref<1x512xf32, #tpu.memory_space<vmem>>, vector<1x512xf32>
    %663 = vector.broadcast %662 : vector<1x512xf32> to vector<64x512xf32>
    %664 = arith.addf %661, %663 : vector<64x512xf32>
    %665 = vector.shape_cast %664 : vector<64x512xf32> to vector<8x8x512xf32>
    %c0_344 = arith.constant 0 : index
    %c0_345 = arith.constant 0 : index
    %c0_346 = arith.constant 0 : index
    %666 = vector.load %arg18[%c0_344, %c0_345, %c0_346] : memref<8x8x512xf32, #tpu.memory_space<vmem>>, vector<8x8x512xf32>
    tpu.vector_store %arg18[%c0_344, %c0_345, %c0_346], %665 {strides = array<i32>} : memref<8x8x512xf32, #tpu.memory_space<vmem>>, vector<8x8x512xf32>,
    %cst_347 = arith.constant 0.000000e+00 : f32
    %667 = vector.broadcast %cst_347 : f32 to vector<8x128xf32>
    %c0_348 = arith.constant 0 : index
    %c0_349 = arith.constant 0 : index
    %668 = vector.load %arg21[%c0_348, %c0_349] : memref<8x128xf32, #tpu.memory_space<vmem>>, vector<8x128xf32>
    tpu.vector_store %arg21[%c0_348, %c0_349], %667 {strides = array<i32>} : memref<8x128xf32, #tpu.memory_space<vmem>>, vector<8x128xf32>,
    %cst_350 = arith.constant 0.000000e+00 : f32
    %669 = vector.broadcast %cst_350 : f32 to vector<8x128xf32>
    %c0_351 = arith.constant 0 : index
    %c0_352 = arith.constant 0 : index
    %670 = vector.load %arg22[%c0_351, %c0_352] : memref<8x128xf32, #tpu.memory_space<vmem>>, vector<8x128xf32>
    tpu.vector_store %arg22[%c0_351, %c0_352], %669 {strides = array<i32>} : memref<8x128xf32, #tpu.memory_space<vmem>>, vector<8x128xf32>,
    %c0_i32_353 = arith.constant 0 : i32
    %c0_354 = arith.constant 0 : index
    %c0_355 = arith.constant 0 : index
    %671 = vector.load %arg21[%c0_354, %c0_355] : memref<8x128xf32, #tpu.memory_space<vmem>>, vector<8x128xf32>
    %c0_356 = arith.constant 0 : index
    %c0_357 = arith.constant 0 : index
    %672 = vector.load %arg22[%c0_356, %c0_357] : memref<8x128xf32, #tpu.memory_space<vmem>>, vector<8x128xf32>
    %673 = arith.index_cast %c0_i32_353 : i32 to index
    %c0_358 = arith.constant 0 : index
    %c0_359 = arith.constant 0 : index
    %674 = vector.load %arg18[%673, %c0_358, %c0_359] : memref<8x8x512xf32, #tpu.memory_space<vmem>>, vector<1x8x512xf32>
    %675 = vector.shape_cast %674 : vector<1x8x512xf32> to vector<8x512xf32>
    %c0_360 = arith.constant 0 : index
    %c0_361 = arith.constant 0 : index
    %676 = vector.load %arg8[%c0_360, %c0_361] : memref<128x512xf32, #tpu.memory_space<vmem>>, vector<128x512xf32>
    %cst_362 = arith.constant dense<0.000000e+00> : vector<8x512xf32>
    %677 = tpu.matmul %671, %676, %cst_362 {dimension_numbers = #tpu.dot_dimension_numbers<[1], [0], [0], [1], [0, 0, 1, 1], [], []>} : vector<8x128xf32>, vector<128x512xf32>, vector<8x512xf32> -> vector<8x512xf32>
    %678 = arith.addf %675, %677 : vector<8x512xf32>
    %679 = vector.extract_strided_slice %678 {offsets = [0, 0], sizes = [8, 128], strides = [1, 1]} : vector<8x512xf32> to vector<8x128xf32>
    %680 = arith.negf %679 : vector<8x128xf32>
    %681 = math.exp %680 : vector<8x128xf32>
    %cst_363 = arith.constant 1.000000e+00 : f32
    %682 = vector.broadcast %cst_363 : f32 to vector<8x128xf32>
    %683 = arith.addf %682, %681 : vector<8x128xf32>
    %684 = arith.divf %682, %683 : vector<8x128xf32>
    %685 = vector.extract_strided_slice %678 {offsets = [0, 128], sizes = [8, 128], strides = [1, 1]} : vector<8x512xf32> to vector<8x128xf32>
    %686 = arith.negf %685 : vector<8x128xf32>
    %687 = math.exp %686 : vector<8x128xf32>
    %cst_364 = arith.constant 1.000000e+00 : f32
    %688 = vector.broadcast %cst_364 : f32 to vector<8x128xf32>
    %689 = arith.addf %688, %687 : vector<8x128xf32>
    %690 = arith.divf %688, %689 : vector<8x128xf32>
    %691 = vector.extract_strided_slice %678 {offsets = [0, 256], sizes = [8, 128], strides = [1, 1]} : vector<8x512xf32> to vector<8x128xf32>
    %692 = math.tanh %691 : vector<8x128xf32>
    %693 = vector.extract_strided_slice %678 {offsets = [0, 384], sizes = [8, 128], strides = [1, 1]} : vector<8x512xf32> to vector<8x128xf32>
    %694 = arith.negf %693 : vector<8x128xf32>
    %695 = math.exp %694 : vector<8x128xf32>
    %cst_365 = arith.constant 1.000000e+00 : f32
    %696 = vector.broadcast %cst_365 : f32 to vector<8x128xf32>
    %697 = arith.addf %696, %695 : vector<8x128xf32>
    %698 = arith.divf %696, %697 : vector<8x128xf32>
    %699 = arith.mulf %690, %672 : vector<8x128xf32>
    %700 = arith.mulf %684, %692 : vector<8x128xf32>
    %701 = arith.addf %699, %700 : vector<8x128xf32>
    %702 = math.tanh %701 : vector<8x128xf32>
    %703 = arith.mulf %698, %702 : vector<8x128xf32>
    %c0_366 = arith.constant 0 : index
    %c0_367 = arith.constant 0 : index
    %704 = vector.load %arg21[%c0_366, %c0_367] : memref<8x128xf32, #tpu.memory_space<vmem>>, vector<8x128xf32>
    tpu.vector_store %arg21[%c0_366, %c0_367], %703 {strides = array<i32>} : memref<8x128xf32, #tpu.memory_space<vmem>>, vector<8x128xf32>,
    %c0_368 = arith.constant 0 : index
    %c0_369 = arith.constant 0 : index
    %705 = vector.load %arg22[%c0_368, %c0_369] : memref<8x128xf32, #tpu.memory_space<vmem>>, vector<8x128xf32>
    tpu.vector_store %arg22[%c0_368, %c0_369], %701 {strides = array<i32>} : memref<8x128xf32, #tpu.memory_space<vmem>>, vector<8x128xf32>,
    %706 = arith.index_cast %c0_i32_353 : i32 to index
    %c0_370 = arith.constant 0 : index
    %c0_371 = arith.constant 0 : index
    %707 = vector.load %arg20[%706, %c0_370, %c0_371] : memref<8x8x256xf32, #tpu.memory_space<vmem>>, vector<1x8x128xf32>
    %708 = vector.shape_cast %707 : vector<1x8x128xf32> to vector<8x128xf32>
    %709 = vector.shape_cast %703 : vector<8x128xf32> to vector<1x8x128xf32>
    tpu.vector_store %arg20[%706, %c0_370, %c0_371], %709 {strides = array<i32>} : memref<8x8x256xf32, #tpu.memory_space<vmem>>, vector<1x8x128xf32>,
    %c1_i32_372 = arith.constant 1 : i32
    %c0_373 = arith.constant 0 : index
    %c0_374 = arith.constant 0 : index
    %710 = vector.load %arg21[%c0_373, %c0_374] : memref<8x128xf32, #tpu.memory_space<vmem>>, vector<8x128xf32>
    %c0_375 = arith.constant 0 : index
    %c0_376 = arith.constant 0 : index
    %711 = vector.load %arg22[%c0_375, %c0_376] : memref<8x128xf32, #tpu.memory_space<vmem>>, vector<8x128xf32>
    %712 = arith.index_cast %c1_i32_372 : i32 to index
    %c0_377 = arith.constant 0 : index
    %c0_378 = arith.constant 0 : index
    %713 = vector.load %arg18[%712, %c0_377, %c0_378] : memref<8x8x512xf32, #tpu.memory_space<vmem>>, vector<1x8x512xf32>
    %714 = vector.shape_cast %713 : vector<1x8x512xf32> to vector<8x512xf32>
    %c0_379 = arith.constant 0 : index
    %c0_380 = arith.constant 0 : index
    %715 = vector.load %arg8[%c0_379, %c0_380] : memref<128x512xf32, #tpu.memory_space<vmem>>, vector<128x512xf32>
    %cst_381 = arith.constant dense<0.000000e+00> : vector<8x512xf32>
    %716 = tpu.matmul %710, %715, %cst_381 {dimension_numbers = #tpu.dot_dimension_numbers<[1], [0], [0], [1], [0, 0, 1, 1], [], []>} : vector<8x128xf32>, vector<128x512xf32>, vector<8x512xf32> -> vector<8x512xf32>
    %717 = arith.addf %714, %716 : vector<8x512xf32>
    %718 = vector.extract_strided_slice %717 {offsets = [0, 0], sizes = [8, 128], strides = [1, 1]} : vector<8x512xf32> to vector<8x128xf32>
    %719 = arith.negf %718 : vector<8x128xf32>
    %720 = math.exp %719 : vector<8x128xf32>
    %cst_382 = arith.constant 1.000000e+00 : f32
    %721 = vector.broadcast %cst_382 : f32 to vector<8x128xf32>
    %722 = arith.addf %721, %720 : vector<8x128xf32>
    %723 = arith.divf %721, %722 : vector<8x128xf32>
    %724 = vector.extract_strided_slice %717 {offsets = [0, 128], sizes = [8, 128], strides = [1, 1]} : vector<8x512xf32> to vector<8x128xf32>
    %725 = arith.negf %724 : vector<8x128xf32>
    %726 = math.exp %725 : vector<8x128xf32>
    %cst_383 = arith.constant 1.000000e+00 : f32
    %727 = vector.broadcast %cst_383 : f32 to vector<8x128xf32>
    %728 = arith.addf %727, %726 : vector<8x128xf32>
    %729 = arith.divf %727, %728 : vector<8x128xf32>
    %730 = vector.extract_strided_slice %717 {offsets = [0, 256], sizes = [8, 128], strides = [1, 1]} : vector<8x512xf32> to vector<8x128xf32>
    %731 = math.tanh %730 : vector<8x128xf32>
    %732 = vector.extract_strided_slice %717 {offsets = [0, 384], sizes = [8, 128], strides = [1, 1]} : vector<8x512xf32> to vector<8x128xf32>
    %733 = arith.negf %732 : vector<8x128xf32>
    %734 = math.exp %733 : vector<8x128xf32>
    %cst_384 = arith.constant 1.000000e+00 : f32
    %735 = vector.broadcast %cst_384 : f32 to vector<8x128xf32>
    %736 = arith.addf %735, %734 : vector<8x128xf32>
    %737 = arith.divf %735, %736 : vector<8x128xf32>
    %738 = arith.mulf %729, %711 : vector<8x128xf32>
    %739 = arith.mulf %723, %731 : vector<8x128xf32>
    %740 = arith.addf %738, %739 : vector<8x128xf32>
    %741 = math.tanh %740 : vector<8x128xf32>
    %742 = arith.mulf %737, %741 : vector<8x128xf32>
    %c0_385 = arith.constant 0 : index
    %c0_386 = arith.constant 0 : index
    %743 = vector.load %arg21[%c0_385, %c0_386] : memref<8x128xf32, #tpu.memory_space<vmem>>, vector<8x128xf32>
    tpu.vector_store %arg21[%c0_385, %c0_386], %742 {strides = array<i32>} : memref<8x128xf32, #tpu.memory_space<vmem>>, vector<8x128xf32>,
    %c0_387 = arith.constant 0 : index
    %c0_388 = arith.constant 0 : index
    %744 = vector.load %arg22[%c0_387, %c0_388] : memref<8x128xf32, #tpu.memory_space<vmem>>, vector<8x128xf32>
    tpu.vector_store %arg22[%c0_387, %c0_388], %740 {strides = array<i32>} : memref<8x128xf32, #tpu.memory_space<vmem>>, vector<8x128xf32>,
    %745 = arith.index_cast %c1_i32_372 : i32 to index
    %c0_389 = arith.constant 0 : index
    %c0_390 = arith.constant 0 : index
    %746 = vector.load %arg20[%745, %c0_389, %c0_390] : memref<8x8x256xf32, #tpu.memory_space<vmem>>, vector<1x8x128xf32>
    %747 = vector.shape_cast %746 : vector<1x8x128xf32> to vector<8x128xf32>
    %748 = vector.shape_cast %742 : vector<8x128xf32> to vector<1x8x128xf32>
    tpu.vector_store %arg20[%745, %c0_389, %c0_390], %748 {strides = array<i32>} : memref<8x8x256xf32, #tpu.memory_space<vmem>>, vector<1x8x128xf32>,
    %c2_i32_391 = arith.constant 2 : i32
    %c0_392 = arith.constant 0 : index
    %c0_393 = arith.constant 0 : index
    %749 = vector.load %arg21[%c0_392, %c0_393] : memref<8x128xf32, #tpu.memory_space<vmem>>, vector<8x128xf32>
    %c0_394 = arith.constant 0 : index
    %c0_395 = arith.constant 0 : index
    %750 = vector.load %arg22[%c0_394, %c0_395] : memref<8x128xf32, #tpu.memory_space<vmem>>, vector<8x128xf32>
    %751 = arith.index_cast %c2_i32_391 : i32 to index
    %c0_396 = arith.constant 0 : index
    %c0_397 = arith.constant 0 : index
    %752 = vector.load %arg18[%751, %c0_396, %c0_397] : memref<8x8x512xf32, #tpu.memory_space<vmem>>, vector<1x8x512xf32>
    %753 = vector.shape_cast %752 : vector<1x8x512xf32> to vector<8x512xf32>
    %c0_398 = arith.constant 0 : index
    %c0_399 = arith.constant 0 : index
    %754 = vector.load %arg8[%c0_398, %c0_399] : memref<128x512xf32, #tpu.memory_space<vmem>>, vector<128x512xf32>
    %cst_400 = arith.constant dense<0.000000e+00> : vector<8x512xf32>
    %755 = tpu.matmul %749, %754, %cst_400 {dimension_numbers = #tpu.dot_dimension_numbers<[1], [0], [0], [1], [0, 0, 1, 1], [], []>} : vector<8x128xf32>, vector<128x512xf32>, vector<8x512xf32> -> vector<8x512xf32>
    %756 = arith.addf %753, %755 : vector<8x512xf32>
    %757 = vector.extract_strided_slice %756 {offsets = [0, 0], sizes = [8, 128], strides = [1, 1]} : vector<8x512xf32> to vector<8x128xf32>
    %758 = arith.negf %757 : vector<8x128xf32>
    %759 = math.exp %758 : vector<8x128xf32>
    %cst_401 = arith.constant 1.000000e+00 : f32
    %760 = vector.broadcast %cst_401 : f32 to vector<8x128xf32>
    %761 = arith.addf %760, %759 : vector<8x128xf32>
    %762 = arith.divf %760, %761 : vector<8x128xf32>
    %763 = vector.extract_strided_slice %756 {offsets = [0, 128], sizes = [8, 128], strides = [1, 1]} : vector<8x512xf32> to vector<8x128xf32>
    %764 = arith.negf %763 : vector<8x128xf32>
    %765 = math.exp %764 : vector<8x128xf32>
    %cst_402 = arith.constant 1.000000e+00 : f32
    %766 = vector.broadcast %cst_402 : f32 to vector<8x128xf32>
    %767 = arith.addf %766, %765 : vector<8x128xf32>
    %768 = arith.divf %766, %767 : vector<8x128xf32>
    %769 = vector.extract_strided_slice %756 {offsets = [0, 256], sizes = [8, 128], strides = [1, 1]} : vector<8x512xf32> to vector<8x128xf32>
    %770 = math.tanh %769 : vector<8x128xf32>
    %771 = vector.extract_strided_slice %756 {offsets = [0, 384], sizes = [8, 128], strides = [1, 1]} : vector<8x512xf32> to vector<8x128xf32>
    %772 = arith.negf %771 : vector<8x128xf32>
    %773 = math.exp %772 : vector<8x128xf32>
    %cst_403 = arith.constant 1.000000e+00 : f32
    %774 = vector.broadcast %cst_403 : f32 to vector<8x128xf32>
    %775 = arith.addf %774, %773 : vector<8x128xf32>
    %776 = arith.divf %774, %775 : vector<8x128xf32>
    %777 = arith.mulf %768, %750 : vector<8x128xf32>
    %778 = arith.mulf %762, %770 : vector<8x128xf32>
    %779 = arith.addf %777, %778 : vector<8x128xf32>
    %780 = math.tanh %779 : vector<8x128xf32>
    %781 = arith.mulf %776, %780 : vector<8x128xf32>
    %c0_404 = arith.constant 0 : index
    %c0_405 = arith.constant 0 : index
    %782 = vector.load %arg21[%c0_404, %c0_405] : memref<8x128xf32, #tpu.memory_space<vmem>>, vector<8x128xf32>
    tpu.vector_store %arg21[%c0_404, %c0_405], %781 {strides = array<i32>} : memref<8x128xf32, #tpu.memory_space<vmem>>, vector<8x128xf32>,
    %c0_406 = arith.constant 0 : index
    %c0_407 = arith.constant 0 : index
    %783 = vector.load %arg22[%c0_406, %c0_407] : memref<8x128xf32, #tpu.memory_space<vmem>>, vector<8x128xf32>
    tpu.vector_store %arg22[%c0_406, %c0_407], %779 {strides = array<i32>} : memref<8x128xf32, #tpu.memory_space<vmem>>, vector<8x128xf32>,
    %784 = arith.index_cast %c2_i32_391 : i32 to index
    %c0_408 = arith.constant 0 : index
    %c0_409 = arith.constant 0 : index
    %785 = vector.load %arg20[%784, %c0_408, %c0_409] : memref<8x8x256xf32, #tpu.memory_space<vmem>>, vector<1x8x128xf32>
    %786 = vector.shape_cast %785 : vector<1x8x128xf32> to vector<8x128xf32>
    %787 = vector.shape_cast %781 : vector<8x128xf32> to vector<1x8x128xf32>
    tpu.vector_store %arg20[%784, %c0_408, %c0_409], %787 {strides = array<i32>} : memref<8x8x256xf32, #tpu.memory_space<vmem>>, vector<1x8x128xf32>,
    %c3_i32_410 = arith.constant 3 : i32
    %c0_411 = arith.constant 0 : index
    %c0_412 = arith.constant 0 : index
    %788 = vector.load %arg21[%c0_411, %c0_412] : memref<8x128xf32, #tpu.memory_space<vmem>>, vector<8x128xf32>
    %c0_413 = arith.constant 0 : index
    %c0_414 = arith.constant 0 : index
    %789 = vector.load %arg22[%c0_413, %c0_414] : memref<8x128xf32, #tpu.memory_space<vmem>>, vector<8x128xf32>
    %790 = arith.index_cast %c3_i32_410 : i32 to index
    %c0_415 = arith.constant 0 : index
    %c0_416 = arith.constant 0 : index
    %791 = vector.load %arg18[%790, %c0_415, %c0_416] : memref<8x8x512xf32, #tpu.memory_space<vmem>>, vector<1x8x512xf32>
    %792 = vector.shape_cast %791 : vector<1x8x512xf32> to vector<8x512xf32>
    %c0_417 = arith.constant 0 : index
    %c0_418 = arith.constant 0 : index
    %793 = vector.load %arg8[%c0_417, %c0_418] : memref<128x512xf32, #tpu.memory_space<vmem>>, vector<128x512xf32>
    %cst_419 = arith.constant dense<0.000000e+00> : vector<8x512xf32>
    %794 = tpu.matmul %788, %793, %cst_419 {dimension_numbers = #tpu.dot_dimension_numbers<[1], [0], [0], [1], [0, 0, 1, 1], [], []>} : vector<8x128xf32>, vector<128x512xf32>, vector<8x512xf32> -> vector<8x512xf32>
    %795 = arith.addf %792, %794 : vector<8x512xf32>
    %796 = vector.extract_strided_slice %795 {offsets = [0, 0], sizes = [8, 128], strides = [1, 1]} : vector<8x512xf32> to vector<8x128xf32>
    %797 = arith.negf %796 : vector<8x128xf32>
    %798 = math.exp %797 : vector<8x128xf32>
    %cst_420 = arith.constant 1.000000e+00 : f32
    %799 = vector.broadcast %cst_420 : f32 to vector<8x128xf32>
    %800 = arith.addf %799, %798 : vector<8x128xf32>
    %801 = arith.divf %799, %800 : vector<8x128xf32>
    %802 = vector.extract_strided_slice %795 {offsets = [0, 128], sizes = [8, 128], strides = [1, 1]} : vector<8x512xf32> to vector<8x128xf32>
    %803 = arith.negf %802 : vector<8x128xf32>
    %804 = math.exp %803 : vector<8x128xf32>
    %cst_421 = arith.constant 1.000000e+00 : f32
    %805 = vector.broadcast %cst_421 : f32 to vector<8x128xf32>
    %806 = arith.addf %805, %804 : vector<8x128xf32>
    %807 = arith.divf %805, %806 : vector<8x128xf32>
    %808 = vector.extract_strided_slice %795 {offsets = [0, 256], sizes = [8, 128], strides = [1, 1]} : vector<8x512xf32> to vector<8x128xf32>
    %809 = math.tanh %808 : vector<8x128xf32>
    %810 = vector.extract_strided_slice %795 {offsets = [0, 384], sizes = [8, 128], strides = [1, 1]} : vector<8x512xf32> to vector<8x128xf32>
    %811 = arith.negf %810 : vector<8x128xf32>
    %812 = math.exp %811 : vector<8x128xf32>
    %cst_422 = arith.constant 1.000000e+00 : f32
    %813 = vector.broadcast %cst_422 : f32 to vector<8x128xf32>
    %814 = arith.addf %813, %812 : vector<8x128xf32>
    %815 = arith.divf %813, %814 : vector<8x128xf32>
    %816 = arith.mulf %807, %789 : vector<8x128xf32>
    %817 = arith.mulf %801, %809 : vector<8x128xf32>
    %818 = arith.addf %816, %817 : vector<8x128xf32>
    %819 = math.tanh %818 : vector<8x128xf32>
    %820 = arith.mulf %815, %819 : vector<8x128xf32>
    %c0_423 = arith.constant 0 : index
    %c0_424 = arith.constant 0 : index
    %821 = vector.load %arg21[%c0_423, %c0_424] : memref<8x128xf32, #tpu.memory_space<vmem>>, vector<8x128xf32>
    tpu.vector_store %arg21[%c0_423, %c0_424], %820 {strides = array<i32>} : memref<8x128xf32, #tpu.memory_space<vmem>>, vector<8x128xf32>,
    %c0_425 = arith.constant 0 : index
    %c0_426 = arith.constant 0 : index
    %822 = vector.load %arg22[%c0_425, %c0_426] : memref<8x128xf32, #tpu.memory_space<vmem>>, vector<8x128xf32>
    tpu.vector_store %arg22[%c0_425, %c0_426], %818 {strides = array<i32>} : memref<8x128xf32, #tpu.memory_space<vmem>>, vector<8x128xf32>,
    %823 = arith.index_cast %c3_i32_410 : i32 to index
    %c0_427 = arith.constant 0 : index
    %c0_428 = arith.constant 0 : index
    %824 = vector.load %arg20[%823, %c0_427, %c0_428] : memref<8x8x256xf32, #tpu.memory_space<vmem>>, vector<1x8x128xf32>
    %825 = vector.shape_cast %824 : vector<1x8x128xf32> to vector<8x128xf32>
    %826 = vector.shape_cast %820 : vector<8x128xf32> to vector<1x8x128xf32>
    tpu.vector_store %arg20[%823, %c0_427, %c0_428], %826 {strides = array<i32>} : memref<8x8x256xf32, #tpu.memory_space<vmem>>, vector<1x8x128xf32>,
    %c4_i32_429 = arith.constant 4 : i32
    %c0_430 = arith.constant 0 : index
    %c0_431 = arith.constant 0 : index
    %827 = vector.load %arg21[%c0_430, %c0_431] : memref<8x128xf32, #tpu.memory_space<vmem>>, vector<8x128xf32>
    %c0_432 = arith.constant 0 : index
    %c0_433 = arith.constant 0 : index
    %828 = vector.load %arg22[%c0_432, %c0_433] : memref<8x128xf32, #tpu.memory_space<vmem>>, vector<8x128xf32>
    %829 = arith.index_cast %c4_i32_429 : i32 to index
    %c0_434 = arith.constant 0 : index
    %c0_435 = arith.constant 0 : index
    %830 = vector.load %arg18[%829, %c0_434, %c0_435] : memref<8x8x512xf32, #tpu.memory_space<vmem>>, vector<1x8x512xf32>
    %831 = vector.shape_cast %830 : vector<1x8x512xf32> to vector<8x512xf32>
    %c0_436 = arith.constant 0 : index
    %c0_437 = arith.constant 0 : index
    %832 = vector.load %arg8[%c0_436, %c0_437] : memref<128x512xf32, #tpu.memory_space<vmem>>, vector<128x512xf32>
    %cst_438 = arith.constant dense<0.000000e+00> : vector<8x512xf32>
    %833 = tpu.matmul %827, %832, %cst_438 {dimension_numbers = #tpu.dot_dimension_numbers<[1], [0], [0], [1], [0, 0, 1, 1], [], []>} : vector<8x128xf32>, vector<128x512xf32>, vector<8x512xf32> -> vector<8x512xf32>
    %834 = arith.addf %831, %833 : vector<8x512xf32>
    %835 = vector.extract_strided_slice %834 {offsets = [0, 0], sizes = [8, 128], strides = [1, 1]} : vector<8x512xf32> to vector<8x128xf32>
    %836 = arith.negf %835 : vector<8x128xf32>
    %837 = math.exp %836 : vector<8x128xf32>
    %cst_439 = arith.constant 1.000000e+00 : f32
    %838 = vector.broadcast %cst_439 : f32 to vector<8x128xf32>
    %839 = arith.addf %838, %837 : vector<8x128xf32>
    %840 = arith.divf %838, %839 : vector<8x128xf32>
    %841 = vector.extract_strided_slice %834 {offsets = [0, 128], sizes = [8, 128], strides = [1, 1]} : vector<8x512xf32> to vector<8x128xf32>
    %842 = arith.negf %841 : vector<8x128xf32>
    %843 = math.exp %842 : vector<8x128xf32>
    %cst_440 = arith.constant 1.000000e+00 : f32
    %844 = vector.broadcast %cst_440 : f32 to vector<8x128xf32>
    %845 = arith.addf %844, %843 : vector<8x128xf32>
    %846 = arith.divf %844, %845 : vector<8x128xf32>
    %847 = vector.extract_strided_slice %834 {offsets = [0, 256], sizes = [8, 128], strides = [1, 1]} : vector<8x512xf32> to vector<8x128xf32>
    %848 = math.tanh %847 : vector<8x128xf32>
    %849 = vector.extract_strided_slice %834 {offsets = [0, 384], sizes = [8, 128], strides = [1, 1]} : vector<8x512xf32> to vector<8x128xf32>
    %850 = arith.negf %849 : vector<8x128xf32>
    %851 = math.exp %850 : vector<8x128xf32>
    %cst_441 = arith.constant 1.000000e+00 : f32
    %852 = vector.broadcast %cst_441 : f32 to vector<8x128xf32>
    %853 = arith.addf %852, %851 : vector<8x128xf32>
    %854 = arith.divf %852, %853 : vector<8x128xf32>
    %855 = arith.mulf %846, %828 : vector<8x128xf32>
    %856 = arith.mulf %840, %848 : vector<8x128xf32>
    %857 = arith.addf %855, %856 : vector<8x128xf32>
    %858 = math.tanh %857 : vector<8x128xf32>
    %859 = arith.mulf %854, %858 : vector<8x128xf32>
    %c0_442 = arith.constant 0 : index
    %c0_443 = arith.constant 0 : index
    %860 = vector.load %arg21[%c0_442, %c0_443] : memref<8x128xf32, #tpu.memory_space<vmem>>, vector<8x128xf32>
    tpu.vector_store %arg21[%c0_442, %c0_443], %859 {strides = array<i32>} : memref<8x128xf32, #tpu.memory_space<vmem>>, vector<8x128xf32>,
    %c0_444 = arith.constant 0 : index
    %c0_445 = arith.constant 0 : index
    %861 = vector.load %arg22[%c0_444, %c0_445] : memref<8x128xf32, #tpu.memory_space<vmem>>, vector<8x128xf32>
    tpu.vector_store %arg22[%c0_444, %c0_445], %857 {strides = array<i32>} : memref<8x128xf32, #tpu.memory_space<vmem>>, vector<8x128xf32>,
    %862 = arith.index_cast %c4_i32_429 : i32 to index
    %c0_446 = arith.constant 0 : index
    %c0_447 = arith.constant 0 : index
    %863 = vector.load %arg20[%862, %c0_446, %c0_447] : memref<8x8x256xf32, #tpu.memory_space<vmem>>, vector<1x8x128xf32>
    %864 = vector.shape_cast %863 : vector<1x8x128xf32> to vector<8x128xf32>
    %865 = vector.shape_cast %859 : vector<8x128xf32> to vector<1x8x128xf32>
    tpu.vector_store %arg20[%862, %c0_446, %c0_447], %865 {strides = array<i32>} : memref<8x8x256xf32, #tpu.memory_space<vmem>>, vector<1x8x128xf32>,
    %c5_i32_448 = arith.constant 5 : i32
    %c0_449 = arith.constant 0 : index
    %c0_450 = arith.constant 0 : index
    %866 = vector.load %arg21[%c0_449, %c0_450] : memref<8x128xf32, #tpu.memory_space<vmem>>, vector<8x128xf32>
    %c0_451 = arith.constant 0 : index
    %c0_452 = arith.constant 0 : index
    %867 = vector.load %arg22[%c0_451, %c0_452] : memref<8x128xf32, #tpu.memory_space<vmem>>, vector<8x128xf32>
    %868 = arith.index_cast %c5_i32_448 : i32 to index
    %c0_453 = arith.constant 0 : index
    %c0_454 = arith.constant 0 : index
    %869 = vector.load %arg18[%868, %c0_453, %c0_454] : memref<8x8x512xf32, #tpu.memory_space<vmem>>, vector<1x8x512xf32>
    %870 = vector.shape_cast %869 : vector<1x8x512xf32> to vector<8x512xf32>
    %c0_455 = arith.constant 0 : index
    %c0_456 = arith.constant 0 : index
    %871 = vector.load %arg8[%c0_455, %c0_456] : memref<128x512xf32, #tpu.memory_space<vmem>>, vector<128x512xf32>
    %cst_457 = arith.constant dense<0.000000e+00> : vector<8x512xf32>
    %872 = tpu.matmul %866, %871, %cst_457 {dimension_numbers = #tpu.dot_dimension_numbers<[1], [0], [0], [1], [0, 0, 1, 1], [], []>} : vector<8x128xf32>, vector<128x512xf32>, vector<8x512xf32> -> vector<8x512xf32>
    %873 = arith.addf %870, %872 : vector<8x512xf32>
    %874 = vector.extract_strided_slice %873 {offsets = [0, 0], sizes = [8, 128], strides = [1, 1]} : vector<8x512xf32> to vector<8x128xf32>
    %875 = arith.negf %874 : vector<8x128xf32>
    %876 = math.exp %875 : vector<8x128xf32>
    %cst_458 = arith.constant 1.000000e+00 : f32
    %877 = vector.broadcast %cst_458 : f32 to vector<8x128xf32>
    %878 = arith.addf %877, %876 : vector<8x128xf32>
    %879 = arith.divf %877, %878 : vector<8x128xf32>
    %880 = vector.extract_strided_slice %873 {offsets = [0, 128], sizes = [8, 128], strides = [1, 1]} : vector<8x512xf32> to vector<8x128xf32>
    %881 = arith.negf %880 : vector<8x128xf32>
    %882 = math.exp %881 : vector<8x128xf32>
    %cst_459 = arith.constant 1.000000e+00 : f32
    %883 = vector.broadcast %cst_459 : f32 to vector<8x128xf32>
    %884 = arith.addf %883, %882 : vector<8x128xf32>
    %885 = arith.divf %883, %884 : vector<8x128xf32>
    %886 = vector.extract_strided_slice %873 {offsets = [0, 256], sizes = [8, 128], strides = [1, 1]} : vector<8x512xf32> to vector<8x128xf32>
    %887 = math.tanh %886 : vector<8x128xf32>
    %888 = vector.extract_strided_slice %873 {offsets = [0, 384], sizes = [8, 128], strides = [1, 1]} : vector<8x512xf32> to vector<8x128xf32>
    %889 = arith.negf %888 : vector<8x128xf32>
    %890 = math.exp %889 : vector<8x128xf32>
    %cst_460 = arith.constant 1.000000e+00 : f32
    %891 = vector.broadcast %cst_460 : f32 to vector<8x128xf32>
    %892 = arith.addf %891, %890 : vector<8x128xf32>
    %893 = arith.divf %891, %892 : vector<8x128xf32>
    %894 = arith.mulf %885, %867 : vector<8x128xf32>
    %895 = arith.mulf %879, %887 : vector<8x128xf32>
    %896 = arith.addf %894, %895 : vector<8x128xf32>
    %897 = math.tanh %896 : vector<8x128xf32>
    %898 = arith.mulf %893, %897 : vector<8x128xf32>
    %c0_461 = arith.constant 0 : index
    %c0_462 = arith.constant 0 : index
    %899 = vector.load %arg21[%c0_461, %c0_462] : memref<8x128xf32, #tpu.memory_space<vmem>>, vector<8x128xf32>
    tpu.vector_store %arg21[%c0_461, %c0_462], %898 {strides = array<i32>} : memref<8x128xf32, #tpu.memory_space<vmem>>, vector<8x128xf32>,
    %c0_463 = arith.constant 0 : index
    %c0_464 = arith.constant 0 : index
    %900 = vector.load %arg22[%c0_463, %c0_464] : memref<8x128xf32, #tpu.memory_space<vmem>>, vector<8x128xf32>
    tpu.vector_store %arg22[%c0_463, %c0_464], %896 {strides = array<i32>} : memref<8x128xf32, #tpu.memory_space<vmem>>, vector<8x128xf32>,
    %901 = arith.index_cast %c5_i32_448 : i32 to index
    %c0_465 = arith.constant 0 : index
    %c0_466 = arith.constant 0 : index
    %902 = vector.load %arg20[%901, %c0_465, %c0_466] : memref<8x8x256xf32, #tpu.memory_space<vmem>>, vector<1x8x128xf32>
    %903 = vector.shape_cast %902 : vector<1x8x128xf32> to vector<8x128xf32>
    %904 = vector.shape_cast %898 : vector<8x128xf32> to vector<1x8x128xf32>
    tpu.vector_store %arg20[%901, %c0_465, %c0_466], %904 {strides = array<i32>} : memref<8x8x256xf32, #tpu.memory_space<vmem>>, vector<1x8x128xf32>,
    %c6_i32_467 = arith.constant 6 : i32
    %c0_468 = arith.constant 0 : index
    %c0_469 = arith.constant 0 : index
    %905 = vector.load %arg21[%c0_468, %c0_469] : memref<8x128xf32, #tpu.memory_space<vmem>>, vector<8x128xf32>
    %c0_470 = arith.constant 0 : index
    %c0_471 = arith.constant 0 : index
    %906 = vector.load %arg22[%c0_470, %c0_471] : memref<8x128xf32, #tpu.memory_space<vmem>>, vector<8x128xf32>
    %907 = arith.index_cast %c6_i32_467 : i32 to index
    %c0_472 = arith.constant 0 : index
    %c0_473 = arith.constant 0 : index
    %908 = vector.load %arg18[%907, %c0_472, %c0_473] : memref<8x8x512xf32, #tpu.memory_space<vmem>>, vector<1x8x512xf32>
    %909 = vector.shape_cast %908 : vector<1x8x512xf32> to vector<8x512xf32>
    %c0_474 = arith.constant 0 : index
    %c0_475 = arith.constant 0 : index
    %910 = vector.load %arg8[%c0_474, %c0_475] : memref<128x512xf32, #tpu.memory_space<vmem>>, vector<128x512xf32>
    %cst_476 = arith.constant dense<0.000000e+00> : vector<8x512xf32>
    %911 = tpu.matmul %905, %910, %cst_476 {dimension_numbers = #tpu.dot_dimension_numbers<[1], [0], [0], [1], [0, 0, 1, 1], [], []>} : vector<8x128xf32>, vector<128x512xf32>, vector<8x512xf32> -> vector<8x512xf32>
    %912 = arith.addf %909, %911 : vector<8x512xf32>
    %913 = vector.extract_strided_slice %912 {offsets = [0, 0], sizes = [8, 128], strides = [1, 1]} : vector<8x512xf32> to vector<8x128xf32>
    %914 = arith.negf %913 : vector<8x128xf32>
    %915 = math.exp %914 : vector<8x128xf32>
    %cst_477 = arith.constant 1.000000e+00 : f32
    %916 = vector.broadcast %cst_477 : f32 to vector<8x128xf32>
    %917 = arith.addf %916, %915 : vector<8x128xf32>
    %918 = arith.divf %916, %917 : vector<8x128xf32>
    %919 = vector.extract_strided_slice %912 {offsets = [0, 128], sizes = [8, 128], strides = [1, 1]} : vector<8x512xf32> to vector<8x128xf32>
    %920 = arith.negf %919 : vector<8x128xf32>
    %921 = math.exp %920 : vector<8x128xf32>
    %cst_478 = arith.constant 1.000000e+00 : f32
    %922 = vector.broadcast %cst_478 : f32 to vector<8x128xf32>
    %923 = arith.addf %922, %921 : vector<8x128xf32>
    %924 = arith.divf %922, %923 : vector<8x128xf32>
    %925 = vector.extract_strided_slice %912 {offsets = [0, 256], sizes = [8, 128], strides = [1, 1]} : vector<8x512xf32> to vector<8x128xf32>
    %926 = math.tanh %925 : vector<8x128xf32>
    %927 = vector.extract_strided_slice %912 {offsets = [0, 384], sizes = [8, 128], strides = [1, 1]} : vector<8x512xf32> to vector<8x128xf32>
    %928 = arith.negf %927 : vector<8x128xf32>
    %929 = math.exp %928 : vector<8x128xf32>
    %cst_479 = arith.constant 1.000000e+00 : f32
    %930 = vector.broadcast %cst_479 : f32 to vector<8x128xf32>
    %931 = arith.addf %930, %929 : vector<8x128xf32>
    %932 = arith.divf %930, %931 : vector<8x128xf32>
    %933 = arith.mulf %924, %906 : vector<8x128xf32>
    %934 = arith.mulf %918, %926 : vector<8x128xf32>
    %935 = arith.addf %933, %934 : vector<8x128xf32>
    %936 = math.tanh %935 : vector<8x128xf32>
    %937 = arith.mulf %932, %936 : vector<8x128xf32>
    %c0_480 = arith.constant 0 : index
    %c0_481 = arith.constant 0 : index
    %938 = vector.load %arg21[%c0_480, %c0_481] : memref<8x128xf32, #tpu.memory_space<vmem>>, vector<8x128xf32>
    tpu.vector_store %arg21[%c0_480, %c0_481], %937 {strides = array<i32>} : memref<8x128xf32, #tpu.memory_space<vmem>>, vector<8x128xf32>,
    %c0_482 = arith.constant 0 : index
    %c0_483 = arith.constant 0 : index
    %939 = vector.load %arg22[%c0_482, %c0_483] : memref<8x128xf32, #tpu.memory_space<vmem>>, vector<8x128xf32>
    tpu.vector_store %arg22[%c0_482, %c0_483], %935 {strides = array<i32>} : memref<8x128xf32, #tpu.memory_space<vmem>>, vector<8x128xf32>,
    %940 = arith.index_cast %c6_i32_467 : i32 to index
    %c0_484 = arith.constant 0 : index
    %c0_485 = arith.constant 0 : index
    %941 = vector.load %arg20[%940, %c0_484, %c0_485] : memref<8x8x256xf32, #tpu.memory_space<vmem>>, vector<1x8x128xf32>
    %942 = vector.shape_cast %941 : vector<1x8x128xf32> to vector<8x128xf32>
    %943 = vector.shape_cast %937 : vector<8x128xf32> to vector<1x8x128xf32>
    tpu.vector_store %arg20[%940, %c0_484, %c0_485], %943 {strides = array<i32>} : memref<8x8x256xf32, #tpu.memory_space<vmem>>, vector<1x8x128xf32>,
    %c7_i32_486 = arith.constant 7 : i32
    %c0_487 = arith.constant 0 : index
    %c0_488 = arith.constant 0 : index
    %944 = vector.load %arg21[%c0_487, %c0_488] : memref<8x128xf32, #tpu.memory_space<vmem>>, vector<8x128xf32>
    %c0_489 = arith.constant 0 : index
    %c0_490 = arith.constant 0 : index
    %945 = vector.load %arg22[%c0_489, %c0_490] : memref<8x128xf32, #tpu.memory_space<vmem>>, vector<8x128xf32>
    %946 = arith.index_cast %c7_i32_486 : i32 to index
    %c0_491 = arith.constant 0 : index
    %c0_492 = arith.constant 0 : index
    %947 = vector.load %arg18[%946, %c0_491, %c0_492] : memref<8x8x512xf32, #tpu.memory_space<vmem>>, vector<1x8x512xf32>
    %948 = vector.shape_cast %947 : vector<1x8x512xf32> to vector<8x512xf32>
    %c0_493 = arith.constant 0 : index
    %c0_494 = arith.constant 0 : index
    %949 = vector.load %arg8[%c0_493, %c0_494] : memref<128x512xf32, #tpu.memory_space<vmem>>, vector<128x512xf32>
    %cst_495 = arith.constant dense<0.000000e+00> : vector<8x512xf32>
    %950 = tpu.matmul %944, %949, %cst_495 {dimension_numbers = #tpu.dot_dimension_numbers<[1], [0], [0], [1], [0, 0, 1, 1], [], []>} : vector<8x128xf32>, vector<128x512xf32>, vector<8x512xf32> -> vector<8x512xf32>
    %951 = arith.addf %948, %950 : vector<8x512xf32>
    %952 = vector.extract_strided_slice %951 {offsets = [0, 0], sizes = [8, 128], strides = [1, 1]} : vector<8x512xf32> to vector<8x128xf32>
    %953 = arith.negf %952 : vector<8x128xf32>
    %954 = math.exp %953 : vector<8x128xf32>
    %cst_496 = arith.constant 1.000000e+00 : f32
    %955 = vector.broadcast %cst_496 : f32 to vector<8x128xf32>
    %956 = arith.addf %955, %954 : vector<8x128xf32>
    %957 = arith.divf %955, %956 : vector<8x128xf32>
    %958 = vector.extract_strided_slice %951 {offsets = [0, 128], sizes = [8, 128], strides = [1, 1]} : vector<8x512xf32> to vector<8x128xf32>
    %959 = arith.negf %958 : vector<8x128xf32>
    %960 = math.exp %959 : vector<8x128xf32>
    %cst_497 = arith.constant 1.000000e+00 : f32
    %961 = vector.broadcast %cst_497 : f32 to vector<8x128xf32>
    %962 = arith.addf %961, %960 : vector<8x128xf32>
    %963 = arith.divf %961, %962 : vector<8x128xf32>
    %964 = vector.extract_strided_slice %951 {offsets = [0, 256], sizes = [8, 128], strides = [1, 1]} : vector<8x512xf32> to vector<8x128xf32>
    %965 = math.tanh %964 : vector<8x128xf32>
    %966 = vector.extract_strided_slice %951 {offsets = [0, 384], sizes = [8, 128], strides = [1, 1]} : vector<8x512xf32> to vector<8x128xf32>
    %967 = arith.negf %966 : vector<8x128xf32>
    %968 = math.exp %967 : vector<8x128xf32>
    %cst_498 = arith.constant 1.000000e+00 : f32
    %969 = vector.broadcast %cst_498 : f32 to vector<8x128xf32>
    %970 = arith.addf %969, %968 : vector<8x128xf32>
    %971 = arith.divf %969, %970 : vector<8x128xf32>
    %972 = arith.mulf %963, %945 : vector<8x128xf32>
    %973 = arith.mulf %957, %965 : vector<8x128xf32>
    %974 = arith.addf %972, %973 : vector<8x128xf32>
    %975 = math.tanh %974 : vector<8x128xf32>
    %976 = arith.mulf %971, %975 : vector<8x128xf32>
    %c0_499 = arith.constant 0 : index
    %c0_500 = arith.constant 0 : index
    %977 = vector.load %arg21[%c0_499, %c0_500] : memref<8x128xf32, #tpu.memory_space<vmem>>, vector<8x128xf32>
    tpu.vector_store %arg21[%c0_499, %c0_500], %976 {strides = array<i32>} : memref<8x128xf32, #tpu.memory_space<vmem>>, vector<8x128xf32>,
    %c0_501 = arith.constant 0 : index
    %c0_502 = arith.constant 0 : index
    %978 = vector.load %arg22[%c0_501, %c0_502] : memref<8x128xf32, #tpu.memory_space<vmem>>, vector<8x128xf32>
    tpu.vector_store %arg22[%c0_501, %c0_502], %974 {strides = array<i32>} : memref<8x128xf32, #tpu.memory_space<vmem>>, vector<8x128xf32>,
    %979 = arith.index_cast %c7_i32_486 : i32 to index
    %c0_503 = arith.constant 0 : index
    %c0_504 = arith.constant 0 : index
    %980 = vector.load %arg20[%979, %c0_503, %c0_504] : memref<8x8x256xf32, #tpu.memory_space<vmem>>, vector<1x8x128xf32>
    %981 = vector.shape_cast %980 : vector<1x8x128xf32> to vector<8x128xf32>
    %982 = vector.shape_cast %976 : vector<8x128xf32> to vector<1x8x128xf32>
    tpu.vector_store %arg20[%979, %c0_503, %c0_504], %982 {strides = array<i32>} : memref<8x8x256xf32, #tpu.memory_space<vmem>>, vector<1x8x128xf32>,
    %c8_i32_505 = arith.constant 8 : i32
    %c0_506 = arith.constant 0 : index
    %c0_507 = arith.constant 0 : index
    %c0_508 = arith.constant 0 : index
    %983 = vector.load %arg19[%c0_506, %c0_507, %c0_508] : memref<8x8x256xf32, #tpu.memory_space<vmem>>, vector<8x8x256xf32>
    %984 = vector.shape_cast %983 : vector<8x8x256xf32> to vector<64x256xf32>
    %c0_509 = arith.constant 0 : index
    %c0_510 = arith.constant 0 : index
    %985 = vector.load %arg10[%c0_509, %c0_510] : memref<256x512xf32, #tpu.memory_space<vmem>>, vector<256x512xf32>
    %cst_511 = arith.constant dense<0.000000e+00> : vector<64x512xf32>
    %986 = tpu.matmul %984, %985, %cst_511 {dimension_numbers = #tpu.dot_dimension_numbers<[1], [0], [0], [1], [0, 0, 1, 1], [], []>} : vector<64x256xf32>, vector<256x512xf32>, vector<64x512xf32> -> vector<64x512xf32>
    %c0_512 = arith.constant 0 : index
    %c0_513 = arith.constant 0 : index
    %987 = vector.load %arg12[%c0_512, %c0_513] : memref<1x512xf32, #tpu.memory_space<vmem>>, vector<1x512xf32>
    %988 = vector.broadcast %987 : vector<1x512xf32> to vector<64x512xf32>
    %989 = arith.addf %986, %988 : vector<64x512xf32>
    %990 = vector.shape_cast %989 : vector<64x512xf32> to vector<8x8x512xf32>
    %c0_514 = arith.constant 0 : index
    %c0_515 = arith.constant 0 : index
    %c0_516 = arith.constant 0 : index
    %991 = vector.load %arg18[%c0_514, %c0_515, %c0_516] : memref<8x8x512xf32, #tpu.memory_space<vmem>>, vector<8x8x512xf32>
    tpu.vector_store %arg18[%c0_514, %c0_515, %c0_516], %990 {strides = array<i32>} : memref<8x8x512xf32, #tpu.memory_space<vmem>>, vector<8x8x512xf32>,
    %cst_517 = arith.constant 0.000000e+00 : f32
    %992 = vector.broadcast %cst_517 : f32 to vector<8x128xf32>
    %c0_518 = arith.constant 0 : index
    %c0_519 = arith.constant 0 : index
    %993 = vector.load %arg21[%c0_518, %c0_519] : memref<8x128xf32, #tpu.memory_space<vmem>>, vector<8x128xf32>
    tpu.vector_store %arg21[%c0_518, %c0_519], %992 {strides = array<i32>} : memref<8x128xf32, #tpu.memory_space<vmem>>, vector<8x128xf32>,
    %cst_520 = arith.constant 0.000000e+00 : f32
    %994 = vector.broadcast %cst_520 : f32 to vector<8x128xf32>
    %c0_521 = arith.constant 0 : index
    %c0_522 = arith.constant 0 : index
    %995 = vector.load %arg22[%c0_521, %c0_522] : memref<8x128xf32, #tpu.memory_space<vmem>>, vector<8x128xf32>
    tpu.vector_store %arg22[%c0_521, %c0_522], %994 {strides = array<i32>} : memref<8x128xf32, #tpu.memory_space<vmem>>, vector<8x128xf32>,
    %c0_i32_523 = arith.constant 0 : i32
    %c7_i32_524 = arith.constant 7 : i32
    %996 = arith.subi %c7_i32_524, %c0_i32_523 : i32
    %c0_525 = arith.constant 0 : index
    %c0_526 = arith.constant 0 : index
    %997 = vector.load %arg21[%c0_525, %c0_526] : memref<8x128xf32, #tpu.memory_space<vmem>>, vector<8x128xf32>
    %c0_527 = arith.constant 0 : index
    %c0_528 = arith.constant 0 : index
    %998 = vector.load %arg22[%c0_527, %c0_528] : memref<8x128xf32, #tpu.memory_space<vmem>>, vector<8x128xf32>
    %999 = arith.index_cast %996 : i32 to index
    %c0_529 = arith.constant 0 : index
    %c0_530 = arith.constant 0 : index
    %1000 = vector.load %arg18[%999, %c0_529, %c0_530] : memref<8x8x512xf32, #tpu.memory_space<vmem>>, vector<1x8x512xf32>
    %1001 = vector.shape_cast %1000 : vector<1x8x512xf32> to vector<8x512xf32>
    %c0_531 = arith.constant 0 : index
    %c0_532 = arith.constant 0 : index
    %1002 = vector.load %arg11[%c0_531, %c0_532] : memref<128x512xf32, #tpu.memory_space<vmem>>, vector<128x512xf32>
    %cst_533 = arith.constant dense<0.000000e+00> : vector<8x512xf32>
    %1003 = tpu.matmul %997, %1002, %cst_533 {dimension_numbers = #tpu.dot_dimension_numbers<[1], [0], [0], [1], [0, 0, 1, 1], [], []>} : vector<8x128xf32>, vector<128x512xf32>, vector<8x512xf32> -> vector<8x512xf32>
    %1004 = arith.addf %1001, %1003 : vector<8x512xf32>
    %1005 = vector.extract_strided_slice %1004 {offsets = [0, 0], sizes = [8, 128], strides = [1, 1]} : vector<8x512xf32> to vector<8x128xf32>
    %1006 = arith.negf %1005 : vector<8x128xf32>
    %1007 = math.exp %1006 : vector<8x128xf32>
    %cst_534 = arith.constant 1.000000e+00 : f32
    %1008 = vector.broadcast %cst_534 : f32 to vector<8x128xf32>
    %1009 = arith.addf %1008, %1007 : vector<8x128xf32>
    %1010 = arith.divf %1008, %1009 : vector<8x128xf32>
    %1011 = vector.extract_strided_slice %1004 {offsets = [0, 128], sizes = [8, 128], strides = [1, 1]} : vector<8x512xf32> to vector<8x128xf32>
    %1012 = arith.negf %1011 : vector<8x128xf32>
    %1013 = math.exp %1012 : vector<8x128xf32>
    %cst_535 = arith.constant 1.000000e+00 : f32
    %1014 = vector.broadcast %cst_535 : f32 to vector<8x128xf32>
    %1015 = arith.addf %1014, %1013 : vector<8x128xf32>
    %1016 = arith.divf %1014, %1015 : vector<8x128xf32>
    %1017 = vector.extract_strided_slice %1004 {offsets = [0, 256], sizes = [8, 128], strides = [1, 1]} : vector<8x512xf32> to vector<8x128xf32>
    %1018 = math.tanh %1017 : vector<8x128xf32>
    %1019 = vector.extract_strided_slice %1004 {offsets = [0, 384], sizes = [8, 128], strides = [1, 1]} : vector<8x512xf32> to vector<8x128xf32>
    %1020 = arith.negf %1019 : vector<8x128xf32>
    %1021 = math.exp %1020 : vector<8x128xf32>
    %cst_536 = arith.constant 1.000000e+00 : f32
    %1022 = vector.broadcast %cst_536 : f32 to vector<8x128xf32>
    %1023 = arith.addf %1022, %1021 : vector<8x128xf32>
    %1024 = arith.divf %1022, %1023 : vector<8x128xf32>
    %1025 = arith.mulf %1016, %998 : vector<8x128xf32>
    %1026 = arith.mulf %1010, %1018 : vector<8x128xf32>
    %1027 = arith.addf %1025, %1026 : vector<8x128xf32>
    %1028 = math.tanh %1027 : vector<8x128xf32>
    %1029 = arith.mulf %1024, %1028 : vector<8x128xf32>
    %c0_537 = arith.constant 0 : index
    %c0_538 = arith.constant 0 : index
    %1030 = vector.load %arg21[%c0_537, %c0_538] : memref<8x128xf32, #tpu.memory_space<vmem>>, vector<8x128xf32>
    tpu.vector_store %arg21[%c0_537, %c0_538], %1029 {strides = array<i32>} : memref<8x128xf32, #tpu.memory_space<vmem>>, vector<8x128xf32>,
    %c0_539 = arith.constant 0 : index
    %c0_540 = arith.constant 0 : index
    %1031 = vector.load %arg22[%c0_539, %c0_540] : memref<8x128xf32, #tpu.memory_space<vmem>>, vector<8x128xf32>
    tpu.vector_store %arg22[%c0_539, %c0_540], %1027 {strides = array<i32>} : memref<8x128xf32, #tpu.memory_space<vmem>>, vector<8x128xf32>,
    %1032 = arith.index_cast %996 : i32 to index
    %c0_541 = arith.constant 0 : index
    %c128_542 = arith.constant 128 : index
    %1033 = vector.load %arg20[%1032, %c0_541, %c128_542] : memref<8x8x256xf32, #tpu.memory_space<vmem>>, vector<1x8x128xf32>
    %1034 = vector.shape_cast %1033 : vector<1x8x128xf32> to vector<8x128xf32>
    %1035 = vector.shape_cast %1029 : vector<8x128xf32> to vector<1x8x128xf32>
    tpu.vector_store %arg20[%1032, %c0_541, %c128_542], %1035 {strides = array<i32>} : memref<8x8x256xf32, #tpu.memory_space<vmem>>, vector<1x8x128xf32>,
    %c1_i32_543 = arith.constant 1 : i32
    %c7_i32_544 = arith.constant 7 : i32
    %1036 = arith.subi %c7_i32_544, %c1_i32_543 : i32
    %c0_545 = arith.constant 0 : index
    %c0_546 = arith.constant 0 : index
    %1037 = vector.load %arg21[%c0_545, %c0_546] : memref<8x128xf32, #tpu.memory_space<vmem>>, vector<8x128xf32>
    %c0_547 = arith.constant 0 : index
    %c0_548 = arith.constant 0 : index
    %1038 = vector.load %arg22[%c0_547, %c0_548] : memref<8x128xf32, #tpu.memory_space<vmem>>, vector<8x128xf32>
    %1039 = arith.index_cast %1036 : i32 to index
    %c0_549 = arith.constant 0 : index
    %c0_550 = arith.constant 0 : index
    %1040 = vector.load %arg18[%1039, %c0_549, %c0_550] : memref<8x8x512xf32, #tpu.memory_space<vmem>>, vector<1x8x512xf32>
    %1041 = vector.shape_cast %1040 : vector<1x8x512xf32> to vector<8x512xf32>
    %c0_551 = arith.constant 0 : index
    %c0_552 = arith.constant 0 : index
    %1042 = vector.load %arg11[%c0_551, %c0_552] : memref<128x512xf32, #tpu.memory_space<vmem>>, vector<128x512xf32>
    %cst_553 = arith.constant dense<0.000000e+00> : vector<8x512xf32>
    %1043 = tpu.matmul %1037, %1042, %cst_553 {dimension_numbers = #tpu.dot_dimension_numbers<[1], [0], [0], [1], [0, 0, 1, 1], [], []>} : vector<8x128xf32>, vector<128x512xf32>, vector<8x512xf32> -> vector<8x512xf32>
    %1044 = arith.addf %1041, %1043 : vector<8x512xf32>
    %1045 = vector.extract_strided_slice %1044 {offsets = [0, 0], sizes = [8, 128], strides = [1, 1]} : vector<8x512xf32> to vector<8x128xf32>
    %1046 = arith.negf %1045 : vector<8x128xf32>
    %1047 = math.exp %1046 : vector<8x128xf32>
    %cst_554 = arith.constant 1.000000e+00 : f32
    %1048 = vector.broadcast %cst_554 : f32 to vector<8x128xf32>
    %1049 = arith.addf %1048, %1047 : vector<8x128xf32>
    %1050 = arith.divf %1048, %1049 : vector<8x128xf32>
    %1051 = vector.extract_strided_slice %1044 {offsets = [0, 128], sizes = [8, 128], strides = [1, 1]} : vector<8x512xf32> to vector<8x128xf32>
    %1052 = arith.negf %1051 : vector<8x128xf32>
    %1053 = math.exp %1052 : vector<8x128xf32>
    %cst_555 = arith.constant 1.000000e+00 : f32
    %1054 = vector.broadcast %cst_555 : f32 to vector<8x128xf32>
    %1055 = arith.addf %1054, %1053 : vector<8x128xf32>
    %1056 = arith.divf %1054, %1055 : vector<8x128xf32>
    %1057 = vector.extract_strided_slice %1044 {offsets = [0, 256], sizes = [8, 128], strides = [1, 1]} : vector<8x512xf32> to vector<8x128xf32>
    %1058 = math.tanh %1057 : vector<8x128xf32>
    %1059 = vector.extract_strided_slice %1044 {offsets = [0, 384], sizes = [8, 128], strides = [1, 1]} : vector<8x512xf32> to vector<8x128xf32>
    %1060 = arith.negf %1059 : vector<8x128xf32>
    %1061 = math.exp %1060 : vector<8x128xf32>
    %cst_556 = arith.constant 1.000000e+00 : f32
    %1062 = vector.broadcast %cst_556 : f32 to vector<8x128xf32>
    %1063 = arith.addf %1062, %1061 : vector<8x128xf32>
    %1064 = arith.divf %1062, %1063 : vector<8x128xf32>
    %1065 = arith.mulf %1056, %1038 : vector<8x128xf32>
    %1066 = arith.mulf %1050, %1058 : vector<8x128xf32>
    %1067 = arith.addf %1065, %1066 : vector<8x128xf32>
    %1068 = math.tanh %1067 : vector<8x128xf32>
    %1069 = arith.mulf %1064, %1068 : vector<8x128xf32>
    %c0_557 = arith.constant 0 : index
    %c0_558 = arith.constant 0 : index
    %1070 = vector.load %arg21[%c0_557, %c0_558] : memref<8x128xf32, #tpu.memory_space<vmem>>, vector<8x128xf32>
    tpu.vector_store %arg21[%c0_557, %c0_558], %1069 {strides = array<i32>} : memref<8x128xf32, #tpu.memory_space<vmem>>, vector<8x128xf32>,
    %c0_559 = arith.constant 0 : index
    %c0_560 = arith.constant 0 : index
    %1071 = vector.load %arg22[%c0_559, %c0_560] : memref<8x128xf32, #tpu.memory_space<vmem>>, vector<8x128xf32>
    tpu.vector_store %arg22[%c0_559, %c0_560], %1067 {strides = array<i32>} : memref<8x128xf32, #tpu.memory_space<vmem>>, vector<8x128xf32>,
    %1072 = arith.index_cast %1036 : i32 to index
    %c0_561 = arith.constant 0 : index
    %c128_562 = arith.constant 128 : index
    %1073 = vector.load %arg20[%1072, %c0_561, %c128_562] : memref<8x8x256xf32, #tpu.memory_space<vmem>>, vector<1x8x128xf32>
    %1074 = vector.shape_cast %1073 : vector<1x8x128xf32> to vector<8x128xf32>
    %1075 = vector.shape_cast %1069 : vector<8x128xf32> to vector<1x8x128xf32>
    tpu.vector_store %arg20[%1072, %c0_561, %c128_562], %1075 {strides = array<i32>} : memref<8x8x256xf32, #tpu.memory_space<vmem>>, vector<1x8x128xf32>,
    %c2_i32_563 = arith.constant 2 : i32
    %c7_i32_564 = arith.constant 7 : i32
    %1076 = arith.subi %c7_i32_564, %c2_i32_563 : i32
    %c0_565 = arith.constant 0 : index
    %c0_566 = arith.constant 0 : index
    %1077 = vector.load %arg21[%c0_565, %c0_566] : memref<8x128xf32, #tpu.memory_space<vmem>>, vector<8x128xf32>
    %c0_567 = arith.constant 0 : index
    %c0_568 = arith.constant 0 : index
    %1078 = vector.load %arg22[%c0_567, %c0_568] : memref<8x128xf32, #tpu.memory_space<vmem>>, vector<8x128xf32>
    %1079 = arith.index_cast %1076 : i32 to index
    %c0_569 = arith.constant 0 : index
    %c0_570 = arith.constant 0 : index
    %1080 = vector.load %arg18[%1079, %c0_569, %c0_570] : memref<8x8x512xf32, #tpu.memory_space<vmem>>, vector<1x8x512xf32>
    %1081 = vector.shape_cast %1080 : vector<1x8x512xf32> to vector<8x512xf32>
    %c0_571 = arith.constant 0 : index
    %c0_572 = arith.constant 0 : index
    %1082 = vector.load %arg11[%c0_571, %c0_572] : memref<128x512xf32, #tpu.memory_space<vmem>>, vector<128x512xf32>
    %cst_573 = arith.constant dense<0.000000e+00> : vector<8x512xf32>
    %1083 = tpu.matmul %1077, %1082, %cst_573 {dimension_numbers = #tpu.dot_dimension_numbers<[1], [0], [0], [1], [0, 0, 1, 1], [], []>} : vector<8x128xf32>, vector<128x512xf32>, vector<8x512xf32> -> vector<8x512xf32>
    %1084 = arith.addf %1081, %1083 : vector<8x512xf32>
    %1085 = vector.extract_strided_slice %1084 {offsets = [0, 0], sizes = [8, 128], strides = [1, 1]} : vector<8x512xf32> to vector<8x128xf32>
    %1086 = arith.negf %1085 : vector<8x128xf32>
    %1087 = math.exp %1086 : vector<8x128xf32>
    %cst_574 = arith.constant 1.000000e+00 : f32
    %1088 = vector.broadcast %cst_574 : f32 to vector<8x128xf32>
    %1089 = arith.addf %1088, %1087 : vector<8x128xf32>
    %1090 = arith.divf %1088, %1089 : vector<8x128xf32>
    %1091 = vector.extract_strided_slice %1084 {offsets = [0, 128], sizes = [8, 128], strides = [1, 1]} : vector<8x512xf32> to vector<8x128xf32>
    %1092 = arith.negf %1091 : vector<8x128xf32>
    %1093 = math.exp %1092 : vector<8x128xf32>
    %cst_575 = arith.constant 1.000000e+00 : f32
    %1094 = vector.broadcast %cst_575 : f32 to vector<8x128xf32>
    %1095 = arith.addf %1094, %1093 : vector<8x128xf32>
    %1096 = arith.divf %1094, %1095 : vector<8x128xf32>
    %1097 = vector.extract_strided_slice %1084 {offsets = [0, 256], sizes = [8, 128], strides = [1, 1]} : vector<8x512xf32> to vector<8x128xf32>
    %1098 = math.tanh %1097 : vector<8x128xf32>
    %1099 = vector.extract_strided_slice %1084 {offsets = [0, 384], sizes = [8, 128], strides = [1, 1]} : vector<8x512xf32> to vector<8x128xf32>
    %1100 = arith.negf %1099 : vector<8x128xf32>
    %1101 = math.exp %1100 : vector<8x128xf32>
    %cst_576 = arith.constant 1.000000e+00 : f32
    %1102 = vector.broadcast %cst_576 : f32 to vector<8x128xf32>
    %1103 = arith.addf %1102, %1101 : vector<8x128xf32>
    %1104 = arith.divf %1102, %1103 : vector<8x128xf32>
    %1105 = arith.mulf %1096, %1078 : vector<8x128xf32>
    %1106 = arith.mulf %1090, %1098 : vector<8x128xf32>
    %1107 = arith.addf %1105, %1106 : vector<8x128xf32>
    %1108 = math.tanh %1107 : vector<8x128xf32>
    %1109 = arith.mulf %1104, %1108 : vector<8x128xf32>
    %c0_577 = arith.constant 0 : index
    %c0_578 = arith.constant 0 : index
    %1110 = vector.load %arg21[%c0_577, %c0_578] : memref<8x128xf32, #tpu.memory_space<vmem>>, vector<8x128xf32>
    tpu.vector_store %arg21[%c0_577, %c0_578], %1109 {strides = array<i32>} : memref<8x128xf32, #tpu.memory_space<vmem>>, vector<8x128xf32>,
    %c0_579 = arith.constant 0 : index
    %c0_580 = arith.constant 0 : index
    %1111 = vector.load %arg22[%c0_579, %c0_580] : memref<8x128xf32, #tpu.memory_space<vmem>>, vector<8x128xf32>
    tpu.vector_store %arg22[%c0_579, %c0_580], %1107 {strides = array<i32>} : memref<8x128xf32, #tpu.memory_space<vmem>>, vector<8x128xf32>,
    %1112 = arith.index_cast %1076 : i32 to index
    %c0_581 = arith.constant 0 : index
    %c128_582 = arith.constant 128 : index
    %1113 = vector.load %arg20[%1112, %c0_581, %c128_582] : memref<8x8x256xf32, #tpu.memory_space<vmem>>, vector<1x8x128xf32>
    %1114 = vector.shape_cast %1113 : vector<1x8x128xf32> to vector<8x128xf32>
    %1115 = vector.shape_cast %1109 : vector<8x128xf32> to vector<1x8x128xf32>
    tpu.vector_store %arg20[%1112, %c0_581, %c128_582], %1115 {strides = array<i32>} : memref<8x8x256xf32, #tpu.memory_space<vmem>>, vector<1x8x128xf32>,
    %c3_i32_583 = arith.constant 3 : i32
    %c7_i32_584 = arith.constant 7 : i32
    %1116 = arith.subi %c7_i32_584, %c3_i32_583 : i32
    %c0_585 = arith.constant 0 : index
    %c0_586 = arith.constant 0 : index
    %1117 = vector.load %arg21[%c0_585, %c0_586] : memref<8x128xf32, #tpu.memory_space<vmem>>, vector<8x128xf32>
    %c0_587 = arith.constant 0 : index
    %c0_588 = arith.constant 0 : index
    %1118 = vector.load %arg22[%c0_587, %c0_588] : memref<8x128xf32, #tpu.memory_space<vmem>>, vector<8x128xf32>
    %1119 = arith.index_cast %1116 : i32 to index
    %c0_589 = arith.constant 0 : index
    %c0_590 = arith.constant 0 : index
    %1120 = vector.load %arg18[%1119, %c0_589, %c0_590] : memref<8x8x512xf32, #tpu.memory_space<vmem>>, vector<1x8x512xf32>
    %1121 = vector.shape_cast %1120 : vector<1x8x512xf32> to vector<8x512xf32>
    %c0_591 = arith.constant 0 : index
    %c0_592 = arith.constant 0 : index
    %1122 = vector.load %arg11[%c0_591, %c0_592] : memref<128x512xf32, #tpu.memory_space<vmem>>, vector<128x512xf32>
    %cst_593 = arith.constant dense<0.000000e+00> : vector<8x512xf32>
    %1123 = tpu.matmul %1117, %1122, %cst_593 {dimension_numbers = #tpu.dot_dimension_numbers<[1], [0], [0], [1], [0, 0, 1, 1], [], []>} : vector<8x128xf32>, vector<128x512xf32>, vector<8x512xf32> -> vector<8x512xf32>
    %1124 = arith.addf %1121, %1123 : vector<8x512xf32>
    %1125 = vector.extract_strided_slice %1124 {offsets = [0, 0], sizes = [8, 128], strides = [1, 1]} : vector<8x512xf32> to vector<8x128xf32>
    %1126 = arith.negf %1125 : vector<8x128xf32>
    %1127 = math.exp %1126 : vector<8x128xf32>
    %cst_594 = arith.constant 1.000000e+00 : f32
    %1128 = vector.broadcast %cst_594 : f32 to vector<8x128xf32>
    %1129 = arith.addf %1128, %1127 : vector<8x128xf32>
    %1130 = arith.divf %1128, %1129 : vector<8x128xf32>
    %1131 = vector.extract_strided_slice %1124 {offsets = [0, 128], sizes = [8, 128], strides = [1, 1]} : vector<8x512xf32> to vector<8x128xf32>
    %1132 = arith.negf %1131 : vector<8x128xf32>
    %1133 = math.exp %1132 : vector<8x128xf32>
    %cst_595 = arith.constant 1.000000e+00 : f32
    %1134 = vector.broadcast %cst_595 : f32 to vector<8x128xf32>
    %1135 = arith.addf %1134, %1133 : vector<8x128xf32>
    %1136 = arith.divf %1134, %1135 : vector<8x128xf32>
    %1137 = vector.extract_strided_slice %1124 {offsets = [0, 256], sizes = [8, 128], strides = [1, 1]} : vector<8x512xf32> to vector<8x128xf32>
    %1138 = math.tanh %1137 : vector<8x128xf32>
    %1139 = vector.extract_strided_slice %1124 {offsets = [0, 384], sizes = [8, 128], strides = [1, 1]} : vector<8x512xf32> to vector<8x128xf32>
    %1140 = arith.negf %1139 : vector<8x128xf32>
    %1141 = math.exp %1140 : vector<8x128xf32>
    %cst_596 = arith.constant 1.000000e+00 : f32
    %1142 = vector.broadcast %cst_596 : f32 to vector<8x128xf32>
    %1143 = arith.addf %1142, %1141 : vector<8x128xf32>
    %1144 = arith.divf %1142, %1143 : vector<8x128xf32>
    %1145 = arith.mulf %1136, %1118 : vector<8x128xf32>
    %1146 = arith.mulf %1130, %1138 : vector<8x128xf32>
    %1147 = arith.addf %1145, %1146 : vector<8x128xf32>
    %1148 = math.tanh %1147 : vector<8x128xf32>
    %1149 = arith.mulf %1144, %1148 : vector<8x128xf32>
    %c0_597 = arith.constant 0 : index
    %c0_598 = arith.constant 0 : index
    %1150 = vector.load %arg21[%c0_597, %c0_598] : memref<8x128xf32, #tpu.memory_space<vmem>>, vector<8x128xf32>
    tpu.vector_store %arg21[%c0_597, %c0_598], %1149 {strides = array<i32>} : memref<8x128xf32, #tpu.memory_space<vmem>>, vector<8x128xf32>,
    %c0_599 = arith.constant 0 : index
    %c0_600 = arith.constant 0 : index
    %1151 = vector.load %arg22[%c0_599, %c0_600] : memref<8x128xf32, #tpu.memory_space<vmem>>, vector<8x128xf32>
    tpu.vector_store %arg22[%c0_599, %c0_600], %1147 {strides = array<i32>} : memref<8x128xf32, #tpu.memory_space<vmem>>, vector<8x128xf32>,
    %1152 = arith.index_cast %1116 : i32 to index
    %c0_601 = arith.constant 0 : index
    %c128_602 = arith.constant 128 : index
    %1153 = vector.load %arg20[%1152, %c0_601, %c128_602] : memref<8x8x256xf32, #tpu.memory_space<vmem>>, vector<1x8x128xf32>
    %1154 = vector.shape_cast %1153 : vector<1x8x128xf32> to vector<8x128xf32>
    %1155 = vector.shape_cast %1149 : vector<8x128xf32> to vector<1x8x128xf32>
    tpu.vector_store %arg20[%1152, %c0_601, %c128_602], %1155 {strides = array<i32>} : memref<8x8x256xf32, #tpu.memory_space<vmem>>, vector<1x8x128xf32>,
    %c4_i32_603 = arith.constant 4 : i32
    %c7_i32_604 = arith.constant 7 : i32
    %1156 = arith.subi %c7_i32_604, %c4_i32_603 : i32
    %c0_605 = arith.constant 0 : index
    %c0_606 = arith.constant 0 : index
    %1157 = vector.load %arg21[%c0_605, %c0_606] : memref<8x128xf32, #tpu.memory_space<vmem>>, vector<8x128xf32>
    %c0_607 = arith.constant 0 : index
    %c0_608 = arith.constant 0 : index
    %1158 = vector.load %arg22[%c0_607, %c0_608] : memref<8x128xf32, #tpu.memory_space<vmem>>, vector<8x128xf32>
    %1159 = arith.index_cast %1156 : i32 to index
    %c0_609 = arith.constant 0 : index
    %c0_610 = arith.constant 0 : index
    %1160 = vector.load %arg18[%1159, %c0_609, %c0_610] : memref<8x8x512xf32, #tpu.memory_space<vmem>>, vector<1x8x512xf32>
    %1161 = vector.shape_cast %1160 : vector<1x8x512xf32> to vector<8x512xf32>
    %c0_611 = arith.constant 0 : index
    %c0_612 = arith.constant 0 : index
    %1162 = vector.load %arg11[%c0_611, %c0_612] : memref<128x512xf32, #tpu.memory_space<vmem>>, vector<128x512xf32>
    %cst_613 = arith.constant dense<0.000000e+00> : vector<8x512xf32>
    %1163 = tpu.matmul %1157, %1162, %cst_613 {dimension_numbers = #tpu.dot_dimension_numbers<[1], [0], [0], [1], [0, 0, 1, 1], [], []>} : vector<8x128xf32>, vector<128x512xf32>, vector<8x512xf32> -> vector<8x512xf32>
    %1164 = arith.addf %1161, %1163 : vector<8x512xf32>
    %1165 = vector.extract_strided_slice %1164 {offsets = [0, 0], sizes = [8, 128], strides = [1, 1]} : vector<8x512xf32> to vector<8x128xf32>
    %1166 = arith.negf %1165 : vector<8x128xf32>
    %1167 = math.exp %1166 : vector<8x128xf32>
    %cst_614 = arith.constant 1.000000e+00 : f32
    %1168 = vector.broadcast %cst_614 : f32 to vector<8x128xf32>
    %1169 = arith.addf %1168, %1167 : vector<8x128xf32>
    %1170 = arith.divf %1168, %1169 : vector<8x128xf32>
    %1171 = vector.extract_strided_slice %1164 {offsets = [0, 128], sizes = [8, 128], strides = [1, 1]} : vector<8x512xf32> to vector<8x128xf32>
    %1172 = arith.negf %1171 : vector<8x128xf32>
    %1173 = math.exp %1172 : vector<8x128xf32>
    %cst_615 = arith.constant 1.000000e+00 : f32
    %1174 = vector.broadcast %cst_615 : f32 to vector<8x128xf32>
    %1175 = arith.addf %1174, %1173 : vector<8x128xf32>
    %1176 = arith.divf %1174, %1175 : vector<8x128xf32>
    %1177 = vector.extract_strided_slice %1164 {offsets = [0, 256], sizes = [8, 128], strides = [1, 1]} : vector<8x512xf32> to vector<8x128xf32>
    %1178 = math.tanh %1177 : vector<8x128xf32>
    %1179 = vector.extract_strided_slice %1164 {offsets = [0, 384], sizes = [8, 128], strides = [1, 1]} : vector<8x512xf32> to vector<8x128xf32>
    %1180 = arith.negf %1179 : vector<8x128xf32>
    %1181 = math.exp %1180 : vector<8x128xf32>
    %cst_616 = arith.constant 1.000000e+00 : f32
    %1182 = vector.broadcast %cst_616 : f32 to vector<8x128xf32>
    %1183 = arith.addf %1182, %1181 : vector<8x128xf32>
    %1184 = arith.divf %1182, %1183 : vector<8x128xf32>
    %1185 = arith.mulf %1176, %1158 : vector<8x128xf32>
    %1186 = arith.mulf %1170, %1178 : vector<8x128xf32>
    %1187 = arith.addf %1185, %1186 : vector<8x128xf32>
    %1188 = math.tanh %1187 : vector<8x128xf32>
    %1189 = arith.mulf %1184, %1188 : vector<8x128xf32>
    %c0_617 = arith.constant 0 : index
    %c0_618 = arith.constant 0 : index
    %1190 = vector.load %arg21[%c0_617, %c0_618] : memref<8x128xf32, #tpu.memory_space<vmem>>, vector<8x128xf32>
    tpu.vector_store %arg21[%c0_617, %c0_618], %1189 {strides = array<i32>} : memref<8x128xf32, #tpu.memory_space<vmem>>, vector<8x128xf32>,
    %c0_619 = arith.constant 0 : index
    %c0_620 = arith.constant 0 : index
    %1191 = vector.load %arg22[%c0_619, %c0_620] : memref<8x128xf32, #tpu.memory_space<vmem>>, vector<8x128xf32>
    tpu.vector_store %arg22[%c0_619, %c0_620], %1187 {strides = array<i32>} : memref<8x128xf32, #tpu.memory_space<vmem>>, vector<8x128xf32>,
    %1192 = arith.index_cast %1156 : i32 to index
    %c0_621 = arith.constant 0 : index
    %c128_622 = arith.constant 128 : index
    %1193 = vector.load %arg20[%1192, %c0_621, %c128_622] : memref<8x8x256xf32, #tpu.memory_space<vmem>>, vector<1x8x128xf32>
    %1194 = vector.shape_cast %1193 : vector<1x8x128xf32> to vector<8x128xf32>
    %1195 = vector.shape_cast %1189 : vector<8x128xf32> to vector<1x8x128xf32>
    tpu.vector_store %arg20[%1192, %c0_621, %c128_622], %1195 {strides = array<i32>} : memref<8x8x256xf32, #tpu.memory_space<vmem>>, vector<1x8x128xf32>,
    %c5_i32_623 = arith.constant 5 : i32
    %c7_i32_624 = arith.constant 7 : i32
    %1196 = arith.subi %c7_i32_624, %c5_i32_623 : i32
    %c0_625 = arith.constant 0 : index
    %c0_626 = arith.constant 0 : index
    %1197 = vector.load %arg21[%c0_625, %c0_626] : memref<8x128xf32, #tpu.memory_space<vmem>>, vector<8x128xf32>
    %c0_627 = arith.constant 0 : index
    %c0_628 = arith.constant 0 : index
    %1198 = vector.load %arg22[%c0_627, %c0_628] : memref<8x128xf32, #tpu.memory_space<vmem>>, vector<8x128xf32>
    %1199 = arith.index_cast %1196 : i32 to index
    %c0_629 = arith.constant 0 : index
    %c0_630 = arith.constant 0 : index
    %1200 = vector.load %arg18[%1199, %c0_629, %c0_630] : memref<8x8x512xf32, #tpu.memory_space<vmem>>, vector<1x8x512xf32>
    %1201 = vector.shape_cast %1200 : vector<1x8x512xf32> to vector<8x512xf32>
    %c0_631 = arith.constant 0 : index
    %c0_632 = arith.constant 0 : index
    %1202 = vector.load %arg11[%c0_631, %c0_632] : memref<128x512xf32, #tpu.memory_space<vmem>>, vector<128x512xf32>
    %cst_633 = arith.constant dense<0.000000e+00> : vector<8x512xf32>
    %1203 = tpu.matmul %1197, %1202, %cst_633 {dimension_numbers = #tpu.dot_dimension_numbers<[1], [0], [0], [1], [0, 0, 1, 1], [], []>} : vector<8x128xf32>, vector<128x512xf32>, vector<8x512xf32> -> vector<8x512xf32>
    %1204 = arith.addf %1201, %1203 : vector<8x512xf32>
    %1205 = vector.extract_strided_slice %1204 {offsets = [0, 0], sizes = [8, 128], strides = [1, 1]} : vector<8x512xf32> to vector<8x128xf32>
    %1206 = arith.negf %1205 : vector<8x128xf32>
    %1207 = math.exp %1206 : vector<8x128xf32>
    %cst_634 = arith.constant 1.000000e+00 : f32
    %1208 = vector.broadcast %cst_634 : f32 to vector<8x128xf32>
    %1209 = arith.addf %1208, %1207 : vector<8x128xf32>
    %1210 = arith.divf %1208, %1209 : vector<8x128xf32>
    %1211 = vector.extract_strided_slice %1204 {offsets = [0, 128], sizes = [8, 128], strides = [1, 1]} : vector<8x512xf32> to vector<8x128xf32>
    %1212 = arith.negf %1211 : vector<8x128xf32>
    %1213 = math.exp %1212 : vector<8x128xf32>
    %cst_635 = arith.constant 1.000000e+00 : f32
    %1214 = vector.broadcast %cst_635 : f32 to vector<8x128xf32>
    %1215 = arith.addf %1214, %1213 : vector<8x128xf32>
    %1216 = arith.divf %1214, %1215 : vector<8x128xf32>
    %1217 = vector.extract_strided_slice %1204 {offsets = [0, 256], sizes = [8, 128], strides = [1, 1]} : vector<8x512xf32> to vector<8x128xf32>
    %1218 = math.tanh %1217 : vector<8x128xf32>
    %1219 = vector.extract_strided_slice %1204 {offsets = [0, 384], sizes = [8, 128], strides = [1, 1]} : vector<8x512xf32> to vector<8x128xf32>
    %1220 = arith.negf %1219 : vector<8x128xf32>
    %1221 = math.exp %1220 : vector<8x128xf32>
    %cst_636 = arith.constant 1.000000e+00 : f32
    %1222 = vector.broadcast %cst_636 : f32 to vector<8x128xf32>
    %1223 = arith.addf %1222, %1221 : vector<8x128xf32>
    %1224 = arith.divf %1222, %1223 : vector<8x128xf32>
    %1225 = arith.mulf %1216, %1198 : vector<8x128xf32>
    %1226 = arith.mulf %1210, %1218 : vector<8x128xf32>
    %1227 = arith.addf %1225, %1226 : vector<8x128xf32>
    %1228 = math.tanh %1227 : vector<8x128xf32>
    %1229 = arith.mulf %1224, %1228 : vector<8x128xf32>
    %c0_637 = arith.constant 0 : index
    %c0_638 = arith.constant 0 : index
    %1230 = vector.load %arg21[%c0_637, %c0_638] : memref<8x128xf32, #tpu.memory_space<vmem>>, vector<8x128xf32>
    tpu.vector_store %arg21[%c0_637, %c0_638], %1229 {strides = array<i32>} : memref<8x128xf32, #tpu.memory_space<vmem>>, vector<8x128xf32>,
    %c0_639 = arith.constant 0 : index
    %c0_640 = arith.constant 0 : index
    %1231 = vector.load %arg22[%c0_639, %c0_640] : memref<8x128xf32, #tpu.memory_space<vmem>>, vector<8x128xf32>
    tpu.vector_store %arg22[%c0_639, %c0_640], %1227 {strides = array<i32>} : memref<8x128xf32, #tpu.memory_space<vmem>>, vector<8x128xf32>,
    %1232 = arith.index_cast %1196 : i32 to index
    %c0_641 = arith.constant 0 : index
    %c128_642 = arith.constant 128 : index
    %1233 = vector.load %arg20[%1232, %c0_641, %c128_642] : memref<8x8x256xf32, #tpu.memory_space<vmem>>, vector<1x8x128xf32>
    %1234 = vector.shape_cast %1233 : vector<1x8x128xf32> to vector<8x128xf32>
    %1235 = vector.shape_cast %1229 : vector<8x128xf32> to vector<1x8x128xf32>
    tpu.vector_store %arg20[%1232, %c0_641, %c128_642], %1235 {strides = array<i32>} : memref<8x8x256xf32, #tpu.memory_space<vmem>>, vector<1x8x128xf32>,
    %c6_i32_643 = arith.constant 6 : i32
    %c7_i32_644 = arith.constant 7 : i32
    %1236 = arith.subi %c7_i32_644, %c6_i32_643 : i32
    %c0_645 = arith.constant 0 : index
    %c0_646 = arith.constant 0 : index
    %1237 = vector.load %arg21[%c0_645, %c0_646] : memref<8x128xf32, #tpu.memory_space<vmem>>, vector<8x128xf32>
    %c0_647 = arith.constant 0 : index
    %c0_648 = arith.constant 0 : index
    %1238 = vector.load %arg22[%c0_647, %c0_648] : memref<8x128xf32, #tpu.memory_space<vmem>>, vector<8x128xf32>
    %1239 = arith.index_cast %1236 : i32 to index
    %c0_649 = arith.constant 0 : index
    %c0_650 = arith.constant 0 : index
    %1240 = vector.load %arg18[%1239, %c0_649, %c0_650] : memref<8x8x512xf32, #tpu.memory_space<vmem>>, vector<1x8x512xf32>
    %1241 = vector.shape_cast %1240 : vector<1x8x512xf32> to vector<8x512xf32>
    %c0_651 = arith.constant 0 : index
    %c0_652 = arith.constant 0 : index
    %1242 = vector.load %arg11[%c0_651, %c0_652] : memref<128x512xf32, #tpu.memory_space<vmem>>, vector<128x512xf32>
    %cst_653 = arith.constant dense<0.000000e+00> : vector<8x512xf32>
    %1243 = tpu.matmul %1237, %1242, %cst_653 {dimension_numbers = #tpu.dot_dimension_numbers<[1], [0], [0], [1], [0, 0, 1, 1], [], []>} : vector<8x128xf32>, vector<128x512xf32>, vector<8x512xf32> -> vector<8x512xf32>
    %1244 = arith.addf %1241, %1243 : vector<8x512xf32>
    %1245 = vector.extract_strided_slice %1244 {offsets = [0, 0], sizes = [8, 128], strides = [1, 1]} : vector<8x512xf32> to vector<8x128xf32>
    %1246 = arith.negf %1245 : vector<8x128xf32>
    %1247 = math.exp %1246 : vector<8x128xf32>
    %cst_654 = arith.constant 1.000000e+00 : f32
    %1248 = vector.broadcast %cst_654 : f32 to vector<8x128xf32>
    %1249 = arith.addf %1248, %1247 : vector<8x128xf32>
    %1250 = arith.divf %1248, %1249 : vector<8x128xf32>
    %1251 = vector.extract_strided_slice %1244 {offsets = [0, 128], sizes = [8, 128], strides = [1, 1]} : vector<8x512xf32> to vector<8x128xf32>
    %1252 = arith.negf %1251 : vector<8x128xf32>
    %1253 = math.exp %1252 : vector<8x128xf32>
    %cst_655 = arith.constant 1.000000e+00 : f32
    %1254 = vector.broadcast %cst_655 : f32 to vector<8x128xf32>
    %1255 = arith.addf %1254, %1253 : vector<8x128xf32>
    %1256 = arith.divf %1254, %1255 : vector<8x128xf32>
    %1257 = vector.extract_strided_slice %1244 {offsets = [0, 256], sizes = [8, 128], strides = [1, 1]} : vector<8x512xf32> to vector<8x128xf32>
    %1258 = math.tanh %1257 : vector<8x128xf32>
    %1259 = vector.extract_strided_slice %1244 {offsets = [0, 384], sizes = [8, 128], strides = [1, 1]} : vector<8x512xf32> to vector<8x128xf32>
    %1260 = arith.negf %1259 : vector<8x128xf32>
    %1261 = math.exp %1260 : vector<8x128xf32>
    %cst_656 = arith.constant 1.000000e+00 : f32
    %1262 = vector.broadcast %cst_656 : f32 to vector<8x128xf32>
    %1263 = arith.addf %1262, %1261 : vector<8x128xf32>
    %1264 = arith.divf %1262, %1263 : vector<8x128xf32>
    %1265 = arith.mulf %1256, %1238 : vector<8x128xf32>
    %1266 = arith.mulf %1250, %1258 : vector<8x128xf32>
    %1267 = arith.addf %1265, %1266 : vector<8x128xf32>
    %1268 = math.tanh %1267 : vector<8x128xf32>
    %1269 = arith.mulf %1264, %1268 : vector<8x128xf32>
    %c0_657 = arith.constant 0 : index
    %c0_658 = arith.constant 0 : index
    %1270 = vector.load %arg21[%c0_657, %c0_658] : memref<8x128xf32, #tpu.memory_space<vmem>>, vector<8x128xf32>
    tpu.vector_store %arg21[%c0_657, %c0_658], %1269 {strides = array<i32>} : memref<8x128xf32, #tpu.memory_space<vmem>>, vector<8x128xf32>,
    %c0_659 = arith.constant 0 : index
    %c0_660 = arith.constant 0 : index
    %1271 = vector.load %arg22[%c0_659, %c0_660] : memref<8x128xf32, #tpu.memory_space<vmem>>, vector<8x128xf32>
    tpu.vector_store %arg22[%c0_659, %c0_660], %1267 {strides = array<i32>} : memref<8x128xf32, #tpu.memory_space<vmem>>, vector<8x128xf32>,
    %1272 = arith.index_cast %1236 : i32 to index
    %c0_661 = arith.constant 0 : index
    %c128_662 = arith.constant 128 : index
    %1273 = vector.load %arg20[%1272, %c0_661, %c128_662] : memref<8x8x256xf32, #tpu.memory_space<vmem>>, vector<1x8x128xf32>
    %1274 = vector.shape_cast %1273 : vector<1x8x128xf32> to vector<8x128xf32>
    %1275 = vector.shape_cast %1269 : vector<8x128xf32> to vector<1x8x128xf32>
    tpu.vector_store %arg20[%1272, %c0_661, %c128_662], %1275 {strides = array<i32>} : memref<8x8x256xf32, #tpu.memory_space<vmem>>, vector<1x8x128xf32>,
    %c7_i32_663 = arith.constant 7 : i32
    %c7_i32_664 = arith.constant 7 : i32
    %1276 = arith.subi %c7_i32_664, %c7_i32_663 : i32
    %c0_665 = arith.constant 0 : index
    %c0_666 = arith.constant 0 : index
    %1277 = vector.load %arg21[%c0_665, %c0_666] : memref<8x128xf32, #tpu.memory_space<vmem>>, vector<8x128xf32>
    %c0_667 = arith.constant 0 : index
    %c0_668 = arith.constant 0 : index
    %1278 = vector.load %arg22[%c0_667, %c0_668] : memref<8x128xf32, #tpu.memory_space<vmem>>, vector<8x128xf32>
    %1279 = arith.index_cast %1276 : i32 to index
    %c0_669 = arith.constant 0 : index
    %c0_670 = arith.constant 0 : index
    %1280 = vector.load %arg18[%1279, %c0_669, %c0_670] : memref<8x8x512xf32, #tpu.memory_space<vmem>>, vector<1x8x512xf32>
    %1281 = vector.shape_cast %1280 : vector<1x8x512xf32> to vector<8x512xf32>
    %c0_671 = arith.constant 0 : index
    %c0_672 = arith.constant 0 : index
    %1282 = vector.load %arg11[%c0_671, %c0_672] : memref<128x512xf32, #tpu.memory_space<vmem>>, vector<128x512xf32>
    %cst_673 = arith.constant dense<0.000000e+00> : vector<8x512xf32>
    %1283 = tpu.matmul %1277, %1282, %cst_673 {dimension_numbers = #tpu.dot_dimension_numbers<[1], [0], [0], [1], [0, 0, 1, 1], [], []>} : vector<8x128xf32>, vector<128x512xf32>, vector<8x512xf32> -> vector<8x512xf32>
    %1284 = arith.addf %1281, %1283 : vector<8x512xf32>
    %1285 = vector.extract_strided_slice %1284 {offsets = [0, 0], sizes = [8, 128], strides = [1, 1]} : vector<8x512xf32> to vector<8x128xf32>
    %1286 = arith.negf %1285 : vector<8x128xf32>
    %1287 = math.exp %1286 : vector<8x128xf32>
    %cst_674 = arith.constant 1.000000e+00 : f32
    %1288 = vector.broadcast %cst_674 : f32 to vector<8x128xf32>
    %1289 = arith.addf %1288, %1287 : vector<8x128xf32>
    %1290 = arith.divf %1288, %1289 : vector<8x128xf32>
    %1291 = vector.extract_strided_slice %1284 {offsets = [0, 128], sizes = [8, 128], strides = [1, 1]} : vector<8x512xf32> to vector<8x128xf32>
    %1292 = arith.negf %1291 : vector<8x128xf32>
    %1293 = math.exp %1292 : vector<8x128xf32>
    %cst_675 = arith.constant 1.000000e+00 : f32
    %1294 = vector.broadcast %cst_675 : f32 to vector<8x128xf32>
    %1295 = arith.addf %1294, %1293 : vector<8x128xf32>
    %1296 = arith.divf %1294, %1295 : vector<8x128xf32>
    %1297 = vector.extract_strided_slice %1284 {offsets = [0, 256], sizes = [8, 128], strides = [1, 1]} : vector<8x512xf32> to vector<8x128xf32>
    %1298 = math.tanh %1297 : vector<8x128xf32>
    %1299 = vector.extract_strided_slice %1284 {offsets = [0, 384], sizes = [8, 128], strides = [1, 1]} : vector<8x512xf32> to vector<8x128xf32>
    %1300 = arith.negf %1299 : vector<8x128xf32>
    %1301 = math.exp %1300 : vector<8x128xf32>
    %cst_676 = arith.constant 1.000000e+00 : f32
    %1302 = vector.broadcast %cst_676 : f32 to vector<8x128xf32>
    %1303 = arith.addf %1302, %1301 : vector<8x128xf32>
    %1304 = arith.divf %1302, %1303 : vector<8x128xf32>
    %1305 = arith.mulf %1296, %1278 : vector<8x128xf32>
    %1306 = arith.mulf %1290, %1298 : vector<8x128xf32>
    %1307 = arith.addf %1305, %1306 : vector<8x128xf32>
    %1308 = math.tanh %1307 : vector<8x128xf32>
    %1309 = arith.mulf %1304, %1308 : vector<8x128xf32>
    %c0_677 = arith.constant 0 : index
    %c0_678 = arith.constant 0 : index
    %1310 = vector.load %arg21[%c0_677, %c0_678] : memref<8x128xf32, #tpu.memory_space<vmem>>, vector<8x128xf32>
    tpu.vector_store %arg21[%c0_677, %c0_678], %1309 {strides = array<i32>} : memref<8x128xf32, #tpu.memory_space<vmem>>, vector<8x128xf32>,
    %c0_679 = arith.constant 0 : index
    %c0_680 = arith.constant 0 : index
    %1311 = vector.load %arg22[%c0_679, %c0_680] : memref<8x128xf32, #tpu.memory_space<vmem>>, vector<8x128xf32>
    tpu.vector_store %arg22[%c0_679, %c0_680], %1307 {strides = array<i32>} : memref<8x128xf32, #tpu.memory_space<vmem>>, vector<8x128xf32>,
    %1312 = arith.index_cast %1276 : i32 to index
    %c0_681 = arith.constant 0 : index
    %c128_682 = arith.constant 128 : index
    %1313 = vector.load %arg20[%1312, %c0_681, %c128_682] : memref<8x8x256xf32, #tpu.memory_space<vmem>>, vector<1x8x128xf32>
    %1314 = vector.shape_cast %1313 : vector<1x8x128xf32> to vector<8x128xf32>
    %1315 = vector.shape_cast %1309 : vector<8x128xf32> to vector<1x8x128xf32>
    tpu.vector_store %arg20[%1312, %c0_681, %c128_682], %1315 {strides = array<i32>} : memref<8x8x256xf32, #tpu.memory_space<vmem>>, vector<1x8x128xf32>,
    %c8_i32_683 = arith.constant 8 : i32
    %c0_684 = arith.constant 0 : index
    %c0_685 = arith.constant 0 : index
    %c0_686 = arith.constant 0 : index
    %1316 = vector.load %arg20[%c0_684, %c0_685, %c0_686] : memref<8x8x256xf32, #tpu.memory_space<vmem>>, vector<8x8x256xf32>
    %1317 = vector.shape_cast %1316 : vector<8x8x256xf32> to vector<64x256xf32>
    %c0_687 = arith.constant 0 : index
    %c0_688 = arith.constant 0 : index
    %1318 = vector.load %arg13[%c0_687, %c0_688] : memref<256x128xf32, #tpu.memory_space<vmem>>, vector<256x128xf32>
    %cst_689 = arith.constant dense<0.000000e+00> : vector<64x128xf32>
    %1319 = tpu.matmul %1317, %1318, %cst_689 {dimension_numbers = #tpu.dot_dimension_numbers<[1], [0], [0], [1], [0, 0, 1, 1], [], []>} : vector<64x256xf32>, vector<256x128xf32>, vector<64x128xf32> -> vector<64x128xf32>
    %c0_690 = arith.constant 0 : index
    %c0_691 = arith.constant 0 : index
    %1320 = vector.load %arg14[%c0_690, %c0_691] : memref<1x128xf32, #tpu.memory_space<vmem>>, vector<1x128xf32>
    %1321 = vector.broadcast %1320 : vector<1x128xf32> to vector<64x128xf32>
    %1322 = arith.addf %1319, %1321 : vector<64x128xf32>
    %cst_692 = arith.constant 0.000000e+00 : f32
    %1323 = vector.broadcast %cst_692 : f32 to vector<64x128xf32>
    %1324 = arith.maximumf %1322, %1323 : vector<64x128xf32>
    %1325 = vector.shape_cast %1324 : vector<64x128xf32> to vector<8x8x128xf32>
    %cst_693 = arith.constant dense<0.000000e+00> : vector<8x128xf32>
    %1326 = vector.multi_reduction <add>, %1325, %cst_693 [0] : vector<8x8x128xf32> to vector<8x128xf32>
    %cst_694 = arith.constant 8.000000e+00 : f32
    %1327 = vector.broadcast %cst_694 : f32 to vector<8x128xf32>
    %1328 = arith.divf %1326, %1327 : vector<8x128xf32>
    %c0_695 = arith.constant 0 : index
    %c0_696 = arith.constant 0 : index
    %1329 = vector.load %arg15[%c0_695, %c0_696] : memref<128x2xf32, #tpu.memory_space<vmem>>, vector<128x2xf32>
    %cst_697 = arith.constant dense<0.000000e+00> : vector<8x2xf32>
    %1330 = tpu.matmul %1328, %1329, %cst_697 {dimension_numbers = #tpu.dot_dimension_numbers<[1], [0], [0], [1], [0, 0, 1, 1], [], []>} : vector<8x128xf32>, vector<128x2xf32>, vector<8x2xf32> -> vector<8x2xf32>
    %c0_698 = arith.constant 0 : index
    %c0_699 = arith.constant 0 : index
    %1331 = vector.load %arg16[%c0_698, %c0_699] : memref<1x2xf32, #tpu.memory_space<vmem>>, vector<1x2xf32>
    %1332 = vector.broadcast %1331 : vector<1x2xf32> to vector<8x2xf32>
    %1333 = arith.addf %1330, %1332 : vector<8x2xf32>
    %c0_700 = arith.constant 0 : index
    %c0_701 = arith.constant 0 : index
    %1334 = vector.load %arg17[%c0_700, %c0_701] : memref<8x2xf32, #tpu.memory_space<vmem>>, vector<8x2xf32>
    tpu.vector_store %arg17[%c0_700, %c0_701], %1333 {strides = array<i32>} : memref<8x2xf32, #tpu.memory_space<vmem>>, vector<8x2xf32>,
    return
  }
}

</mosaic_0001>

<bundles_post_ra>
// kernel: model_forward.1
= control target key start
LH: loop header
LB: loop body
LE: loop exit
PB: predicated region body
PF: predicated region fallthrough
CT: control target
= control target key end

     0   :  { %s16152_s0 = inlined_call_operand.vmem [shape: f32[8,8,128], index: 0, kind: input, shape index: {}]   ;;  %s16153_s1 = inlined_call_operand.vmem [shape: f32[128,512], index: 1, kind: input, shape index: {}]   ;;  %s16154_s2 = inlined_call_operand.hbm [shape: f32[128,512], index: 2, kind: input, shape index: {}]   ;;  %s16155_s3 = inlined_call_operand.vmem [shape: f32[1,512], index: 3, kind: input, shape index: {}]   ;;  %s16156_s4 = inlined_call_operand.hbm [shape: f32[128,512], index: 4, kind: input, shape index: {}]   ;;  %s16157_s5 = inlined_call_operand.hbm [shape: f32[128,512], index: 5, kind: input, shape index: {}]   ;;  %s16158_s6 = inlined_call_operand.vmem [shape: f32[1,512], index: 6, kind: input, shape index: {}]   ;;  %s16159_s7 = inlined_call_operand.hbm [shape: f32[256,512], index: 7, kind: input, shape index: {}]   ;;  %s16160_s8 = inlined_call_operand.hbm [shape: f32[128,512], index: 8, kind: input, shape index: {}]   ;;  %s16161_s9 = inlined_call_operand.vmem [shape: f32[1,512], index: 9, kind: input, shape index: {}]   ;;  %s16162_s10 = inlined_call_operand.hbm [shape: f32[256,512], index: 10, kind: input, shape index: {}]   ;;  %s16163_s11 = inlined_call_operand.hbm [shape: f32[128,512], index: 11, kind: input, shape index: {}]   ;;  %s16164_s12 = inlined_call_operand.vmem [shape: f32[1,512], index: 12, kind: input, shape index: {}]   ;;  %s16165_s13 = inlined_call_operand.vmem [shape: f32[256,128], index: 13, kind: input, shape index: {}]   ;;  %s16166_s14 = inlined_call_operand.vmem [shape: f32[1,128], index: 14, kind: input, shape index: {}]   ;;  %s16167_s15 = inlined_call_operand.vmem [shape: f32[128,2], index: 15, kind: input, shape index: {}]   ;;  %s16168_s16 = inlined_call_operand.vmem [shape: f32[1,2], index: 16, kind: input, shape index: {}]   ;;  %s16169_s17 = inlined_call_operand.vmem [shape: f32[8,2], index: 17, kind: output, shape index: {}]  }
   0x1   :  { %16198 = sst [smem:[#allocation36_spill]] %s16152_s0 }
   0x2   :  { %16199 = sst [smem:[#allocation37_spill]] %s16153_s1 }
   0x3   :  { %22 = vsyncpa [#allocation8], 0 }
   0x4   :  { %23 = vsyncpa [#allocation10], 0 }
   0x5   :  { %24 = vsyncpa [#allocation13], 0 }
   0x6   :  { %25 = vsyncpa [#allocation16], 0  ;;  %s13424_s24 = smov [#allocation9]   ;;  %s13425_s26 = smov [#allocation12]  }
   0x7   :  { %s49_s25 = sshll.u32 %s13424_s24, 4  ;;  %s75_s27 = sshll.u32 %s13425_s26, 4  ;;  %s50_s25 = int_to_ptr.vmem [resolvable:$true] %s49_s25  ;;  %s13526_s27 = int_to_ptr.vmem [resolvable:$true] %s75_s27 }
   0x8   :  { %s13262_s0 = scalar_lea.hbm %s16156_s4, 8192 }
   0x9   :  { %p13263_p0 = scmp.ne.s32.totalorder %s16156_s4, %s13262_s0  ;;  %p13266_p1 = scmp.lt.u32.totalorder %s13262_s0, %s16156_s4 }
   0xb   :  { %p13268_p2 = pnand %p13266_p1, %p13263_p0 }
   0xd   :  { %13271 = shalt.err (!%p13268_p2)
}
   0xe   :  { %s13272_s20 = scalar_lea.vmem %s50_s25, 8192  ;;  %p13277_p4 = scmp.lt.s32.totalorder %s50_s25, %s50_s25 }
   0xf   :  { %p13273_p3 = scmp.ne.s32.totalorder %s50_s25, %s13272_s20  ;;  %p13278_p5 = scmp.lt.s32.totalorder %s13272_s20, %s13272_s20 }
  0x11   :  { %p13279_p6 = por %p13278_p5, %p13277_p4 }
  0x13   :  { %p13280_p7 = pnand %p13279_p6, %p13273_p3 }
  0x15   :  { %13283 = shalt.err (!%p13280_p7)
}
  0x16   :  { %s13426_s21 = smov 512   ;;  %s13427_s22 = smov 32  }
  0x17   :  { %55 = dma.hbm_to_vmem [thread:$0]  %s16156_s4, 8192, %s50_s25, [#allocation10], %s13426_s21, %s13426_s21, %s13427_s22  }
  0x18   :  { %s13284_s29 = scalar_lea.hbm %s16159_s7, 16384 }
  0x19   :  { %p13285_p8 = scmp.ne.s32.totalorder %s16159_s7, %s13284_s29  ;;  %p13288_p9 = scmp.lt.u32.totalorder %s13284_s29, %s16159_s7 }
  0x1b   :  { %p13290_p10 = pnand %p13288_p9, %p13285_p8 }
  0x1d   :  { %13293 = shalt.err (!%p13290_p10)
}
  0x1e   :  { %s13294_s1 = scalar_lea.vmem %s13526_s27, 16384  ;;  %p13299_p12 = scmp.lt.s32.totalorder %s13526_s27, %s13526_s27 }
  0x1f   :  { %p13295_p11 = scmp.ne.s32.totalorder %s13526_s27, %s13294_s1  ;;  %p13300_p13 = scmp.lt.s32.totalorder %s13294_s1, %s13294_s1 }
  0x21   :  { %p13301_p0 = por %p13300_p13, %p13299_p12 }
  0x23   :  { %p13302_p1 = pnand %p13301_p0, %p13295_p11 }
  0x25   :  { %13305 = shalt.err (!%p13302_p1)
}
  0x26   :  { %81 = dma.hbm_to_vmem [thread:$0]  %s16159_s7, 16384, %s13526_s27, [#allocation13], %s13426_s21, %s13426_s21, %s13427_s22  }
  0x27   :  { %s13428_s20 = smov [#allocation15]   ;;  %s13429_s24 = smov [#allocation7]  }
  0x28   :  { %s101_s23 = sshll.u32 %s13428_s20, 4  ;;  %s35_s26 = sshll.u32 %s13429_s24, 4  ;;  %s102_s23 = int_to_ptr.vmem [resolvable:$true] %s101_s23  ;;  %s13563_s26 = int_to_ptr.vmem [resolvable:$true] %s35_s26 }
  0x29   :  { %s13306_s0 = scalar_lea.hbm %s16162_s10, 16384 }
  0x2a   :  { %p13307_p2 = scmp.ne.s32.totalorder %s16162_s10, %s13306_s0  ;;  %p13310_p3 = scmp.lt.u32.totalorder %s13306_s0, %s16162_s10 }
  0x2c   :  { %p13312_p4 = pnand %p13310_p3, %p13307_p2 }
  0x2e   :  { %13315 = shalt.err (!%p13312_p4)
}
  0x2f   :  { %s13316_s7 = scalar_lea.vmem %s102_s23, 16384  ;;  %p13321_p6 = scmp.lt.s32.totalorder %s102_s23, %s102_s23 }
  0x30   :  { %p13317_p5 = scmp.ne.s32.totalorder %s102_s23, %s13316_s7  ;;  %p13322_p7 = scmp.lt.s32.totalorder %s13316_s7, %s13316_s7 }
  0x32   :  { %p13323_p8 = por %p13322_p7, %p13321_p6 }
  0x34   :  { %p13324_p9 = pnand %p13323_p8, %p13317_p5 }
  0x36   :  { %13327 = shalt.err (!%p13324_p9)
}
  0x37   :  { %107 = dma.hbm_to_vmem [thread:$0]  %s16162_s10, 16384, %s102_s23, [#allocation16], %s13426_s21, %s13426_s21, %s13427_s22  }
  0x38   :  { %s13328_s24 = scalar_lea.hbm %s16154_s2, 8192 }
  0x39   :  { %p13329_p10 = scmp.ne.s32.totalorder %s16154_s2, %s13328_s24  ;;  %p13332_p11 = scmp.lt.u32.totalorder %s13328_s24, %s16154_s2 }
  0x3b   :  { %p13334_p12 = pnand %p13332_p11, %p13329_p10 }
  0x3d   :  { %13337 = shalt.err (!%p13334_p12)
}
  0x3e   :  { %s13338_s18 = scalar_lea.vmem %s13563_s26, 8192  ;;  %p13343_p0 = scmp.lt.s32.totalorder %s13563_s26, %s13563_s26 }
  0x3f   :  { %p13339_p13 = scmp.ne.s32.totalorder %s13563_s26, %s13338_s18  ;;  %p13344_p1 = scmp.lt.s32.totalorder %s13338_s18, %s13338_s18 }
  0x41   :  { %p13345_p2 = por %p13344_p1, %p13343_p0 }
  0x43   :  { %p13346_p3 = pnand %p13345_p2, %p13339_p13 }
  0x45   :  { %13349 = shalt.err (!%p13346_p3)
}
  0x46   :  { %41 = dma.hbm_to_vmem [thread:$0]  %s16154_s2, 8192, %s13563_s26, [#allocation8], %s13426_s21, %s13426_s21, %s13427_s22  }
  0x47   :  { %s13430_s19 = smov [#allocation11]   ;;  %s13431_s7 = smov [#allocation14]  }
  0x48   :  { %s61_s1 = sshll.u32 %s13430_s19, 4  ;;  %s87_s27 = sshll.u32 %s13431_s7, 4  ;;  %s62_s1 = int_to_ptr.vmem [resolvable:$true] %s61_s1  ;;  %s13600_s27 = int_to_ptr.vmem [resolvable:$true] %s87_s27 }
  0x49   :  { %s13350_s20 = scalar_lea.hbm %s16157_s5, 8192 }
  0x4a   :  { %p13351_p4 = scmp.ne.s32.totalorder %s16157_s5, %s13350_s20  ;;  %p13354_p5 = scmp.lt.u32.totalorder %s13350_s20, %s16157_s5 }
  0x4c   :  { %p13356_p6 = pnand %p13354_p5, %p13351_p4 }
  0x4e   :  { %13359 = shalt.err (!%p13356_p6)
}
  0x4f   :  { %s13360_s2 = scalar_lea.vmem %s62_s1, 8192  ;;  %p13365_p8 = scmp.lt.s32.totalorder %s62_s1, %s62_s1 }
  0x50   :  { %p13361_p7 = scmp.ne.s32.totalorder %s62_s1, %s13360_s2  ;;  %p13366_p9 = scmp.lt.s32.totalorder %s13360_s2, %s13360_s2 }
  0x52   :  { %p13367_p10 = por %p13366_p9, %p13365_p8 }
  0x54   :  { %p13368_p11 = pnand %p13367_p10, %p13361_p7 }
  0x56   :  { %13371 = shalt.err (!%p13368_p11)
}
  0x57   :  { %67 = dma.hbm_to_vmem [thread:$0]  %s16157_s5, 8192, %s62_s1, [#allocation10], %s13426_s21, %s13426_s21, %s13427_s22  }
  0x58   :  { %s13372_s23 = scalar_lea.hbm %s16160_s8, 8192 }
  0x59   :  { %p13373_p12 = scmp.ne.s32.totalorder %s16160_s8, %s13372_s23  ;;  %p13376_p13 = scmp.lt.u32.totalorder %s13372_s23, %s16160_s8 }
  0x5b   :  { %p13378_p0 = pnand %p13376_p13, %p13373_p12 }
  0x5d   :  { %13381 = shalt.err (!%p13378_p0)
}
  0x5e   :  { %s13382_s20 = scalar_lea.vmem %s13600_s27, 8192  ;;  %p13387_p2 = scmp.lt.s32.totalorder %s13600_s27, %s13600_s27 }
  0x5f   :  { %p13383_p1 = scmp.ne.s32.totalorder %s13600_s27, %s13382_s20  ;;  %p13388_p3 = scmp.lt.s32.totalorder %s13382_s20, %s13382_s20 }
  0x61   :  { %p13389_p4 = por %p13388_p3, %p13387_p2 }
  0x63   :  { %p13390_p5 = pnand %p13389_p4, %p13383_p1 }
  0x65   :  { %13393 = shalt.err (!%p13390_p5)
}
  0x66   :  { %93 = dma.hbm_to_vmem [thread:$0]  %s16160_s8, 8192, %s13600_s27, [#allocation13], %s13426_s21, %s13426_s21, %s13427_s22  }
  0x67   :  { %s13432_s24 = smov [#allocation17]   ;;  %s13394_s2 = scalar_lea.hbm %s16163_s11, 8192 }
  0x68   :  { %s113_s28 = sshll.u32 %s13432_s24, 4  ;;  %p13395_p6 = scmp.ne.s32.totalorder %s16163_s11, %s13394_s2  ;;  %s114_s28 = int_to_ptr.vmem [resolvable:$true] %s113_s28 }
  0x69   :  { %p13398_p7 = scmp.lt.u32.totalorder %s13394_s2, %s16163_s11 }
  0x6b   :  { %p13400_p8 = pnand %p13398_p7, %p13395_p6 }
  0x6d   :  { %13403 = shalt.err (!%p13400_p8)
}
  0x6e   :  { %s13404_s23 = scalar_lea.vmem %s114_s28, 8192  ;;  %p13409_p10 = scmp.lt.s32.totalorder %s114_s28, %s114_s28 }
  0x6f   :  { %p13405_p9 = scmp.ne.s32.totalorder %s114_s28, %s13404_s23  ;;  %p13410_p11 = scmp.lt.s32.totalorder %s13404_s23, %s13404_s23 }
  0x71   :  { %p13411_p12 = por %p13410_p11, %p13409_p10 }
  0x73   :  { %p13412_p13 = pnand %p13411_p12, %p13405_p9 }
  0x75   :  { %13415 = shalt.err (!%p13412_p13)
}
  0x76   :  { %119 = dma.hbm_to_vmem [thread:$0]  %s16163_s11, 8192, %s114_s28, [#allocation16], %s13426_s21, %s13426_s21, %s13427_s22  }
  0x77   :  { %13416 = dma.done.wait [#allocation8], 8192  }
  0x78   :  { %13417 = vsyncadd [#allocation8], 4294959104 }
  0x79   :  { %13418 = dma.done.wait [#allocation10], 16384  }
  0x7a   :  { %13419 = vsyncadd [#allocation10], 4294950912 }
  0x7b   :  { %13420 = dma.done.wait [#allocation13], 24576  }
  0x7c   :  { %13421 = vsyncadd [#allocation13], 4294942720 }
  0x7d   :  { %13422 = dma.done.wait [#allocation16], 24576  }
  0x7e   :  { %13423 = vsyncadd [#allocation16], 4294942720  ;;  %v16172_v0 = vmov 0.0   ;;  %s16200_s4 = sld [smem:[#allocation37_spill]]  ;;  %s16201_s20 = sld [smem:[#allocation36_spill]]  ;;  %vm13435_vm0 = vmmov 0  }
  0x7f   :  { %309 = vmatprep.mubr.f32.mxu0 %v16172_v0  ;;  %422 = vmatprep.mubr.f32.mxu1 %v16172_v0  ;;  %vm9778_vm1 = vcmask 15360  }
  0x84   :  { %v160_v1 = vld [vmem:[%s16200_s4 + $0x8] sm:$0xff]  ;;  %v162_v3 = vld [vmem:[%s16200_s4 + $0x18] sm:$0xff]  ;;  %v159_v6 = vld [vmem:[%s16200_s4] sm:$0xff] }
  0x85   :  { %v164_v2 = vld [vmem:[%s16200_s4 + $0x28] sm:$0xff]  ;;  %v166_v5 = vld [vmem:[%s16200_s4 + $0x38] sm:$0xff]  ;;  %v163_v7 = vld [vmem:[%s16200_s4 + $0x20] sm:$0xff] }
  0x86   :  { %v9994_v4 = vpack.c.bf16 %v164_v2, %v160_v1  ;;  %v10026_v8 = vpack.c.bf16 %v166_v5, %v162_v3  ;;  %v9996_v9 = vpack.c.bf16 %v163_v7, %v159_v6  ;;  %v161_v10 = vld [vmem:[%s16200_s4 + $0x10] sm:$0xff]  ;;  %v168_v12 = vld [vmem:[%s16200_s4 + $0x48] sm:$0xff]  ;;  %v170_v15 = vld [vmem:[%s16200_s4 + $0x58] sm:$0xff] }
  0x87   :  { %v165_v11 = vld [vmem:[%s16200_s4 + $0x30] sm:$0xff]  ;;  %v172_v14 = vld [vmem:[%s16200_s4 + $0x68] sm:$0xff]  ;;  %v174_v16 = vld [vmem:[%s16200_s4 + $0x78] sm:$0xff] }
  0x88   :  { %9995 = vmatprep.subr.bf16.mxu0 %v9994_v4  ;;  %v10028_v13 = vpack.c.bf16 %v165_v11, %v161_v10  ;;  %10027 = vmatprep.subr.bf16.mxu1 %v10026_v8  ;;  %v9998_v17 = vpack.c.bf16 %v172_v14, %v168_v12  ;;  %v10030_v18 = vpack.c.bf16 %v174_v16, %v170_v15  ;;  %v167_v19 = vld [vmem:[%s16200_s4 + $0x40] sm:$0xff]  ;;  %v169_v21 = vld [vmem:[%s16200_s4 + $0x50] sm:$0xff]  ;;  %v176_v24 = vld [vmem:[%s16200_s4 + $0x88] sm:$0xff] }
  0x89   :  { %9997 = vmatpush1.bf16.msra.mxu0 %v9996_v9  ;;  %v171_v20 = vld [vmem:[%s16200_s4 + $0x60] sm:$0xff]  ;;  %v173_v23 = vld [vmem:[%s16200_s4 + $0x70] sm:$0xff]  ;;  %v180_v25 = vld [vmem:[%s16200_s4 + $0xa8] sm:$0xff] }
  0x8a   :  { %10029 = vmatpush1.bf16.msra.mxu1 %v10028_v13  ;;  %v10000_v22 = vpack.c.bf16 %v171_v20, %v167_v19  ;;  %9999 = vmatprep.subr.bf16.mxu0 %v9998_v17  ;;  %v10032_v26 = vpack.c.bf16 %v173_v23, %v169_v21  ;;  %v10002_v27 = vpack.c.bf16 %v180_v25, %v176_v24  ;;  %v178_v28 = vld [vmem:[%s16200_s4 + $0x98] sm:$0xff]  ;;  %v175_v30 = vld [vmem:[%s16200_s4 + $0x80] sm:$0xff]  ;;  %v177_v33 = vld [vmem:[%s16200_s4 + $0x90] sm:$0xff] }
  0x8b   :  { %10031 = vmatprep.subr.bf16.mxu1 %v10030_v18  ;;  %v182_v29 = vld [vmem:[%s16200_s4 + $0xb8] sm:$0xff]  ;;  %v179_v32 = vld [vmem:[%s16200_s4 + $0xa0] sm:$0xff]  ;;  %v181_v34 = vld [vmem:[%s16200_s4 + $0xb0] sm:$0xff] }
  0x8c   :  { %v10034_v31 = vpack.c.bf16 %v182_v29, %v178_v28  ;;  %v10004_v35 = vpack.c.bf16 %v179_v32, %v175_v30  ;;  %v184_v36 = vld [vmem:[%s16200_s4 + $0xc8] sm:$0xff]  ;;  %v186_v38 = vld [vmem:[%s16200_s4 + $0xd8] sm:$0xff]  ;;  %v10036_v39 = vpack.c.bf16 %v181_v34, %v177_v33  ;;  %v183_v42 = vld [vmem:[%s16200_s4 + $0xc0] sm:$0xff] }
  0x8d   :  { %10001 = vmatpush1.bf16.msra.mxu0 %v10000_v22  ;;  %v188_v37 = vld [vmem:[%s16200_s4 + $0xe8] sm:$0xff]  ;;  %v190_v41 = vld [vmem:[%s16200_s4 + $0xf8] sm:$0xff]  ;;  %v187_v43 = vld [vmem:[%s16200_s4 + $0xe0] sm:$0xff] }
  0x8e   :  { %10033 = vmatpush1.bf16.msra.mxu1 %v10032_v26  ;;  %10003 = vmatprep.subr.bf16.mxu0 %v10002_v27  ;;  %v10006_v40 = vpack.c.bf16 %v188_v37, %v184_v36  ;;  %v10038_v44 = vpack.c.bf16 %v190_v41, %v186_v38  ;;  %v185_v45 = vld [vmem:[%s16200_s4 + $0xd0] sm:$0xff]  ;;  %v192_v47 = vld [vmem:[%s16200_s4 + $0x108] sm:$0xff]  ;;  %v194_v49 = vld [vmem:[%s16200_s4 + $0x118] sm:$0xff]  ;;  %v10008_v51 = vpack.c.bf16 %v187_v43, %v183_v42 }
  0x8f   :  { %10035 = vmatprep.subr.bf16.mxu1 %v10034_v31  ;;  %v189_v46 = vld [vmem:[%s16200_s4 + $0xf0] sm:$0xff]  ;;  %v196_v48 = vld [vmem:[%s16200_s4 + $0x128] sm:$0xff]  ;;  %v198_v50 = vld [vmem:[%s16200_s4 + $0x138] sm:$0xff] }
  0x90   :  { %v10040_v52 = vpack.c.bf16 %v189_v46, %v185_v45  ;;  %v10010_v53 = vpack.c.bf16 %v196_v48, %v192_v47  ;;  %v191_v54 = vld [vmem:[%s16200_s4 + $0x100] sm:$0xff]  ;;  %v193_v56 = vld [vmem:[%s16200_s4 + $0x110] sm:$0xff]  ;;  %v10042_v57 = vpack.c.bf16 %v198_v50, %v194_v49  ;;  %v200_v59 = vld [vmem:[%s16200_s4 + $0x148] sm:$0xff] }
  0x91   :  { %10005 = vmatpush1.bf16.msra.mxu0 %v10004_v35  ;;  %v195_v55 = vld [vmem:[%s16200_s4 + $0x120] sm:$0xff]  ;;  %v197_v58 = vld [vmem:[%s16200_s4 + $0x130] sm:$0xff]  ;;  %v204_v60 = vld [vmem:[%s16200_s4 + $0x168] sm:$0xff] }
  0x92   :  { %10037 = vmatpush1.bf16.msra.mxu1 %v10036_v39  ;;  %10007 = vmatprep.subr.bf16.mxu0 %v10006_v40  ;;  %v202_v61 = vld [vmem:[%s16200_s4 + $0x158] sm:$0xff]  ;;  %v10012_v63 = vpack.c.bf16 %v195_v55, %v191_v54  ;;  %v10044_v1 = vpack.c.bf16 %v197_v58, %v193_v56  ;;  %v10014_v2 = vpack.c.bf16 %v204_v60, %v200_v59  ;;  %v199_v3 = vld [vmem:[%s16200_s4 + $0x140] sm:$0xff]  ;;  %v201_v5 = vld [vmem:[%s16200_s4 + $0x150] sm:$0xff] }
  0x93   :  { %10039 = vmatprep.subr.bf16.mxu1 %v10038_v44  ;;  %v206_v62 = vld [vmem:[%s16200_s4 + $0x178] sm:$0xff]  ;;  %v203_v4 = vld [vmem:[%s16200_s4 + $0x160] sm:$0xff]  ;;  %v205_v7 = vld [vmem:[%s16200_s4 + $0x170] sm:$0xff] }
  0x94   :  { %v10046_v6 = vpack.c.bf16 %v206_v62, %v202_v61  ;;  %v208_v8 = vld [vmem:[%s16200_s4 + $0x188] sm:$0xff]  ;;  %v210_v10 = vld [vmem:[%s16200_s4 + $0x198] sm:$0xff]  ;;  %v10016_v12 = vpack.c.bf16 %v203_v4, %v199_v3  ;;  %v10048_v13 = vpack.c.bf16 %v205_v7, %v201_v5  ;;  %v207_v15 = vld [vmem:[%s16200_s4 + $0x180] sm:$0xff] }
  0x95   :  { %10009 = vmatpush1.bf16.msra.mxu0 %v10008_v51  ;;  %v212_v9 = vld [vmem:[%s16200_s4 + $0x1a8] sm:$0xff]  ;;  %v214_v11 = vld [vmem:[%s16200_s4 + $0x1b8] sm:$0xff]  ;;  %v211_v16 = vld [vmem:[%s16200_s4 + $0x1a0] sm:$0xff] }
  0x96   :  { %10041 = vmatpush1.bf16.msra.mxu1 %v10040_v52  ;;  %10011 = vmatprep.subr.bf16.mxu0 %v10010_v53  ;;  %v10018_v14 = vpack.c.bf16 %v212_v9, %v208_v8  ;;  %v209_v17 = vld [vmem:[%s16200_s4 + $0x190] sm:$0xff]  ;;  %v10050_v18 = vpack.c.bf16 %v214_v11, %v210_v10  ;;  %v216_v20 = vld [vmem:[%s16200_s4 + $0x1c8] sm:$0xff]  ;;  %v218_v22 = vld [vmem:[%s16200_s4 + $0x1d8] sm:$0xff]  ;;  %v10020_v24 = vpack.c.bf16 %v211_v16, %v207_v15 }
  0x97   :  { %10043 = vmatprep.subr.bf16.mxu1 %v10042_v57  ;;  %v213_v19 = vld [vmem:[%s16200_s4 + $0x1b0] sm:$0xff]  ;;  %v220_v21 = vld [vmem:[%s16200_s4 + $0x1e8] sm:$0xff]  ;;  %v222_v23 = vld [vmem:[%s16200_s4 + $0x1f8] sm:$0xff] }
  0x98   :  { %v10052_v25 = vpack.c.bf16 %v213_v19, %v209_v17  ;;  %v10022_v26 = vpack.c.bf16 %v220_v21, %v216_v20  ;;  %v215_v27 = vld [vmem:[%s16200_s4 + $0x1c0] sm:$0xff]  ;;  %v217_v29 = vld [vmem:[%s16200_s4 + $0x1d0] sm:$0xff]  ;;  %v10054_v30 = vpack.c.bf16 %v222_v23, %v218_v22  ;;  %v512_v32 = vld [vmem:[#allocation7 + $0x8] sm:$0xff] }
  0x99   :  { %10013 = vmatpush1.bf16.msra.mxu0 %v10012_v63  ;;  %v219_v28 = vld [vmem:[%s16200_s4 + $0x1e0] sm:$0xff]  ;;  %v221_v31 = vld [vmem:[%s16200_s4 + $0x1f0] sm:$0xff]  ;;  %v516_v33 = vld [vmem:[#allocation7 + $0x28] sm:$0xff] }
  0x9a   :  { %10045 = vmatpush1.bf16.msra.mxu1 %v10044_v1  ;;  %10015 = vmatprep.subr.bf16.mxu0 %v10014_v2  ;;  %v514_v34 = vld [vmem:[#allocation7 + $0x18] sm:$0xff]  ;;  %v10024_v36 = vpack.c.bf16 %v219_v28, %v215_v27  ;;  %v10056_v37 = vpack.c.bf16 %v221_v31, %v217_v29  ;;  %v13846_v38 = vpack.c.bf16 %v516_v33, %v512_v32  ;;  %v511_v39 = vld [vmem:[#allocation7] sm:$0xff]  ;;  %v513_v42 = vld [vmem:[#allocation7 + $0x10] sm:$0xff] }
  0x9b   :  { %10047 = vmatprep.subr.bf16.mxu1 %v10046_v6  ;;  %v518_v35 = vld [vmem:[#allocation7 + $0x38] sm:$0xff]  ;;  %v515_v40 = vld [vmem:[#allocation7 + $0x20] sm:$0xff]  ;;  %v517_v43 = vld [vmem:[#allocation7 + $0x30] sm:$0xff] }
  0x9c   :  { %v13848_v41 = vpack.c.bf16 %v518_v35, %v514_v34  ;;  %v520_v44 = vld [vmem:[#allocation7 + $0x48] sm:$0xff]  ;;  %v151_v46 = vld [vmem:[%s16201_s20] sm:$0xff]  ;;  %v13853_v47 = vpack.c.bf16 %v515_v40, %v511_v39  ;;  %v522_v48 = vld [vmem:[#allocation7 + $0x58] sm:$0xff]  ;;  %v13856_v50 = vpack.c.bf16 %v517_v43, %v513_v42 }
  0x9d   :  { %10017 = vmatpush1.bf16.msra.mxu0 %v10016_v12  ;;  %v524_v45 = vld [vmem:[#allocation7 + $0x68] sm:$0xff]  ;;  %v526_v49 = vld [vmem:[#allocation7 + $0x78] sm:$0xff]  ;;  %v519_v51 = vld [vmem:[#allocation7 + $0x40] sm:$0xff] }
  0x9e   :  { %10049 = vmatpush1.bf16.msra.mxu1 %v10048_v13  ;;  %10019 = vmatprep.subr.bf16.mxu0 %v10018_v14  ;;  %v523_v52 = vld [vmem:[#allocation7 + $0x60] sm:$0xff]  ;;  %v13859_v53 = vpack.c.bf16 %v524_v45, %v520_v44  ;;  %v521_v54 = vld [vmem:[#allocation7 + $0x50] sm:$0xff]  ;;  %v13861_v56 = vpack.c.bf16 %v526_v49, %v522_v48  ;;  %v528_v57 = vld [vmem:[#allocation7 + $0x88] sm:$0xff] }
  0x9f   :  { %10051 = vmatprep.subr.bf16.mxu1 %v10050_v18  ;;  %v525_v55 = vld [vmem:[#allocation7 + $0x70] sm:$0xff]  ;;  %v532_v58 = vld [vmem:[#allocation7 + $0xa8] sm:$0xff]  ;;  %v13867_v60 = vpack.c.bf16 %v523_v52, %v519_v51  ;;  %v530_v61 = vld [vmem:[#allocation7 + $0x98] sm:$0xff] }
  0xa0   :  { %v152_v59 = vld [vmem:[%s16201_s20 + $0x8] sm:$0xff]  ;;  %v534_v62 = vld [vmem:[#allocation7 + $0xb8] sm:$0xff]  ;;  %v13871_v63 = vpack.c.bf16 %v525_v55, %v521_v54  ;;  %v527_v1 = vld [vmem:[#allocation7 + $0x80] sm:$0xff]  ;;  %v13875_v3 = vpack.c.bf16 %v532_v58, %v528_v57 }
  0xa1   :  { %10021 = vmatpush1.bf16.msra.mxu0 %v10020_v24  ;;  %v531_v2 = vld [vmem:[#allocation7 + $0xa0] sm:$0xff]  ;;  %v529_v4 = vld [vmem:[#allocation7 + $0x90] sm:$0xff]  ;;  %v13878_v6 = vpack.c.bf16 %v534_v62, %v530_v61  ;;  %v536_v7 = vld [vmem:[#allocation7 + $0xc8] sm:$0xff] }
  0xa2   :  { %10053 = vmatpush1.bf16.msra.mxu1 %v10052_v25  ;;  %10023 = vmatprep.subr.bf16.mxu0 %v10022_v26  ;;  %v533_v5 = vld [vmem:[#allocation7 + $0xb0] sm:$0xff]  ;;  %v540_v8 = vld [vmem:[#allocation7 + $0xe8] sm:$0xff]  ;;  %v13884_v10 = vpack.c.bf16 %v531_v2, %v527_v1  ;;  %v538_v11 = vld [vmem:[#allocation7 + $0xd8] sm:$0xff] }
  0xa3   :  { %10055 = vmatprep.subr.bf16.mxu1 %v10054_v30  ;;  %v153_v9 = vld [vmem:[%s16201_s20 + $0x10] sm:$0xff]  ;;  %v542_v12 = vld [vmem:[#allocation7 + $0xf8] sm:$0xff]  ;;  %v13888_v13 = vpack.c.bf16 %v533_v5, %v529_v4  ;;  %v535_v14 = vld [vmem:[#allocation7 + $0xc0] sm:$0xff]  ;;  %v13892_v16 = vpack.c.bf16 %v540_v8, %v536_v7 }
  0xa4   :  { %v539_v15 = vld [vmem:[#allocation7 + $0xe0] sm:$0xff]  ;;  %v537_v17 = vld [vmem:[#allocation7 + $0xd0] sm:$0xff]  ;;  %v13895_v19 = vpack.c.bf16 %v542_v12, %v538_v11  ;;  %v544_v20 = vld [vmem:[#allocation7 + $0x108] sm:$0xff] }
  0xa5   :  { %10025 = vmatpush1.bf16.msra.mxu0 %v10024_v36  ;;  %v541_v18 = vld [vmem:[#allocation7 + $0xf0] sm:$0xff]  ;;  %v548_v21 = vld [vmem:[#allocation7 + $0x128] sm:$0xff]  ;;  %v154_v22 = vld [vmem:[%s16201_s20 + $0x18] sm:$0xff]  ;;  %v13901_v23 = vpack.c.bf16 %v539_v15, %v535_v14 }
  0xa6   :  { %10057 = vmatpush1.bf16.msra.mxu1 %v10056_v37  ;;  %10059 = vmatprep.subr.bf16.mxu0 %v13846_v38  ;;  %v546_v24 = vld [vmem:[#allocation7 + $0x118] sm:$0xff]  ;;  %v13905_v26 = vpack.c.bf16 %v541_v18, %v537_v17  ;;  %v543_v27 = vld [vmem:[#allocation7 + $0x100] sm:$0xff]  ;;  %v13909_v29 = vpack.c.bf16 %v548_v21, %v544_v20  ;;  %v545_v30 = vld [vmem:[#allocation7 + $0x110] sm:$0xff] }
  0xa7   :  { %10091 = vmatprep.subr.bf16.mxu1 %v13848_v41  ;;  %v550_v25 = vld [vmem:[#allocation7 + $0x138] sm:$0xff]  ;;  %v547_v28 = vld [vmem:[#allocation7 + $0x120] sm:$0xff]  ;;  %v549_v31 = vld [vmem:[#allocation7 + $0x130] sm:$0xff] }
  0xa8   :  { %310 = vmatmul.mubr.f32.vlgmr.msra.gmra.mrb[0].mxu0 %v151_v46  ;;  %v13912_v32 = vpack.c.bf16 %v550_v25, %v546_v24  ;;  %v552_v33 = vld [vmem:[#allocation7 + $0x148] sm:$0xff]  ;;  %v155_v35 = vld [vmem:[%s16201_s20 + $0x20] sm:$0xff]  ;;  %v13918_v36 = vpack.c.bf16 %v547_v28, %v543_v27  ;;  %v554_v37 = vld [vmem:[#allocation7 + $0x158] sm:$0xff]  ;;  %v13922_v40 = vpack.c.bf16 %v549_v31, %v545_v30  ;;  %v225_v28 = vlaneseq }
  0xa9   :  { %423 = vmatmul.mubr.f32.vlgmr.msra.gmra.mrb[0].mxu1 %v151_v46  ;;  %10061 = vmatpush1.bf16.msra.mxu0 %v13853_v47  ;;  %v556_v34 = vld [vmem:[#allocation7 + $0x168] sm:$0xff]  ;;  %v558_v39 = vld [vmem:[#allocation7 + $0x178] sm:$0xff]  ;;  %v551_v42 = vld [vmem:[#allocation7 + $0x140] sm:$0xff] }
  0xaa   :  { %10093 = vmatpush1.bf16.msra.mxu1 %v13856_v50  ;;  %315 = vmatprep.mubr.f32.mxu0 %v16172_v0  ;;  %v555_v43 = vld [vmem:[#allocation7 + $0x160] sm:$0xff]  ;;  %v13926_v44 = vpack.c.bf16 %v556_v34, %v552_v33  ;;  %v553_v45 = vld [vmem:[#allocation7 + $0x150] sm:$0xff]  ;;  %v13929_v48 = vpack.c.bf16 %v558_v39, %v554_v37  ;;  %v560_v49 = vld [vmem:[#allocation7 + $0x188] sm:$0xff]  ;;  %v226_v30 = vshrl.u32 %v225_v28, 7 }
  0xab   :  { %428 = vmatprep.mubr.f32.mxu1 %v16172_v0  ;;  %10063 = vmatprep.subr.bf16.mxu0 %v13859_v53  ;;  %v557_v46 = vld [vmem:[#allocation7 + $0x170] sm:$0xff]  ;;  %v564_v51 = vld [vmem:[#allocation7 + $0x1a8] sm:$0xff]  ;;  %v13935_v54 = vpack.c.bf16 %v555_v43, %v551_v42  ;;  %v562_v55 = vld [vmem:[#allocation7 + $0x198] sm:$0xff] }
  0xac   :  { %316 = vmatmul.mubr.f32.gmra.mrb[2].mxu0 %v152_v59  ;;  %10095 = vmatprep.subr.bf16.mxu1 %v13861_v56  ;;  %v156_v52 = vld [vmem:[%s16201_s20 + $0x28] sm:$0xff]  ;;  %v566_v57 = vld [vmem:[#allocation7 + $0x1b8] sm:$0xff]  ;;  %v13939_v58 = vpack.c.bf16 %v557_v46, %v553_v45  ;;  %v563_v61 = vld [vmem:[#allocation7 + $0x1a0] sm:$0xff]  ;;  %v13943_v62 = vpack.c.bf16 %v564_v51, %v560_v49  ;;  %v14020_v31 = vsub.s32 0, %v226_v30  ;;  %v14025_v34 = vsub.s32 1, %v226_v30 }
  0xad   :  { %429 = vmatmul.mubr.f32.gmra.mrb[2].mxu1 %v152_v59  ;;  %10065 = vmatpush1.bf16.msra.mxu0 %v13867_v60  ;;  %v559_v59 = vld [vmem:[#allocation7 + $0x180] sm:$0xff]  ;;  %v561_v1 = vld [vmem:[#allocation7 + $0x190] sm:$0xff]  ;;  %v13946_v4 = vpack.c.bf16 %v566_v57, %v562_v55  ;;  %v568_v5 = vld [vmem:[#allocation7 + $0x1c8] sm:$0xff]  ;;  %v14040_v55 = vsub.s32 2, %v226_v30 }
  0xae   :  { %10097 = vmatpush1.bf16.msra.mxu1 %v13871_v63  ;;  %321 = vmatprep.mubr.f32.mxu0 %v16172_v0  ;;  %v565_v2 = vld [vmem:[#allocation7 + $0x1b0] sm:$0xff]  ;;  %v572_v7 = vld [vmem:[#allocation7 + $0x1e8] sm:$0xff]  ;;  %v570_v11 = vld [vmem:[#allocation7 + $0x1d8] sm:$0xff]  ;;  %16202 = vst [vmem:[#allocation22_spill] sm:$0xff] %v14020_v31 }
  0xaf   :  { %434 = vmatprep.mubr.f32.mxu1 %v16172_v0  ;;  %10067 = vmatprep.subr.bf16.mxu0 %v13875_v3  ;;  %v157_v8 = vld [vmem:[%s16201_s20 + $0x30] sm:$0xff]  ;;  %v574_v12 = vld [vmem:[#allocation7 + $0x1f8] sm:$0xff]  ;;  %v13956_v14 = vpack.c.bf16 %v565_v2, %v561_v1  ;;  %v567_v15 = vld [vmem:[#allocation7 + $0x1c0] sm:$0xff]  ;;  %v13960_v18 = vpack.c.bf16 %v572_v7, %v568_v5  ;;  %16203 = vst [vmem:[#allocation23_spill] sm:$0xff] %v14025_v34 }
  0xb0   :  { %322 = vmatmul.mubr.f32.gmra.mrb[4].mxu0 %v153_v9  ;;  %10099 = vmatprep.subr.bf16.mxu1 %v13878_v6  ;;  %v571_v17 = vld [vmem:[#allocation7 + $0x1e0] sm:$0xff]  ;;  %v569_v20 = vld [vmem:[#allocation7 + $0x1d0] sm:$0xff]  ;;  %v158_v24 = vld [vmem:[%s16201_s20 + $0x38] sm:$0xff]  ;;  %16205 = vst [vmem:[#allocation25_spill] sm:$0xff] %v14040_v55 }
  0xb1   :  { %435 = vmatmul.mubr.f32.gmra.mrb[4].mxu1 %v153_v9  ;;  %10069 = vmatpush1.bf16.msra.mxu0 %v13884_v10  ;;  %v13952_v9 = vpack.c.bf16 %v563_v61, %v559_v59  ;;  %v573_v21 = vld [vmem:[#allocation7 + $0x1f0] sm:$0xff]  ;;  %v13969_v25 = vpack.c.bf16 %v571_v17, %v567_v15  ;;  %v223_v33 = vld [vmem:[%s16155_s3] sm:$0xf] }
  0xb2   :  { %10101 = vmatpush1.bf16.msra.mxu1 %v13888_v13  ;;  %327 = vmatprep.mubr.f32.mxu0 %v16172_v0  ;;  %v13973_v27 = vpack.c.bf16 %v573_v21, %v569_v20  ;;  %v14031_v37 = vrot.slane %v223_v33, %v14025_v34  ;;  %v14044_v59 = vrot.slane %v223_v33, %v14040_v55 }
  0xb3   :  { %440 = vmatprep.mubr.f32.mxu1 %v16172_v0  ;;  %10071 = vmatprep.subr.bf16.mxu0 %v13892_v16 }
  0xb4   :  { %328 = vmatmul.mubr.f32.gmra.mrb[6].mxu0 %v154_v22  ;;  %10103 = vmatprep.subr.bf16.mxu1 %v13895_v19 }
  0xb5   :  { %441 = vmatmul.mubr.f32.gmra.mrb[6].mxu1 %v154_v22  ;;  %10073 = vmatpush1.bf16.msra.mxu0 %v13901_v23  ;;  %v13963_v22 = vpack.c.bf16 %v574_v12, %v570_v11 }
  0xb6   :  { %10105 = vmatpush1.bf16.msra.mxu1 %v13905_v26  ;;  %333 = vmatprep.mubr.f32.mxu0 %v16172_v0 }
  0xb7   :  { %446 = vmatprep.mubr.f32.mxu1 %v16172_v0  ;;  %10075 = vmatprep.subr.bf16.mxu0 %v13909_v29 }
  0xb8   :  { %334 = vmatmul.mubr.f32.gmra.mrb[8].mxu0 %v155_v35  ;;  %10107 = vmatprep.subr.bf16.mxu1 %v13912_v32 }
  0xb9   :  { %447 = vmatmul.mubr.f32.gmra.mrb[8].mxu1 %v155_v35  ;;  %10077 = vmatpush1.bf16.msra.mxu0 %v13918_v36  ;;  %v14028_v35 = vrot.slane %v223_v33, %v14020_v31 }
  0xba   :  { %10109 = vmatpush1.bf16.msra.mxu1 %v13922_v40  ;;  %339 = vmatprep.mubr.f32.mxu0 %v16172_v0 }
  0xbb   :  { %452 = vmatprep.mubr.f32.mxu1 %v16172_v0  ;;  %10079 = vmatprep.subr.bf16.mxu0 %v13926_v44 }
  0xbc   :  { %340 = vmatmul.mubr.f32.gmra.mrb[10].mxu0 %v156_v52  ;;  %10111 = vmatprep.subr.bf16.mxu1 %v13929_v48 }
  0xbd   :  { %453 = vmatmul.mubr.f32.gmra.mrb[10].mxu1 %v156_v52  ;;  %10081 = vmatpush1.bf16.msra.mxu0 %v13935_v54 }
  0xbe   :  { %10113 = vmatpush1.bf16.msra.mxu1 %v13939_v58  ;;  %345 = vmatprep.mubr.f32.mxu0 %v16172_v0 }
  0xbf   :  { %458 = vmatprep.mubr.f32.mxu1 %v16172_v0  ;;  %10083 = vmatprep.subr.bf16.mxu0 %v13943_v62 }
  0xc0   :  { %346 = vmatmul.mubr.f32.gmra.mrb[12].mxu0 %v157_v8  ;;  %10115 = vmatprep.subr.bf16.mxu1 %v13946_v4 }
  0xc1   :  { %459 = vmatmul.mubr.f32.gmra.mrb[12].mxu1 %v157_v8  ;;  %10085 = vmatpush1.bf16.msra.mxu0 %v13952_v9 }
  0xc2   :  { %10117 = vmatpush1.bf16.msra.mxu1 %v13956_v14  ;;  %351 = vmatprep.mubr.f32.mxu0 %v16172_v0 }
  0xc3   :  { %464 = vmatprep.mubr.f32.mxu1 %v16172_v0  ;;  %10087 = vmatprep.subr.bf16.mxu0 %v13960_v18 }
  0xc4   :  { %352 = vmatmul.mubr.f32.gmra.mrb[14].mxu0 %v158_v24  ;;  %10119 = vmatprep.subr.bf16.mxu1 %v13963_v22 }
  0xc5   :  { %465 = vmatmul.mubr.f32.gmra.mrb[14].mxu1 %v158_v24  ;;  %10089 = vmatpush1.bf16.msra.mxu0 %v13969_v25 }
  0xc6   :  { %10121 = vmatpush1.bf16.msra.mxu1 %v13973_v27  ;;  %639 = vmatprep.mubr.f32.mxu0 %v16172_v0 }
  0xc7   :  { %710 = vmatprep.mubr.f32.mxu1 %v16172_v0  ;;  %10123 = vmatprep.subr.bf16.mxu0 %v13846_v38 }
  0xc8   :  { %640 = vmatmul.mubr.f32.vlgmr.msra.gmra.mrb[0].mxu0 %v16172_v0  ;;  %10155 = vmatprep.subr.bf16.mxu1 %v13848_v41 }
  0xc9   :  { %711 = vmatmul.mubr.f32.vlgmr.msra.gmra.mrb[0].mxu1 %v16172_v0  ;;  %10125 = vmatpush1.bf16.msra.mxu0 %v13853_v47 }
  0xca   :  { %10157 = vmatpush1.bf16.msra.mxu1 %v13856_v50  ;;  %10127 = vmatprep.subr.bf16.mxu0 %v13859_v53 }
  0xcb   :  { %10159 = vmatprep.subr.bf16.mxu1 %v13861_v56  ;;  %883 = vmatprep.mubr.f32.mxu0 %v16172_v0 }
  0xcc   :  { %954 = vmatprep.mubr.f32.mxu1 %v16172_v0 }
  0xcd   :  { %10129 = vmatpush1.bf16.msra.mxu0 %v13867_v60 }
  0xce   :  { %10161 = vmatpush1.bf16.msra.mxu1 %v13871_v63  ;;  %10131 = vmatprep.subr.bf16.mxu0 %v13875_v3 }
  0xcf   :  { %10163 = vmatprep.subr.bf16.mxu1 %v13878_v6 }
  0xd1   :  { %10133 = vmatpush1.bf16.msra.mxu0 %v13884_v10 }
  0xd2   :  { %10165 = vmatpush1.bf16.msra.mxu1 %v13888_v13  ;;  %10135 = vmatprep.subr.bf16.mxu0 %v13892_v16 }
  0xd3   :  { %10167 = vmatprep.subr.bf16.mxu1 %v13895_v19 }
  0xd5   :  { %10137 = vmatpush1.bf16.msra.mxu0 %v13901_v23 }
  0xd6   :  { %10169 = vmatpush1.bf16.msra.mxu1 %v13905_v26  ;;  %10139 = vmatprep.subr.bf16.mxu0 %v13909_v29 }
  0xd7   :  { %10171 = vmatprep.subr.bf16.mxu1 %v13912_v32 }
  0xd9   :  { %10141 = vmatpush1.bf16.msra.mxu0 %v13918_v36 }
  0xda   :  { %10173 = vmatpush1.bf16.msra.mxu1 %v13922_v40  ;;  %10143 = vmatprep.subr.bf16.mxu0 %v13926_v44 }
  0xdb   :  { %10175 = vmatprep.subr.bf16.mxu1 %v13929_v48 }
  0xdd   :  { %10145 = vmatpush1.bf16.msra.mxu0 %v13935_v54 }
  0xde   :  { %10177 = vmatpush1.bf16.msra.mxu1 %v13939_v58  ;;  %10147 = vmatprep.subr.bf16.mxu0 %v13943_v62 }
  0xdf   :  { %10179 = vmatprep.subr.bf16.mxu1 %v13946_v4 }
  0xe1   :  { %10149 = vmatpush1.bf16.msra.mxu0 %v13952_v9 }
  0xe2   :  { %10181 = vmatpush1.bf16.msra.mxu1 %v13956_v14  ;;  %10151 = vmatprep.subr.bf16.mxu0 %v13960_v18 }
  0xe3   :  { %10183 = vmatprep.subr.bf16.mxu1 %v13963_v22 }
  0xe5   :  { %10153 = vmatpush1.bf16.msra.mxu0 %v13969_v25 }
  0xe6   :  { %10185 = vmatpush1.bf16.msra.mxu1 %v13973_v27  ;;  %10187 = vmatprep.subr.bf16.mxu0 %v13846_v38  ;;  %v14033_v38 = vsub.s32 3, %v226_v30 }
  0xe7   :  { %10219 = vmatprep.subr.bf16.mxu1 %v13848_v41 }
  0xe8   :  { %16204 = vst [vmem:[#allocation24_spill] sm:$0xff] %v14033_v38  ;;  %v14038_v52 = vrot.slane %v223_v33, %v14033_v38 }
 0x19b   :  { %v641_v39 = vpop.f32.mrb[0].mxu0 }
 0x19c   :  { %v12482_v41 = vadd.f32 %v641_v39, %v14028_v35  ;;  %v712_v42 = vpop.f32.mrb[0].mxu1  ;;  %v643_v43 = vpop.f32.mrb[1].mxu0 }
 0x19d   :  { %v12483_v45 = vadd.f32 %v643_v43, %v14031_v37  ;;  %v714_v46 = vpop.f32.mrb[1].mxu1  ;;  %v12498_v1 = vadd.f32 %v712_v42, %v14044_v59 }
 0x19e   :  { %v9788_v49 = vmul.f32 -1.442695, %v12482_v41  ;;  %v12499_v57 = vadd.f32 %v714_v46, %v14038_v52 }
 0x19f   :  { %v9789_v51 = vmul.f32 -1.442695, %v12483_v45 }
 0x1a0   :  { %12750 = vpow2.f32 %v9788_v49  ;;  %v9790_v61 = vmul.f32 -1.442695, %v12499_v57 }
 0x1a1   :  { %12752 = vpow2.f32 %v9789_v51 }
 0x1a2   :  { %12754 = vpow2.f32 %v9790_v61 }
 0x1a3   :  { %12756 = vtanh.f32 %v12498_v1 }
 0x1aa   :  { %v12751_v2 = vpop.eup %12750 }
 0x1ab   :  { %v12753_v5 = vpop.eup %12752  ;;  %v724_v7 = vadd.f32 1.0, %v12751_v2 }
 0x1ac   :  { %v730_v8 = vadd.f32 1.0, %v12753_v5  ;;  %v12755_v11 = vpop.eup %12754 }
 0x1ad   :  { %12758 = vrcp.f32 %v724_v7  ;;  %v12757_v12 = vpop.eup %12756  ;;  %v737_v21 = vadd.f32 1.0, %v12755_v11 }
 0x1ae   :  { %12760 = vrcp.f32 %v730_v8 }
 0x1af   :  { %12762 = vrcp.f32 %v737_v21 }
 0x1b7   :  { %v12759_v15 = vpop.eup %12758 }
 0x1b8   :  { %v12761_v17 = vpop.eup %12760  ;;  %v741_v20 = vmul.f32 %v12759_v15, %v12757_v12 }
 0x1b9   :  { %v740_v24 = vmul.f32 0.0, %v12761_v17  ;;  %v12763_v30 = vpop.eup %12762 }
 0x1bb   :  { %v14047_v28 = vadd.f32 %v741_v20, %v740_v24  ;;  %v1246_v24 = vld [vmem:[#allocation7 + $0x8] sm:$0xff] }
 0x1bd   :  { %12764 = vtanh.f32 %v14047_v28 }
 0x1c7   :  { %v12765_v33 = vpop.eup %12764 }
 0x1c8   :  { %v14050_v39 = vmul.f32 %v12765_v33, %v12763_v30  ;;  %v1250_v30 = vld [vmem:[#allocation7 + $0x28] sm:$0xff] }
 0x1c9   :  { %v14100_v33 = vpack.c.bf16 %v1250_v30, %v1246_v24  ;;  %v1513_v30 = vld [vmem:[#allocation7 + $0xb8] sm:$0xff] }
 0x1ca   :  { %884 = vmatmul.mubr.f32.vlgmr.msra.gmra.mrb[2].mxu0 %v14050_v39  ;;  %955 = vmatmul.mubr.f32.vlgmr.msra.gmra.mrb[2].mxu1 %v14050_v39 }
 0x1cb   :  { %10189 = vmatpush1.bf16.msra.mxu0 %v13853_v47  ;;  %10221 = vmatpush1.bf16.msra.mxu1 %v13856_v50 }
 0x1cc   :  { %10191 = vmatprep.subr.bf16.mxu0 %v13859_v53  ;;  %10223 = vmatprep.subr.bf16.mxu1 %v13861_v56 }
 0x1cd   :  { %1128 = vmatprep.mubr.f32.mxu0 %v16172_v0  ;;  %1199 = vmatprep.mubr.f32.mxu1 %v16172_v0 }
 0x1cf   :  { %10193 = vmatpush1.bf16.msra.mxu0 %v13867_v60  ;;  %10225 = vmatpush1.bf16.msra.mxu1 %v13871_v63 }
 0x1d0   :  { %10195 = vmatprep.subr.bf16.mxu0 %v13875_v3  ;;  %10227 = vmatprep.subr.bf16.mxu1 %v13878_v6 }
 0x1d3   :  { %10197 = vmatpush1.bf16.msra.mxu0 %v13884_v10  ;;  %10229 = vmatpush1.bf16.msra.mxu1 %v13888_v13 }
 0x1d4   :  { %10199 = vmatprep.subr.bf16.mxu0 %v13892_v16  ;;  %10231 = vmatprep.subr.bf16.mxu1 %v13895_v19 }
 0x1d7   :  { %10201 = vmatpush1.bf16.msra.mxu0 %v13901_v23  ;;  %10233 = vmatpush1.bf16.msra.mxu1 %v13905_v26 }
 0x1d8   :  { %10203 = vmatprep.subr.bf16.mxu0 %v13909_v29  ;;  %10235 = vmatprep.subr.bf16.mxu1 %v13912_v32 }
 0x1db   :  { %10205 = vmatpush1.bf16.msra.mxu0 %v13918_v36  ;;  %10237 = vmatpush1.bf16.msra.mxu1 %v13922_v40 }
 0x1dc   :  { %10207 = vmatprep.subr.bf16.mxu0 %v13926_v44  ;;  %10239 = vmatprep.subr.bf16.mxu1 %v13929_v48 }
 0x1df   :  { %10209 = vmatpush1.bf16.msra.mxu0 %v13935_v54  ;;  %10241 = vmatpush1.bf16.msra.mxu1 %v13939_v58 }
 0x1e0   :  { %10211 = vmatprep.subr.bf16.mxu0 %v13943_v62  ;;  %10243 = vmatprep.subr.bf16.mxu1 %v13946_v4 }
 0x1e3   :  { %10213 = vmatpush1.bf16.msra.mxu0 %v13952_v9  ;;  %10245 = vmatpush1.bf16.msra.mxu1 %v13956_v14 }
 0x1e4   :  { %10215 = vmatprep.subr.bf16.mxu0 %v13960_v18  ;;  %10247 = vmatprep.subr.bf16.mxu1 %v13963_v22 }
 0x1e7   :  { %10217 = vmatpush1.bf16.msra.mxu0 %v13969_v25  ;;  %10249 = vmatpush1.bf16.msra.mxu1 %v13973_v27 }
 0x1e8   :  { %10251 = vmatprep.subr.bf16.mxu0 %v14100_v33 }
 0x29d   :  { %v885_v47 = vpop.f32.mrb[2].mxu0  ;;  %v956_v50 = vpop.f32.mrb[2].mxu1 }
 0x29e   :  { %v12484_v53 = vadd.f32 %v885_v47, %v14028_v35  ;;  %v887_v56 = vpop.f32.mrb[3].mxu0  ;;  %v958_v60 = vpop.f32.mrb[3].mxu1  ;;  %v12500_v46 = vadd.f32 %v956_v50, %v14044_v59  ;;  %v1252_v47 = vld [vmem:[#allocation7 + $0x38] sm:$0xff]  ;;  %v1245_v50 = vld [vmem:[#allocation7] sm:$0xff] }
 0x29f   :  { %v12485_v63 = vadd.f32 %v887_v56, %v14031_v37  ;;  %v12501_v43 = vadd.f32 %v958_v60, %v14038_v52 }
 0x2a0   :  { %v9791_v41 = vmul.f32 -1.442695, %v12484_v53  ;;  %v1249_v53 = vld [vmem:[#allocation7 + $0x20] sm:$0xff] }
 0x2a1   :  { %v9792_v42 = vmul.f32 -1.442695, %v12485_v63  ;;  %v9793_v45 = vmul.f32 -1.442695, %v12501_v43  ;;  %v14104_v60 = vpack.c.bf16 %v1249_v53, %v1245_v50  ;;  %v1247_v63 = vld [vmem:[#allocation7 + $0x10] sm:$0xff]  ;;  %v1254_v43 = vld [vmem:[#allocation7 + $0x48] sm:$0xff] }
 0x2a2   :  { %12766 = vpow2.f32 %v9791_v41  ;;  %v1251_v41 = vld [vmem:[#allocation7 + $0x30] sm:$0xff] }
 0x2a3   :  { %12768 = vpow2.f32 %v9792_v42  ;;  %v14107_v42 = vpack.c.bf16 %v1251_v41, %v1247_v63  ;;  %v1508_v63 = vld [vmem:[#allocation7 + $0x90] sm:$0xff] }
 0x2a4   :  { %12770 = vpow2.f32 %v9793_v45  ;;  %v1258_v45 = vld [vmem:[#allocation7 + $0x68] sm:$0xff]  ;;  %v1512_v41 = vld [vmem:[#allocation7 + $0xb0] sm:$0xff] }
 0x2a5   :  { %12772 = vtanh.f32 %v12500_v46  ;;  %v1256_v46 = vld [vmem:[#allocation7 + $0x58] sm:$0xff] }
 0x2ac   :  { %v12767_v49 = vpop.eup %12766 }
 0x2ad   :  { %v12769_v51 = vpop.eup %12768  ;;  %v968_v57 = vadd.f32 1.0, %v12767_v49  ;;  %v14112_v49 = vpack.c.bf16 %v1258_v45, %v1254_v43  ;;  %v14177_v43 = vpack.c.bf16 %v1512_v41, %v1508_v63  ;;  %v1515_v45 = vld [vmem:[#allocation7 + $0xc8] sm:$0xff]  ;;  %v1541_v41 = vld [vmem:[#allocation7 + $0x198] sm:$0xff] }
 0x2ae   :  { %v974_v61 = vadd.f32 1.0, %v12769_v51  ;;  %v12771_v1 = vpop.eup %12770  ;;  %v1260_v51 = vld [vmem:[#allocation7 + $0x78] sm:$0xff]  ;;  %v1543_v63 = vld [vmem:[#allocation7 + $0x1a8] sm:$0xff] }
 0x2af   :  { %12774 = vrcp.f32 %v968_v57  ;;  %v12773_v2 = vpop.eup %12772  ;;  %v981_v11 = vadd.f32 1.0, %v12771_v1  ;;  %v1253_v57 = vld [vmem:[#allocation7 + $0x40] sm:$0xff]  ;;  %v14114_v1 = vpack.c.bf16 %v1260_v51, %v1256_v46  ;;  %v1519_v46 = vld [vmem:[#allocation7 + $0xe8] sm:$0xff]  ;;  %v1517_v51 = vld [vmem:[#allocation7 + $0xd8] sm:$0xff] }
 0x2b0   :  { %12776 = vrcp.f32 %v974_v61  ;;  %v1257_v61 = vld [vmem:[#allocation7 + $0x60] sm:$0xff] }
 0x2b1   :  { %12778 = vrcp.f32 %v981_v11 }
 0x2b9   :  { %v12775_v5 = vpop.eup %12774 }
 0x2ba   :  { %v12777_v7 = vpop.eup %12776  ;;  %v985_v8 = vmul.f32 %v12775_v5, %v12773_v2  ;;  %v14116_v2 = vpack.c.bf16 %v1257_v61, %v1253_v57  ;;  %v1255_v5 = vld [vmem:[#allocation7 + $0x50] sm:$0xff]  ;;  %v14182_v57 = vpack.c.bf16 %v1519_v46, %v1515_v45  ;;  %v1521_v61 = vld [vmem:[#allocation7 + $0xf8] sm:$0xff] }
 0x2bb   :  { %v984_v12 = vmul.f32 %v12777_v7, %v14047_v28  ;;  %v12779_v17 = vpop.eup %12778  ;;  %v1248_v28 = vld [vmem:[#allocation7 + $0x18] sm:$0xff]  ;;  %v1259_v7 = vld [vmem:[#allocation7 + $0x70] sm:$0xff] }
 0x2bc   :  { %v14102_v56 = vpack.c.bf16 %v1252_v47, %v1248_v28  ;;  %v1506_v28 = vld [vmem:[#allocation7 + $0x80] sm:$0xff]  ;;  %v1545_v46 = vld [vmem:[#allocation7 + $0x1b8] sm:$0xff] }
 0x2bd   :  { %v14091_v15 = vadd.f32 %v985_v8, %v984_v12  ;;  %v14119_v8 = vpack.c.bf16 %v1259_v7, %v1255_v5  ;;  %v1510_v47 = vld [vmem:[#allocation7 + $0xa0] sm:$0xff] }
 0x2be   :  { %10283 = vmatprep.subr.bf16.mxu1 %v14102_v56  ;;  %v14174_v53 = vpack.c.bf16 %v1510_v47, %v1506_v28  ;;  %v1514_v5 = vld [vmem:[#allocation7 + $0xc0] sm:$0xff]  ;;  %v1539_v47 = vld [vmem:[#allocation7 + $0x188] sm:$0xff] }
 0x2bf   :  { %12780 = vtanh.f32 %v14091_v15  ;;  %v1518_v7 = vld [vmem:[#allocation7 + $0xe0] sm:$0xff]  ;;  %v14218_v45 = vpack.c.bf16 %v1543_v63, %v1539_v47 }
 0x2c9   :  { %v12781_v20 = vpop.eup %12780 }
 0x2ca   :  { %v14094_v21 = vmul.f32 %v12781_v20, %v12779_v17  ;;  %v1511_v17 = vld [vmem:[#allocation7 + $0xa8] sm:$0xff]  ;;  %v1509_v20 = vld [vmem:[#allocation7 + $0x98] sm:$0xff] }
 0x2cb   :  { %v14172_v50 = vpack.c.bf16 %v1513_v30, %v1509_v20  ;;  %v1532_v20 = vld [vmem:[#allocation7 + $0x150] sm:$0xff] }
 0x2cc   :  { %1129 = vmatmul.mubr.f32.vlgmr.msra.gmra.mrb[4].mxu0 %v14094_v21  ;;  %1200 = vmatmul.mubr.f32.vlgmr.msra.gmra.mrb[4].mxu1 %v14094_v21  ;;  %v1536_v30 = vld [vmem:[#allocation7 + $0x170] sm:$0xff] }
 0x2cd   :  { %1373 = vmatprep.mubr.f32.mxu0 %v16172_v0  ;;  %1444 = vmatprep.mubr.f32.mxu1 %v16172_v0  ;;  %v14213_v28 = vpack.c.bf16 %v1536_v30, %v1532_v20 }
 0x2ce   :  { %10253 = vmatpush1.bf16.msra.mxu0 %v14104_v60  ;;  %10285 = vmatpush1.bf16.msra.mxu1 %v14107_v42 }
 0x2cf   :  { %10255 = vmatprep.subr.bf16.mxu0 %v14112_v49  ;;  %10287 = vmatprep.subr.bf16.mxu1 %v14114_v1 }
 0x2d2   :  { %10257 = vmatpush1.bf16.msra.mxu0 %v14116_v2  ;;  %10289 = vmatpush1.bf16.msra.mxu1 %v14119_v8 }
 0x2d3   :  { %10259 = vmatprep.subr.bf16.mxu0 %v13875_v3  ;;  %10291 = vmatprep.subr.bf16.mxu1 %v13878_v6 }
 0x2d6   :  { %10261 = vmatpush1.bf16.msra.mxu0 %v13884_v10  ;;  %10293 = vmatpush1.bf16.msra.mxu1 %v13888_v13 }
 0x2d7   :  { %10263 = vmatprep.subr.bf16.mxu0 %v13892_v16  ;;  %10295 = vmatprep.subr.bf16.mxu1 %v13895_v19 }
 0x2da   :  { %10265 = vmatpush1.bf16.msra.mxu0 %v13901_v23  ;;  %10297 = vmatpush1.bf16.msra.mxu1 %v13905_v26 }
 0x2db   :  { %10267 = vmatprep.subr.bf16.mxu0 %v13909_v29  ;;  %10299 = vmatprep.subr.bf16.mxu1 %v13912_v32 }
 0x2de   :  { %10269 = vmatpush1.bf16.msra.mxu0 %v13918_v36  ;;  %10301 = vmatpush1.bf16.msra.mxu1 %v13922_v40 }
 0x2df   :  { %10271 = vmatprep.subr.bf16.mxu0 %v13926_v44  ;;  %10303 = vmatprep.subr.bf16.mxu1 %v13929_v48 }
 0x2e2   :  { %10273 = vmatpush1.bf16.msra.mxu0 %v13935_v54  ;;  %10305 = vmatpush1.bf16.msra.mxu1 %v13939_v58 }
 0x2e3   :  { %10275 = vmatprep.subr.bf16.mxu0 %v13943_v62  ;;  %10307 = vmatprep.subr.bf16.mxu1 %v13946_v4 }
 0x2e6   :  { %10277 = vmatpush1.bf16.msra.mxu0 %v13952_v9  ;;  %10309 = vmatpush1.bf16.msra.mxu1 %v13956_v14 }
 0x2e7   :  { %10279 = vmatprep.subr.bf16.mxu0 %v13960_v18  ;;  %10311 = vmatprep.subr.bf16.mxu1 %v13963_v22 }
 0x2ea   :  { %10281 = vmatpush1.bf16.msra.mxu0 %v13969_v25  ;;  %10313 = vmatpush1.bf16.msra.mxu1 %v13973_v27 }
 0x2eb   :  { %10315 = vmatprep.subr.bf16.mxu0 %v14100_v33  ;;  %10347 = vmatprep.subr.bf16.mxu1 %v14102_v56 }
 0x39f   :  { %v1130_v3 = vpop.f32.mrb[4].mxu0  ;;  %v1201_v6 = vpop.f32.mrb[4].mxu1 }
 0x3a0   :  { %v12486_v10 = vadd.f32 %v1130_v3, %v14028_v35  ;;  %v1132_v13 = vpop.f32.mrb[5].mxu0  ;;  %v1203_v16 = vpop.f32.mrb[5].mxu1  ;;  %v12502_v36 = vadd.f32 %v1201_v6, %v14044_v59  ;;  %v14184_v3 = vpack.c.bf16 %v1521_v61, %v1517_v51  ;;  %v14186_v6 = vpack.c.bf16 %v1518_v7, %v1514_v5  ;;  %v1538_v51 = vld [vmem:[#allocation7 + $0x180] sm:$0xff] }
 0x3a1   :  { %v12487_v19 = vadd.f32 %v1132_v13, %v14031_v37  ;;  %v12503_v29 = vadd.f32 %v1203_v16, %v14038_v52  ;;  %v1520_v13 = vld [vmem:[#allocation7 + $0xf0] sm:$0xff]  ;;  %v1542_v61 = vld [vmem:[#allocation7 + $0x1a0] sm:$0xff]  ;;  %v14220_v5 = vpack.c.bf16 %v1545_v46, %v1541_v41 }
 0x3a2   :  { %v9794_v23 = vmul.f32 -1.442695, %v12486_v10  ;;  %v1516_v10 = vld [vmem:[#allocation7 + $0xd0] sm:$0xff]  ;;  %v14222_v7 = vpack.c.bf16 %v1542_v61, %v1538_v51 }
 0x3a3   :  { %v9795_v26 = vmul.f32 -1.442695, %v12487_v19  ;;  %v9796_v32 = vmul.f32 -1.442695, %v12503_v29  ;;  %v14189_v16 = vpack.c.bf16 %v1520_v13, %v1516_v10  ;;  %v1523_v19 = vld [vmem:[#allocation7 + $0x108] sm:$0xff]  ;;  %v1540_v10 = vld [vmem:[#allocation7 + $0x190] sm:$0xff] }
 0x3a4   :  { %12782 = vpow2.f32 %v9794_v23  ;;  %v1527_v23 = vld [vmem:[#allocation7 + $0x128] sm:$0xff]  ;;  %v1544_v13 = vld [vmem:[#allocation7 + $0x1b0] sm:$0xff] }
 0x3a5   :  { %12784 = vpow2.f32 %v9795_v26  ;;  %v1525_v26 = vld [vmem:[#allocation7 + $0x118] sm:$0xff]  ;;  %v14194_v29 = vpack.c.bf16 %v1527_v23, %v1523_v19  ;;  %v14225_v19 = vpack.c.bf16 %v1544_v13, %v1540_v10  ;;  %v1547_v23 = vld [vmem:[#allocation7 + $0x1c8] sm:$0xff] }
 0x3a6   :  { %12786 = vpow2.f32 %v9796_v32  ;;  %v1529_v32 = vld [vmem:[#allocation7 + $0x138] sm:$0xff] }
 0x3a7   :  { %12788 = vtanh.f32 %v12502_v36  ;;  %v1522_v36 = vld [vmem:[#allocation7 + $0x100] sm:$0xff] }
 0x3ae   :  { %v12783_v40 = vpop.eup %12782 }
 0x3af   :  { %v12785_v44 = vpop.eup %12784  ;;  %v1213_v48 = vadd.f32 1.0, %v12783_v40  ;;  %v1526_v40 = vld [vmem:[#allocation7 + $0x120] sm:$0xff] }
 0x3b0   :  { %v1219_v54 = vadd.f32 1.0, %v12785_v44  ;;  %v12787_v58 = vpop.eup %12786  ;;  %v14196_v44 = vpack.c.bf16 %v1529_v32, %v1525_v26  ;;  %v1551_v26 = vld [vmem:[#allocation7 + $0x1e8] sm:$0xff]  ;;  %v1549_v32 = vld [vmem:[#allocation7 + $0x1d8] sm:$0xff] }
 0x3b1   :  { %12790 = vrcp.f32 %v1213_v48  ;;  %v12789_v62 = vpop.eup %12788  ;;  %v1226_v18 = vadd.f32 1.0, %v12787_v58  ;;  %v14198_v48 = vpack.c.bf16 %v1526_v40, %v1522_v36  ;;  %v1528_v58 = vld [vmem:[#allocation7 + $0x130] sm:$0xff]  ;;  %v14230_v36 = vpack.c.bf16 %v1551_v26, %v1547_v23  ;;  %v1553_v40 = vld [vmem:[#allocation7 + $0x1f8] sm:$0xff] }
 0x3b2   :  { %12792 = vrcp.f32 %v1219_v54  ;;  %v1524_v54 = vld [vmem:[#allocation7 + $0x110] sm:$0xff] }
 0x3b3   :  { %12794 = vrcp.f32 %v1226_v18 }
 0x3bb   :  { %v12791_v4 = vpop.eup %12790 }
 0x3bc   :  { %v12793_v9 = vpop.eup %12792  ;;  %v1230_v14 = vmul.f32 %v12791_v4, %v12789_v62  ;;  %v14201_v62 = vpack.c.bf16 %v1528_v58, %v1524_v54  ;;  %v1531_v4 = vld [vmem:[#allocation7 + $0x148] sm:$0xff]  ;;  %v1546_v54 = vld [vmem:[#allocation7 + $0x1c0] sm:$0xff] }
 0x3bd   :  { %v1229_v22 = vmul.f32 %v12793_v9, %v14091_v15  ;;  %v12795_v27 = vpop.eup %12794  ;;  %v1507_v15 = vld [vmem:[#allocation7 + $0x88] sm:$0xff]  ;;  %v1550_v58 = vld [vmem:[#allocation7 + $0x1e0] sm:$0xff] }
 0x3be   :  { %v14170_v24 = vpack.c.bf16 %v1511_v17, %v1507_v15  ;;  %v1535_v9 = vld [vmem:[#allocation7 + $0x168] sm:$0xff] }
 0x3bf   :  { %v14155_v25 = vadd.f32 %v1230_v14, %v1229_v22  ;;  %v1533_v14 = vld [vmem:[#allocation7 + $0x158] sm:$0xff]  ;;  %v14206_v18 = vpack.c.bf16 %v1535_v9, %v1531_v4  ;;  %v14232_v4 = vpack.c.bf16 %v1553_v40, %v1549_v32  ;;  %v14234_v9 = vpack.c.bf16 %v1550_v58, %v1546_v54 }
 0x3c0   :  { %v1537_v22 = vld [vmem:[#allocation7 + $0x178] sm:$0xff] }
 0x3c1   :  { %12796 = vtanh.f32 %v14155_v25  ;;  %v14208_v15 = vpack.c.bf16 %v1537_v22, %v1533_v14  ;;  %v1548_v14 = vld [vmem:[#allocation7 + $0x1d0] sm:$0xff] }
 0x3c2   :  { %v1552_v22 = vld [vmem:[#allocation7 + $0x1f0] sm:$0xff] }
 0x3cb   :  { %v12797_v11 = vpop.eup %12796 }
 0x3cc   :  { %v14158_v12 = vmul.f32 %v12797_v11, %v12795_v27  ;;  %v1530_v27 = vld [vmem:[#allocation7 + $0x140] sm:$0xff] }
 0x3cd   :  { %v1534_v11 = vld [vmem:[#allocation7 + $0x160] sm:$0xff] }
 0x3ce   :  { %1374 = vmatmul.mubr.f32.vlgmr.msra.gmra.mrb[6].mxu0 %v14158_v12  ;;  %1445 = vmatmul.mubr.f32.vlgmr.msra.gmra.mrb[6].mxu1 %v14158_v12  ;;  %v14210_v17 = vpack.c.bf16 %v1534_v11, %v1530_v27  ;;  %v14237_v27 = vpack.c.bf16 %v1552_v22, %v1548_v14 }
 0x3cf   :  { %10317 = vmatpush1.bf16.msra.mxu0 %v14104_v60  ;;  %10349 = vmatpush1.bf16.msra.mxu1 %v14107_v42 }
 0x3d0   :  { %10319 = vmatprep.subr.bf16.mxu0 %v14112_v49  ;;  %10351 = vmatprep.subr.bf16.mxu1 %v14114_v1 }
 0x3d1   :  { %1618 = vmatprep.mubr.f32.mxu0 %v16172_v0  ;;  %1689 = vmatprep.mubr.f32.mxu1 %v16172_v0 }
 0x3d3   :  { %10321 = vmatpush1.bf16.msra.mxu0 %v14116_v2  ;;  %10353 = vmatpush1.bf16.msra.mxu1 %v14119_v8 }
 0x3d4   :  { %10323 = vmatprep.subr.bf16.mxu0 %v14170_v24  ;;  %10355 = vmatprep.subr.bf16.mxu1 %v14172_v50 }
 0x3d7   :  { %10325 = vmatpush1.bf16.msra.mxu0 %v14174_v53  ;;  %10357 = vmatpush1.bf16.msra.mxu1 %v14177_v43 }
 0x3d8   :  { %10327 = vmatprep.subr.bf16.mxu0 %v14182_v57  ;;  %10359 = vmatprep.subr.bf16.mxu1 %v14184_v3 }
 0x3db   :  { %10329 = vmatpush1.bf16.msra.mxu0 %v14186_v6  ;;  %10361 = vmatpush1.bf16.msra.mxu1 %v14189_v16 }
 0x3dc   :  { %10331 = vmatprep.subr.bf16.mxu0 %v14194_v29  ;;  %10363 = vmatprep.subr.bf16.mxu1 %v14196_v44 }
 0x3df   :  { %10333 = vmatpush1.bf16.msra.mxu0 %v14198_v48  ;;  %10365 = vmatpush1.bf16.msra.mxu1 %v14201_v62 }
 0x3e0   :  { %10335 = vmatprep.subr.bf16.mxu0 %v14206_v18  ;;  %10367 = vmatprep.subr.bf16.mxu1 %v14208_v15 }
 0x3e3   :  { %10337 = vmatpush1.bf16.msra.mxu0 %v14210_v17  ;;  %10369 = vmatpush1.bf16.msra.mxu1 %v14213_v28 }
 0x3e4   :  { %10339 = vmatprep.subr.bf16.mxu0 %v14218_v45  ;;  %10371 = vmatprep.subr.bf16.mxu1 %v14220_v5 }
 0x3e7   :  { %10341 = vmatpush1.bf16.msra.mxu0 %v14222_v7  ;;  %10373 = vmatpush1.bf16.msra.mxu1 %v14225_v19 }
 0x3e8   :  { %10343 = vmatprep.subr.bf16.mxu0 %v14230_v36  ;;  %10375 = vmatprep.subr.bf16.mxu1 %v14232_v4 }
 0x3eb   :  { %10345 = vmatpush1.bf16.msra.mxu0 %v14234_v9  ;;  %10377 = vmatpush1.bf16.msra.mxu1 %v14237_v27 }
 0x3ec   :  { %10379 = vmatprep.subr.bf16.mxu0 %v14100_v33  ;;  %10411 = vmatprep.subr.bf16.mxu1 %v14102_v56 }
 0x4a1   :  { %v1375_v11 = vpop.f32.mrb[6].mxu0  ;;  %v1446_v20 = vpop.f32.mrb[6].mxu1 }
 0x4a2   :  { %v12488_v30 = vadd.f32 %v1375_v11, %v14028_v35  ;;  %v1377_v47 = vpop.f32.mrb[7].mxu0  ;;  %v1448_v63 = vpop.f32.mrb[7].mxu1  ;;  %v12504_v13 = vadd.f32 %v1446_v20, %v14044_v59 }
 0x4a3   :  { %v12489_v41 = vadd.f32 %v1377_v47, %v14031_v37  ;;  %v12505_v61 = vadd.f32 %v1448_v63, %v14038_v52 }
 0x4a4   :  { %v9797_v46 = vmul.f32 -1.442695, %v12488_v30 }
 0x4a5   :  { %v9798_v51 = vmul.f32 -1.442695, %v12489_v41  ;;  %v9799_v10 = vmul.f32 -1.442695, %v12505_v61 }
 0x4a6   :  { %12798 = vpow2.f32 %v9797_v46 }
 0x4a7   :  { %12800 = vpow2.f32 %v9798_v51 }
 0x4a8   :  { %12802 = vpow2.f32 %v9799_v10 }
 0x4a9   :  { %12804 = vtanh.f32 %v12504_v13 }
 0x4b0   :  { %v12799_v23 = vpop.eup %12798 }
 0x4b1   :  { %v12801_v26 = vpop.eup %12800  ;;  %v1458_v32 = vadd.f32 1.0, %v12799_v23 }
 0x4b2   :  { %v1464_v40 = vadd.f32 1.0, %v12801_v26  ;;  %v12803_v54 = vpop.eup %12802 }
 0x4b3   :  { %12806 = vrcp.f32 %v1458_v32  ;;  %v12805_v58 = vpop.eup %12804  ;;  %v1471_v30 = vadd.f32 1.0, %v12803_v54 }
 0x4b4   :  { %12808 = vrcp.f32 %v1464_v40 }
 0x4b5   :  { %12810 = vrcp.f32 %v1471_v30 }
 0x4bd   :  { %v12807_v14 = vpop.eup %12806 }
 0x4be   :  { %v12809_v22 = vpop.eup %12808  ;;  %v1475_v11 = vmul.f32 %v12807_v14, %v12805_v58 }
 0x4bf   :  { %v1474_v47 = vmul.f32 %v12809_v22, %v14155_v25  ;;  %v12811_v20 = vpop.eup %12810 }
 0x4c1   :  { %v14249_v63 = vadd.f32 %v1475_v11, %v1474_v47 }
 0x4c3   :  { %12812 = vtanh.f32 %v14249_v63 }
 0x4cd   :  { %v12813_v41 = vpop.eup %12812 }
 0x4ce   :  { %v14252_v46 = vmul.f32 %v12813_v41, %v12811_v20 }
 0x4d0   :  { %1619 = vmatmul.mubr.f32.vlgmr.msra.gmra.mrb[8].mxu0 %v14252_v46  ;;  %1690 = vmatmul.mubr.f32.vlgmr.msra.gmra.mrb[8].mxu1 %v14252_v46 }
 0x4d1   :  { %10381 = vmatpush1.bf16.msra.mxu0 %v14104_v60  ;;  %10413 = vmatpush1.bf16.msra.mxu1 %v14107_v42 }
 0x4d2   :  { %10383 = vmatprep.subr.bf16.mxu0 %v14112_v49  ;;  %10415 = vmatprep.subr.bf16.mxu1 %v14114_v1 }
 0x4d3   :  { %1863 = vmatprep.mubr.f32.mxu0 %v16172_v0  ;;  %1934 = vmatprep.mubr.f32.mxu1 %v16172_v0 }
 0x4d5   :  { %10385 = vmatpush1.bf16.msra.mxu0 %v14116_v2  ;;  %10417 = vmatpush1.bf16.msra.mxu1 %v14119_v8 }
 0x4d6   :  { %10387 = vmatprep.subr.bf16.mxu0 %v14170_v24  ;;  %10419 = vmatprep.subr.bf16.mxu1 %v14172_v50 }
 0x4d9   :  { %10389 = vmatpush1.bf16.msra.mxu0 %v14174_v53  ;;  %10421 = vmatpush1.bf16.msra.mxu1 %v14177_v43 }
 0x4da   :  { %10391 = vmatprep.subr.bf16.mxu0 %v14182_v57  ;;  %10423 = vmatprep.subr.bf16.mxu1 %v14184_v3 }
 0x4dd   :  { %10393 = vmatpush1.bf16.msra.mxu0 %v14186_v6  ;;  %10425 = vmatpush1.bf16.msra.mxu1 %v14189_v16 }
 0x4de   :  { %10395 = vmatprep.subr.bf16.mxu0 %v14194_v29  ;;  %10427 = vmatprep.subr.bf16.mxu1 %v14196_v44 }
 0x4e1   :  { %10397 = vmatpush1.bf16.msra.mxu0 %v14198_v48  ;;  %10429 = vmatpush1.bf16.msra.mxu1 %v14201_v62 }
 0x4e2   :  { %10399 = vmatprep.subr.bf16.mxu0 %v14206_v18  ;;  %10431 = vmatprep.subr.bf16.mxu1 %v14208_v15 }
 0x4e5   :  { %10401 = vmatpush1.bf16.msra.mxu0 %v14210_v17  ;;  %10433 = vmatpush1.bf16.msra.mxu1 %v14213_v28 }
 0x4e6   :  { %10403 = vmatprep.subr.bf16.mxu0 %v14218_v45  ;;  %10435 = vmatprep.subr.bf16.mxu1 %v14220_v5 }
 0x4e9   :  { %10405 = vmatpush1.bf16.msra.mxu0 %v14222_v7  ;;  %10437 = vmatpush1.bf16.msra.mxu1 %v14225_v19 }
 0x4ea   :  { %10407 = vmatprep.subr.bf16.mxu0 %v14230_v36  ;;  %10439 = vmatprep.subr.bf16.mxu1 %v14232_v4 }
 0x4ed   :  { %10409 = vmatpush1.bf16.msra.mxu0 %v14234_v9  ;;  %10441 = vmatpush1.bf16.msra.mxu1 %v14237_v27 }
 0x4ee   :  { %10443 = vmatprep.subr.bf16.mxu0 %v14100_v33  ;;  %10475 = vmatprep.subr.bf16.mxu1 %v14102_v56 }
 0x5a3   :  { %v1620_v25 = vpop.f32.mrb[8].mxu0  ;;  %v1691_v51 = vpop.f32.mrb[8].mxu1 }
 0x5a4   :  { %v12490_v61 = vadd.f32 %v1620_v25, %v14028_v35  ;;  %v1622_v10 = vpop.f32.mrb[9].mxu0  ;;  %v1693_v13 = vpop.f32.mrb[9].mxu1  ;;  %v12506_v58 = vadd.f32 %v1691_v51, %v14044_v59 }
 0x5a5   :  { %v12491_v23 = vadd.f32 %v1622_v10, %v14031_v37  ;;  %v12507_v40 = vadd.f32 %v1693_v13, %v14038_v52 }
 0x5a6   :  { %v9800_v26 = vmul.f32 -1.442695, %v12490_v61 }
 0x5a7   :  { %v9801_v32 = vmul.f32 -1.442695, %v12491_v23  ;;  %v9802_v54 = vmul.f32 -1.442695, %v12507_v40 }
 0x5a8   :  { %12814 = vpow2.f32 %v9800_v26 }
 0x5a9   :  { %12816 = vpow2.f32 %v9801_v32 }
 0x5aa   :  { %12818 = vpow2.f32 %v9802_v54 }
 0x5ab   :  { %12820 = vtanh.f32 %v12506_v58 }
 0x5b2   :  { %v12815_v33 = vpop.eup %12814 }
 0x5b3   :  { %v12817_v14 = vpop.eup %12816  ;;  %v1703_v56 = vadd.f32 1.0, %v12815_v33 }
 0x5b4   :  { %v1709_v22 = vadd.f32 1.0, %v12817_v14  ;;  %v12819_v11 = vpop.eup %12818 }
 0x5b5   :  { %12822 = vrcp.f32 %v1703_v56  ;;  %v12821_v30 = vpop.eup %12820  ;;  %v1716_v25 = vadd.f32 1.0, %v12819_v11 }
 0x5b6   :  { %12824 = vrcp.f32 %v1709_v22 }
 0x5b7   :  { %12826 = vrcp.f32 %v1716_v25 }
 0x5bf   :  { %v12823_v47 = vpop.eup %12822 }
 0x5c0   :  { %v12825_v20 = vpop.eup %12824  ;;  %v1720_v41 = vmul.f32 %v12823_v47, %v12821_v30 }
 0x5c1   :  { %v1719_v61 = vmul.f32 %v12825_v20, %v14249_v63  ;;  %v12827_v51 = vpop.eup %12826 }
 0x5c3   :  { %v14295_v10 = vadd.f32 %v1720_v41, %v1719_v61 }
 0x5c5   :  { %12828 = vtanh.f32 %v14295_v10 }
 0x5cf   :  { %v12829_v13 = vpop.eup %12828 }
 0x5d0   :  { %v14298_v23 = vmul.f32 %v12829_v13, %v12827_v51 }
 0x5d2   :  { %1864 = vmatmul.mubr.f32.vlgmr.msra.gmra.mrb[10].mxu0 %v14298_v23  ;;  %1935 = vmatmul.mubr.f32.vlgmr.msra.gmra.mrb[10].mxu1 %v14298_v23 }
 0x5d3   :  { %10445 = vmatpush1.bf16.msra.mxu0 %v14104_v60  ;;  %10477 = vmatpush1.bf16.msra.mxu1 %v14107_v42 }
 0x5d4   :  { %10447 = vmatprep.subr.bf16.mxu0 %v14112_v49  ;;  %10479 = vmatprep.subr.bf16.mxu1 %v14114_v1 }
 0x5d5   :  { %2108 = vmatprep.mubr.f32.mxu0 %v16172_v0  ;;  %2179 = vmatprep.mubr.f32.mxu1 %v16172_v0 }
 0x5d7   :  { %10449 = vmatpush1.bf16.msra.mxu0 %v14116_v2  ;;  %10481 = vmatpush1.bf16.msra.mxu1 %v14119_v8 }
 0x5d8   :  { %10451 = vmatprep.subr.bf16.mxu0 %v14170_v24  ;;  %10483 = vmatprep.subr.bf16.mxu1 %v14172_v50 }
 0x5db   :  { %10453 = vmatpush1.bf16.msra.mxu0 %v14174_v53  ;;  %10485 = vmatpush1.bf16.msra.mxu1 %v14177_v43 }
 0x5dc   :  { %10455 = vmatprep.subr.bf16.mxu0 %v14182_v57  ;;  %10487 = vmatprep.subr.bf16.mxu1 %v14184_v3 }
 0x5df   :  { %10457 = vmatpush1.bf16.msra.mxu0 %v14186_v6  ;;  %10489 = vmatpush1.bf16.msra.mxu1 %v14189_v16 }
 0x5e0   :  { %10459 = vmatprep.subr.bf16.mxu0 %v14194_v29  ;;  %10491 = vmatprep.subr.bf16.mxu1 %v14196_v44 }
 0x5e3   :  { %10461 = vmatpush1.bf16.msra.mxu0 %v14198_v48  ;;  %10493 = vmatpush1.bf16.msra.mxu1 %v14201_v62 }
 0x5e4   :  { %10463 = vmatprep.subr.bf16.mxu0 %v14206_v18  ;;  %10495 = vmatprep.subr.bf16.mxu1 %v14208_v15 }
 0x5e7   :  { %10465 = vmatpush1.bf16.msra.mxu0 %v14210_v17  ;;  %10497 = vmatpush1.bf16.msra.mxu1 %v14213_v28 }
 0x5e8   :  { %10467 = vmatprep.subr.bf16.mxu0 %v14218_v45  ;;  %10499 = vmatprep.subr.bf16.mxu1 %v14220_v5 }
 0x5eb   :  { %10469 = vmatpush1.bf16.msra.mxu0 %v14222_v7  ;;  %10501 = vmatpush1.bf16.msra.mxu1 %v14225_v19 }
 0x5ec   :  { %10471 = vmatprep.subr.bf16.mxu0 %v14230_v36  ;;  %10503 = vmatprep.subr.bf16.mxu1 %v14232_v4 }
 0x5ef   :  { %10473 = vmatpush1.bf16.msra.mxu0 %v14234_v9  ;;  %10505 = vmatpush1.bf16.msra.mxu1 %v14237_v27 }
 0x6a5   :  { %v1865_v60 = vpop.f32.mrb[10].mxu0  ;;  %v1936_v42 = vpop.f32.mrb[10].mxu1 }
 0x6a6   :  { %v12492_v49 = vadd.f32 %v1865_v60, %v14028_v35  ;;  %v1867_v1 = vpop.f32.mrb[11].mxu0  ;;  %v1938_v2 = vpop.f32.mrb[11].mxu1  ;;  %v12508_v54 = vadd.f32 %v1936_v42, %v14044_v59  ;;  %v2226_v42 = vld [vmem:[#allocation7 + $0x8] sm:$0xff] }
 0x6a7   :  { %v12493_v8 = vadd.f32 %v1867_v1, %v14031_v37  ;;  %v12509_v32 = vadd.f32 %v1938_v2, %v14038_v52  ;;  %v2225_v1 = vld [vmem:[#allocation7] sm:$0xff] }
 0x6a8   :  { %v9803_v63 = vmul.f32 -1.442695, %v12492_v49  ;;  %v2230_v49 = vld [vmem:[#allocation7 + $0x28] sm:$0xff]  ;;  %v2229_v2 = vld [vmem:[#allocation7 + $0x20] sm:$0xff] }
 0x6a9   :  { %v9804_v26 = vmul.f32 -1.442695, %v12493_v8  ;;  %v9805_v40 = vmul.f32 -1.442695, %v12509_v32  ;;  %v2228_v8 = vld [vmem:[#allocation7 + $0x18] sm:$0xff]  ;;  %v2227_v32 = vld [vmem:[#allocation7 + $0x10] sm:$0xff] }
 0x6aa   :  { %12830 = vpow2.f32 %v9803_v63  ;;  %v10508_v63 = vpack.c.bf16 %v2229_v2, %v2225_v1 }
 0x6ab   :  { %12832 = vpow2.f32 %v9804_v26  ;;  %v2232_v26 = vld [vmem:[#allocation7 + $0x38] sm:$0xff] }
 0x6ac   :  { %12834 = vpow2.f32 %v9805_v40  ;;  %v2231_v40 = vld [vmem:[#allocation7 + $0x30] sm:$0xff] }
 0x6ad   :  { %12836 = vtanh.f32 %v12508_v54  ;;  %v10538_v54 = vpack.c.bf16 %v2232_v26, %v2228_v8  ;;  %v2471_v8 = vld [vmem:[#allocation9] sm:$0xff]  ;;  %v2480_v26 = vld [vmem:[#allocation9 + $0x48] sm:$0xff] }
 0x6af   :  { %10539 = vmatprep.subr.bf16.mxu1 %v10538_v54  ;;  %v2484_v54 = vld [vmem:[#allocation9 + $0x68] sm:$0xff] }
 0x6b4   :  { %v12831_v58 = vpop.eup %12830 }
 0x6b5   :  { %v12833_v33 = vpop.eup %12832  ;;  %v1948_v14 = vadd.f32 1.0, %v12831_v58  ;;  %v10540_v58 = vpack.c.bf16 %v2231_v40, %v2227_v32  ;;  %v2473_v32 = vld [vmem:[#allocation9 + $0x10] sm:$0xff] }
 0x6b6   :  { %v1954_v56 = vadd.f32 1.0, %v12833_v33  ;;  %v12835_v22 = vpop.eup %12834  ;;  %v2234_v33 = vld [vmem:[#allocation7 + $0x48] sm:$0xff]  ;;  %v2477_v40 = vld [vmem:[#allocation9 + $0x30] sm:$0xff] }
 0x6b7   :  { %12838 = vrcp.f32 %v1948_v14  ;;  %v12837_v11 = vpop.eup %12836  ;;  %v1961_v41 = vadd.f32 1.0, %v12835_v22  ;;  %v2238_v14 = vld [vmem:[#allocation7 + $0x68] sm:$0xff]  ;;  %v2233_v22 = vld [vmem:[#allocation7 + $0x40] sm:$0xff] }
 0x6b8   :  { %12840 = vrcp.f32 %v1954_v56  ;;  %v10510_v56 = vpack.c.bf16 %v2238_v14, %v2234_v33  ;;  %v2486_v33 = vld [vmem:[#allocation9 + $0x78] sm:$0xff] }
 0x6b9   :  { %12842 = vrcp.f32 %v1961_v41  ;;  %v2235_v41 = vld [vmem:[#allocation7 + $0x50] sm:$0xff] }
 0x6c1   :  { %v12839_v30 = vpop.eup %12838 }
 0x6c2   :  { %v12841_v47 = vpop.eup %12840  ;;  %v1965_v20 = vmul.f32 %v12839_v30, %v12837_v11  ;;  %v2237_v11 = vld [vmem:[#allocation7 + $0x60] sm:$0xff]  ;;  %v2236_v30 = vld [vmem:[#allocation7 + $0x58] sm:$0xff] }
 0x6c3   :  { %v1964_v25 = vmul.f32 %v12841_v47, %v14295_v10  ;;  %v12843_v51 = vpop.eup %12842  ;;  %v10506_v10 = vpack.c.bf16 %v2230_v49, %v2226_v42  ;;  %v10512_v47 = vpack.c.bf16 %v2237_v11, %v2233_v22  ;;  %v2479_v11 = vld [vmem:[#allocation9 + $0x40] sm:$0xff] }
 0x6c5   :  { %v14339_v61 = vadd.f32 %v1965_v20, %v1964_v25  ;;  %10507 = vmatprep.subr.bf16.mxu0 %v10506_v10  ;;  %v2240_v20 = vld [vmem:[#allocation7 + $0x78] sm:$0xff]  ;;  %v2239_v25 = vld [vmem:[#allocation7 + $0x70] sm:$0xff] }
 0x6c7   :  { %12844 = vtanh.f32 %v14339_v61 }
 0x6d1   :  { %v12845_v13 = vpop.eup %12844 }
 0x6d2   :  { %v14342_v60 = vmul.f32 %v12845_v13, %v12843_v51  ;;  %v10542_v51 = vpack.c.bf16 %v2240_v20, %v2236_v30  ;;  %v10544_v13 = vpack.c.bf16 %v2239_v25, %v2235_v41  ;;  %v2483_v30 = vld [vmem:[#allocation9 + $0x60] sm:$0xff]  ;;  %v10574_v20 = vpack.c.bf16 %v2484_v54, %v2480_v26  ;;  %v2488_v41 = vld [vmem:[#allocation9 + $0x88] sm:$0xff] }
 0x6d4   :  { %16206 = vst [vmem:[#allocation26_spill] sm:$0xff] %v14342_v60  ;;  %2109 = vmatmul.mubr.f32.vlgmr.msra.gmra.mrb[12].mxu0 %v14342_v60  ;;  %2180 = vmatmul.mubr.f32.vlgmr.msra.gmra.mrb[12].mxu1 %v14342_v60 }
 0x6d5   :  { %2353 = vmatprep.mubr.f32.mxu0 %v16172_v0  ;;  %2424 = vmatprep.mubr.f32.mxu1 %v16172_v0 }
 0x6d6   :  { %10509 = vmatpush1.bf16.msra.mxu0 %v10508_v63  ;;  %10541 = vmatpush1.bf16.msra.mxu1 %v10540_v58  ;;  %v2475_v63 = vld [vmem:[#allocation9 + $0x20] sm:$0xff]  ;;  %v2482_v58 = vld [vmem:[#allocation9 + $0x58] sm:$0xff] }
 0x6d7   :  { %10511 = vmatprep.subr.bf16.mxu0 %v10510_v56  ;;  %10543 = vmatprep.subr.bf16.mxu1 %v10542_v51  ;;  %v10572_v22 = vpack.c.bf16 %v2475_v63, %v2471_v8  ;;  %v10606_v25 = vpack.c.bf16 %v2486_v33, %v2482_v58  ;;  %v2481_v51 = vld [vmem:[#allocation9 + $0x50] sm:$0xff]  ;;  %v2503_v8 = vld [vmem:[#allocation9 + $0x100] sm:$0xff] }
 0x6d8   :  { %v2507_v63 = vld [vmem:[#allocation9 + $0x120] sm:$0xff]  ;;  %v2505_v58 = vld [vmem:[#allocation9 + $0x110] sm:$0xff] }
 0x6d9   :  { %v2509_v33 = vld [vmem:[#allocation9 + $0x130] sm:$0xff] }
 0x6da   :  { %10513 = vmatpush1.bf16.msra.mxu0 %v10512_v47  ;;  %10545 = vmatpush1.bf16.msra.mxu1 %v10544_v13  ;;  %v10604_v47 = vpack.c.bf16 %v2477_v40, %v2473_v32  ;;  %v2485_v13 = vld [vmem:[#allocation9 + $0x70] sm:$0xff]  ;;  %v2512_v40 = vld [vmem:[#allocation9 + $0x148] sm:$0xff] }
 0x6db   :  { %10515 = vmatprep.subr.bf16.mxu0 %v14170_v24  ;;  %10547 = vmatprep.subr.bf16.mxu1 %v14172_v50  ;;  %v2472_v24 = vld [vmem:[#allocation9 + $0x8] sm:$0xff] }
 0x6dc   :  { %v2476_v50 = vld [vmem:[#allocation9 + $0x28] sm:$0xff] }
 0x6de   :  { %10517 = vmatpush1.bf16.msra.mxu0 %v14174_v53  ;;  %10549 = vmatpush1.bf16.msra.mxu1 %v14177_v43  ;;  %v10570_v53 = vpack.c.bf16 %v2476_v50, %v2472_v24  ;;  %v2474_v43 = vld [vmem:[#allocation9 + $0x18] sm:$0xff]  ;;  %v2492_v24 = vld [vmem:[#allocation9 + $0xa8] sm:$0xff] }
 0x6df   :  { %10519 = vmatprep.subr.bf16.mxu0 %v14182_v57  ;;  %10551 = vmatprep.subr.bf16.mxu1 %v14184_v3  ;;  %v2478_v57 = vld [vmem:[#allocation9 + $0x38] sm:$0xff] }
 0x6e0   :  { %v10602_v3 = vpack.c.bf16 %v2478_v57, %v2474_v43  ;;  %v2490_v50 = vld [vmem:[#allocation9 + $0x98] sm:$0xff]  ;;  %v10576_v43 = vpack.c.bf16 %v2483_v30, %v2479_v11  ;;  %v2487_v57 = vld [vmem:[#allocation9 + $0x80] sm:$0xff]  ;;  %v10588_v11 = vpack.c.bf16 %v2507_v63, %v2503_v8 }
 0x6e1   :  { %v2511_v30 = vld [vmem:[#allocation9 + $0x140] sm:$0xff] }
 0x6e2   :  { %10521 = vmatpush1.bf16.msra.mxu0 %v14186_v6  ;;  %10553 = vmatpush1.bf16.msra.mxu1 %v14189_v16 }
 0x6e3   :  { %10523 = vmatprep.subr.bf16.mxu0 %v14194_v29  ;;  %10555 = vmatprep.subr.bf16.mxu1 %v14196_v44 }
 0x6e6   :  { %10525 = vmatpush1.bf16.msra.mxu0 %v14198_v48  ;;  %10557 = vmatpush1.bf16.msra.mxu1 %v14201_v62 }
 0x6e7   :  { %10527 = vmatprep.subr.bf16.mxu0 %v14206_v18  ;;  %10559 = vmatprep.subr.bf16.mxu1 %v14208_v15 }
 0x6ea   :  { %10529 = vmatpush1.bf16.msra.mxu0 %v14210_v17  ;;  %10561 = vmatpush1.bf16.msra.mxu1 %v14213_v28 }
 0x6eb   :  { %10531 = vmatprep.subr.bf16.mxu0 %v14218_v45  ;;  %10563 = vmatprep.subr.bf16.mxu1 %v14220_v5 }
 0x6ee   :  { %10533 = vmatpush1.bf16.msra.mxu0 %v14222_v7  ;;  %10565 = vmatpush1.bf16.msra.mxu1 %v14225_v19 }
 0x6ef   :  { %10535 = vmatprep.subr.bf16.mxu0 %v14230_v36  ;;  %10567 = vmatprep.subr.bf16.mxu1 %v14232_v4 }
 0x6f2   :  { %10537 = vmatpush1.bf16.msra.mxu0 %v14234_v9  ;;  %10569 = vmatpush1.bf16.msra.mxu1 %v14237_v27 }
 0x6f3   :  { %10571 = vmatprep.subr.bf16.mxu0 %v10570_v53  ;;  %10603 = vmatprep.subr.bf16.mxu1 %v10602_v3  ;;  %v2494_v53 = vld [vmem:[#allocation9 + $0xb8] sm:$0xff]  ;;  %v2491_v3 = vld [vmem:[#allocation9 + $0xa0] sm:$0xff] }
 0x7a7   :  { %v2110_v6 = vpop.f32.mrb[12].mxu0  ;;  %v2181_v16 = vpop.f32.mrb[12].mxu1 }
 0x7a8   :  { %v12494_v29 = vadd.f32 %v2110_v6, %v14028_v35  ;;  %v2112_v44 = vpop.f32.mrb[13].mxu0  ;;  %v2183_v48 = vpop.f32.mrb[13].mxu1  ;;  %v12510_v45 = vadd.f32 %v2181_v16, %v14044_v59  ;;  %v10608_v6 = vpack.c.bf16 %v2485_v13, %v2481_v51  ;;  %v10578_v16 = vpack.c.bf16 %v2492_v24, %v2488_v41  ;;  %v2513_v13 = vld [vmem:[#allocation9 + $0x150] sm:$0xff] }
 0x7a9   :  { %v12495_v62 = vadd.f32 %v2112_v44, %v14031_v37  ;;  %v12511_v17 = vadd.f32 %v2183_v48, %v14038_v52  ;;  %v10610_v44 = vpack.c.bf16 %v2494_v53, %v2490_v50  ;;  %v2489_v48 = vld [vmem:[#allocation9 + $0x90] sm:$0xff]  ;;  %v2524_v50 = vld [vmem:[#allocation9 + $0x1a8] sm:$0xff]  ;;  %v2522_v53 = vld [vmem:[#allocation9 + $0x198] sm:$0xff] }
 0x7aa   :  { %v9806_v18 = vmul.f32 -1.442695, %v12494_v29  ;;  %v2496_v29 = vld [vmem:[#allocation9 + $0xc8] sm:$0xff]  ;;  %v2517_v24 = vld [vmem:[#allocation9 + $0x170] sm:$0xff] }
 0x7ab   :  { %v9807_v15 = vmul.f32 -1.442695, %v12495_v62  ;;  %v9808_v28 = vmul.f32 -1.442695, %v12511_v17  ;;  %v2493_v62 = vld [vmem:[#allocation9 + $0xb0] sm:$0xff]  ;;  %v2502_v17 = vld [vmem:[#allocation9 + $0xf8] sm:$0xff] }
 0x7ac   :  { %12846 = vpow2.f32 %v9806_v18  ;;  %v2500_v18 = vld [vmem:[#allocation9 + $0xe8] sm:$0xff] }
 0x7ad   :  { %12848 = vpow2.f32 %v9807_v15  ;;  %v2498_v15 = vld [vmem:[#allocation9 + $0xd8] sm:$0xff] }
 0x7ae   :  { %12850 = vpow2.f32 %v9808_v28  ;;  %v10580_v28 = vpack.c.bf16 %v2491_v3, %v2487_v57  ;;  %v2519_v3 = vld [vmem:[#allocation9 + $0x180] sm:$0xff] }
 0x7af   :  { %12852 = vtanh.f32 %v12510_v45  ;;  %v2495_v45 = vld [vmem:[#allocation9 + $0xc0] sm:$0xff] }
 0x7b6   :  { %v12847_v5 = vpop.eup %12846 }
 0x7b7   :  { %v12849_v7 = vpop.eup %12848  ;;  %v2193_v19 = vadd.f32 1.0, %v12847_v5  ;;  %v2499_v5 = vld [vmem:[#allocation9 + $0xe0] sm:$0xff] }
 0x7b8   :  { %v2199_v36 = vadd.f32 1.0, %v12849_v7  ;;  %v12851_v4 = vpop.eup %12850  ;;  %v10612_v7 = vpack.c.bf16 %v2493_v62, %v2489_v48  ;;  %v2521_v62 = vld [vmem:[#allocation9 + $0x190] sm:$0xff] }
 0x7b9   :  { %12854 = vrcp.f32 %v2193_v19  ;;  %v12853_v9 = vpop.eup %12852  ;;  %v2206_v10 = vadd.f32 1.0, %v12851_v4  ;;  %v10582_v19 = vpack.c.bf16 %v2500_v18, %v2496_v29  ;;  %v10614_v4 = vpack.c.bf16 %v2502_v17, %v2498_v15  ;;  %v2525_v18 = vld [vmem:[#allocation9 + $0x1b0] sm:$0xff]  ;;  %v2532_v15 = vld [vmem:[#allocation9 + $0x1e8] sm:$0xff]  ;;  %v2530_v17 = vld [vmem:[#allocation9 + $0x1d8] sm:$0xff] }
 0x7ba   :  { %12856 = vrcp.f32 %v2199_v36  ;;  %v2504_v36 = vld [vmem:[#allocation9 + $0x108] sm:$0xff] }
 0x7bb   :  { %12858 = vrcp.f32 %v2206_v10  ;;  %v2510_v10 = vld [vmem:[#allocation9 + $0x138] sm:$0xff] }
 0x7c3   :  { %v12855_v27 = vpop.eup %12854 }
 0x7c4   :  { %v12857_v42 = vpop.eup %12856  ;;  %v2210_v49 = vmul.f32 %v12855_v27, %v12853_v9  ;;  %v2497_v9 = vld [vmem:[#allocation9 + $0xd0] sm:$0xff] }
 0x7c5   :  { %v2209_v1 = vmul.f32 %v12857_v42, %v14339_v61  ;;  %v12859_v14 = vpop.eup %12858  ;;  %v2501_v27 = vld [vmem:[#allocation9 + $0xf0] sm:$0xff]  ;;  %v2508_v42 = vld [vmem:[#allocation9 + $0x128] sm:$0xff] }
 0x7c6   :  { %v10616_v26 = vpack.c.bf16 %v2501_v27, %v2497_v9  ;;  %v10586_v32 = vpack.c.bf16 %v2508_v42, %v2504_v36  ;;  %v2529_v27 = vld [vmem:[#allocation9 + $0x1d0] sm:$0xff] }
 0x7c7   :  { %v14377_v2 = vadd.f32 %v2210_v49, %v2209_v1  ;;  %v2506_v49 = vld [vmem:[#allocation9 + $0x118] sm:$0xff]  ;;  %v10584_v1 = vpack.c.bf16 %v2499_v5, %v2495_v45  ;;  %v2527_v5 = vld [vmem:[#allocation9 + $0x1c0] sm:$0xff]  ;;  %v2533_v42 = vld [vmem:[#allocation9 + $0x1f0] sm:$0xff] }
 0x7c8   :  { %v10618_v54 = vpack.c.bf16 %v2510_v10, %v2506_v49  ;;  %v2828_v49 = vld [vmem:[#allocation11 + $0x28] sm:$0xff]  ;;  %v2826_v10 = vld [vmem:[#allocation11 + $0x18] sm:$0xff]  ;;  %v10632_v63 = vpack.c.bf16 %v2533_v42, %v2529_v27  ;;  %v2845_v27 = vld [vmem:[#allocation11 + $0xb0] sm:$0xff] }
 0x7c9   :  { %12860 = vtanh.f32 %v14377_v2  ;;  %v2850_v42 = vld [vmem:[#allocation11 + $0xd8] sm:$0xff] }
 0x7d3   :  { %v12861_v56 = vpop.eup %12860 }
 0x7d4   :  { %v14380_v61 = vmul.f32 %v12861_v56, %v12859_v14  ;;  %v2516_v14 = vld [vmem:[#allocation9 + $0x168] sm:$0xff]  ;;  %v2514_v56 = vld [vmem:[#allocation9 + $0x158] sm:$0xff] }
 0x7d5   :  { %v10590_v41 = vpack.c.bf16 %v2516_v14, %v2512_v40  ;;  %v2827_v40 = vld [vmem:[#allocation11 + $0x20] sm:$0xff]  ;;  %v2825_v14 = vld [vmem:[#allocation11 + $0x10] sm:$0xff] }
 0x7d6   :  { %16207 = vst [vmem:[#allocation27_spill] sm:$0xff] %v14380_v61  ;;  %2354 = vmatmul.mubr.f32.vlgmr.msra.gmra.mrb[14].mxu0 %v14380_v61  ;;  %2425 = vmatmul.mubr.f32.vlgmr.msra.gmra.mrb[14].mxu1 %v14380_v61 }
 0x7d7   :  { %10573 = vmatpush1.bf16.msra.mxu0 %v10572_v22  ;;  %10605 = vmatpush1.bf16.msra.mxu1 %v10604_v47  ;;  %v2518_v22 = vld [vmem:[#allocation9 + $0x178] sm:$0xff]  ;;  %v2515_v47 = vld [vmem:[#allocation9 + $0x160] sm:$0xff] }
 0x7d8   :  { %10575 = vmatprep.subr.bf16.mxu0 %v10574_v20  ;;  %10607 = vmatprep.subr.bf16.mxu1 %v10606_v25  ;;  %v10620_v20 = vpack.c.bf16 %v2509_v33, %v2505_v58  ;;  %v2520_v25 = vld [vmem:[#allocation9 + $0x188] sm:$0xff]  ;;  %v10622_v51 = vpack.c.bf16 %v2518_v22, %v2514_v56  ;;  %v10592_v57 = vpack.c.bf16 %v2515_v47, %v2511_v30  ;;  %v2829_v56 = vld [vmem:[#allocation11 + $0x30] sm:$0xff]  ;;  %v2463_v22 = vld [vmem:[%s16201_s20] sm:$0xff] }
 0x7d9   :  { %2621 = vmatprep.mubr.f32.mxu0 %v16172_v0  ;;  %2734 = vmatprep.mubr.f32.mxu1 %v16172_v0  ;;  %v10594_v29 = vpack.c.bf16 %v2524_v50, %v2520_v25  ;;  %v2832_v58 = vld [vmem:[#allocation11 + $0x48] sm:$0xff]  ;;  %v2831_v47 = vld [vmem:[#allocation11 + $0x40] sm:$0xff] }
 0x7da   :  { %v2836_v33 = vld [vmem:[#allocation11 + $0x68] sm:$0xff] }
 0x7db   :  { %10577 = vmatpush1.bf16.msra.mxu0 %v10576_v43  ;;  %10609 = vmatpush1.bf16.msra.mxu1 %v10608_v6  ;;  %v2526_v43 = vld [vmem:[#allocation9 + $0x1b8] sm:$0xff]  ;;  %v2523_v6 = vld [vmem:[#allocation9 + $0x1a0] sm:$0xff]  ;;  %v14396_v30 = vpack.c.bf16 %v2836_v33, %v2832_v58  ;;  %v2844_v25 = vld [vmem:[#allocation11 + $0xa8] sm:$0xff] }
 0x7dc   :  { %10579 = vmatprep.subr.bf16.mxu0 %v10578_v16  ;;  %10611 = vmatprep.subr.bf16.mxu1 %v10610_v44  ;;  %v10624_v16 = vpack.c.bf16 %v2517_v24, %v2513_v13  ;;  %v2528_v44 = vld [vmem:[#allocation9 + $0x1c8] sm:$0xff]  ;;  %v10626_v48 = vpack.c.bf16 %v2526_v43, %v2522_v53  ;;  %v10596_v45 = vpack.c.bf16 %v2523_v6, %v2519_v3  ;;  %v2834_v13 = vld [vmem:[#allocation11 + $0x58] sm:$0xff]  ;;  %v2843_v3 = vld [vmem:[#allocation11 + $0xa0] sm:$0xff] }
 0x7dd   :  { %v10598_v36 = vpack.c.bf16 %v2532_v15, %v2528_v44  ;;  %v2838_v24 = vld [vmem:[#allocation11 + $0x78] sm:$0xff]  ;;  %v2464_v50 = vld [vmem:[%s16201_s20 + $0x8] sm:$0xff]  ;;  %v2833_v44 = vld [vmem:[#allocation11 + $0x50] sm:$0xff] }
 0x7de   :  { %v2848_v6 = vld [vmem:[#allocation11 + $0xc8] sm:$0xff]  ;;  %v2465_v15 = vld [vmem:[%s16201_s20 + $0x10] sm:$0xff] }
 0x7df   :  { %10581 = vmatpush1.bf16.msra.mxu0 %v10580_v28  ;;  %10613 = vmatpush1.bf16.msra.mxu1 %v10612_v7  ;;  %v2534_v28 = vld [vmem:[#allocation9 + $0x1f8] sm:$0xff]  ;;  %v2531_v7 = vld [vmem:[#allocation9 + $0x1e0] sm:$0xff]  ;;  %v2849_v58 = vld [vmem:[#allocation11 + $0xd0] sm:$0xff] }
 0x7e0   :  { %10583 = vmatprep.subr.bf16.mxu0 %v10582_v19  ;;  %10615 = vmatprep.subr.bf16.mxu1 %v10614_v4  ;;  %v10628_v19 = vpack.c.bf16 %v2525_v18, %v2521_v62  ;;  %v2824_v4 = vld [vmem:[#allocation11 + $0x8] sm:$0xff]  ;;  %v10630_v9 = vpack.c.bf16 %v2534_v28, %v2530_v17  ;;  %v10600_v8 = vpack.c.bf16 %v2531_v7, %v2527_v5  ;;  %v2842_v62 = vld [vmem:[#allocation11 + $0x98] sm:$0xff]  ;;  %v2851_v5 = vld [vmem:[#allocation11 + $0xe0] sm:$0xff] }
 0x7e1   :  { %v2846_v18 = vld [vmem:[#allocation11 + $0xb8] sm:$0xff] }
 0x7e3   :  { %10585 = vmatpush1.bf16.msra.mxu0 %v10584_v1  ;;  %10617 = vmatpush1.bf16.msra.mxu1 %v10616_v26  ;;  %v2830_v1 = vld [vmem:[#allocation11 + $0x38] sm:$0xff]  ;;  %v14386_v26 = vpack.c.bf16 %v2828_v49, %v2824_v4  ;;  %v14429_v4 = vpack.c.bf16 %v2846_v18, %v2842_v62 }
 0x7e4   :  { %10587 = vmatprep.subr.bf16.mxu0 %v10586_v32  ;;  %10619 = vmatprep.subr.bf16.mxu1 %v10618_v54  ;;  %v2823_v32 = vld [vmem:[#allocation11] sm:$0xff]  ;;  %v14388_v54 = vpack.c.bf16 %v2830_v1, %v2826_v10  ;;  %v2854_v49 = vld [vmem:[#allocation11 + $0xf8] sm:$0xff] }
 0x7e5   :  { %v2466_v10 = vld [vmem:[%s16201_s20 + $0x18] sm:$0xff]  ;;  %v14446_v33 = vpack.c.bf16 %v2854_v49, %v2850_v42  ;;  %v2869_v49 = vld [vmem:[#allocation11 + $0x170] sm:$0xff] }
 0x7e6   :  { %v2866_v62 = vld [vmem:[#allocation11 + $0x158] sm:$0xff] }
 0x7e7   :  { %10589 = vmatpush1.bf16.msra.mxu0 %v10588_v11  ;;  %10621 = vmatpush1.bf16.msra.mxu1 %v10620_v20  ;;  %v14393_v11 = vpack.c.bf16 %v2827_v40, %v2823_v32  ;;  %v2835_v20 = vld [vmem:[#allocation11 + $0x60] sm:$0xff]  ;;  %v2870_v18 = vld [vmem:[#allocation11 + $0x178] sm:$0xff] }
 0x7e8   :  { %10591 = vmatprep.subr.bf16.mxu0 %v10590_v41  ;;  %10623 = vmatprep.subr.bf16.mxu1 %v10622_v51  ;;  %v2840_v41 = vld [vmem:[#allocation11 + $0x88] sm:$0xff]  ;;  %v14399_v51 = vpack.c.bf16 %v2829_v56, %v2825_v14  ;;  %v14406_v53 = vpack.c.bf16 %v2835_v20, %v2831_v47  ;;  %v2859_v32 = vld [vmem:[#allocation11 + $0x120] sm:$0xff]  ;;  %v2858_v47 = vld [vmem:[#allocation11 + $0x118] sm:$0xff]  ;;  %v14480_v42 = vpack.c.bf16 %v2870_v18, %v2866_v62 }
 0x7e9   :  { %v14410_v43 = vpack.c.bf16 %v2844_v25, %v2840_v41  ;;  %v2864_v14 = vld [vmem:[#allocation11 + $0x148] sm:$0xff]  ;;  %v2862_v20 = vld [vmem:[#allocation11 + $0x138] sm:$0xff]  ;;  %v2467_v41 = vld [vmem:[%s16201_s20 + $0x20] sm:$0xff] }
 0x7ea   :  { %v2868_v56 = vld [vmem:[#allocation11 + $0x168] sm:$0xff] }
 0x7eb   :  { %10593 = vmatpush1.bf16.msra.mxu0 %v10592_v57  ;;  %10625 = vmatpush1.bf16.msra.mxu1 %v10624_v16  ;;  %v2839_v57 = vld [vmem:[#allocation11 + $0x80] sm:$0xff]  ;;  %v2852_v16 = vld [vmem:[#allocation11 + $0xe8] sm:$0xff] }
 0x7ec   :  { %10595 = vmatprep.subr.bf16.mxu0 %v10594_v29  ;;  %10627 = vmatprep.subr.bf16.mxu1 %v10626_v48  ;;  %v14413_v29 = vpack.c.bf16 %v2838_v24, %v2834_v13  ;;  %v2837_v48 = vld [vmem:[#allocation11 + $0x70] sm:$0xff]  ;;  %v14420_v17 = vpack.c.bf16 %v2843_v3, %v2839_v57  ;;  %v14424_v28 = vpack.c.bf16 %v2852_v16, %v2848_v6  ;;  %v2867_v57 = vld [vmem:[#allocation11 + $0x160] sm:$0xff]  ;;  %v2872_v16 = vld [vmem:[#allocation11 + $0x188] sm:$0xff] }
 0x7ed   :  { %v14426_v7 = vpack.c.bf16 %v2837_v48, %v2833_v44  ;;  %v14457_v13 = vpack.c.bf16 %v2868_v56, %v2864_v14  ;;  %v2857_v3 = vld [vmem:[#allocation11 + $0x110] sm:$0xff]  ;;  %v14463_v6 = vpack.c.bf16 %v2862_v20, %v2858_v47  ;;  %v2876_v44 = vld [vmem:[#allocation11 + $0x1a8] sm:$0xff]  ;;  %v2879_v20 = vld [vmem:[#allocation11 + $0x1c0] sm:$0xff] }
 0x7ee   :  { %v2861_v48 = vld [vmem:[#allocation11 + $0x130] sm:$0xff] }
 0x7ef   :  { %10597 = vmatpush1.bf16.msra.mxu0 %v10596_v45  ;;  %10629 = vmatpush1.bf16.msra.mxu1 %v10628_v19  ;;  %v2847_v45 = vld [vmem:[#allocation11 + $0xc0] sm:$0xff]  ;;  %v2856_v19 = vld [vmem:[#allocation11 + $0x108] sm:$0xff]  ;;  %v2469_v14 = vld [vmem:[%s16201_s20 + $0x30] sm:$0xff] }
 0x7f0   :  { %10599 = vmatprep.subr.bf16.mxu0 %v10598_v36  ;;  %10631 = vmatprep.subr.bf16.mxu1 %v10630_v9  ;;  %v2860_v36 = vld [vmem:[#allocation11 + $0x128] sm:$0xff]  ;;  %v2841_v9 = vld [vmem:[#allocation11 + $0x90] sm:$0xff]  ;;  %v14436_v1 = vpack.c.bf16 %v2851_v5, %v2847_v45  ;;  %v14474_v5 = vpack.c.bf16 %v2876_v44, %v2872_v16  ;;  %v2882_v16 = vld [vmem:[#allocation11 + $0x1d8] sm:$0xff] }
 0x7f1   :  { %v14442_v40 = vpack.c.bf16 %v2845_v27, %v2841_v9  ;;  %v2875_v9 = vld [vmem:[#allocation11 + $0x1a0] sm:$0xff]  ;;  %v2865_v27 = vld [vmem:[#allocation11 + $0x150] sm:$0xff]  ;;  %v2886_v44 = vld [vmem:[#allocation11 + $0x1f8] sm:$0xff] }
 0x7f3   :  { %10601 = vmatpush1.bf16.msra.mxu0 %v10600_v8  ;;  %10633 = vmatpush1.bf16.msra.mxu1 %v10632_v63  ;;  %v14440_v8 = vpack.c.bf16 %v2860_v36, %v2856_v19  ;;  %v2855_v63 = vld [vmem:[#allocation11 + $0x100] sm:$0xff]  ;;  %v14476_v19 = vpack.c.bf16 %v2861_v48, %v2857_v3  ;;  %v2877_v3 = vld [vmem:[#allocation11 + $0x1b0] sm:$0xff]  ;;  %v2470_v48 = vld [vmem:[%s16201_s20 + $0x38] sm:$0xff] }
 0x7f4   :  { %10635 = vmatprep.subr.bf16.mxu0 %v14386_v26  ;;  %10667 = vmatprep.subr.bf16.mxu1 %v14388_v54  ;;  %v14453_v25 = vpack.c.bf16 %v2859_v32, %v2855_v63  ;;  %v2871_v36 = vld [vmem:[#allocation11 + $0x180] sm:$0xff]  ;;  %v2884_v63 = vld [vmem:[#allocation11 + $0x1e8] sm:$0xff]  ;;  %v2874_v32 = vld [vmem:[#allocation11 + $0x198] sm:$0xff] }
 0x7f5   :  { %v14487_v56 = vpack.c.bf16 %v2875_v9, %v2871_v36  ;;  %v2881_v36 = vld [vmem:[#allocation11 + $0x1d0] sm:$0xff] }
 0x7f6   :  { %2622 = vmatmul.mubr.f32.vlgmr.msra.gmra.mrb[16].mxu0 %v2463_v22  ;;  %2735 = vmatmul.mubr.f32.vlgmr.msra.gmra.mrb[16].mxu1 %v2463_v22  ;;  %v2853_v22 = vld [vmem:[#allocation11 + $0xf0] sm:$0xff] }
 0x7f7   :  { %10637 = vmatpush1.bf16.msra.mxu0 %v14393_v11  ;;  %2627 = vmatprep.mubr.f32.mxu0 %v16172_v0  ;;  %v14459_v24 = vpack.c.bf16 %v2853_v22, %v2849_v58  ;;  %v2878_v58 = vld [vmem:[#allocation11 + $0x1b8] sm:$0xff]  ;;  %v14491_v22 = vpack.c.bf16 %v2869_v49, %v2865_v27  ;;  %v2885_v9 = vld [vmem:[#allocation11 + $0x1f0] sm:$0xff] }
 0x7f8   :  { %10639 = vmatprep.subr.bf16.mxu0 %v14396_v30  ;;  %2740 = vmatprep.mubr.f32.mxu1 %v16172_v0  ;;  %v14517_v27 = vpack.c.bf16 %v2885_v9, %v2881_v36 }
 0x7f9   :  { %10669 = vmatpush1.bf16.msra.mxu1 %v14399_v51 }
 0x7fa   :  { %2628 = vmatmul.mubr.f32.gmra.mrb[18].mxu0 %v2464_v50  ;;  %2741 = vmatmul.mubr.f32.gmra.mrb[18].mxu1 %v2464_v50  ;;  %v2863_v50 = vld [vmem:[#allocation11 + $0x140] sm:$0xff] }
 0x7fb   :  { %10641 = vmatpush1.bf16.msra.mxu0 %v14406_v53  ;;  %2633 = vmatprep.mubr.f32.mxu0 %v16172_v0  ;;  %v14470_v45 = vpack.c.bf16 %v2867_v57, %v2863_v50  ;;  %v14497_v50 = vpack.c.bf16 %v2878_v58, %v2874_v32  ;;  %v2873_v57 = vld [vmem:[#allocation11 + $0x190] sm:$0xff] }
 0x7fc   :  { %10643 = vmatprep.subr.bf16.mxu0 %v14410_v43  ;;  %2746 = vmatprep.mubr.f32.mxu1 %v16172_v0  ;;  %v14508_v18 = vpack.c.bf16 %v2877_v3, %v2873_v57 }
 0x7fd   :  { %10671 = vmatprep.subr.bf16.mxu1 %v14413_v29 }
 0x7fe   :  { %2634 = vmatmul.mubr.f32.gmra.mrb[20].mxu0 %v2465_v15  ;;  %2747 = vmatmul.mubr.f32.gmra.mrb[20].mxu1 %v2465_v15  ;;  %v2468_v15 = vld [vmem:[%s16201_s20 + $0x28] sm:$0xff] }
 0x7ff   :  { %10645 = vmatpush1.bf16.msra.mxu0 %v14420_v17  ;;  %2639 = vmatprep.mubr.f32.mxu0 %v16172_v0 }
 0x800   :  { %10647 = vmatprep.subr.bf16.mxu0 %v14424_v28  ;;  %10673 = vmatpush1.bf16.msra.mxu1 %v14426_v7 }
 0x801   :  { %2752 = vmatprep.mubr.f32.mxu1 %v16172_v0  ;;  %10675 = vmatprep.subr.bf16.mxu1 %v14429_v4 }
 0x802   :  { %2640 = vmatmul.mubr.f32.gmra.mrb[22].mxu0 %v2466_v10  ;;  %2753 = vmatmul.mubr.f32.gmra.mrb[22].mxu1 %v2466_v10  ;;  %v2880_v10 = vld [vmem:[#allocation11 + $0x1c8] sm:$0xff] }
 0x803   :  { %2645 = vmatprep.mubr.f32.mxu0 %v16172_v0  ;;  %10649 = vmatpush1.bf16.msra.mxu0 %v14436_v1  ;;  %v14493_v47 = vpack.c.bf16 %v2884_v63, %v2880_v10 }
 0x804   :  { %10651 = vmatprep.subr.bf16.mxu0 %v14440_v8  ;;  %10677 = vmatpush1.bf16.msra.mxu1 %v14442_v40 }
 0x805   :  { %2758 = vmatprep.mubr.f32.mxu1 %v16172_v0  ;;  %10679 = vmatprep.subr.bf16.mxu1 %v14446_v33 }
 0x806   :  { %2646 = vmatmul.mubr.f32.gmra.mrb[24].mxu0 %v2467_v41  ;;  %2759 = vmatmul.mubr.f32.gmra.mrb[24].mxu1 %v2467_v41  ;;  %v2883_v41 = vld [vmem:[#allocation11 + $0x1e0] sm:$0xff] }
 0x807   :  { %2651 = vmatprep.mubr.f32.mxu0 %v16172_v0  ;;  %10653 = vmatpush1.bf16.msra.mxu0 %v14453_v25  ;;  %v14504_v62 = vpack.c.bf16 %v2883_v41, %v2879_v20 }
 0x808   :  { %10655 = vmatprep.subr.bf16.mxu0 %v14457_v13  ;;  %10681 = vmatpush1.bf16.msra.mxu1 %v14459_v24 }
 0x809   :  { %2764 = vmatprep.mubr.f32.mxu1 %v16172_v0  ;;  %10683 = vmatprep.subr.bf16.mxu1 %v14463_v6 }
 0x80a   :  { %2652 = vmatmul.mubr.f32.gmra.mrb[26].mxu0 %v2468_v15  ;;  %2765 = vmatmul.mubr.f32.gmra.mrb[26].mxu1 %v2468_v15  ;;  %v14512_v15 = vpack.c.bf16 %v2886_v44, %v2882_v16 }
 0x80b   :  { %2657 = vmatprep.mubr.f32.mxu0 %v16172_v0  ;;  %10657 = vmatpush1.bf16.msra.mxu0 %v14470_v45 }
 0x80c   :  { %10659 = vmatprep.subr.bf16.mxu0 %v14474_v5  ;;  %10685 = vmatpush1.bf16.msra.mxu1 %v14476_v19 }
 0x80d   :  { %2770 = vmatprep.mubr.f32.mxu1 %v16172_v0  ;;  %10687 = vmatprep.subr.bf16.mxu1 %v14480_v42 }
 0x80e   :  { %2658 = vmatmul.mubr.f32.gmra.mrb[28].mxu0 %v2469_v14  ;;  %2771 = vmatmul.mubr.f32.gmra.mrb[28].mxu1 %v2469_v14 }
 0x80f   :  { %2663 = vmatprep.mubr.f32.mxu0 %v16172_v0  ;;  %10661 = vmatpush1.bf16.msra.mxu0 %v14487_v56 }
 0x810   :  { %10689 = vmatpush1.bf16.msra.mxu1 %v14491_v22  ;;  %10663 = vmatprep.subr.bf16.mxu0 %v14493_v47 }
 0x811   :  { %2776 = vmatprep.mubr.f32.mxu1 %v16172_v0  ;;  %10691 = vmatprep.subr.bf16.mxu1 %v14497_v50 }
 0x812   :  { %2664 = vmatmul.mubr.f32.gmra.mrb[30].mxu0 %v2470_v48  ;;  %2777 = vmatmul.mubr.f32.gmra.mrb[30].mxu1 %v2470_v48 }
 0x813   :  { %10665 = vmatpush1.bf16.msra.mxu0 %v14504_v62  ;;  %2951 = vmatprep.mubr.f32.mxu0 %v16172_v0 }
 0x814   :  { %10693 = vmatpush1.bf16.msra.mxu1 %v14508_v18  ;;  %3022 = vmatprep.mubr.f32.mxu1 %v16172_v0 }
 0x815   :  { %10695 = vmatprep.subr.bf16.mxu1 %v14512_v15  ;;  %10699 = vmatprep.subr.bf16.mxu0 %v14386_v26 }
 0x818   :  { %10697 = vmatpush1.bf16.msra.mxu1 %v14517_v27 }
 0x819   :  { %10731 = vmatprep.subr.bf16.mxu1 %v14388_v54 }
 0x81a   :  { %2952 = vmatmul.mubr.f32.vlgmr.msra.gmra.mrb[30].mxu0 %v16172_v0 }
 0x81b   :  { %3023 = vmatmul.mubr.f32.vlgmr.msra.gmra.mrb[30].mxu1 %v16172_v0  ;;  %10701 = vmatpush1.bf16.msra.mxu0 %v14393_v11 }
 0x81c   :  { %10733 = vmatpush1.bf16.msra.mxu1 %v14399_v51  ;;  %10703 = vmatprep.subr.bf16.mxu0 %v14396_v30 }
 0x81d   :  { %10735 = vmatprep.subr.bf16.mxu1 %v14413_v29  ;;  %3194 = vmatprep.mubr.f32.mxu0 %v16172_v0 }
 0x81e   :  { %3265 = vmatprep.mubr.f32.mxu1 %v16172_v0 }
 0x81f   :  { %10705 = vmatpush1.bf16.msra.mxu0 %v14406_v53 }
 0x820   :  { %10737 = vmatpush1.bf16.msra.mxu1 %v14426_v7  ;;  %10707 = vmatprep.subr.bf16.mxu0 %v14410_v43 }
 0x821   :  { %10739 = vmatprep.subr.bf16.mxu1 %v14429_v4 }
 0x823   :  { %10709 = vmatpush1.bf16.msra.mxu0 %v14420_v17 }
 0x824   :  { %10741 = vmatpush1.bf16.msra.mxu1 %v14442_v40  ;;  %10711 = vmatprep.subr.bf16.mxu0 %v14424_v28 }
 0x825   :  { %10743 = vmatprep.subr.bf16.mxu1 %v14446_v33 }
 0x827   :  { %10713 = vmatpush1.bf16.msra.mxu0 %v14436_v1 }
 0x828   :  { %10745 = vmatpush1.bf16.msra.mxu1 %v14459_v24  ;;  %10715 = vmatprep.subr.bf16.mxu0 %v14440_v8 }
 0x829   :  { %10747 = vmatprep.subr.bf16.mxu1 %v14463_v6 }
 0x82b   :  { %10717 = vmatpush1.bf16.msra.mxu0 %v14453_v25 }
 0x82c   :  { %10749 = vmatpush1.bf16.msra.mxu1 %v14476_v19  ;;  %10719 = vmatprep.subr.bf16.mxu0 %v14457_v13 }
 0x82d   :  { %10751 = vmatprep.subr.bf16.mxu1 %v14480_v42 }
 0x82f   :  { %10721 = vmatpush1.bf16.msra.mxu0 %v14470_v45 }
 0x830   :  { %10753 = vmatpush1.bf16.msra.mxu1 %v14491_v22  ;;  %10723 = vmatprep.subr.bf16.mxu0 %v14474_v5 }
 0x831   :  { %10755 = vmatprep.subr.bf16.mxu1 %v14497_v50 }
 0x833   :  { %10725 = vmatpush1.bf16.msra.mxu0 %v14487_v56 }
 0x834   :  { %10757 = vmatpush1.bf16.msra.mxu1 %v14508_v18  ;;  %10727 = vmatprep.subr.bf16.mxu0 %v14493_v47 }
 0x835   :  { %10759 = vmatprep.subr.bf16.mxu1 %v14512_v15 }
 0x837   :  { %10729 = vmatpush1.bf16.msra.mxu0 %v14504_v62 }
 0x838   :  { %10761 = vmatpush1.bf16.msra.mxu1 %v14517_v27  ;;  %10763 = vmatprep.subr.bf16.mxu0 %v14386_v26 }
 0x839   :  { %10795 = vmatprep.subr.bf16.mxu1 %v14388_v54 }
 0x8a9   :  { %v2355_v49 = vpop.f32.mrb[14].mxu0  ;;  %v2426_v10 = vpop.f32.mrb[14].mxu1 }
 0x8aa   :  { %v12496_v63 = vadd.f32 %v2355_v49, %v14028_v35  ;;  %v2357_v32 = vpop.f32.mrb[15].mxu0  ;;  %v2428_v58 = vpop.f32.mrb[15].mxu1  ;;  %v12512_v16 = vadd.f32 %v2426_v10, %v14044_v59 }
 0x8ab   :  { %v12497_v14 = vadd.f32 %v2357_v32, %v14031_v37  ;;  %v12513_v57 = vadd.f32 %v2428_v58, %v14038_v52 }
 0x8ac   :  { %v9809_v20 = vmul.f32 -1.442695, %v12496_v63 }
 0x8ad   :  { %v9810_v41 = vmul.f32 -1.442695, %v12497_v14  ;;  %v9811_v3 = vmul.f32 -1.442695, %v12513_v57 }
 0x8ae   :  { %12862 = vpow2.f32 %v9809_v20  ;;  %v2535_v20 = vld [vmem:[%s16158_s6] sm:$0xf] }
 0x8af   :  { %12864 = vpow2.f32 %v9810_v41  ;;  %v14571_v41 = vrot.slane %v2535_v20, %v14020_v31  ;;  %v14574_v57 = vrot.slane %v2535_v20, %v14025_v34 }
 0x8b0   :  { %12866 = vpow2.f32 %v9811_v3 }
 0x8b1   :  { %12868 = vtanh.f32 %v12512_v16 }
 0x8b8   :  { %v12863_v26 = vpop.eup %12862 }
 0x8b9   :  { %v12865_v44 = vpop.eup %12864  ;;  %v2438_v48 = vadd.f32 1.0, %v12863_v26 }
 0x8ba   :  { %v2444_v36 = vadd.f32 1.0, %v12865_v44  ;;  %v12867_v35 = vpop.eup %12866 }
 0x8bb   :  { %12870 = vrcp.f32 %v2438_v48  ;;  %v12869_v9 = vpop.eup %12868  ;;  %v2451_v32 = vadd.f32 1.0, %v12867_v35 }
 0x8bc   :  { %12872 = vrcp.f32 %v2444_v36 }
 0x8bd   :  { %12874 = vrcp.f32 %v2451_v32 }
 0x8c5   :  { %v12871_v37 = vpop.eup %12870 }
 0x8c6   :  { %v12873_v49 = vpop.eup %12872  ;;  %v2455_v63 = vmul.f32 %v12871_v37, %v12869_v9  ;;  %v14579_v9 = vrot.slane %v2535_v20, %v14033_v38 }
 0x8c7   :  { %v2454_v14 = vmul.f32 %v12873_v49, %v14377_v2  ;;  %v12875_v59 = vpop.eup %12874  ;;  %v14583_v49 = vrot.slane %v2535_v20, %v14040_v55 }
 0x8c9   :  { %v2456_v52 = vadd.f32 %v2455_v63, %v2454_v14 }
 0x8cb   :  { %12876 = vtanh.f32 %v2456_v52 }
 0x8d5   :  { %v12877_v10 = vpop.eup %12876 }
 0x8d6   :  { %v14565_v58 = vmul.f32 %v12877_v10, %v12875_v59 }
 0x8d8   :  { %16208 = vst [vmem:[#allocation28_spill] sm:$0xff] %v14565_v58 }
 0x8ed   :  { %v2953_v3 = vpop.f32.mrb[30].mxu0 }
 0x8ee   :  { %v12528_v2 = vadd.f32 %v2953_v3, %v14571_v41  ;;  %v2955_v16 = vpop.f32.mrb[31].mxu0  ;;  %v3024_v26 = vpop.f32.mrb[30].mxu1 }
 0x8ef   :  { %v12529_v44 = vadd.f32 %v2955_v16, %v14574_v57  ;;  %v3026_v48 = vpop.f32.mrb[31].mxu1  ;;  %v12544_v32 = vadd.f32 %v3024_v26, %v14583_v49 }
 0x8f0   :  { %v9812_v36 = vmul.f32 -1.442695, %v12528_v2  ;;  %v12545_v37 = vadd.f32 %v3026_v48, %v14579_v9 }
 0x8f1   :  { %v9813_v35 = vmul.f32 -1.442695, %v12529_v44 }
 0x8f2   :  { %12878 = vpow2.f32 %v9812_v36  ;;  %v9814_v63 = vmul.f32 -1.442695, %v12545_v37 }
 0x8f3   :  { %12880 = vpow2.f32 %v9813_v35 }
 0x8f4   :  { %12882 = vpow2.f32 %v9814_v63 }
 0x8f5   :  { %12884 = vtanh.f32 %v12544_v32 }
 0x8fc   :  { %v12879_v14 = vpop.eup %12878 }
 0x8fd   :  { %v12881_v52 = vpop.eup %12880  ;;  %v3036_v59 = vadd.f32 1.0, %v12879_v14 }
 0x8fe   :  { %v3042_v10 = vadd.f32 1.0, %v12881_v52  ;;  %v12883_v3 = vpop.eup %12882 }
 0x8ff   :  { %12886 = vrcp.f32 %v3036_v59  ;;  %v12885_v2 = vpop.eup %12884  ;;  %v3049_v48 = vadd.f32 1.0, %v12883_v3 }
 0x900   :  { %12888 = vrcp.f32 %v3042_v10 }
 0x901   :  { %12890 = vrcp.f32 %v3049_v48  ;;  %v3557_v48 = vld [vmem:[#allocation11 + $0x28] sm:$0xff] }
 0x909   :  { %v12887_v16 = vpop.eup %12886 }
 0x90a   :  { %v12889_v44 = vpop.eup %12888  ;;  %v3053_v36 = vmul.f32 %v12887_v16, %v12885_v2 }
 0x90b   :  { %v3052_v35 = vmul.f32 0.0, %v12889_v44  ;;  %v12891_v26 = vpop.eup %12890 }
 0x90d   :  { %v14586_v20 = vadd.f32 %v3053_v36, %v3052_v35  ;;  %v3553_v36 = vld [vmem:[#allocation11 + $0x8] sm:$0xff] }
 0x90e   :  { %v14640_v35 = vpack.c.bf16 %v3557_v48, %v3553_v36  ;;  %v3592_v48 = vld [vmem:[#allocation11 + $0x140] sm:$0xff] }
 0x90f   :  { %12892 = vtanh.f32 %v14586_v20 }
 0x919   :  { %v12893_v37 = vpop.eup %12892 }
 0x91a   :  { %v14589_v14 = vmul.f32 %v12893_v37, %v12891_v26  ;;  %v3556_v26 = vld [vmem:[#allocation11 + $0x20] sm:$0xff]  ;;  %v3554_v37 = vld [vmem:[#allocation11 + $0x10] sm:$0xff] }
 0x91c   :  { %16209 = vst [vmem:[#allocation29_spill] sm:$0xff] %v14589_v14  ;;  %3195 = vmatmul.mubr.f32.vlgmr.msra.gmra.mrb[28].mxu0 %v14589_v14  ;;  %3266 = vmatmul.mubr.f32.vlgmr.msra.gmra.mrb[28].mxu1 %v14589_v14 }
 0x91d   :  { %10765 = vmatpush1.bf16.msra.mxu0 %v14393_v11  ;;  %10797 = vmatpush1.bf16.msra.mxu1 %v14399_v51 }
 0x91e   :  { %10767 = vmatprep.subr.bf16.mxu0 %v14396_v30  ;;  %10799 = vmatprep.subr.bf16.mxu1 %v14413_v29 }
 0x91f   :  { %3437 = vmatprep.mubr.f32.mxu0 %v16172_v0  ;;  %3508 = vmatprep.mubr.f32.mxu1 %v16172_v0 }
 0x921   :  { %10769 = vmatpush1.bf16.msra.mxu0 %v14406_v53  ;;  %10801 = vmatpush1.bf16.msra.mxu1 %v14426_v7 }
 0x922   :  { %10771 = vmatprep.subr.bf16.mxu0 %v14410_v43  ;;  %10803 = vmatprep.subr.bf16.mxu1 %v14429_v4 }
 0x925   :  { %10773 = vmatpush1.bf16.msra.mxu0 %v14420_v17  ;;  %10805 = vmatpush1.bf16.msra.mxu1 %v14442_v40 }
 0x926   :  { %10775 = vmatprep.subr.bf16.mxu0 %v14424_v28  ;;  %10807 = vmatprep.subr.bf16.mxu1 %v14446_v33 }
 0x929   :  { %10777 = vmatpush1.bf16.msra.mxu0 %v14436_v1  ;;  %10809 = vmatpush1.bf16.msra.mxu1 %v14459_v24 }
 0x92a   :  { %10779 = vmatprep.subr.bf16.mxu0 %v14440_v8  ;;  %10811 = vmatprep.subr.bf16.mxu1 %v14463_v6 }
 0x92d   :  { %10781 = vmatpush1.bf16.msra.mxu0 %v14453_v25  ;;  %10813 = vmatpush1.bf16.msra.mxu1 %v14476_v19 }
 0x92e   :  { %10783 = vmatprep.subr.bf16.mxu0 %v14457_v13  ;;  %10815 = vmatprep.subr.bf16.mxu1 %v14480_v42 }
 0x931   :  { %10785 = vmatpush1.bf16.msra.mxu0 %v14470_v45  ;;  %10817 = vmatpush1.bf16.msra.mxu1 %v14491_v22 }
 0x932   :  { %10787 = vmatprep.subr.bf16.mxu0 %v14474_v5  ;;  %10819 = vmatprep.subr.bf16.mxu1 %v14497_v50 }
 0x935   :  { %10789 = vmatpush1.bf16.msra.mxu0 %v14487_v56  ;;  %10821 = vmatpush1.bf16.msra.mxu1 %v14508_v18 }
 0x936   :  { %10791 = vmatprep.subr.bf16.mxu0 %v14493_v47  ;;  %10823 = vmatprep.subr.bf16.mxu1 %v14512_v15 }
 0x939   :  { %10793 = vmatpush1.bf16.msra.mxu0 %v14504_v62  ;;  %10825 = vmatpush1.bf16.msra.mxu1 %v14517_v27 }
 0x93a   :  { %10859 = vmatprep.subr.bf16.mxu1 %v14388_v54  ;;  %10827 = vmatprep.subr.bf16.mxu0 %v14640_v35 }
 0x9ef   :  { %v3196_v11 = vpop.f32.mrb[28].mxu0  ;;  %v3267_v30 = vpop.f32.mrb[28].mxu1 }
 0x9f0   :  { %v12526_v51 = vadd.f32 %v3196_v11, %v14571_v41  ;;  %v3198_v53 = vpop.f32.mrb[29].mxu0  ;;  %v3269_v43 = vpop.f32.mrb[29].mxu1  ;;  %v12542_v13 = vadd.f32 %v3267_v30, %v14583_v49  ;;  %v3558_v30 = vld [vmem:[#allocation11 + $0x30] sm:$0xff] }
 0x9f1   :  { %v12527_v17 = vadd.f32 %v3198_v53, %v14574_v57  ;;  %v12543_v8 = vadd.f32 %v3269_v43, %v14579_v9  ;;  %v3561_v53 = vld [vmem:[#allocation11 + $0x48] sm:$0xff] }
 0x9f2   :  { %v9815_v28 = vmul.f32 -1.442695, %v12526_v51  ;;  %v14645_v51 = vpack.c.bf16 %v3558_v30, %v3554_v37  ;;  %v3565_v43 = vld [vmem:[#allocation11 + $0x68] sm:$0xff]  ;;  %v3600_v30 = vld [vmem:[#allocation11 + $0x180] sm:$0xff] }
 0x9f3   :  { %v9816_v1 = vmul.f32 -1.442695, %v12527_v17  ;;  %v9817_v25 = vmul.f32 -1.442695, %v12543_v8  ;;  %v14649_v17 = vpack.c.bf16 %v3565_v43, %v3561_v53  ;;  %v3613_v43 = vld [vmem:[#allocation11 + $0x1e8] sm:$0xff] }
 0x9f4   :  { %12894 = vpow2.f32 %v9815_v28  ;;  %v3560_v28 = vld [vmem:[#allocation11 + $0x40] sm:$0xff] }
 0x9f5   :  { %12896 = vpow2.f32 %v9816_v1  ;;  %v3564_v1 = vld [vmem:[#allocation11 + $0x60] sm:$0xff] }
 0x9f6   :  { %12898 = vpow2.f32 %v9817_v25  ;;  %v14652_v8 = vpack.c.bf16 %v3564_v1, %v3560_v28  ;;  %v3569_v25 = vld [vmem:[#allocation11 + $0x88] sm:$0xff]  ;;  %v3608_v1 = vld [vmem:[#allocation11 + $0x1c0] sm:$0xff] }
 0x9f7   :  { %12900 = vtanh.f32 %v12542_v13  ;;  %v3573_v13 = vld [vmem:[#allocation11 + $0xa8] sm:$0xff] }
 0x9fe   :  { %v12895_v45 = vpop.eup %12894 }
 0x9ff   :  { %v12897_v5 = vpop.eup %12896  ;;  %v3279_v54 = vadd.f32 1.0, %v12895_v45  ;;  %v14657_v45 = vpack.c.bf16 %v3573_v13, %v3569_v25 }
 0xa00   :  { %v3285_v56 = vadd.f32 1.0, %v12897_v5  ;;  %v12899_v47 = vpop.eup %12898  ;;  %v3568_v5 = vld [vmem:[#allocation11 + $0x80] sm:$0xff] }
 0xa01   :  { %12902 = vrcp.f32 %v3279_v54  ;;  %v12901_v62 = vpop.eup %12900  ;;  %v3292_v59 = vadd.f32 1.0, %v12899_v47  ;;  %v3572_v54 = vld [vmem:[#allocation11 + $0xa0] sm:$0xff]  ;;  %v3581_v47 = vld [vmem:[#allocation11 + $0xe8] sm:$0xff] }
 0xa02   :  { %12904 = vrcp.f32 %v3285_v56  ;;  %v14660_v56 = vpack.c.bf16 %v3572_v54, %v3568_v5 }
 0xa03   :  { %12906 = vrcp.f32 %v3292_v59 }
 0xa0b   :  { %v12903_v63 = vpop.eup %12902 }
 0xa0c   :  { %v12905_v32 = vpop.eup %12904  ;;  %v3296_v52 = vmul.f32 %v12903_v63, %v12901_v62  ;;  %v3576_v63 = vld [vmem:[#allocation11 + $0xc0] sm:$0xff] }
 0xa0d   :  { %v3295_v10 = vmul.f32 %v12905_v32, %v14586_v20  ;;  %v12907_v2 = vpop.eup %12906  ;;  %v3552_v20 = vld [vmem:[#allocation11] sm:$0xff] }
 0xa0e   :  { %v14642_v11 = vpack.c.bf16 %v3556_v26, %v3552_v20  ;;  %v3605_v26 = vld [vmem:[#allocation11 + $0x1a8] sm:$0xff] }
 0xa0f   :  { %v14631_v3 = vadd.f32 %v3296_v52, %v3295_v10  ;;  %v3589_v52 = vld [vmem:[#allocation11 + $0x128] sm:$0xff]  ;;  %v3584_v10 = vld [vmem:[#allocation11 + $0x100] sm:$0xff] }
 0xa11   :  { %12908 = vtanh.f32 %v14631_v3 }
 0xa1b   :  { %v12909_v16 = vpop.eup %12908 }
 0xa1c   :  { %v14634_v44 = vmul.f32 %v12909_v16, %v12907_v2  ;;  %v3597_v16 = vld [vmem:[#allocation11 + $0x168] sm:$0xff] }
 0xa1e   :  { %16210 = vst [vmem:[#allocation30_spill] sm:$0xff] %v14634_v44  ;;  %3438 = vmatmul.mubr.f32.vlgmr.msra.gmra.mrb[26].mxu0 %v14634_v44  ;;  %3509 = vmatmul.mubr.f32.vlgmr.msra.gmra.mrb[26].mxu1 %v14634_v44 }
 0xa1f   :  { %3680 = vmatprep.mubr.f32.mxu0 %v16172_v0  ;;  %3751 = vmatprep.mubr.f32.mxu1 %v16172_v0 }
 0xa20   :  { %10829 = vmatpush1.bf16.msra.mxu0 %v14642_v11  ;;  %10861 = vmatpush1.bf16.msra.mxu1 %v14645_v51 }
 0xa21   :  { %10863 = vmatprep.subr.bf16.mxu1 %v14413_v29  ;;  %10831 = vmatprep.subr.bf16.mxu0 %v14649_v17  ;;  %v3577_v29 = vld [vmem:[#allocation11 + $0xc8] sm:$0xff] }
 0xa22   :  { %v14665_v62 = vpack.c.bf16 %v3581_v47, %v3577_v29 }
 0xa24   :  { %10833 = vmatpush1.bf16.msra.mxu0 %v14652_v8  ;;  %10865 = vmatpush1.bf16.msra.mxu1 %v14426_v7  ;;  %v3580_v7 = vld [vmem:[#allocation11 + $0xe0] sm:$0xff] }
 0xa25   :  { %10867 = vmatprep.subr.bf16.mxu1 %v14429_v4  ;;  %10835 = vmatprep.subr.bf16.mxu0 %v14657_v45  ;;  %v14668_v32 = vpack.c.bf16 %v3580_v7, %v3576_v63  ;;  %v3585_v4 = vld [vmem:[#allocation11 + $0x108] sm:$0xff] }
 0xa26   :  { %v14673_v59 = vpack.c.bf16 %v3589_v52, %v3585_v4 }
 0xa28   :  { %10837 = vmatpush1.bf16.msra.mxu0 %v14660_v56  ;;  %10869 = vmatpush1.bf16.msra.mxu1 %v14442_v40  ;;  %v3588_v40 = vld [vmem:[#allocation11 + $0x120] sm:$0xff] }
 0xa29   :  { %10871 = vmatprep.subr.bf16.mxu1 %v14446_v33  ;;  %10839 = vmatprep.subr.bf16.mxu0 %v14665_v62  ;;  %v14676_v2 = vpack.c.bf16 %v3588_v40, %v3584_v10  ;;  %v3593_v33 = vld [vmem:[#allocation11 + $0x148] sm:$0xff] }
 0xa2a   :  { %v14681_v36 = vpack.c.bf16 %v3597_v16, %v3593_v33 }
 0xa2c   :  { %10841 = vmatpush1.bf16.msra.mxu0 %v14668_v32  ;;  %10873 = vmatpush1.bf16.msra.mxu1 %v14459_v24  ;;  %v3596_v24 = vld [vmem:[#allocation11 + $0x160] sm:$0xff] }
 0xa2d   :  { %10875 = vmatprep.subr.bf16.mxu1 %v14463_v6  ;;  %10843 = vmatprep.subr.bf16.mxu0 %v14673_v59  ;;  %v14684_v20 = vpack.c.bf16 %v3596_v24, %v3592_v48  ;;  %v3601_v6 = vld [vmem:[#allocation11 + $0x188] sm:$0xff] }
 0xa2e   :  { %v14689_v37 = vpack.c.bf16 %v3605_v26, %v3601_v6 }
 0xa30   :  { %10845 = vmatpush1.bf16.msra.mxu0 %v14676_v2  ;;  %10877 = vmatpush1.bf16.msra.mxu1 %v14476_v19  ;;  %v3604_v19 = vld [vmem:[#allocation11 + $0x1a0] sm:$0xff] }
 0xa31   :  { %10879 = vmatprep.subr.bf16.mxu1 %v14480_v42  ;;  %10847 = vmatprep.subr.bf16.mxu0 %v14681_v36  ;;  %v14692_v53 = vpack.c.bf16 %v3604_v19, %v3600_v30  ;;  %v3609_v42 = vld [vmem:[#allocation11 + $0x1c8] sm:$0xff] }
 0xa32   :  { %v14697_v28 = vpack.c.bf16 %v3613_v43, %v3609_v42 }
 0xa34   :  { %10849 = vmatpush1.bf16.msra.mxu0 %v14684_v20  ;;  %10881 = vmatpush1.bf16.msra.mxu1 %v14491_v22  ;;  %v3612_v22 = vld [vmem:[#allocation11 + $0x1e0] sm:$0xff] }
 0xa35   :  { %10883 = vmatprep.subr.bf16.mxu1 %v14497_v50  ;;  %10851 = vmatprep.subr.bf16.mxu0 %v14689_v37  ;;  %v14700_v25 = vpack.c.bf16 %v3612_v22, %v3608_v1  ;;  %v3802_v22 = vld [vmem:[#allocation11 + $0x38] sm:$0xff] }
 0xa38   :  { %10853 = vmatpush1.bf16.msra.mxu0 %v14692_v53  ;;  %10885 = vmatpush1.bf16.msra.mxu1 %v14508_v18 }
 0xa39   :  { %10887 = vmatprep.subr.bf16.mxu1 %v14512_v15  ;;  %10855 = vmatprep.subr.bf16.mxu0 %v14697_v28 }
 0xa3c   :  { %10857 = vmatpush1.bf16.msra.mxu0 %v14700_v25  ;;  %10889 = vmatpush1.bf16.msra.mxu1 %v14517_v27 }
 0xa3d   :  { %10891 = vmatprep.subr.bf16.mxu0 %v14640_v35 }
 0xaf1   :  { %v3439_v50 = vpop.f32.mrb[26].mxu0  ;;  %v3510_v13 = vpop.f32.mrb[26].mxu1 }
 0xaf2   :  { %v12524_v18 = vadd.f32 %v3439_v50, %v14571_v41  ;;  %v3441_v5 = vpop.f32.mrb[27].mxu0  ;;  %v3512_v54 = vpop.f32.mrb[27].mxu1  ;;  %v12540_v4 = vadd.f32 %v3510_v13, %v14583_v49  ;;  %v3806_v13 = vld [vmem:[#allocation11 + $0x58] sm:$0xff] }
 0xaf3   :  { %v12525_v29 = vadd.f32 %v3441_v5, %v14574_v57  ;;  %v12541_v63 = vadd.f32 %v3512_v54, %v14579_v9  ;;  %v3805_v54 = vld [vmem:[#allocation11 + $0x50] sm:$0xff] }
 0xaf4   :  { %v9818_v47 = vmul.f32 -1.442695, %v12524_v18  ;;  %v3810_v18 = vld [vmem:[#allocation11 + $0x78] sm:$0xff] }
 0xaf5   :  { %v9819_v15 = vmul.f32 -1.442695, %v12525_v29  ;;  %v9820_v7 = vmul.f32 -1.442695, %v12541_v63  ;;  %v14740_v5 = vpack.c.bf16 %v3810_v18, %v3806_v13  ;;  %v3809_v29 = vld [vmem:[#allocation11 + $0x70] sm:$0xff]  ;;  %v3818_v63 = vld [vmem:[#allocation11 + $0xb8] sm:$0xff] }
 0xaf6   :  { %12910 = vpow2.f32 %v9818_v47  ;;  %v14742_v47 = vpack.c.bf16 %v3809_v29, %v3805_v54  ;;  %v3842_v13 = vld [vmem:[#allocation11 + $0x178] sm:$0xff]  ;;  %v3837_v54 = vld [vmem:[#allocation11 + $0x150] sm:$0xff] }
 0xaf7   :  { %12912 = vpow2.f32 %v9819_v15  ;;  %v3814_v15 = vld [vmem:[#allocation11 + $0x98] sm:$0xff]  ;;  %v3841_v29 = vld [vmem:[#allocation11 + $0x170] sm:$0xff] }
 0xaf8   :  { %12914 = vpow2.f32 %v9820_v7  ;;  %v14746_v7 = vpack.c.bf16 %v3818_v63, %v3814_v15  ;;  %v14766_v15 = vpack.c.bf16 %v3841_v29, %v3837_v54  ;;  %v3846_v63 = vld [vmem:[#allocation11 + $0x198] sm:$0xff] }
 0xaf9   :  { %12916 = vtanh.f32 %v12540_v4  ;;  %v3813_v4 = vld [vmem:[#allocation11 + $0x90] sm:$0xff] }
 0xb00   :  { %v12911_v27 = vpop.eup %12910 }
 0xb01   :  { %v12913_v52 = vpop.eup %12912  ;;  %v3522_v10 = vadd.f32 1.0, %v12911_v27  ;;  %v3817_v27 = vld [vmem:[#allocation11 + $0xb0] sm:$0xff] }
 0xb02   :  { %v3528_v40 = vadd.f32 1.0, %v12913_v52  ;;  %v12915_v33 = vpop.eup %12914  ;;  %v14748_v52 = vpack.c.bf16 %v3817_v27, %v3813_v4  ;;  %v3850_v4 = vld [vmem:[#allocation11 + $0x1b8] sm:$0xff] }
 0xb03   :  { %12918 = vrcp.f32 %v3522_v10  ;;  %v12917_v16 = vpop.eup %12916  ;;  %v3535_v26 = vadd.f32 1.0, %v12915_v33  ;;  %v3822_v10 = vld [vmem:[#allocation11 + $0xd8] sm:$0xff]  ;;  %v14770_v27 = vpack.c.bf16 %v3850_v4, %v3846_v63 }
 0xb04   :  { %12920 = vrcp.f32 %v3528_v40  ;;  %v3826_v40 = vld [vmem:[#allocation11 + $0xf8] sm:$0xff] }
 0xb05   :  { %12922 = vrcp.f32 %v3535_v26  ;;  %v14752_v33 = vpack.c.bf16 %v3826_v40, %v3822_v10  ;;  %v3834_v26 = vld [vmem:[#allocation11 + $0x138] sm:$0xff]  ;;  %v3845_v10 = vld [vmem:[#allocation11 + $0x190] sm:$0xff] }
 0xb06   :  { %v3849_v40 = vld [vmem:[#allocation11 + $0x1b0] sm:$0xff] }
 0xb0d   :  { %v12919_v48 = vpop.eup %12918 }
 0xb0e   :  { %v12921_v24 = vpop.eup %12920  ;;  %v3539_v6 = vmul.f32 %v12919_v48, %v12917_v16  ;;  %v3821_v16 = vld [vmem:[#allocation11 + $0xd0] sm:$0xff] }
 0xb0f   :  { %v3538_v30 = vmul.f32 %v12921_v24, %v14631_v3  ;;  %v12923_v42 = vpop.eup %12922  ;;  %v3798_v3 = vld [vmem:[#allocation11 + $0x18] sm:$0xff]  ;;  %v3825_v48 = vld [vmem:[#allocation11 + $0xf0] sm:$0xff] }
 0xb10   :  { %v14736_v50 = vpack.c.bf16 %v3802_v22, %v3798_v3  ;;  %v14754_v24 = vpack.c.bf16 %v3825_v48, %v3821_v16  ;;  %v3838_v22 = vld [vmem:[#allocation11 + $0x158] sm:$0xff]  ;;  %v14772_v16 = vpack.c.bf16 %v3849_v40, %v3845_v10 }
 0xb11   :  { %v14711_v19 = vadd.f32 %v3539_v6, %v3538_v30  ;;  %v3830_v6 = vld [vmem:[#allocation11 + $0x118] sm:$0xff]  ;;  %v14764_v18 = vpack.c.bf16 %v3842_v13, %v3838_v22 }
 0xb12   :  { %10923 = vmatprep.subr.bf16.mxu1 %v14736_v50  ;;  %v14758_v30 = vpack.c.bf16 %v3834_v26, %v3830_v6  ;;  %v3854_v48 = vld [vmem:[#allocation11 + $0x1d8] sm:$0xff] }
 0xb13   :  { %12924 = vtanh.f32 %v14711_v19  ;;  %v3858_v6 = vld [vmem:[#allocation11 + $0x1f8] sm:$0xff] }
 0xb14   :  { %v14776_v26 = vpack.c.bf16 %v3858_v6, %v3854_v48 }
 0xb1d   :  { %v12925_v43 = vpop.eup %12924 }
 0xb1e   :  { %v14714_v1 = vmul.f32 %v12925_v43, %v12923_v42  ;;  %v3829_v42 = vld [vmem:[#allocation11 + $0x110] sm:$0xff] }
 0xb1f   :  { %v3833_v43 = vld [vmem:[#allocation11 + $0x130] sm:$0xff] }
 0xb20   :  { %16211 = vst [vmem:[#allocation31_spill] sm:$0xff] %v14714_v1  ;;  %3681 = vmatmul.mubr.f32.vlgmr.msra.gmra.mrb[24].mxu0 %v14714_v1  ;;  %3752 = vmatmul.mubr.f32.vlgmr.msra.gmra.mrb[24].mxu1 %v14714_v1  ;;  %v14760_v3 = vpack.c.bf16 %v3833_v43, %v3829_v42  ;;  %v3853_v42 = vld [vmem:[#allocation11 + $0x1d0] sm:$0xff] }
 0xb21   :  { %10893 = vmatpush1.bf16.msra.mxu0 %v14642_v11  ;;  %3923 = vmatprep.mubr.f32.mxu0 %v16172_v0  ;;  %v3857_v43 = vld [vmem:[#allocation11 + $0x1f0] sm:$0xff] }
 0xb22   :  { %10895 = vmatprep.subr.bf16.mxu0 %v14649_v17  ;;  %3994 = vmatprep.mubr.f32.mxu1 %v16172_v0  ;;  %v14778_v22 = vpack.c.bf16 %v3857_v43, %v3853_v42 }
 0xb23   :  { %10925 = vmatpush1.bf16.msra.mxu1 %v14645_v51 }
 0xb24   :  { %10927 = vmatprep.subr.bf16.mxu1 %v14740_v5 }
 0xb25   :  { %10897 = vmatpush1.bf16.msra.mxu0 %v14652_v8 }
 0xb26   :  { %10899 = vmatprep.subr.bf16.mxu0 %v14657_v45 }
 0xb27   :  { %10929 = vmatpush1.bf16.msra.mxu1 %v14742_v47 }
 0xb28   :  { %10931 = vmatprep.subr.bf16.mxu1 %v14746_v7 }
 0xb29   :  { %10901 = vmatpush1.bf16.msra.mxu0 %v14660_v56 }
 0xb2a   :  { %10903 = vmatprep.subr.bf16.mxu0 %v14665_v62 }
 0xb2b   :  { %10933 = vmatpush1.bf16.msra.mxu1 %v14748_v52 }
 0xb2c   :  { %10935 = vmatprep.subr.bf16.mxu1 %v14752_v33 }
 0xb2d   :  { %10905 = vmatpush1.bf16.msra.mxu0 %v14668_v32 }
 0xb2e   :  { %10907 = vmatprep.subr.bf16.mxu0 %v14673_v59 }
 0xb2f   :  { %10937 = vmatpush1.bf16.msra.mxu1 %v14754_v24 }
 0xb30   :  { %10939 = vmatprep.subr.bf16.mxu1 %v14758_v30 }
 0xb31   :  { %10909 = vmatpush1.bf16.msra.mxu0 %v14676_v2 }
 0xb32   :  { %10911 = vmatprep.subr.bf16.mxu0 %v14681_v36 }
 0xb33   :  { %10941 = vmatpush1.bf16.msra.mxu1 %v14760_v3 }
 0xb34   :  { %10943 = vmatprep.subr.bf16.mxu1 %v14764_v18 }
 0xb35   :  { %10913 = vmatpush1.bf16.msra.mxu0 %v14684_v20 }
 0xb36   :  { %10915 = vmatprep.subr.bf16.mxu0 %v14689_v37 }
 0xb37   :  { %10945 = vmatpush1.bf16.msra.mxu1 %v14766_v15 }
 0xb38   :  { %10947 = vmatprep.subr.bf16.mxu1 %v14770_v27 }
 0xb39   :  { %10917 = vmatpush1.bf16.msra.mxu0 %v14692_v53 }
 0xb3a   :  { %10919 = vmatprep.subr.bf16.mxu0 %v14697_v28 }
 0xb3b   :  { %10949 = vmatpush1.bf16.msra.mxu1 %v14772_v16 }
 0xb3c   :  { %10951 = vmatprep.subr.bf16.mxu1 %v14776_v26 }
 0xb3d   :  { %10921 = vmatpush1.bf16.msra.mxu0 %v14700_v25 }
 0xb3e   :  { %10955 = vmatprep.subr.bf16.mxu0 %v14640_v35 }
 0xb3f   :  { %10953 = vmatpush1.bf16.msra.mxu1 %v14778_v22 }
 0xb40   :  { %10987 = vmatprep.subr.bf16.mxu1 %v14736_v50 }
 0xbf3   :  { %v3682_v13 = vpop.f32.mrb[24].mxu0  ;;  %v3753_v54 = vpop.f32.mrb[24].mxu1 }
 0xbf4   :  { %v12522_v29 = vadd.f32 %v3682_v13, %v14571_v41  ;;  %v3684_v63 = vpop.f32.mrb[25].mxu0  ;;  %v3755_v4 = vpop.f32.mrb[25].mxu1  ;;  %v12538_v43 = vadd.f32 %v3753_v54, %v14583_v49 }
 0xbf5   :  { %v12523_v10 = vadd.f32 %v3684_v63, %v14574_v57  ;;  %v12539_v6 = vadd.f32 %v3755_v4, %v14579_v9 }
 0xbf6   :  { %v9821_v40 = vmul.f32 -1.442695, %v12522_v29 }
 0xbf7   :  { %v9822_v48 = vmul.f32 -1.442695, %v12523_v10  ;;  %v9823_v42 = vmul.f32 -1.442695, %v12539_v6 }
 0xbf8   :  { %12926 = vpow2.f32 %v9821_v40 }
 0xbf9   :  { %12928 = vpow2.f32 %v9822_v48 }
 0xbfa   :  { %12930 = vpow2.f32 %v9823_v42 }
 0xbfb   :  { %12932 = vtanh.f32 %v12538_v43 }
 0xc02   :  { %v12927_v0 = vpop.eup %12926 }
 0xc03   :  { %v12929_v55 = vpop.eup %12928  ;;  %v3765_v38 = vadd.f32 1.0, %v12927_v0 }
 0xc04   :  { %v3771_v34 = vadd.f32 1.0, %v12929_v55  ;;  %v12931_v13 = vpop.eup %12930 }
 0xc05   :  { %12934 = vrcp.f32 %v3765_v38  ;;  %v12933_v31 = vpop.eup %12932  ;;  %v3778_v40 = vadd.f32 1.0, %v12931_v13 }
 0xc06   :  { %12936 = vrcp.f32 %v3771_v34 }
 0xc07   :  { %12938 = vrcp.f32 %v3778_v40 }
 0xc0f   :  { %v12935_v63 = vpop.eup %12934 }
 0xc10   :  { %v12937_v29 = vpop.eup %12936  ;;  %v3782_v10 = vmul.f32 %v12935_v63, %v12933_v31  ;;  %v16212_v31 = vmov 0.0  }
 0xc11   :  { %v3781_v48 = vmul.f32 %v12937_v29, %v14711_v19  ;;  %v12939_v54 = vpop.eup %12938 }
 0xc13   :  { %v14788_v4 = vadd.f32 %v3782_v10, %v3781_v48 }
 0xc15   :  { %12940 = vtanh.f32 %v14788_v4 }
 0xc1f   :  { %v12941_v0 = vpop.eup %12940 }
 0xc20   :  { %v14791_v6 = vmul.f32 %v12941_v0, %v12939_v54 }
 0xc22   :  { %3924 = vmatmul.mubr.f32.vlgmr.msra.gmra.mrb[22].mxu0 %v14791_v6  ;;  %3995 = vmatmul.mubr.f32.vlgmr.msra.gmra.mrb[22].mxu1 %v14791_v6 }
 0xc23   :  { %10957 = vmatpush1.bf16.msra.mxu0 %v14642_v11  ;;  %10989 = vmatpush1.bf16.msra.mxu1 %v14645_v51 }
 0xc24   :  { %10959 = vmatprep.subr.bf16.mxu0 %v14649_v17  ;;  %10991 = vmatprep.subr.bf16.mxu1 %v14740_v5 }
 0xc25   :  { %4166 = vmatprep.mubr.f32.mxu0 %v16212_v31  ;;  %4237 = vmatprep.mubr.f32.mxu1 %v16212_v31 }
 0xc27   :  { %10961 = vmatpush1.bf16.msra.mxu0 %v14652_v8  ;;  %10993 = vmatpush1.bf16.msra.mxu1 %v14742_v47 }
 0xc28   :  { %10963 = vmatprep.subr.bf16.mxu0 %v14657_v45  ;;  %10995 = vmatprep.subr.bf16.mxu1 %v14746_v7 }
 0xc2b   :  { %10965 = vmatpush1.bf16.msra.mxu0 %v14660_v56  ;;  %10997 = vmatpush1.bf16.msra.mxu1 %v14748_v52 }
 0xc2c   :  { %10967 = vmatprep.subr.bf16.mxu0 %v14665_v62  ;;  %10999 = vmatprep.subr.bf16.mxu1 %v14752_v33 }
 0xc2f   :  { %10969 = vmatpush1.bf16.msra.mxu0 %v14668_v32  ;;  %11001 = vmatpush1.bf16.msra.mxu1 %v14754_v24 }
 0xc30   :  { %10971 = vmatprep.subr.bf16.mxu0 %v14673_v59  ;;  %11003 = vmatprep.subr.bf16.mxu1 %v14758_v30 }
 0xc33   :  { %10973 = vmatpush1.bf16.msra.mxu0 %v14676_v2  ;;  %11005 = vmatpush1.bf16.msra.mxu1 %v14760_v3 }
 0xc34   :  { %10975 = vmatprep.subr.bf16.mxu0 %v14681_v36  ;;  %11007 = vmatprep.subr.bf16.mxu1 %v14764_v18 }
 0xc37   :  { %10977 = vmatpush1.bf16.msra.mxu0 %v14684_v20  ;;  %11009 = vmatpush1.bf16.msra.mxu1 %v14766_v15 }
 0xc38   :  { %10979 = vmatprep.subr.bf16.mxu0 %v14689_v37  ;;  %11011 = vmatprep.subr.bf16.mxu1 %v14770_v27 }
 0xc3b   :  { %10981 = vmatpush1.bf16.msra.mxu0 %v14692_v53  ;;  %11013 = vmatpush1.bf16.msra.mxu1 %v14772_v16 }
 0xc3c   :  { %10983 = vmatprep.subr.bf16.mxu0 %v14697_v28  ;;  %11015 = vmatprep.subr.bf16.mxu1 %v14776_v26 }
 0xc3f   :  { %10985 = vmatpush1.bf16.msra.mxu0 %v14700_v25  ;;  %11017 = vmatpush1.bf16.msra.mxu1 %v14778_v22 }
 0xc40   :  { %11019 = vmatprep.subr.bf16.mxu0 %v14640_v35  ;;  %11051 = vmatprep.subr.bf16.mxu1 %v14736_v50 }
 0xcf5   :  { %v3925_v34 = vpop.f32.mrb[22].mxu0  ;;  %v3996_v38 = vpop.f32.mrb[22].mxu1 }
 0xcf6   :  { %v12520_v55 = vadd.f32 %v3925_v34, %v14571_v41  ;;  %v3927_v19 = vpop.f32.mrb[23].mxu0  ;;  %v3998_v42 = vpop.f32.mrb[23].mxu1  ;;  %v12536_v40 = vadd.f32 %v3996_v38, %v14583_v49 }
 0xcf7   :  { %v12521_v43 = vadd.f32 %v3927_v19, %v14574_v57  ;;  %v12537_v29 = vadd.f32 %v3998_v42, %v14579_v9 }
 0xcf8   :  { %v9824_v13 = vmul.f32 -1.442695, %v12520_v55 }
 0xcf9   :  { %v9825_v63 = vmul.f32 -1.442695, %v12521_v43  ;;  %v9826_v10 = vmul.f32 -1.442695, %v12537_v29 }
 0xcfa   :  { %12942 = vpow2.f32 %v9824_v13 }
 0xcfb   :  { %12944 = vpow2.f32 %v9825_v63 }
 0xcfc   :  { %12946 = vpow2.f32 %v9826_v10 }
 0xcfd   :  { %12948 = vtanh.f32 %v12536_v40 }
 0xd04   :  { %v12943_v35 = vpop.eup %12942 }
 0xd05   :  { %v12945_v48 = vpop.eup %12944  ;;  %v4008_v54 = vadd.f32 1.0, %v12943_v35 }
 0xd06   :  { %v4014_v0 = vadd.f32 1.0, %v12945_v48  ;;  %v12947_v34 = vpop.eup %12946 }
 0xd07   :  { %12950 = vrcp.f32 %v4008_v54  ;;  %v12949_v58 = vpop.eup %12948  ;;  %v4021_v13 = vadd.f32 1.0, %v12947_v34 }
 0xd08   :  { %12952 = vrcp.f32 %v4014_v0 }
 0xd09   :  { %12954 = vrcp.f32 %v4021_v13 }
 0xd11   :  { %v12951_v19 = vpop.eup %12950 }
 0xd12   :  { %v12953_v55 = vpop.eup %12952  ;;  %v4025_v43 = vmul.f32 %v12951_v19, %v12949_v58 }
 0xd13   :  { %v4024_v63 = vmul.f32 %v12953_v55, %v14788_v4  ;;  %v12955_v38 = vpop.eup %12954  ;;  %v4525_v55 = vld [vmem:[#allocation11 + $0x8] sm:$0xff] }
 0xd15   :  { %v14834_v42 = vadd.f32 %v4025_v43, %v4024_v63  ;;  %v4529_v43 = vld [vmem:[#allocation11 + $0x28] sm:$0xff]  ;;  %v4524_v63 = vld [vmem:[#allocation11] sm:$0xff] }
 0xd16   :  { %v11082_v13 = vpack.c.bf16 %v4529_v43, %v4525_v55  ;;  %v4564_v55 = vld [vmem:[#allocation11 + $0x140] sm:$0xff] }
 0xd17   :  { %12956 = vtanh.f32 %v14834_v42  ;;  %v4568_v43 = vld [vmem:[#allocation11 + $0x160] sm:$0xff] }
 0xd21   :  { %v12957_v29 = vpop.eup %12956 }
 0xd22   :  { %v14837_v10 = vmul.f32 %v12957_v29, %v12955_v38  ;;  %v4526_v38 = vld [vmem:[#allocation11 + $0x10] sm:$0xff] }
 0xd24   :  { %4167 = vmatmul.mubr.f32.vlgmr.msra.gmra.mrb[20].mxu0 %v14837_v10  ;;  %4238 = vmatmul.mubr.f32.vlgmr.msra.gmra.mrb[20].mxu1 %v14837_v10 }
 0xd25   :  { %11021 = vmatpush1.bf16.msra.mxu0 %v14642_v11  ;;  %11053 = vmatpush1.bf16.msra.mxu1 %v14645_v51 }
 0xd26   :  { %11023 = vmatprep.subr.bf16.mxu0 %v14649_v17  ;;  %11055 = vmatprep.subr.bf16.mxu1 %v14740_v5 }
 0xd27   :  { %4409 = vmatprep.mubr.f32.mxu0 %v16212_v31  ;;  %4480 = vmatprep.mubr.f32.mxu1 %v16212_v31 }
 0xd29   :  { %11025 = vmatpush1.bf16.msra.mxu0 %v14652_v8  ;;  %11057 = vmatpush1.bf16.msra.mxu1 %v14742_v47 }
 0xd2a   :  { %11027 = vmatprep.subr.bf16.mxu0 %v14657_v45  ;;  %11059 = vmatprep.subr.bf16.mxu1 %v14746_v7 }
 0xd2d   :  { %11029 = vmatpush1.bf16.msra.mxu0 %v14660_v56  ;;  %11061 = vmatpush1.bf16.msra.mxu1 %v14748_v52 }
 0xd2e   :  { %11031 = vmatprep.subr.bf16.mxu0 %v14665_v62  ;;  %11063 = vmatprep.subr.bf16.mxu1 %v14752_v33 }
 0xd31   :  { %11033 = vmatpush1.bf16.msra.mxu0 %v14668_v32  ;;  %11065 = vmatpush1.bf16.msra.mxu1 %v14754_v24 }
 0xd32   :  { %11035 = vmatprep.subr.bf16.mxu0 %v14673_v59  ;;  %11067 = vmatprep.subr.bf16.mxu1 %v14758_v30 }
 0xd35   :  { %11037 = vmatpush1.bf16.msra.mxu0 %v14676_v2  ;;  %11069 = vmatpush1.bf16.msra.mxu1 %v14760_v3 }
 0xd36   :  { %11039 = vmatprep.subr.bf16.mxu0 %v14681_v36  ;;  %11071 = vmatprep.subr.bf16.mxu1 %v14764_v18 }
 0xd39   :  { %11041 = vmatpush1.bf16.msra.mxu0 %v14684_v20  ;;  %11073 = vmatpush1.bf16.msra.mxu1 %v14766_v15 }
 0xd3a   :  { %11043 = vmatprep.subr.bf16.mxu0 %v14689_v37  ;;  %11075 = vmatprep.subr.bf16.mxu1 %v14770_v27 }
 0xd3d   :  { %11045 = vmatpush1.bf16.msra.mxu0 %v14692_v53  ;;  %11077 = vmatpush1.bf16.msra.mxu1 %v14772_v16 }
 0xd3e   :  { %11047 = vmatprep.subr.bf16.mxu0 %v14697_v28  ;;  %11079 = vmatprep.subr.bf16.mxu1 %v14776_v26 }
 0xd41   :  { %11049 = vmatpush1.bf16.msra.mxu0 %v14700_v25  ;;  %11081 = vmatpush1.bf16.msra.mxu1 %v14778_v22 }
 0xd42   :  { %11115 = vmatprep.subr.bf16.mxu1 %v14736_v50  ;;  %11083 = vmatprep.subr.bf16.mxu0 %v11082_v13  ;;  %v11104_v13 = vpack.c.bf16 %v4568_v43, %v4564_v55  ;;  %v4781_v55 = vld [vmem:[#allocation12 + $0x20] sm:$0xff]  ;;  %v4779_v43 = vld [vmem:[#allocation12 + $0x10] sm:$0xff] }
 0xdf7   :  { %v4168_v58 = vpop.f32.mrb[20].mxu0  ;;  %v4239_v11 = vpop.f32.mrb[20].mxu1 }
 0xdf8   :  { %v12518_v51 = vadd.f32 %v4168_v58, %v14571_v41  ;;  %v4170_v17 = vpop.f32.mrb[21].mxu0  ;;  %v4241_v8 = vpop.f32.mrb[21].mxu1  ;;  %v12534_v2 = vadd.f32 %v4239_v11, %v14583_v49  ;;  %v4530_v58 = vld [vmem:[#allocation11 + $0x30] sm:$0xff] }
 0xdf9   :  { %v12519_v45 = vadd.f32 %v4170_v17, %v14574_v57  ;;  %v12535_v32 = vadd.f32 %v4241_v8, %v14579_v9  ;;  %v11116_v11 = vpack.c.bf16 %v4530_v58, %v4526_v38  ;;  %v4537_v17 = vld [vmem:[#allocation11 + $0x68] sm:$0xff]  ;;  %v4576_v38 = vld [vmem:[#allocation11 + $0x1a0] sm:$0xff] }
 0xdfa   :  { %v9827_v56 = vmul.f32 -1.442695, %v12518_v51  ;;  %v4533_v51 = vld [vmem:[#allocation11 + $0x48] sm:$0xff] }
 0xdfb   :  { %v9828_v62 = vmul.f32 -1.442695, %v12519_v45  ;;  %v9829_v59 = vmul.f32 -1.442695, %v12535_v32  ;;  %v11086_v8 = vpack.c.bf16 %v4537_v17, %v4533_v51  ;;  %v4532_v45 = vld [vmem:[#allocation11 + $0x40] sm:$0xff]  ;;  %v4541_v32 = vld [vmem:[#allocation11 + $0x88] sm:$0xff] }
 0xdfc   :  { %12958 = vpow2.f32 %v9827_v56  ;;  %v4536_v56 = vld [vmem:[#allocation11 + $0x60] sm:$0xff]  ;;  %v4585_v58 = vld [vmem:[#allocation11 + $0x1e8] sm:$0xff] }
 0xdfd   :  { %12960 = vpow2.f32 %v9828_v62  ;;  %v11088_v62 = vpack.c.bf16 %v4536_v56, %v4532_v45  ;;  %v4584_v51 = vld [vmem:[#allocation11 + $0x1e0] sm:$0xff]  ;;  %v4784_v56 = vld [vmem:[#allocation12 + $0x38] sm:$0xff] }
 0xdfe   :  { %12962 = vpow2.f32 %v9829_v59  ;;  %v4545_v59 = vld [vmem:[#allocation11 + $0xa8] sm:$0xff] }
 0xdff   :  { %12964 = vtanh.f32 %v12534_v2  ;;  %v11090_v2 = vpack.c.bf16 %v4545_v59, %v4541_v32 }
 0xe06   :  { %v12959_v36 = vpop.eup %12958 }
 0xe07   :  { %v12961_v20 = vpop.eup %12960  ;;  %v4251_v37 = vadd.f32 1.0, %v12959_v36  ;;  %v4540_v36 = vld [vmem:[#allocation11 + $0x80] sm:$0xff] }
 0xe08   :  { %v4257_v53 = vadd.f32 1.0, %v12961_v20  ;;  %v12963_v28 = vpop.eup %12962  ;;  %v4544_v20 = vld [vmem:[#allocation11 + $0xa0] sm:$0xff] }
 0xe09   :  { %12966 = vrcp.f32 %v4251_v37  ;;  %v12965_v25 = vpop.eup %12964  ;;  %v4264_v35 = vadd.f32 1.0, %v12963_v28  ;;  %v11092_v37 = vpack.c.bf16 %v4544_v20, %v4540_v36  ;;  %v4553_v28 = vld [vmem:[#allocation11 + $0xe8] sm:$0xff] }
 0xe0a   :  { %12968 = vrcp.f32 %v4257_v53  ;;  %v4549_v53 = vld [vmem:[#allocation11 + $0xc8] sm:$0xff] }
 0xe0b   :  { %12970 = vrcp.f32 %v4264_v35  ;;  %v4556_v35 = vld [vmem:[#allocation11 + $0x100] sm:$0xff] }
 0xe13   :  { %v12967_v50 = vpop.eup %12966 }
 0xe14   :  { %v12969_v4 = vpop.eup %12968  ;;  %v4268_v40 = vmul.f32 %v12967_v50, %v12965_v25  ;;  %v4548_v25 = vld [vmem:[#allocation11 + $0xc0] sm:$0xff] }
 0xe15   :  { %v4267_v48 = vmul.f32 %v12969_v4, %v14834_v42  ;;  %v12971_v0 = vpop.eup %12970  ;;  %v4528_v42 = vld [vmem:[#allocation11 + $0x20] sm:$0xff] }
 0xe16   :  { %v11084_v29 = vpack.c.bf16 %v4528_v42, %v4524_v63  ;;  %v4552_v50 = vld [vmem:[#allocation11 + $0xe0] sm:$0xff]  ;;  %v4577_v63 = vld [vmem:[#allocation11 + $0x1a8] sm:$0xff] }
 0xe17   :  { %v14879_v54 = vadd.f32 %v4268_v40, %v4267_v48  ;;  %v11096_v4 = vpack.c.bf16 %v4552_v50, %v4548_v25  ;;  %v4561_v40 = vld [vmem:[#allocation11 + $0x128] sm:$0xff]  ;;  %v4560_v48 = vld [vmem:[#allocation11 + $0x120] sm:$0xff] }
 0xe18   :  { %v4572_v42 = vld [vmem:[#allocation11 + $0x180] sm:$0xff] }
 0xe19   :  { %12972 = vtanh.f32 %v14879_v54 }
 0xe23   :  { %v12973_v34 = vpop.eup %12972 }
 0xe24   :  { %v14882_v19 = vmul.f32 %v12973_v34, %v12971_v0  ;;  %v11100_v0 = vpack.c.bf16 %v4560_v48, %v4556_v35  ;;  %v4569_v34 = vld [vmem:[#allocation11 + $0x168] sm:$0xff] }
 0xe26   :  { %4410 = vmatmul.mubr.f32.vlgmr.msra.gmra.mrb[18].mxu0 %v14882_v19  ;;  %4481 = vmatmul.mubr.f32.vlgmr.msra.gmra.mrb[18].mxu1 %v14882_v19 }
 0xe27   :  { %4652 = vmatprep.mubr.f32.mxu0 %v16212_v31  ;;  %4723 = vmatprep.mubr.f32.mxu1 %v16212_v31 }
 0xe28   :  { %11085 = vmatpush1.bf16.msra.mxu0 %v11084_v29  ;;  %11117 = vmatpush1.bf16.msra.mxu1 %v11116_v11  ;;  %v11108_v29 = vpack.c.bf16 %v4576_v38, %v4572_v42  ;;  %v4580_v11 = vld [vmem:[#allocation11 + $0x1c0] sm:$0xff]  ;;  %v4792_v42 = vld [vmem:[#allocation12 + $0x78] sm:$0xff] }
 0xe29   :  { %11119 = vmatprep.subr.bf16.mxu1 %v14740_v5  ;;  %11087 = vmatprep.subr.bf16.mxu0 %v11086_v8  ;;  %v11094_v5 = vpack.c.bf16 %v4553_v28, %v4549_v53  ;;  %v11112_v17 = vpack.c.bf16 %v4584_v51, %v4580_v11  ;;  %v4782_v8 = vld [vmem:[#allocation12 + $0x28] sm:$0xff]  ;;  %v4789_v11 = vld [vmem:[#allocation12 + $0x60] sm:$0xff] }
 0xe2c   :  { %11089 = vmatpush1.bf16.msra.mxu0 %v11088_v62  ;;  %11121 = vmatpush1.bf16.msra.mxu1 %v14742_v47  ;;  %v4557_v47 = vld [vmem:[#allocation11 + $0x108] sm:$0xff] }
 0xe2d   :  { %11123 = vmatprep.subr.bf16.mxu1 %v14746_v7  ;;  %11091 = vmatprep.subr.bf16.mxu0 %v11090_v2  ;;  %v11098_v7 = vpack.c.bf16 %v4561_v40, %v4557_v47 }
 0xe30   :  { %11093 = vmatpush1.bf16.msra.mxu0 %v11092_v37  ;;  %11125 = vmatpush1.bf16.msra.mxu1 %v14748_v52  ;;  %v4565_v52 = vld [vmem:[#allocation11 + $0x148] sm:$0xff] }
 0xe31   :  { %11127 = vmatprep.subr.bf16.mxu1 %v14752_v33  ;;  %11095 = vmatprep.subr.bf16.mxu0 %v11094_v5  ;;  %v11102_v33 = vpack.c.bf16 %v4569_v34, %v4565_v52 }
 0xe34   :  { %11097 = vmatpush1.bf16.msra.mxu0 %v11096_v4  ;;  %11129 = vmatpush1.bf16.msra.mxu1 %v14754_v24  ;;  %v4573_v24 = vld [vmem:[#allocation11 + $0x188] sm:$0xff] }
 0xe35   :  { %11131 = vmatprep.subr.bf16.mxu1 %v14758_v30  ;;  %11099 = vmatprep.subr.bf16.mxu0 %v11098_v7  ;;  %v11106_v30 = vpack.c.bf16 %v4577_v63, %v4573_v24  ;;  %v4786_v24 = vld [vmem:[#allocation12 + $0x48] sm:$0xff] }
 0xe36   :  { %v4790_v63 = vld [vmem:[#allocation12 + $0x68] sm:$0xff] }
 0xe37   :  { %v11150_v51 = vpack.c.bf16 %v4790_v63, %v4786_v24  ;;  %v4816_v24 = vld [vmem:[#allocation12 + $0x138] sm:$0xff]  ;;  %v4809_v63 = vld [vmem:[#allocation12 + $0x100] sm:$0xff] }
 0xe38   :  { %11101 = vmatpush1.bf16.msra.mxu0 %v11100_v0  ;;  %11133 = vmatpush1.bf16.msra.mxu1 %v14760_v3  ;;  %v4581_v3 = vld [vmem:[#allocation11 + $0x1c8] sm:$0xff] }
 0xe39   :  { %11135 = vmatprep.subr.bf16.mxu1 %v14764_v18  ;;  %11103 = vmatprep.subr.bf16.mxu0 %v11102_v33  ;;  %v11110_v18 = vpack.c.bf16 %v4585_v58, %v4581_v3  ;;  %v4777_v33 = vld [vmem:[#allocation12] sm:$0xff] }
 0xe3a   :  { %v11148_v3 = vpack.c.bf16 %v4781_v55, %v4777_v33  ;;  %v4810_v33 = vld [vmem:[#allocation12 + $0x108] sm:$0xff] }
 0xe3b   :  { %v4814_v55 = vld [vmem:[#allocation12 + $0x128] sm:$0xff] }
 0xe3c   :  { %11105 = vmatpush1.bf16.msra.mxu0 %v11104_v13  ;;  %11137 = vmatpush1.bf16.msra.mxu1 %v14766_v15  ;;  %v4778_v15 = vld [vmem:[#allocation12 + $0x8] sm:$0xff]  ;;  %v4783_v13 = vld [vmem:[#allocation12 + $0x30] sm:$0xff] }
 0xe3d   :  { %11139 = vmatprep.subr.bf16.mxu1 %v14770_v27  ;;  %11107 = vmatprep.subr.bf16.mxu0 %v11106_v30  ;;  %v4780_v27 = vld [vmem:[#allocation12 + $0x18] sm:$0xff]  ;;  %v11146_v45 = vpack.c.bf16 %v4782_v8, %v4778_v15  ;;  %v11212_v58 = vpack.c.bf16 %v4783_v13, %v4779_v43  ;;  %v4787_v15 = vld [vmem:[#allocation12 + $0x50] sm:$0xff]  ;;  %v11162_v13 = vpack.c.bf16 %v4814_v55, %v4810_v33 }
 0xe3e   :  { %v11210_v62 = vpack.c.bf16 %v4784_v56, %v4780_v27  ;;  %v4788_v30 = vld [vmem:[#allocation12 + $0x58] sm:$0xff]  ;;  %v4791_v8 = vld [vmem:[#allocation12 + $0x70] sm:$0xff]  ;;  %v4794_v27 = vld [vmem:[#allocation12 + $0x88] sm:$0xff] }
 0xe3f   :  { %v4796_v56 = vld [vmem:[#allocation12 + $0x98] sm:$0xff]  ;;  %v4835_v55 = vld [vmem:[#allocation12 + $0x1d0] sm:$0xff] }
 0xe40   :  { %11109 = vmatpush1.bf16.msra.mxu0 %v11108_v29  ;;  %11141 = vmatpush1.bf16.msra.mxu1 %v14772_v16  ;;  %v4812_v43 = vld [vmem:[#allocation12 + $0x118] sm:$0xff] }
 0xe41   :  { %11143 = vmatprep.subr.bf16.mxu1 %v14776_v26  ;;  %11111 = vmatprep.subr.bf16.mxu0 %v11110_v18  ;;  %v4785_v18 = vld [vmem:[#allocation12 + $0x40] sm:$0xff] }
 0xe44   :  { %11113 = vmatpush1.bf16.msra.mxu0 %v11112_v17  ;;  %11145 = vmatpush1.bf16.msra.mxu1 %v14778_v22  ;;  %v11214_v17 = vpack.c.bf16 %v4792_v42, %v4788_v30  ;;  %v4813_v30 = vld [vmem:[#allocation12 + $0x120] sm:$0xff]  ;;  %v11226_v42 = vpack.c.bf16 %v4816_v24, %v4812_v43  ;;  %v4839_v43 = vld [vmem:[#allocation12 + $0x1f0] sm:$0xff]  ;;  %v4842_v24 = vld [vmem:[#allocation12 + $0x208] sm:$0xff] }
 0xe45   :  { %11147 = vmatprep.subr.bf16.mxu0 %v11146_v45  ;;  %11211 = vmatprep.subr.bf16.mxu1 %v11210_v62  ;;  %v4798_v45 = vld [vmem:[#allocation12 + $0xa8] sm:$0xff]  ;;  %v4800_v62 = vld [vmem:[#allocation12 + $0xb8] sm:$0xff] }
 0xef9   :  { %v4411_v32 = vpop.f32.mrb[18].mxu0  ;;  %v4482_v16 = vpop.f32.mrb[18].mxu1 }
 0xefa   :  { %v12516_v59 = vadd.f32 %v4411_v32, %v14571_v41  ;;  %v4413_v2 = vpop.f32.mrb[19].mxu0  ;;  %v4484_v36 = vpop.f32.mrb[19].mxu1  ;;  %v12532_v28 = vadd.f32 %v4482_v16, %v14583_v49  ;;  %v11152_v32 = vpack.c.bf16 %v4789_v11, %v4785_v18  ;;  %v11216_v16 = vpack.c.bf16 %v4791_v8, %v4787_v15  ;;  %v4818_v18 = vld [vmem:[#allocation12 + $0x148] sm:$0xff]  ;;  %v4824_v15 = vld [vmem:[#allocation12 + $0x178] sm:$0xff]  ;;  %v4817_v8 = vld [vmem:[#allocation12 + $0x140] sm:$0xff] }
 0xefb   :  { %v12517_v26 = vadd.f32 %v4413_v2, %v14574_v57  ;;  %v12533_v22 = vadd.f32 %v4484_v36, %v14579_v9  ;;  %v4797_v2 = vld [vmem:[#allocation12 + $0xa0] sm:$0xff]  ;;  %v11154_v36 = vpack.c.bf16 %v4798_v45, %v4794_v27  ;;  %v4822_v11 = vld [vmem:[#allocation12 + $0x168] sm:$0xff] }
 0xefc   :  { %v9830_v20 = vmul.f32 -1.442695, %v12516_v59  ;;  %v4793_v59 = vld [vmem:[#allocation12 + $0x80] sm:$0xff] }
 0xefd   :  { %v9831_v37 = vmul.f32 -1.442695, %v12517_v26  ;;  %v9832_v53 = vmul.f32 -1.442695, %v12533_v22  ;;  %v11218_v26 = vpack.c.bf16 %v4800_v62, %v4796_v56  ;;  %v4802_v22 = vld [vmem:[#allocation12 + $0xc8] sm:$0xff]  ;;  %v4821_v27 = vld [vmem:[#allocation12 + $0x160] sm:$0xff] }
 0xefe   :  { %12974 = vpow2.f32 %v9830_v20  ;;  %v4795_v20 = vld [vmem:[#allocation12 + $0x90] sm:$0xff]  ;;  %v11168_v56 = vpack.c.bf16 %v4821_v27, %v4817_v8  ;;  %v4854_v8 = vld [vmem:[#allocation12 + $0x268] sm:$0xff]  ;;  %v4852_v27 = vld [vmem:[#allocation12 + $0x258] sm:$0xff] }
 0xeff   :  { %12976 = vpow2.f32 %v9831_v37  ;;  %v4799_v37 = vld [vmem:[#allocation12 + $0xb0] sm:$0xff] }
 0xf00   :  { %12978 = vpow2.f32 %v9832_v53  ;;  %v4806_v53 = vld [vmem:[#allocation12 + $0xe8] sm:$0xff]  ;;  %v4819_v62 = vld [vmem:[#allocation12 + $0x150] sm:$0xff] }
 0xf01   :  { %12980 = vtanh.f32 %v12532_v28  ;;  %v4804_v28 = vld [vmem:[#allocation12 + $0xd8] sm:$0xff] }
 0xf08   :  { %v12975_v5 = vpop.eup %12974 }
 0xf09   :  { %v12977_v25 = vpop.eup %12976  ;;  %v4494_v50 = vadd.f32 1.0, %v12975_v5  ;;  %v4808_v5 = vld [vmem:[#allocation12 + $0xf8] sm:$0xff] }
 0xf0a   :  { %v4500_v4 = vadd.f32 1.0, %v12977_v25  ;;  %v12979_v47 = vpop.eup %12978  ;;  %v11156_v25 = vpack.c.bf16 %v4797_v2, %v4793_v59  ;;  %v4826_v59 = vld [vmem:[#allocation12 + $0x188] sm:$0xff] }
 0xf0b   :  { %12982 = vrcp.f32 %v4494_v50  ;;  %v12981_v40 = vpop.eup %12980  ;;  %v4507_v0 = vadd.f32 1.0, %v12979_v47  ;;  %v11220_v50 = vpack.c.bf16 %v4799_v37, %v4795_v20  ;;  %v11158_v47 = vpack.c.bf16 %v4806_v53, %v4802_v22  ;;  %v4830_v2 = vld [vmem:[#allocation12 + $0x1a8] sm:$0xff]  ;;  %v4832_v20 = vld [vmem:[#allocation12 + $0x1b8] sm:$0xff]  ;;  %v4825_v37 = vld [vmem:[#allocation12 + $0x180] sm:$0xff] }
 0xf0c   :  { %12984 = vrcp.f32 %v4500_v4  ;;  %v4801_v4 = vld [vmem:[#allocation12 + $0xc0] sm:$0xff] }
 0xf0d   :  { %12986 = vrcp.f32 %v4507_v0  ;;  %v4829_v22 = vld [vmem:[#allocation12 + $0x1a0] sm:$0xff] }
 0xf15   :  { %v12983_v7 = vpop.eup %12982 }
 0xf16   :  { %v12985_v35 = vpop.eup %12984  ;;  %v4511_v48 = vmul.f32 %v12983_v7, %v12981_v40  ;;  %v11222_v40 = vpack.c.bf16 %v4808_v5, %v4804_v28  ;;  %v4805_v7 = vld [vmem:[#allocation12 + $0xe0] sm:$0xff]  ;;  %v11172_v28 = vpack.c.bf16 %v4829_v22, %v4825_v37  ;;  %v4827_v5 = vld [vmem:[#allocation12 + $0x190] sm:$0xff]  ;;  %v4862_v37 = vld [vmem:[#allocation12 + $0x2a8] sm:$0xff] }
 0xf17   :  { %v4510_v52 = vmul.f32 %v12985_v35, %v14879_v54  ;;  %v12987_v38 = vpop.eup %12986  ;;  %v4803_v35 = vld [vmem:[#allocation12 + $0xd0] sm:$0xff]  ;;  %v11160_v0 = vpack.c.bf16 %v4805_v7, %v4801_v4  ;;  %v4834_v4 = vld [vmem:[#allocation12 + $0x1c8] sm:$0xff]  ;;  %v4860_v22 = vld [vmem:[#allocation12 + $0x298] sm:$0xff] }
 0xf19   :  { %v14907_v34 = vadd.f32 %v4511_v48, %v4510_v52  ;;  %v4807_v48 = vld [vmem:[#allocation12 + $0xf0] sm:$0xff] }
 0xf1a   :  { %v11224_v52 = vpack.c.bf16 %v4807_v48, %v4803_v35  ;;  %v4840_v35 = vld [vmem:[#allocation12 + $0x1f8] sm:$0xff]  ;;  %v4833_v48 = vld [vmem:[#allocation12 + $0x1c0] sm:$0xff] }
 0xf1b   :  { %12988 = vtanh.f32 %v14907_v34 }
 0xf25   :  { %v12989_v29 = vpop.eup %12988 }
 0xf26   :  { %v14910_v54 = vmul.f32 %v12989_v29, %v12987_v38  ;;  %v11164_v38 = vpack.c.bf16 %v4813_v30, %v4809_v63  ;;  %v4811_v29 = vld [vmem:[#allocation12 + $0x110] sm:$0xff]  ;;  %v4846_v63 = vld [vmem:[#allocation12 + $0x228] sm:$0xff]  ;;  %v4844_v30 = vld [vmem:[#allocation12 + $0x218] sm:$0xff] }
 0xf28   :  { %4653 = vmatmul.mubr.f32.vlgmr.msra.gmra.mrb[16].mxu0 %v14910_v54  ;;  %4724 = vmatmul.mubr.f32.vlgmr.msra.gmra.mrb[16].mxu1 %v14910_v54 }
 0xf29   :  { %11149 = vmatpush1.bf16.msra.mxu0 %v11148_v3  ;;  %11213 = vmatpush1.bf16.msra.mxu1 %v11212_v58  ;;  %v4815_v3 = vld [vmem:[#allocation12 + $0x130] sm:$0xff] }
 0xf2a   :  { %11151 = vmatprep.subr.bf16.mxu0 %v11150_v51  ;;  %11215 = vmatprep.subr.bf16.mxu1 %v11214_v17  ;;  %v11228_v58 = vpack.c.bf16 %v4815_v3, %v4811_v29  ;;  %v4820_v51 = vld [vmem:[#allocation12 + $0x158] sm:$0xff]  ;;  %v11166_v17 = vpack.c.bf16 %v4822_v11, %v4818_v18  ;;  %v4841_v29 = vld [vmem:[#allocation12 + $0x200] sm:$0xff]  ;;  %v4843_v11 = vld [vmem:[#allocation12 + $0x210] sm:$0xff] }
 0xf2b   :  { %v11230_v45 = vpack.c.bf16 %v4824_v15, %v4820_v51  ;;  %v4845_v3 = vld [vmem:[#allocation12 + $0x220] sm:$0xff]  ;;  %v4847_v51 = vld [vmem:[#allocation12 + $0x230] sm:$0xff]  ;;  %v4850_v15 = vld [vmem:[#allocation12 + $0x248] sm:$0xff] }
 0xf2c   :  { %v11180_v18 = vpack.c.bf16 %v4845_v3, %v4841_v29  ;;  %v4878_v29 = vld [vmem:[#allocation12 + $0x328] sm:$0xff]  ;;  %v4876_v3 = vld [vmem:[#allocation12 + $0x318] sm:$0xff] }
 0xf2d   :  { %11153 = vmatpush1.bf16.msra.mxu0 %v11152_v32  ;;  %11217 = vmatpush1.bf16.msra.mxu1 %v11216_v16  ;;  %v4823_v32 = vld [vmem:[#allocation12 + $0x170] sm:$0xff] }
 0xf2e   :  { %11155 = vmatprep.subr.bf16.mxu0 %v11154_v36  ;;  %11219 = vmatprep.subr.bf16.mxu1 %v11218_v26  ;;  %v11232_v16 = vpack.c.bf16 %v4823_v32, %v4819_v62  ;;  %v4828_v36 = vld [vmem:[#allocation12 + $0x198] sm:$0xff]  ;;  %v11170_v26 = vpack.c.bf16 %v4830_v2, %v4826_v59  ;;  %v4849_v62 = vld [vmem:[#allocation12 + $0x240] sm:$0xff]  ;;  %v4851_v2 = vld [vmem:[#allocation12 + $0x250] sm:$0xff] }
 0xf2f   :  { %v11234_v53 = vpack.c.bf16 %v4832_v20, %v4828_v36  ;;  %v4853_v32 = vld [vmem:[#allocation12 + $0x260] sm:$0xff]  ;;  %v4855_v36 = vld [vmem:[#allocation12 + $0x270] sm:$0xff]  ;;  %v4858_v20 = vld [vmem:[#allocation12 + $0x288] sm:$0xff] }
 0xf30   :  { %v11184_v59 = vpack.c.bf16 %v4853_v32, %v4849_v62  ;;  %v4886_v62 = vld [vmem:[#allocation12 + $0x368] sm:$0xff]  ;;  %v4884_v32 = vld [vmem:[#allocation12 + $0x358] sm:$0xff] }
 0xf31   :  { %11157 = vmatpush1.bf16.msra.mxu0 %v11156_v25  ;;  %11221 = vmatpush1.bf16.msra.mxu1 %v11220_v50  ;;  %v4831_v25 = vld [vmem:[#allocation12 + $0x1b0] sm:$0xff] }
 0xf32   :  { %11159 = vmatprep.subr.bf16.mxu0 %v11158_v47  ;;  %11223 = vmatprep.subr.bf16.mxu1 %v11222_v40  ;;  %v11236_v50 = vpack.c.bf16 %v4831_v25, %v4827_v5  ;;  %v4838_v47 = vld [vmem:[#allocation12 + $0x1e8] sm:$0xff]  ;;  %v4836_v40 = vld [vmem:[#allocation12 + $0x1d8] sm:$0xff]  ;;  %v4857_v5 = vld [vmem:[#allocation12 + $0x280] sm:$0xff] }
 0xf33   :  { %v11174_v7 = vpack.c.bf16 %v4838_v47, %v4834_v4  ;;  %v4861_v25 = vld [vmem:[#allocation12 + $0x2a0] sm:$0xff]  ;;  %v4859_v47 = vld [vmem:[#allocation12 + $0x290] sm:$0xff] }
 0xf34   :  { %v11188_v4 = vpack.c.bf16 %v4861_v25, %v4857_v5  ;;  %v4894_v5 = vld [vmem:[#allocation12 + $0x3a8] sm:$0xff]  ;;  %v4892_v25 = vld [vmem:[#allocation12 + $0x398] sm:$0xff] }
 0xf35   :  { %11161 = vmatpush1.bf16.msra.mxu0 %v11160_v0  ;;  %11225 = vmatpush1.bf16.msra.mxu1 %v11224_v52  ;;  %v4837_v0 = vld [vmem:[#allocation12 + $0x1e0] sm:$0xff]  ;;  %v11238_v52 = vpack.c.bf16 %v4840_v35, %v4836_v40  ;;  %v4863_v40 = vld [vmem:[#allocation12 + $0x2b0] sm:$0xff]  ;;  %v4866_v35 = vld [vmem:[#allocation12 + $0x2c8] sm:$0xff] }
 0xf36   :  { %11163 = vmatprep.subr.bf16.mxu0 %v11162_v13  ;;  %11227 = vmatprep.subr.bf16.mxu1 %v11226_v42  ;;  %v11176_v33 = vpack.c.bf16 %v4837_v0, %v4833_v48  ;;  %v11240_v13 = vpack.c.bf16 %v4839_v43, %v4835_v55  ;;  %v11178_v42 = vpack.c.bf16 %v4846_v63, %v4842_v24  ;;  %v4870_v48 = vld [vmem:[#allocation12 + $0x2e8] sm:$0xff]  ;;  %v4868_v0 = vld [vmem:[#allocation12 + $0x2d8] sm:$0xff]  ;;  %v4865_v55 = vld [vmem:[#allocation12 + $0x2c0] sm:$0xff] }
 0xf37   :  { %v4869_v43 = vld [vmem:[#allocation12 + $0x2e0] sm:$0xff]  ;;  %v4867_v63 = vld [vmem:[#allocation12 + $0x2d0] sm:$0xff] }
 0xf38   :  { %v11192_v24 = vpack.c.bf16 %v4869_v43, %v4865_v55 }
 0xf39   :  { %11165 = vmatpush1.bf16.msra.mxu0 %v11164_v38  ;;  %11229 = vmatpush1.bf16.msra.mxu1 %v11228_v58  ;;  %v4848_v38 = vld [vmem:[#allocation12 + $0x238] sm:$0xff] }
 0xf3a   :  { %11167 = vmatprep.subr.bf16.mxu0 %v11166_v17  ;;  %11231 = vmatprep.subr.bf16.mxu1 %v11230_v45  ;;  %v11242_v58 = vpack.c.bf16 %v4848_v38, %v4844_v30  ;;  %v11244_v17 = vpack.c.bf16 %v4847_v51, %v4843_v11  ;;  %v11182_v45 = vpack.c.bf16 %v4854_v8, %v4850_v15  ;;  %v4871_v30 = vld [vmem:[#allocation12 + $0x2f0] sm:$0xff]  ;;  %v4874_v38 = vld [vmem:[#allocation12 + $0x308] sm:$0xff]  ;;  %v4873_v11 = vld [vmem:[#allocation12 + $0x300] sm:$0xff] }
 0xf3b   :  { %v4877_v51 = vld [vmem:[#allocation12 + $0x320] sm:$0xff]  ;;  %v4875_v8 = vld [vmem:[#allocation12 + $0x310] sm:$0xff] }
 0xf3c   :  { %v11196_v15 = vpack.c.bf16 %v4877_v51, %v4873_v11  ;;  %v5198_v11 = vld [vmem:[#allocation14 + $0x28] sm:$0xff]  ;;  %v5196_v51 = vld [vmem:[#allocation14 + $0x18] sm:$0xff] }
 0xf3d   :  { %11169 = vmatpush1.bf16.msra.mxu0 %v11168_v56  ;;  %11233 = vmatpush1.bf16.msra.mxu1 %v11232_v16  ;;  %v4856_v56 = vld [vmem:[#allocation12 + $0x278] sm:$0xff] }
 0xf3e   :  { %11171 = vmatprep.subr.bf16.mxu0 %v11170_v26  ;;  %11235 = vmatprep.subr.bf16.mxu1 %v11234_v53  ;;  %v11246_v16 = vpack.c.bf16 %v4856_v56, %v4852_v27  ;;  %v11248_v26 = vpack.c.bf16 %v4855_v36, %v4851_v2  ;;  %v11186_v53 = vpack.c.bf16 %v4862_v37, %v4858_v20  ;;  %v4879_v27 = vld [vmem:[#allocation12 + $0x330] sm:$0xff]  ;;  %v4882_v56 = vld [vmem:[#allocation12 + $0x348] sm:$0xff]  ;;  %v4881_v2 = vld [vmem:[#allocation12 + $0x340] sm:$0xff] }
 0xf3f   :  { %v4885_v36 = vld [vmem:[#allocation12 + $0x360] sm:$0xff]  ;;  %v4883_v37 = vld [vmem:[#allocation12 + $0x350] sm:$0xff] }
 0xf40   :  { %v11200_v20 = vpack.c.bf16 %v4885_v36, %v4881_v2 }
 0xf41   :  { %11173 = vmatpush1.bf16.msra.mxu0 %v11172_v28  ;;  %11237 = vmatpush1.bf16.msra.mxu1 %v11236_v50  ;;  %v4864_v28 = vld [vmem:[#allocation12 + $0x2b8] sm:$0xff] }
 0xf42   :  { %11175 = vmatprep.subr.bf16.mxu0 %v11174_v7  ;;  %11239 = vmatprep.subr.bf16.mxu1 %v11238_v52  ;;  %v11250_v50 = vpack.c.bf16 %v4864_v28, %v4860_v22  ;;  %v11252_v7 = vpack.c.bf16 %v4863_v40, %v4859_v47  ;;  %v11190_v52 = vpack.c.bf16 %v4870_v48, %v4866_v35  ;;  %v4887_v22 = vld [vmem:[#allocation12 + $0x370] sm:$0xff]  ;;  %v4889_v40 = vld [vmem:[#allocation12 + $0x380] sm:$0xff] }
 0xf43   :  { %v11264_v28 = vpack.c.bf16 %v4887_v22, %v4883_v37  ;;  %v4891_v35 = vld [vmem:[#allocation12 + $0x390] sm:$0xff] }
 0xf45   :  { %11177 = vmatpush1.bf16.msra.mxu0 %v11176_v33  ;;  %11241 = vmatpush1.bf16.msra.mxu1 %v11240_v13  ;;  %v4872_v33 = vld [vmem:[#allocation12 + $0x2f8] sm:$0xff] }
 0xf46   :  { %11179 = vmatprep.subr.bf16.mxu0 %v11178_v42  ;;  %11243 = vmatprep.subr.bf16.mxu1 %v11242_v58  ;;  %v11254_v13 = vpack.c.bf16 %v4872_v33, %v4868_v0  ;;  %v11256_v42 = vpack.c.bf16 %v4871_v30, %v4867_v63  ;;  %v11194_v58 = vpack.c.bf16 %v4878_v29, %v4874_v38  ;;  %v4895_v0 = vld [vmem:[#allocation12 + $0x3b0] sm:$0xff]  ;;  %v4902_v33 = vld [vmem:[#allocation12 + $0x3e8] sm:$0xff]  ;;  %v4897_v63 = vld [vmem:[#allocation12 + $0x3c0] sm:$0xff] }
 0xf47   :  { %v11268_v55 = vpack.c.bf16 %v4895_v0, %v4891_v35  ;;  %v4899_v38 = vld [vmem:[#allocation12 + $0x3d0] sm:$0xff]  ;;  %v5202_v0 = vld [vmem:[#allocation14 + $0x48] sm:$0xff] }
 0xf48   :  { %v4903_v29 = vld [vmem:[#allocation12 + $0x3f0] sm:$0xff] }
 0xf49   :  { %11181 = vmatpush1.bf16.msra.mxu0 %v11180_v18  ;;  %11245 = vmatpush1.bf16.msra.mxu1 %v11244_v17  ;;  %v4880_v18 = vld [vmem:[#allocation12 + $0x338] sm:$0xff]  ;;  %v5195_v35 = vld [vmem:[#allocation14 + $0x10] sm:$0xff] }
 0xf4a   :  { %11183 = vmatprep.subr.bf16.mxu0 %v11182_v45  ;;  %11247 = vmatprep.subr.bf16.mxu1 %v11246_v16  ;;  %v11258_v17 = vpack.c.bf16 %v4880_v18, %v4876_v3  ;;  %v11260_v45 = vpack.c.bf16 %v4879_v27, %v4875_v8  ;;  %v11198_v16 = vpack.c.bf16 %v4886_v62, %v4882_v56  ;;  %v5194_v18 = vld [vmem:[#allocation14 + $0x8] sm:$0xff] }
 0xf4d   :  { %11185 = vmatpush1.bf16.msra.mxu0 %v11184_v59  ;;  %11249 = vmatpush1.bf16.msra.mxu1 %v11248_v26  ;;  %v4888_v59 = vld [vmem:[#allocation12 + $0x378] sm:$0xff] }
 0xf4e   :  { %11187 = vmatprep.subr.bf16.mxu0 %v11186_v53  ;;  %11251 = vmatprep.subr.bf16.mxu1 %v11250_v50  ;;  %v11262_v26 = vpack.c.bf16 %v4888_v59, %v4884_v32  ;;  %v4890_v53 = vld [vmem:[#allocation12 + $0x388] sm:$0xff]  ;;  %v4896_v50 = vld [vmem:[#allocation12 + $0x3b8] sm:$0xff] }
 0xf4f   :  { %v11266_v47 = vpack.c.bf16 %v4896_v50, %v4892_v25 }
 0xf51   :  { %11189 = vmatpush1.bf16.msra.mxu0 %v11188_v4  ;;  %11253 = vmatpush1.bf16.msra.mxu1 %v11252_v7  ;;  %v11202_v4 = vpack.c.bf16 %v4894_v5, %v4890_v53  ;;  %v4893_v7 = vld [vmem:[#allocation12 + $0x3a0] sm:$0xff] }
 0xf52   :  { %11191 = vmatprep.subr.bf16.mxu0 %v11190_v52  ;;  %11255 = vmatprep.subr.bf16.mxu1 %v11254_v13  ;;  %v11204_v48 = vpack.c.bf16 %v4893_v7, %v4889_v40  ;;  %v4898_v52 = vld [vmem:[#allocation12 + $0x3c8] sm:$0xff]  ;;  %v4900_v13 = vld [vmem:[#allocation12 + $0x3d8] sm:$0xff]  ;;  %v5197_v40 = vld [vmem:[#allocation14 + $0x20] sm:$0xff] }
 0xf53   :  { %v11206_v43 = vpack.c.bf16 %v4902_v33, %v4898_v52  ;;  %v5206_v33 = vld [vmem:[#allocation14 + $0x68] sm:$0xff] }
 0xf55   :  { %11193 = vmatpush1.bf16.msra.mxu0 %v11192_v24  ;;  %11257 = vmatpush1.bf16.msra.mxu1 %v11256_v42  ;;  %v4904_v24 = vld [vmem:[#allocation12 + $0x3f8] sm:$0xff]  ;;  %v4901_v42 = vld [vmem:[#allocation12 + $0x3e0] sm:$0xff] }
 0xf56   :  { %11195 = vmatprep.subr.bf16.mxu0 %v11194_v58  ;;  %11259 = vmatprep.subr.bf16.mxu1 %v11258_v17  ;;  %v11270_v30 = vpack.c.bf16 %v4904_v24, %v4900_v13  ;;  %v11208_v3 = vpack.c.bf16 %v4901_v42, %v4897_v63  ;;  %v11272_v58 = vpack.c.bf16 %v4903_v29, %v4899_v38  ;;  %v5203_v29 = vld [vmem:[#allocation14 + $0x50] sm:$0xff] }
 0xf57   :  { %v14914_v17 = vpack.c.bf16 %v5198_v11, %v5194_v18  ;;  %v14933_v42 = vpack.c.bf16 %v5206_v33, %v5202_v0  ;;  %v5214_v18 = vld [vmem:[#allocation14 + $0xa8] sm:$0xff]  ;;  %v5212_v11 = vld [vmem:[#allocation14 + $0x98] sm:$0xff]  ;;  %v5231_v33 = vld [vmem:[#allocation14 + $0x130] sm:$0xff] }
 0xf59   :  { %11197 = vmatpush1.bf16.msra.mxu0 %v11196_v15  ;;  %11261 = vmatpush1.bf16.msra.mxu1 %v11260_v45  ;;  %v5200_v15 = vld [vmem:[#allocation14 + $0x38] sm:$0xff] }
 0xf5a   :  { %11199 = vmatprep.subr.bf16.mxu0 %v11198_v16  ;;  %11263 = vmatprep.subr.bf16.mxu1 %v11262_v26  ;;  %v14916_v8 = vpack.c.bf16 %v5200_v15, %v5196_v51  ;;  %v5216_v51 = vld [vmem:[#allocation14 + $0xb8] sm:$0xff] }
 0xf5d   :  { %11201 = vmatpush1.bf16.msra.mxu0 %v11200_v20  ;;  %11265 = vmatpush1.bf16.msra.mxu1 %v11264_v28 }
 0xf5e   :  { %11203 = vmatprep.subr.bf16.mxu0 %v11202_v4  ;;  %11267 = vmatprep.subr.bf16.mxu1 %v11266_v47 }
 0xf61   :  { %11205 = vmatpush1.bf16.msra.mxu0 %v11204_v48  ;;  %11269 = vmatpush1.bf16.msra.mxu1 %v11268_v55  ;;  %v5199_v48 = vld [vmem:[#allocation14 + $0x30] sm:$0xff]  ;;  %v5204_v55 = vld [vmem:[#allocation14 + $0x58] sm:$0xff] }
 0xf62   :  { %11207 = vmatprep.subr.bf16.mxu0 %v11206_v43  ;;  %11271 = vmatprep.subr.bf16.mxu1 %v11270_v30  ;;  %v5208_v43 = vld [vmem:[#allocation14 + $0x78] sm:$0xff]  ;;  %v14929_v63 = vpack.c.bf16 %v5199_v48, %v5195_v35  ;;  %v5205_v30 = vld [vmem:[#allocation14 + $0x60] sm:$0xff] }
 0xf63   :  { %v14935_v38 = vpack.c.bf16 %v5208_v43, %v5204_v55  ;;  %v5229_v35 = vld [vmem:[#allocation14 + $0x120] sm:$0xff]  ;;  %v5234_v55 = vld [vmem:[#allocation14 + $0x148] sm:$0xff] }
 0xf64   :  { %v5238_v43 = vld [vmem:[#allocation14 + $0x168] sm:$0xff] }
 0xf65   :  { %11209 = vmatpush1.bf16.msra.mxu0 %v11208_v3  ;;  %11273 = vmatpush1.bf16.msra.mxu1 %v11272_v58  ;;  %v5207_v3 = vld [vmem:[#allocation14 + $0x70] sm:$0xff]  ;;  %v5210_v58 = vld [vmem:[#allocation14 + $0x88] sm:$0xff] }
 0xf66   :  { %11275 = vmatprep.subr.bf16.mxu0 %v14914_v17  ;;  %11307 = vmatprep.subr.bf16.mxu1 %v14916_v8 }
 0xffb   :  { %v4654_v27 = vpop.f32.mrb[16].mxu0  ;;  %v4725_v45 = vpop.f32.mrb[16].mxu1 }
 0xffc   :  { %v12514_v56 = vadd.f32 %v4654_v27, %v14571_v41  ;;  %v4656_v62 = vpop.f32.mrb[17].mxu0  ;;  %v4727_v32 = vpop.f32.mrb[17].mxu1  ;;  %v12530_v20 = vadd.f32 %v4725_v45, %v14583_v49  ;;  %v5193_v49 = vld [vmem:[#allocation14] sm:$0xff]  ;;  %v14945_v27 = vpack.c.bf16 %v5207_v3, %v5203_v29 }
 0xffd   :  { %v12515_v16 = vadd.f32 %v4656_v62, %v14574_v57  ;;  %v12531_v36 = vadd.f32 %v4727_v32, %v14579_v9  ;;  %v14927_v24 = vpack.c.bf16 %v5197_v40, %v5193_v49  ;;  %v5209_v45 = vld [vmem:[#allocation14 + $0x80] sm:$0xff]  ;;  %v14949_v62 = vpack.c.bf16 %v5214_v18, %v5210_v58 }
 0xffe   :  { %v9833_v59 = vmul.f32 -1.442695, %v12514_v56  ;;  %v5213_v56 = vld [vmem:[#allocation14 + $0xa0] sm:$0xff]  ;;  %v14951_v32 = vpack.c.bf16 %v5216_v51, %v5212_v11  ;;  %v14997_v11 = vpack.c.bf16 %v5238_v43, %v5234_v55 }
 0xfff   :  { %v9834_v2 = vmul.f32 -1.442695, %v12515_v16  ;;  %v9835_v26 = vmul.f32 -1.442695, %v12531_v36  ;;  %v5211_v16 = vld [vmem:[#allocation14 + $0x90] sm:$0xff]  ;;  %v5222_v36 = vld [vmem:[#allocation14 + $0xe8] sm:$0xff] }
0x1000   :  { %12990 = vpow2.f32 %v9833_v59  ;;  %v5215_v59 = vld [vmem:[#allocation14 + $0xb0] sm:$0xff]  ;;  %v5233_v58 = vld [vmem:[#allocation14 + $0x140] sm:$0xff] }
0x1001   :  { %12992 = vpow2.f32 %v9834_v2  ;;  %v5218_v2 = vld [vmem:[#allocation14 + $0xc8] sm:$0xff]  ;;  %v5237_v18 = vld [vmem:[#allocation14 + $0x160] sm:$0xff] }
0x1002   :  { %12994 = vpow2.f32 %v9835_v26  ;;  %v5220_v26 = vld [vmem:[#allocation14 + $0xd8] sm:$0xff]  ;;  %v5249_v55 = vld [vmem:[#allocation14 + $0x1c0] sm:$0xff] }
0x1003   :  { %12996 = vtanh.f32 %v12530_v20  ;;  %v5224_v20 = vld [vmem:[#allocation14 + $0xf8] sm:$0xff] }
0x100a   :  { %v12991_v37 = vpop.eup %12990 }
0x100b   :  { %v12993_v22 = vpop.eup %12992  ;;  %v4737_v53 = vadd.f32 1.0, %v12991_v37  ;;  %v14959_v37 = vpack.c.bf16 %v5213_v56, %v5209_v45  ;;  %v5235_v45 = vld [vmem:[#allocation14 + $0x150] sm:$0xff] }
0x100c   :  { %v4743_v28 = vadd.f32 1.0, %v12993_v22  ;;  %v12995_v41 = vpop.eup %12994  ;;  %v14961_v22 = vpack.c.bf16 %v5215_v59, %v5211_v16  ;;  %v5239_v56 = vld [vmem:[#allocation14 + $0x170] sm:$0xff]  ;;  %v5242_v16 = vld [vmem:[#allocation14 + $0x188] sm:$0xff] }
0x100d   :  { %12998 = vrcp.f32 %v4737_v53  ;;  %v12997_v5 = vpop.eup %12996  ;;  %v4750_v4 = vadd.f32 1.0, %v12995_v41  ;;  %v5217_v53 = vld [vmem:[#allocation14 + $0xc0] sm:$0xff]  ;;  %v14965_v41 = vpack.c.bf16 %v5222_v36, %v5218_v2  ;;  %v5246_v59 = vld [vmem:[#allocation14 + $0x1a8] sm:$0xff]  ;;  %v5244_v2 = vld [vmem:[#allocation14 + $0x198] sm:$0xff] }
0x100e   :  { %13000 = vrcp.f32 %v4743_v28  ;;  %v5221_v28 = vld [vmem:[#allocation14 + $0xe0] sm:$0xff]  ;;  %v5248_v36 = vld [vmem:[#allocation14 + $0x1b8] sm:$0xff] }
0x100f   :  { %13002 = vrcp.f32 %v4750_v4  ;;  %v5230_v4 = vld [vmem:[#allocation14 + $0x128] sm:$0xff]  ;;  %v14975_v49 = vpack.c.bf16 %v5221_v28, %v5217_v53  ;;  %v5241_v53 = vld [vmem:[#allocation14 + $0x180] sm:$0xff] }
0x1010   :  { %v5245_v28 = vld [vmem:[#allocation14 + $0x1a0] sm:$0xff] }
0x1017   :  { %v12999_v57 = vpop.eup %12998 }
0x1018   :  { %v13001_v25 = vpop.eup %13000  ;;  %v4754_v50 = vmul.f32 %v12999_v57, %v12997_v5  ;;  %v14967_v5 = vpack.c.bf16 %v5224_v20, %v5220_v26  ;;  %v5219_v57 = vld [vmem:[#allocation14 + $0xd0] sm:$0xff]  ;;  %v15007_v26 = vpack.c.bf16 %v5237_v18, %v5233_v58  ;;  %v15009_v20 = vpack.c.bf16 %v5239_v56, %v5235_v45 }
0x1019   :  { %v4753_v47 = vmul.f32 %v13001_v25, %v14907_v34  ;;  %v13003_v7 = vpop.eup %13002  ;;  %v5201_v34 = vld [vmem:[#allocation14 + $0x40] sm:$0xff]  ;;  %v5223_v25 = vld [vmem:[#allocation14 + $0xf0] sm:$0xff] }
0x101a   :  { %v14943_v15 = vpack.c.bf16 %v5205_v30, %v5201_v34  ;;  %v14977_v40 = vpack.c.bf16 %v5223_v25, %v5219_v57  ;;  %v5236_v34 = vld [vmem:[#allocation14 + $0x158] sm:$0xff]  ;;  %v15013_v57 = vpack.c.bf16 %v5246_v59, %v5242_v16  ;;  %v15015_v25 = vpack.c.bf16 %v5248_v36, %v5244_v2  ;;  %v5251_v58 = vld [vmem:[#allocation14 + $0x1d0] sm:$0xff]  ;;  %v4905_v59 = vld [vmem:[%s16161_s9] sm:$0xf] }
0x101b   :  { %v4755_v9 = vadd.f32 %v4754_v50, %v4753_v47  ;;  %v5226_v50 = vld [vmem:[#allocation14 + $0x108] sm:$0xff]  ;;  %v5228_v47 = vld [vmem:[#allocation14 + $0x118] sm:$0xff]  ;;  %v5255_v18 = vld [vmem:[#allocation14 + $0x1f0] sm:$0xff] }
0x101c   :  { %v14981_v48 = vpack.c.bf16 %v5230_v4, %v5226_v50  ;;  %v5240_v30 = vld [vmem:[#allocation14 + $0x178] sm:$0xff]  ;;  %v5243_v50 = vld [vmem:[#allocation14 + $0x190] sm:$0xff]  ;;  %v15041_v56 = vpack.c.bf16 %v5255_v18, %v5251_v58  ;;  %v16214_v2 = vld [vmem:[#allocation22_spill] sm:$0xff] }
0x101d   :  { %13004 = vtanh.f32 %v4755_v9  ;;  %v5232_v9 = vld [vmem:[#allocation14 + $0x138] sm:$0xff]  ;;  %v14999_v51 = vpack.c.bf16 %v5240_v30, %v5236_v34  ;;  %v5247_v4 = vld [vmem:[#allocation14 + $0x1b0] sm:$0xff]  ;;  %v5253_v30 = vld [vmem:[#allocation14 + $0x1e0] sm:$0xff]  ;;  %v15093_v36 = vrot.slane %v4905_v59, %v16214_v2 }
0x101e   :  { %v14983_v0 = vpack.c.bf16 %v5232_v9, %v5228_v47  ;;  %v5250_v47 = vld [vmem:[#allocation14 + $0x1c8] sm:$0xff]  ;;  %v15039_v45 = vpack.c.bf16 %v5253_v30, %v5249_v55  ;;  %v16213_v16 = vld [vmem:[#allocation28_spill] sm:$0xff] }
0x101f   :  { %v5254_v9 = vld [vmem:[#allocation14 + $0x1e8] sm:$0xff]  ;;  %v16216_v58 = vld [vmem:[#allocation24_spill] sm:$0xff] }
0x1020   :  { %v15029_v43 = vpack.c.bf16 %v5254_v9, %v5250_v47  ;;  %v15101_v18 = vrot.slane %v4905_v59, %v16216_v58 }
0x1027   :  { %v13005_v52 = vpop.eup %13004 }
0x1028   :  { %v14925_v13 = vmul.f32 %v13005_v52, %v13003_v7  ;;  %v5225_v7 = vld [vmem:[#allocation14 + $0x100] sm:$0xff]  ;;  %v5227_v52 = vld [vmem:[#allocation14 + $0x110] sm:$0xff] }
0x1029   :  { %v14991_v29 = vpack.c.bf16 %v5229_v35, %v5225_v7  ;;  %v14993_v3 = vpack.c.bf16 %v5231_v33, %v5227_v52  ;;  %v5252_v7 = vld [vmem:[#allocation14 + $0x1d8] sm:$0xff]  ;;  %v15023_v52 = vpack.c.bf16 %v5245_v28, %v5241_v53  ;;  %v15025_v33 = vpack.c.bf16 %v5247_v4, %v5243_v50  ;;  %v16215_v53 = vld [vmem:[#allocation23_spill] sm:$0xff] }
0x102a   :  { %4991 = vmatprep.mubr.f32.mxu0 %v14925_v13  ;;  %5104 = vmatprep.mubr.f32.mxu1 %v14925_v13  ;;  %v5256_v35 = vld [vmem:[#allocation14 + $0x1f8] sm:$0xff]  ;;  %v15096_v28 = vrot.slane %v4905_v59, %v16215_v53 }
0x102b   :  { %4992 = vmatmul.mubr.f32.vlgmr.msra.gmra.mrb[32].mxu0 %v14050_v39  ;;  %5105 = vmatmul.mubr.f32.vlgmr.msra.gmra.mrb[32].mxu1 %v14050_v39  ;;  %v15031_v34 = vpack.c.bf16 %v5256_v35, %v5252_v7 }
0x102c   :  { %4997 = vmatprep.mubr.f32.mxu0 %v14910_v54  ;;  %5110 = vmatprep.mubr.f32.mxu1 %v14910_v54 }
0x102d   :  { %11277 = vmatpush1.bf16.msra.mxu0 %v14927_v24  ;;  %11309 = vmatpush1.bf16.msra.mxu1 %v14929_v63 }
0x102e   :  { %11279 = vmatprep.subr.bf16.mxu0 %v14933_v42  ;;  %11311 = vmatprep.subr.bf16.mxu1 %v14935_v38 }
0x102f   :  { %4998 = vmatmul.mubr.f32.gmra.mrb[34].mxu0 %v14094_v21  ;;  %5111 = vmatmul.mubr.f32.gmra.mrb[34].mxu1 %v14094_v21 }
0x1030   :  { %5003 = vmatprep.mubr.f32.mxu0 %v14882_v19  ;;  %5116 = vmatprep.mubr.f32.mxu1 %v14882_v19 }
0x1031   :  { %11281 = vmatpush1.bf16.msra.mxu0 %v14943_v15  ;;  %11313 = vmatpush1.bf16.msra.mxu1 %v14945_v27 }
0x1032   :  { %11283 = vmatprep.subr.bf16.mxu0 %v14949_v62  ;;  %11315 = vmatprep.subr.bf16.mxu1 %v14951_v32 }
0x1033   :  { %5004 = vmatmul.mubr.f32.gmra.mrb[36].mxu0 %v14158_v12  ;;  %5117 = vmatmul.mubr.f32.gmra.mrb[36].mxu1 %v14158_v12 }
0x1034   :  { %5009 = vmatprep.mubr.f32.mxu0 %v14837_v10  ;;  %5122 = vmatprep.mubr.f32.mxu1 %v14837_v10 }
0x1035   :  { %11285 = vmatpush1.bf16.msra.mxu0 %v14959_v37  ;;  %11317 = vmatpush1.bf16.msra.mxu1 %v14961_v22 }
0x1036   :  { %11287 = vmatprep.subr.bf16.mxu0 %v14965_v41  ;;  %11319 = vmatprep.subr.bf16.mxu1 %v14967_v5 }
0x1037   :  { %5010 = vmatmul.mubr.f32.gmra.mrb[38].mxu0 %v14252_v46  ;;  %5123 = vmatmul.mubr.f32.gmra.mrb[38].mxu1 %v14252_v46 }
0x1038   :  { %5015 = vmatprep.mubr.f32.mxu0 %v14791_v6  ;;  %5128 = vmatprep.mubr.f32.mxu1 %v14791_v6 }
0x1039   :  { %11289 = vmatpush1.bf16.msra.mxu0 %v14975_v49  ;;  %11321 = vmatpush1.bf16.msra.mxu1 %v14977_v40 }
0x103a   :  { %11291 = vmatprep.subr.bf16.mxu0 %v14981_v48  ;;  %11323 = vmatprep.subr.bf16.mxu1 %v14983_v0 }
0x103b   :  { %5016 = vmatmul.mubr.f32.gmra.mrb[40].mxu0 %v14298_v23  ;;  %5129 = vmatmul.mubr.f32.gmra.mrb[40].mxu1 %v14298_v23 }
0x103c   :  { %5021 = vmatprep.mubr.f32.mxu0 %v14714_v1  ;;  %5134 = vmatprep.mubr.f32.mxu1 %v14714_v1 }
0x103d   :  { %11293 = vmatpush1.bf16.msra.mxu0 %v14991_v29  ;;  %11325 = vmatpush1.bf16.msra.mxu1 %v14993_v3 }
0x103e   :  { %11295 = vmatprep.subr.bf16.mxu0 %v14997_v11  ;;  %11327 = vmatprep.subr.bf16.mxu1 %v14999_v51 }
0x103f   :  { %5022 = vmatmul.mubr.f32.gmra.mrb[42].mxu0 %v14342_v60  ;;  %5135 = vmatmul.mubr.f32.gmra.mrb[42].mxu1 %v14342_v60 }
0x1040   :  { %5027 = vmatprep.mubr.f32.mxu0 %v14634_v44  ;;  %5140 = vmatprep.mubr.f32.mxu1 %v14634_v44 }
0x1041   :  { %11297 = vmatpush1.bf16.msra.mxu0 %v15007_v26  ;;  %11329 = vmatpush1.bf16.msra.mxu1 %v15009_v20 }
0x1042   :  { %11299 = vmatprep.subr.bf16.mxu0 %v15013_v57  ;;  %11331 = vmatprep.subr.bf16.mxu1 %v15015_v25 }
0x1043   :  { %5028 = vmatmul.mubr.f32.gmra.mrb[44].mxu0 %v14380_v61  ;;  %5141 = vmatmul.mubr.f32.gmra.mrb[44].mxu1 %v14380_v61 }
0x1044   :  { %5033 = vmatprep.mubr.f32.mxu0 %v14589_v14  ;;  %5146 = vmatprep.mubr.f32.mxu1 %v14589_v14 }
0x1045   :  { %11301 = vmatpush1.bf16.msra.mxu0 %v15023_v52  ;;  %11333 = vmatpush1.bf16.msra.mxu1 %v15025_v33 }
0x1046   :  { %11303 = vmatprep.subr.bf16.mxu0 %v15029_v43  ;;  %11335 = vmatprep.subr.bf16.mxu1 %v15031_v34 }
0x1047   :  { %5034 = vmatmul.mubr.f32.gmra.mrb[46].mxu0 %v16213_v16  ;;  %5147 = vmatmul.mubr.f32.gmra.mrb[46].mxu1 %v16213_v16  ;;  %v16217_v16 = vld [vmem:[#allocation25_spill] sm:$0xff] }
0x1048   :  { %5321 = vmatprep.mubr.f32.mxu0 %v16212_v31  ;;  %5392 = vmatprep.mubr.f32.mxu1 %v16212_v31  ;;  %v15105_v53 = vrot.slane %v4905_v59, %v16217_v16 }
0x1049   :  { %11305 = vmatpush1.bf16.msra.mxu0 %v15039_v45  ;;  %11337 = vmatpush1.bf16.msra.mxu1 %v15041_v56 }
0x104a   :  { %11339 = vmatprep.subr.bf16.mxu0 %v14914_v17  ;;  %11371 = vmatprep.subr.bf16.mxu1 %v14916_v8 }
0x104c   :  { %5322 = vmatmul.mubr.f32.vlgmr.msra.gmra.mrb[32].mxu0 %v16212_v31  ;;  %5393 = vmatmul.mubr.f32.vlgmr.msra.gmra.mrb[32].mxu1 %v16212_v31 }
0x104d   :  { %11341 = vmatpush1.bf16.msra.mxu0 %v14927_v24  ;;  %11373 = vmatpush1.bf16.msra.mxu1 %v14929_v63 }
0x104e   :  { %11343 = vmatprep.subr.bf16.mxu0 %v14933_v42  ;;  %11375 = vmatprep.subr.bf16.mxu1 %v14935_v38 }
0x104f   :  { %5564 = vmatprep.mubr.f32.mxu0 %v16212_v31  ;;  %5635 = vmatprep.mubr.f32.mxu1 %v16212_v31 }
0x1051   :  { %11345 = vmatpush1.bf16.msra.mxu0 %v14943_v15  ;;  %11377 = vmatpush1.bf16.msra.mxu1 %v14945_v27 }
0x1052   :  { %11347 = vmatprep.subr.bf16.mxu0 %v14949_v62  ;;  %11379 = vmatprep.subr.bf16.mxu1 %v14951_v32 }
0x1055   :  { %11349 = vmatpush1.bf16.msra.mxu0 %v14959_v37  ;;  %11381 = vmatpush1.bf16.msra.mxu1 %v14961_v22 }
0x1056   :  { %11351 = vmatprep.subr.bf16.mxu0 %v14965_v41  ;;  %11383 = vmatprep.subr.bf16.mxu1 %v14967_v5 }
0x1059   :  { %11353 = vmatpush1.bf16.msra.mxu0 %v14975_v49  ;;  %11385 = vmatpush1.bf16.msra.mxu1 %v14977_v40 }
0x105a   :  { %11355 = vmatprep.subr.bf16.mxu0 %v14981_v48  ;;  %11387 = vmatprep.subr.bf16.mxu1 %v14983_v0 }
0x105d   :  { %11357 = vmatpush1.bf16.msra.mxu0 %v14991_v29  ;;  %11389 = vmatpush1.bf16.msra.mxu1 %v14993_v3 }
0x105e   :  { %11359 = vmatprep.subr.bf16.mxu0 %v14997_v11  ;;  %11391 = vmatprep.subr.bf16.mxu1 %v14999_v51 }
0x1061   :  { %11361 = vmatpush1.bf16.msra.mxu0 %v15007_v26  ;;  %11393 = vmatpush1.bf16.msra.mxu1 %v15009_v20 }
0x1062   :  { %11363 = vmatprep.subr.bf16.mxu0 %v15013_v57  ;;  %11395 = vmatprep.subr.bf16.mxu1 %v15015_v25 }
0x1065   :  { %11365 = vmatpush1.bf16.msra.mxu0 %v15023_v52  ;;  %11397 = vmatpush1.bf16.msra.mxu1 %v15025_v33 }
0x1066   :  { %11367 = vmatprep.subr.bf16.mxu0 %v15029_v43  ;;  %11399 = vmatprep.subr.bf16.mxu1 %v15031_v34 }
0x1069   :  { %11369 = vmatpush1.bf16.msra.mxu0 %v15039_v45  ;;  %11401 = vmatpush1.bf16.msra.mxu1 %v15041_v56 }
0x106a   :  { %11403 = vmatprep.subr.bf16.mxu0 %v14914_v17  ;;  %11435 = vmatprep.subr.bf16.mxu1 %v14916_v8 }
0x111f   :  { %v5323_v50 = vpop.f32.mrb[32].mxu0  ;;  %v5394_v4 = vpop.f32.mrb[32].mxu1 }
0x1120   :  { %v12546_v47 = vadd.f32 %v5323_v50, %v15093_v36  ;;  %v5325_v9 = vpop.f32.mrb[33].mxu0  ;;  %v5396_v7 = vpop.f32.mrb[33].mxu1  ;;  %v12562_v61 = vadd.f32 %v5394_v4, %v15105_v53 }
0x1121   :  { %v12547_v35 = vadd.f32 %v5325_v9, %v15096_v28  ;;  %v12563_v2 = vadd.f32 %v5396_v7, %v15101_v18 }
0x1122   :  { %v9836_v55 = vmul.f32 -1.442695, %v12546_v47 }
0x1123   :  { %v9837_v30 = vmul.f32 -1.442695, %v12547_v35  ;;  %v9838_v14 = vmul.f32 -1.442695, %v12563_v2 }
0x1124   :  { %13006 = vpow2.f32 %v9836_v55 }
0x1125   :  { %13008 = vpow2.f32 %v9837_v30 }
0x1126   :  { %13010 = vpow2.f32 %v9838_v14 }
0x1127   :  { %13012 = vtanh.f32 %v12562_v61 }
0x112e   :  { %v13007_v50 = vpop.eup %13006 }
0x112f   :  { %v13009_v44 = vpop.eup %13008  ;;  %v5406_v60 = vadd.f32 1.0, %v13007_v50 }
0x1130   :  { %v5412_v47 = vadd.f32 1.0, %v13009_v44  ;;  %v13011_v9 = vpop.eup %13010 }
0x1131   :  { %13014 = vrcp.f32 %v5406_v60  ;;  %v13013_v35 = vpop.eup %13012  ;;  %v5419_v7 = vadd.f32 1.0, %v13011_v9 }
0x1132   :  { %13016 = vrcp.f32 %v5412_v47 }
0x1133   :  { %13018 = vrcp.f32 %v5419_v7 }
0x113b   :  { %v13015_v55 = vpop.eup %13014 }
0x113c   :  { %v13017_v30 = vpop.eup %13016  ;;  %v5423_v58 = vmul.f32 %v13015_v55, %v13013_v35 }
0x113d   :  { %v5422_v1 = vmul.f32 0.0, %v13017_v30  ;;  %v13019_v2 = vpop.eup %13018 }
0x113f   :  { %v15108_v59 = vadd.f32 %v5423_v58, %v5422_v1 }
0x1141   :  { %13020 = vtanh.f32 %v15108_v59 }
0x114b   :  { %v13021_v4 = vpop.eup %13020 }
0x114c   :  { %v15111_v50 = vmul.f32 %v13021_v4, %v13019_v2 }
0x114e   :  { %16218 = vst [vmem:[#allocation32_spill] sm:$0xff] %v15111_v50  ;;  %5565 = vmatmul.mubr.f32.vlgmr.msra.gmra.mrb[34].mxu0 %v15111_v50  ;;  %5636 = vmatmul.mubr.f32.vlgmr.msra.gmra.mrb[34].mxu1 %v15111_v50 }
0x114f   :  { %11405 = vmatpush1.bf16.msra.mxu0 %v14927_v24  ;;  %11437 = vmatpush1.bf16.msra.mxu1 %v14929_v63 }
0x1150   :  { %11407 = vmatprep.subr.bf16.mxu0 %v14933_v42  ;;  %11439 = vmatprep.subr.bf16.mxu1 %v14935_v38 }
0x1151   :  { %5808 = vmatprep.mubr.f32.mxu0 %v16212_v31  ;;  %5879 = vmatprep.mubr.f32.mxu1 %v16212_v31 }
0x1153   :  { %11409 = vmatpush1.bf16.msra.mxu0 %v14943_v15  ;;  %11441 = vmatpush1.bf16.msra.mxu1 %v14945_v27 }
0x1154   :  { %11411 = vmatprep.subr.bf16.mxu0 %v14949_v62  ;;  %11443 = vmatprep.subr.bf16.mxu1 %v14951_v32 }
0x1157   :  { %11413 = vmatpush1.bf16.msra.mxu0 %v14959_v37  ;;  %11445 = vmatpush1.bf16.msra.mxu1 %v14961_v22 }
0x1158   :  { %11415 = vmatprep.subr.bf16.mxu0 %v14965_v41  ;;  %11447 = vmatprep.subr.bf16.mxu1 %v14967_v5 }
0x115b   :  { %11417 = vmatpush1.bf16.msra.mxu0 %v14975_v49  ;;  %11449 = vmatpush1.bf16.msra.mxu1 %v14977_v40 }
0x115c   :  { %11419 = vmatprep.subr.bf16.mxu0 %v14981_v48  ;;  %11451 = vmatprep.subr.bf16.mxu1 %v14983_v0 }
0x115f   :  { %11421 = vmatpush1.bf16.msra.mxu0 %v14991_v29  ;;  %11453 = vmatpush1.bf16.msra.mxu1 %v14993_v3 }
0x1160   :  { %11423 = vmatprep.subr.bf16.mxu0 %v14997_v11  ;;  %11455 = vmatprep.subr.bf16.mxu1 %v14999_v51 }
0x1163   :  { %11425 = vmatpush1.bf16.msra.mxu0 %v15007_v26  ;;  %11457 = vmatpush1.bf16.msra.mxu1 %v15009_v20 }
0x1164   :  { %11427 = vmatprep.subr.bf16.mxu0 %v15013_v57  ;;  %11459 = vmatprep.subr.bf16.mxu1 %v15015_v25 }
0x1167   :  { %11429 = vmatpush1.bf16.msra.mxu0 %v15023_v52  ;;  %11461 = vmatpush1.bf16.msra.mxu1 %v15025_v33 }
0x1168   :  { %11431 = vmatprep.subr.bf16.mxu0 %v15029_v43  ;;  %11463 = vmatprep.subr.bf16.mxu1 %v15031_v34 }
0x116b   :  { %11433 = vmatpush1.bf16.msra.mxu0 %v15039_v45  ;;  %11465 = vmatpush1.bf16.msra.mxu1 %v15041_v56 }
0x116c   :  { %11467 = vmatprep.subr.bf16.mxu0 %v14914_v17  ;;  %11499 = vmatprep.subr.bf16.mxu1 %v14916_v8 }
0x1221   :  { %v5566_v60 = vpop.f32.mrb[34].mxu0  ;;  %v5637_v61 = vpop.f32.mrb[34].mxu1 }
0x1222   :  { %v12548_v14 = vadd.f32 %v5566_v60, %v15093_v36  ;;  %v5568_v44 = vpop.f32.mrb[35].mxu0  ;;  %v5639_v1 = vpop.f32.mrb[35].mxu1  ;;  %v12564_v30 = vadd.f32 %v5637_v61, %v15105_v53 }
0x1223   :  { %v12549_v58 = vadd.f32 %v5568_v44, %v15096_v28  ;;  %v12565_v35 = vadd.f32 %v5639_v1, %v15101_v18 }
0x1224   :  { %v9839_v47 = vmul.f32 -1.442695, %v12548_v14 }
0x1225   :  { %v9840_v9 = vmul.f32 -1.442695, %v12549_v58  ;;  %v9841_v55 = vmul.f32 -1.442695, %v12565_v35 }
0x1226   :  { %13022 = vpow2.f32 %v9839_v47 }
0x1227   :  { %13024 = vpow2.f32 %v9840_v9 }
0x1228   :  { %13026 = vpow2.f32 %v9841_v55 }
0x1229   :  { %13028 = vtanh.f32 %v12564_v30  ;;  %v6168_v30 = vld [vmem:[#allocation14] sm:$0xff] }
0x1230   :  { %v13023_v17 = vpop.eup %13022 }
0x1231   :  { %v13025_v7 = vpop.eup %13024  ;;  %v5649_v8 = vadd.f32 1.0, %v13023_v17  ;;  %v6172_v17 = vld [vmem:[#allocation14 + $0x20] sm:$0xff] }
0x1232   :  { %v5655_v2 = vadd.f32 1.0, %v13025_v7  ;;  %v13027_v4 = vpop.eup %13026 }
0x1233   :  { %13030 = vrcp.f32 %v5649_v8  ;;  %v13029_v60 = vpop.eup %13028  ;;  %v5662_v47 = vadd.f32 1.0, %v13027_v4  ;;  %v15211_v8 = vpack.c.bf16 %v6172_v17, %v6168_v30  ;;  %v6174_v4 = vld [vmem:[#allocation14 + $0x30] sm:$0xff]  ;;  %v6201_v30 = vld [vmem:[#allocation14 + $0x108] sm:$0xff] }
0x1234   :  { %13032 = vrcp.f32 %v5655_v2  ;;  %v6170_v2 = vld [vmem:[#allocation14 + $0x10] sm:$0xff]  ;;  %v6205_v17 = vld [vmem:[#allocation14 + $0x128] sm:$0xff] }
0x1235   :  { %13034 = vrcp.f32 %v5662_v47 }
0x123d   :  { %v13031_v44 = vpop.eup %13030 }
0x123e   :  { %v13033_v14 = vpop.eup %13032  ;;  %v5666_v58 = vmul.f32 %v13031_v44, %v13029_v60  ;;  %v15214_v60 = vpack.c.bf16 %v6174_v4, %v6170_v2  ;;  %v6177_v44 = vld [vmem:[#allocation14 + $0x48] sm:$0xff]  ;;  %v6203_v2 = vld [vmem:[#allocation14 + $0x118] sm:$0xff]  ;;  %v15255_v4 = vpack.c.bf16 %v6205_v17, %v6201_v30 }
0x123f   :  { %v5665_v9 = vmul.f32 %v13033_v14, %v15108_v59  ;;  %v13035_v61 = vpop.eup %13034  ;;  %v6175_v59 = vld [vmem:[#allocation14 + $0x38] sm:$0xff]  ;;  %v6181_v14 = vld [vmem:[#allocation14 + $0x68] sm:$0xff] }
0x1240   :  { %v15219_v47 = vpack.c.bf16 %v6181_v14, %v6177_v44  ;;  %v6207_v44 = vld [vmem:[#allocation14 + $0x138] sm:$0xff]  ;;  %v6200_v14 = vld [vmem:[#allocation14 + $0x100] sm:$0xff] }
0x1241   :  { %v15154_v1 = vadd.f32 %v5666_v58, %v5665_v9  ;;  %v6179_v58 = vld [vmem:[#allocation14 + $0x58] sm:$0xff] }
0x1242   :  { %v6183_v9 = vld [vmem:[#allocation14 + $0x78] sm:$0xff] }
0x1243   :  { %13036 = vtanh.f32 %v15154_v1 }
0x124d   :  { %v13037_v35 = vpop.eup %13036 }
0x124e   :  { %v15157_v55 = vmul.f32 %v13037_v35, %v13035_v61  ;;  %v6180_v61 = vld [vmem:[#allocation14 + $0x60] sm:$0xff]  ;;  %v15221_v35 = vpack.c.bf16 %v6183_v9, %v6179_v58  ;;  %v15257_v9 = vpack.c.bf16 %v6207_v44, %v6203_v2 }
0x124f   :  { %v6204_v58 = vld [vmem:[#allocation14 + $0x120] sm:$0xff] }
0x1250   :  { %16219 = vst [vmem:[#allocation33_spill] sm:$0xff] %v15157_v55  ;;  %5809 = vmatmul.mubr.f32.vlgmr.msra.gmra.mrb[36].mxu0 %v15157_v55  ;;  %5880 = vmatmul.mubr.f32.vlgmr.msra.gmra.mrb[36].mxu1 %v15157_v55  ;;  %v6216_v2 = vld [vmem:[#allocation14 + $0x180] sm:$0xff] }
0x1251   :  { %11469 = vmatpush1.bf16.msra.mxu0 %v14927_v24  ;;  %11501 = vmatpush1.bf16.msra.mxu1 %v14929_v63  ;;  %v6220_v44 = vld [vmem:[#allocation14 + $0x1a0] sm:$0xff] }
0x1252   :  { %11471 = vmatprep.subr.bf16.mxu0 %v14933_v42  ;;  %11503 = vmatprep.subr.bf16.mxu1 %v14935_v38 }
0x1253   :  { %6052 = vmatprep.mubr.f32.mxu0 %v16212_v31  ;;  %6123 = vmatprep.mubr.f32.mxu1 %v16212_v31 }
0x1255   :  { %11473 = vmatpush1.bf16.msra.mxu0 %v14943_v15  ;;  %11505 = vmatpush1.bf16.msra.mxu1 %v14945_v27 }
0x1256   :  { %11475 = vmatprep.subr.bf16.mxu0 %v14949_v62  ;;  %11507 = vmatprep.subr.bf16.mxu1 %v14951_v32 }
0x1259   :  { %11477 = vmatpush1.bf16.msra.mxu0 %v14959_v37  ;;  %11509 = vmatpush1.bf16.msra.mxu1 %v14961_v22 }
0x125a   :  { %11479 = vmatprep.subr.bf16.mxu0 %v14965_v41  ;;  %11511 = vmatprep.subr.bf16.mxu1 %v14967_v5 }
0x125d   :  { %11481 = vmatpush1.bf16.msra.mxu0 %v14975_v49  ;;  %11513 = vmatpush1.bf16.msra.mxu1 %v14977_v40 }
0x125e   :  { %11483 = vmatprep.subr.bf16.mxu0 %v14981_v48  ;;  %11515 = vmatprep.subr.bf16.mxu1 %v14983_v0 }
0x1261   :  { %11485 = vmatpush1.bf16.msra.mxu0 %v14991_v29  ;;  %11517 = vmatpush1.bf16.msra.mxu1 %v14993_v3 }
0x1262   :  { %11487 = vmatprep.subr.bf16.mxu0 %v14997_v11  ;;  %11519 = vmatprep.subr.bf16.mxu1 %v14999_v51 }
0x1265   :  { %11489 = vmatpush1.bf16.msra.mxu0 %v15007_v26  ;;  %11521 = vmatpush1.bf16.msra.mxu1 %v15009_v20 }
0x1266   :  { %11491 = vmatprep.subr.bf16.mxu0 %v15013_v57  ;;  %11523 = vmatprep.subr.bf16.mxu1 %v15015_v25 }
0x1269   :  { %11493 = vmatpush1.bf16.msra.mxu0 %v15023_v52  ;;  %11525 = vmatpush1.bf16.msra.mxu1 %v15025_v33 }
0x126a   :  { %11495 = vmatprep.subr.bf16.mxu0 %v15029_v43  ;;  %11527 = vmatprep.subr.bf16.mxu1 %v15031_v34  ;;  %v6169_v43 = vld [vmem:[#allocation14 + $0x8] sm:$0xff] }
0x126b   :  { %v6173_v34 = vld [vmem:[#allocation14 + $0x28] sm:$0xff] }
0x126d   :  { %11497 = vmatpush1.bf16.msra.mxu0 %v15039_v45  ;;  %11529 = vmatpush1.bf16.msra.mxu1 %v15041_v56  ;;  %v6171_v45 = vld [vmem:[#allocation14 + $0x18] sm:$0xff]  ;;  %v15207_v56 = vpack.c.bf16 %v6173_v34, %v6169_v43  ;;  %v6194_v34 = vld [vmem:[#allocation14 + $0xd0] sm:$0xff] }
0x126e   :  { %v15209_v7 = vpack.c.bf16 %v6175_v59, %v6171_v45  ;;  %v6198_v45 = vld [vmem:[#allocation14 + $0xf0] sm:$0xff] }
0x126f   :  { %11531 = vmatprep.subr.bf16.mxu0 %v15207_v56  ;;  %v15250_v59 = vpack.c.bf16 %v6198_v45, %v6194_v34  ;;  %v6219_v34 = vld [vmem:[#allocation14 + $0x198] sm:$0xff] }
0x1270   :  { %11563 = vmatprep.subr.bf16.mxu1 %v15209_v7  ;;  %v6223_v45 = vld [vmem:[#allocation14 + $0x1b8] sm:$0xff] }
0x1271   :  { %v15279_v17 = vpack.c.bf16 %v6223_v45, %v6219_v34 }
0x1323   :  { %v5810_v24 = vpop.f32.mrb[36].mxu0  ;;  %v5881_v63 = vpop.f32.mrb[36].mxu1 }
0x1324   :  { %v12550_v42 = vadd.f32 %v5810_v24, %v15093_v36  ;;  %v5812_v38 = vpop.f32.mrb[37].mxu0  ;;  %v5883_v15 = vpop.f32.mrb[37].mxu1  ;;  %v12566_v41 = vadd.f32 %v5881_v63, %v15105_v53  ;;  %v6178_v63 = vld [vmem:[#allocation14 + $0x50] sm:$0xff] }
0x1325   :  { %v12551_v27 = vadd.f32 %v5812_v38, %v15096_v28  ;;  %v12567_v37 = vadd.f32 %v5883_v15, %v15101_v18  ;;  %v6185_v15 = vld [vmem:[#allocation14 + $0x88] sm:$0xff] }
0x1326   :  { %v9842_v62 = vmul.f32 -1.442695, %v12550_v42  ;;  %v6182_v42 = vld [vmem:[#allocation14 + $0x70] sm:$0xff] }
0x1327   :  { %v9843_v32 = vmul.f32 -1.442695, %v12551_v27  ;;  %v9844_v22 = vmul.f32 -1.442695, %v12567_v37  ;;  %v15226_v38 = vpack.c.bf16 %v6182_v42, %v6178_v63  ;;  %v6189_v27 = vld [vmem:[#allocation14 + $0xa8] sm:$0xff]  ;;  %v6191_v37 = vld [vmem:[#allocation14 + $0xb8] sm:$0xff] }
0x1328   :  { %13038 = vpow2.f32 %v9842_v62  ;;  %v6187_v62 = vld [vmem:[#allocation14 + $0x98] sm:$0xff]  ;;  %v6206_v63 = vld [vmem:[#allocation14 + $0x130] sm:$0xff] }
0x1329   :  { %13040 = vpow2.f32 %v9843_v32  ;;  %v15231_v32 = vpack.c.bf16 %v6189_v27, %v6185_v15  ;;  %v6209_v15 = vld [vmem:[#allocation14 + $0x148] sm:$0xff] }
0x132a   :  { %13042 = vpow2.f32 %v9844_v22  ;;  %v6184_v22 = vld [vmem:[#allocation14 + $0x80] sm:$0xff]  ;;  %v6213_v27 = vld [vmem:[#allocation14 + $0x168] sm:$0xff] }
0x132b   :  { %13044 = vtanh.f32 %v12566_v41  ;;  %v6188_v41 = vld [vmem:[#allocation14 + $0xa0] sm:$0xff] }
0x1332   :  { %v13039_v5 = vpop.eup %13038 }
0x1333   :  { %v13041_v49 = vpop.eup %13040  ;;  %v5893_v40 = vadd.f32 1.0, %v13039_v5  ;;  %v15233_v5 = vpack.c.bf16 %v6191_v37, %v6187_v62  ;;  %v6211_v62 = vld [vmem:[#allocation14 + $0x158] sm:$0xff]  ;;  %v15266_v37 = vpack.c.bf16 %v6213_v27, %v6209_v15  ;;  %v6229_v15 = vld [vmem:[#allocation14 + $0x1e8] sm:$0xff] }
0x1334   :  { %v5899_v48 = vadd.f32 1.0, %v13041_v49  ;;  %v13043_v0 = vpop.eup %13042  ;;  %v15235_v49 = vpack.c.bf16 %v6188_v41, %v6184_v22  ;;  %v6215_v22 = vld [vmem:[#allocation14 + $0x178] sm:$0xff]  ;;  %v6208_v41 = vld [vmem:[#allocation14 + $0x140] sm:$0xff] }
0x1335   :  { %13046 = vrcp.f32 %v5893_v40  ;;  %v13045_v29 = vpop.eup %13044  ;;  %v5906_v26 = vadd.f32 1.0, %v13043_v0  ;;  %v6186_v40 = vld [vmem:[#allocation14 + $0x90] sm:$0xff] }
0x1336   :  { %13048 = vrcp.f32 %v5899_v48  ;;  %v6190_v48 = vld [vmem:[#allocation14 + $0xb0] sm:$0xff] }
0x1337   :  { %13050 = vrcp.f32 %v5906_v26  ;;  %v15238_v0 = vpack.c.bf16 %v6190_v48, %v6186_v40  ;;  %v6199_v26 = vld [vmem:[#allocation14 + $0xf8] sm:$0xff]  ;;  %v6212_v40 = vld [vmem:[#allocation14 + $0x160] sm:$0xff]  ;;  %v15269_v48 = vpack.c.bf16 %v6215_v22, %v6211_v62 }
0x1338   :  { %v6227_v22 = vld [vmem:[#allocation14 + $0x1d8] sm:$0xff] }
0x133f   :  { %v13047_v3 = vpop.eup %13046 }
0x1340   :  { %v13049_v11 = vpop.eup %13048  ;;  %v5910_v51 = vmul.f32 %v13047_v3, %v13045_v29  ;;  %v6193_v29 = vld [vmem:[#allocation14 + $0xc8] sm:$0xff] }
0x1341   :  { %v5909_v20 = vmul.f32 %v13049_v11, %v15154_v1  ;;  %v13051_v25 = vpop.eup %13050  ;;  %v6176_v1 = vld [vmem:[#allocation14 + $0x40] sm:$0xff]  ;;  %v6197_v3 = vld [vmem:[#allocation14 + $0xe8] sm:$0xff]  ;;  %v6195_v11 = vld [vmem:[#allocation14 + $0xd8] sm:$0xff] }
0x1342   :  { %v15223_v24 = vpack.c.bf16 %v6180_v61, %v6176_v1  ;;  %v15259_v1 = vpack.c.bf16 %v6204_v58, %v6200_v14  ;;  %v6202_v61 = vld [vmem:[#allocation14 + $0x110] sm:$0xff]  ;;  %v15282_v58 = vpack.c.bf16 %v6220_v44, %v6216_v2 }
0x1343   :  { %v15198_v57 = vadd.f32 %v5910_v51, %v5909_v20  ;;  %v15243_v51 = vpack.c.bf16 %v6197_v3, %v6193_v29  ;;  %v6192_v20 = vld [vmem:[#allocation14 + $0xc0] sm:$0xff]  ;;  %v15262_v42 = vpack.c.bf16 %v6206_v63, %v6202_v61  ;;  %v15271_v29 = vpack.c.bf16 %v6212_v40, %v6208_v41  ;;  %v6210_v3 = vld [vmem:[#allocation14 + $0x150] sm:$0xff]  ;;  %v6225_v63 = vld [vmem:[#allocation14 + $0x1c8] sm:$0xff] }
0x1344   :  { %v6218_v14 = vld [vmem:[#allocation14 + $0x190] sm:$0xff]  ;;  %v15288_v62 = vpack.c.bf16 %v6229_v15, %v6225_v63  ;;  %v6231_v41 = vld [vmem:[#allocation14 + $0x1f8] sm:$0xff]  ;;  %v6224_v40 = vld [vmem:[#allocation14 + $0x1c0] sm:$0xff] }
0x1345   :  { %13052 = vtanh.f32 %v15198_v57  ;;  %v6222_v61 = vld [vmem:[#allocation14 + $0x1b0] sm:$0xff] }
0x1346   :  { %v15286_v27 = vpack.c.bf16 %v6222_v61, %v6218_v14 }
0x134f   :  { %v13053_v52 = vpop.eup %13052 }
0x1350   :  { %v15201_v33 = vmul.f32 %v13053_v52, %v13051_v25  ;;  %v6196_v25 = vld [vmem:[#allocation14 + $0xe0] sm:$0xff]  ;;  %v15245_v52 = vpack.c.bf16 %v6199_v26, %v6195_v11  ;;  %v6214_v11 = vld [vmem:[#allocation14 + $0x170] sm:$0xff]  ;;  %v6217_v26 = vld [vmem:[#allocation14 + $0x188] sm:$0xff] }
0x1351   :  { %v15247_v43 = vpack.c.bf16 %v6196_v25, %v6192_v20  ;;  %v15274_v20 = vpack.c.bf16 %v6214_v11, %v6210_v3  ;;  %v6221_v25 = vld [vmem:[#allocation14 + $0x1a8] sm:$0xff]  ;;  %v15291_v3 = vpack.c.bf16 %v6231_v41, %v6227_v22  ;;  %v6228_v11 = vld [vmem:[#allocation14 + $0x1e0] sm:$0xff] }
0x1352   :  { %16220 = vst [vmem:[#allocation34_spill] sm:$0xff] %v15201_v33  ;;  %6053 = vmatmul.mubr.f32.vlgmr.msra.gmra.mrb[38].mxu0 %v15201_v33  ;;  %6124 = vmatmul.mubr.f32.vlgmr.msra.gmra.mrb[38].mxu1 %v15201_v33  ;;  %v15277_v30 = vpack.c.bf16 %v6221_v25, %v6217_v26  ;;  %v6226_v26 = vld [vmem:[#allocation14 + $0x1d0] sm:$0xff]  ;;  %v15294_v34 = vpack.c.bf16 %v6228_v11, %v6224_v40 }
0x1353   :  { %6296 = vmatprep.mubr.f32.mxu0 %v16212_v31  ;;  %6367 = vmatprep.mubr.f32.mxu1 %v16212_v31  ;;  %v6230_v25 = vld [vmem:[#allocation14 + $0x1f0] sm:$0xff] }
0x1354   :  { %11533 = vmatpush1.bf16.msra.mxu0 %v15211_v8  ;;  %11565 = vmatpush1.bf16.msra.mxu1 %v15214_v60  ;;  %v15298_v45 = vpack.c.bf16 %v6230_v25, %v6226_v26 }
0x1355   :  { %11535 = vmatprep.subr.bf16.mxu0 %v15219_v47  ;;  %11567 = vmatprep.subr.bf16.mxu1 %v15221_v35 }
0x1358   :  { %11537 = vmatpush1.bf16.msra.mxu0 %v15223_v24  ;;  %11569 = vmatpush1.bf16.msra.mxu1 %v15226_v38 }
0x1359   :  { %11539 = vmatprep.subr.bf16.mxu0 %v15231_v32  ;;  %11571 = vmatprep.subr.bf16.mxu1 %v15233_v5 }
0x135c   :  { %11541 = vmatpush1.bf16.msra.mxu0 %v15235_v49  ;;  %11573 = vmatpush1.bf16.msra.mxu1 %v15238_v0 }
0x135d   :  { %11543 = vmatprep.subr.bf16.mxu0 %v15243_v51  ;;  %11575 = vmatprep.subr.bf16.mxu1 %v15245_v52 }
0x1360   :  { %11545 = vmatpush1.bf16.msra.mxu0 %v15247_v43  ;;  %11577 = vmatpush1.bf16.msra.mxu1 %v15250_v59 }
0x1361   :  { %11547 = vmatprep.subr.bf16.mxu0 %v15255_v4  ;;  %11579 = vmatprep.subr.bf16.mxu1 %v15257_v9 }
0x1364   :  { %11549 = vmatpush1.bf16.msra.mxu0 %v15259_v1  ;;  %11581 = vmatpush1.bf16.msra.mxu1 %v15262_v42 }
0x1365   :  { %11551 = vmatprep.subr.bf16.mxu0 %v15266_v37  ;;  %11583 = vmatprep.subr.bf16.mxu1 %v15269_v48 }
0x1368   :  { %11553 = vmatpush1.bf16.msra.mxu0 %v15271_v29  ;;  %11585 = vmatpush1.bf16.msra.mxu1 %v15274_v20 }
0x1369   :  { %11555 = vmatprep.subr.bf16.mxu0 %v15277_v30  ;;  %11587 = vmatprep.subr.bf16.mxu1 %v15279_v17 }
0x136c   :  { %11557 = vmatpush1.bf16.msra.mxu0 %v15282_v58  ;;  %11589 = vmatpush1.bf16.msra.mxu1 %v15286_v27 }
0x136d   :  { %11559 = vmatprep.subr.bf16.mxu0 %v15288_v62  ;;  %11591 = vmatprep.subr.bf16.mxu1 %v15291_v3 }
0x1370   :  { %11561 = vmatpush1.bf16.msra.mxu0 %v15294_v34  ;;  %11593 = vmatpush1.bf16.msra.mxu1 %v15298_v45 }
0x1371   :  { %11595 = vmatprep.subr.bf16.mxu0 %v15207_v56  ;;  %11627 = vmatprep.subr.bf16.mxu1 %v15209_v7 }
0x1425   :  { %v6054_v2 = vpop.f32.mrb[38].mxu0  ;;  %v6125_v44 = vpop.f32.mrb[38].mxu1 }
0x1426   :  { %v12552_v14 = vadd.f32 %v6054_v2, %v15093_v36  ;;  %v6056_v61 = vpop.f32.mrb[39].mxu0  ;;  %v6127_v63 = vpop.f32.mrb[39].mxu1  ;;  %v12568_v26 = vadd.f32 %v6125_v44, %v15105_v53 }
0x1427   :  { %v12553_v15 = vadd.f32 %v6056_v61, %v15096_v28  ;;  %v12569_v40 = vadd.f32 %v6127_v63, %v15101_v18 }
0x1428   :  { %v9845_v22 = vmul.f32 -1.442695, %v12552_v14 }
0x1429   :  { %v9846_v41 = vmul.f32 -1.442695, %v12553_v15  ;;  %v9847_v11 = vmul.f32 -1.442695, %v12569_v40 }
0x142a   :  { %13054 = vpow2.f32 %v9845_v22 }
0x142b   :  { %13056 = vpow2.f32 %v9846_v41 }
0x142c   :  { %13058 = vpow2.f32 %v9847_v11 }
0x142d   :  { %13060 = vtanh.f32 %v12568_v26 }
0x1434   :  { %v13055_v25 = vpop.eup %13054 }
0x1435   :  { %v13057_v33 = vpop.eup %13056  ;;  %v6137_v55 = vadd.f32 1.0, %v13055_v25 }
0x1436   :  { %v6143_v50 = vadd.f32 1.0, %v13057_v33  ;;  %v13059_v2 = vpop.eup %13058 }
0x1437   :  { %13062 = vrcp.f32 %v6137_v55  ;;  %v13061_v16 = vpop.eup %13060  ;;  %v6150_v22 = vadd.f32 1.0, %v13059_v2 }
0x1438   :  { %13064 = vrcp.f32 %v6143_v50 }
0x1439   :  { %13066 = vrcp.f32 %v6150_v22 }
0x1441   :  { %v13063_v61 = vpop.eup %13062 }
0x1442   :  { %v13065_v14 = vpop.eup %13064  ;;  %v6154_v15 = vmul.f32 %v13063_v61, %v13061_v16 }
0x1443   :  { %v6153_v41 = vmul.f32 %v13065_v14, %v15198_v57  ;;  %v13067_v44 = vpop.eup %13066 }
0x1445   :  { %v15310_v63 = vadd.f32 %v6154_v15, %v6153_v41 }
0x1447   :  { %13068 = vtanh.f32 %v15310_v63 }
0x1451   :  { %v13069_v40 = vpop.eup %13068 }
0x1452   :  { %v15313_v11 = vmul.f32 %v13069_v40, %v13067_v44 }
0x1454   :  { %16221 = vst [vmem:[#allocation35_spill] sm:$0xff] %v15313_v11  ;;  %6297 = vmatmul.mubr.f32.vlgmr.msra.gmra.mrb[40].mxu0 %v15313_v11  ;;  %6368 = vmatmul.mubr.f32.vlgmr.msra.gmra.mrb[40].mxu1 %v15313_v11 }
0x1455   :  { %11597 = vmatpush1.bf16.msra.mxu0 %v15211_v8  ;;  %11629 = vmatpush1.bf16.msra.mxu1 %v15214_v60 }
0x1456   :  { %11599 = vmatprep.subr.bf16.mxu0 %v15219_v47  ;;  %11631 = vmatprep.subr.bf16.mxu1 %v15221_v35 }
0x1457   :  { %6540 = vmatprep.mubr.f32.mxu0 %v16212_v31  ;;  %6611 = vmatprep.mubr.f32.mxu1 %v16212_v31 }
0x1459   :  { %11601 = vmatpush1.bf16.msra.mxu0 %v15223_v24  ;;  %11633 = vmatpush1.bf16.msra.mxu1 %v15226_v38 }
0x145a   :  { %11603 = vmatprep.subr.bf16.mxu0 %v15231_v32  ;;  %11635 = vmatprep.subr.bf16.mxu1 %v15233_v5 }
0x145d   :  { %11605 = vmatpush1.bf16.msra.mxu0 %v15235_v49  ;;  %11637 = vmatpush1.bf16.msra.mxu1 %v15238_v0 }
0x145e   :  { %11607 = vmatprep.subr.bf16.mxu0 %v15243_v51  ;;  %11639 = vmatprep.subr.bf16.mxu1 %v15245_v52 }
0x1461   :  { %11609 = vmatpush1.bf16.msra.mxu0 %v15247_v43  ;;  %11641 = vmatpush1.bf16.msra.mxu1 %v15250_v59 }
0x1462   :  { %11611 = vmatprep.subr.bf16.mxu0 %v15255_v4  ;;  %11643 = vmatprep.subr.bf16.mxu1 %v15257_v9 }
0x1465   :  { %11613 = vmatpush1.bf16.msra.mxu0 %v15259_v1  ;;  %11645 = vmatpush1.bf16.msra.mxu1 %v15262_v42 }
0x1466   :  { %11615 = vmatprep.subr.bf16.mxu0 %v15266_v37  ;;  %11647 = vmatprep.subr.bf16.mxu1 %v15269_v48 }
0x1469   :  { %11617 = vmatpush1.bf16.msra.mxu0 %v15271_v29  ;;  %11649 = vmatpush1.bf16.msra.mxu1 %v15274_v20 }
0x146a   :  { %11619 = vmatprep.subr.bf16.mxu0 %v15277_v30  ;;  %11651 = vmatprep.subr.bf16.mxu1 %v15279_v17 }
0x146d   :  { %11621 = vmatpush1.bf16.msra.mxu0 %v15282_v58  ;;  %11653 = vmatpush1.bf16.msra.mxu1 %v15286_v27 }
0x146e   :  { %11623 = vmatprep.subr.bf16.mxu0 %v15288_v62  ;;  %11655 = vmatprep.subr.bf16.mxu1 %v15291_v3 }
0x1471   :  { %11625 = vmatpush1.bf16.msra.mxu0 %v15294_v34  ;;  %11657 = vmatpush1.bf16.msra.mxu1 %v15298_v45 }
0x1472   :  { %11659 = vmatprep.subr.bf16.mxu0 %v15207_v56  ;;  %11691 = vmatprep.subr.bf16.mxu1 %v15209_v7 }
0x1527   :  { %v6298_v16 = vpop.f32.mrb[40].mxu0  ;;  %v6369_v50 = vpop.f32.mrb[40].mxu1 }
0x1528   :  { %v12554_v55 = vadd.f32 %v6298_v16, %v15093_v36  ;;  %v6300_v57 = vpop.f32.mrb[41].mxu0  ;;  %v6371_v33 = vpop.f32.mrb[41].mxu1  ;;  %v12570_v15 = vadd.f32 %v6369_v50, %v15105_v53 }
0x1529   :  { %v12555_v26 = vadd.f32 %v6300_v57, %v15096_v28  ;;  %v12571_v61 = vadd.f32 %v6371_v33, %v15101_v18 }
0x152a   :  { %v9848_v25 = vmul.f32 -1.442695, %v12554_v55 }
0x152b   :  { %v9849_v2 = vmul.f32 -1.442695, %v12555_v26  ;;  %v9850_v14 = vmul.f32 -1.442695, %v12571_v61 }
0x152c   :  { %13070 = vpow2.f32 %v9848_v25 }
0x152d   :  { %13072 = vpow2.f32 %v9849_v2 }
0x152e   :  { %13074 = vpow2.f32 %v9850_v14 }
0x152f   :  { %13076 = vtanh.f32 %v12570_v15 }
0x1536   :  { %v13071_v22 = vpop.eup %13070 }
0x1537   :  { %v13073_v41 = vpop.eup %13072  ;;  %v6381_v44 = vadd.f32 1.0, %v13071_v22 }
0x1538   :  { %v6387_v40 = vadd.f32 1.0, %v13073_v41  ;;  %v13075_v16 = vpop.eup %13074 }
0x1539   :  { %13078 = vrcp.f32 %v6381_v44  ;;  %v13077_v11 = vpop.eup %13076  ;;  %v6394_v25 = vadd.f32 1.0, %v13075_v16 }
0x153a   :  { %13080 = vrcp.f32 %v6387_v40 }
0x153b   :  { %13082 = vrcp.f32 %v6394_v25 }
0x1543   :  { %v13079_v57 = vpop.eup %13078 }
0x1544   :  { %v13081_v55 = vpop.eup %13080  ;;  %v6398_v26 = vmul.f32 %v13079_v57, %v13077_v11 }
0x1545   :  { %v6397_v2 = vmul.f32 %v13081_v55, %v15310_v63  ;;  %v13083_v50 = vpop.eup %13082 }
0x1547   :  { %v15356_v33 = vadd.f32 %v6398_v26, %v6397_v2 }
0x1549   :  { %13084 = vtanh.f32 %v15356_v33 }
0x1553   :  { %v13085_v61 = vpop.eup %13084 }
0x1554   :  { %v15359_v14 = vmul.f32 %v13085_v61, %v13083_v50 }
0x1556   :  { %6541 = vmatmul.mubr.f32.vlgmr.msra.gmra.mrb[42].mxu0 %v15359_v14  ;;  %6612 = vmatmul.mubr.f32.vlgmr.msra.gmra.mrb[42].mxu1 %v15359_v14 }
0x1557   :  { %11661 = vmatpush1.bf16.msra.mxu0 %v15211_v8  ;;  %11693 = vmatpush1.bf16.msra.mxu1 %v15214_v60 }
0x1558   :  { %11663 = vmatprep.subr.bf16.mxu0 %v15219_v47  ;;  %11695 = vmatprep.subr.bf16.mxu1 %v15221_v35 }
0x1559   :  { %6784 = vmatprep.mubr.f32.mxu0 %v16212_v31  ;;  %6855 = vmatprep.mubr.f32.mxu1 %v16212_v31 }
0x155b   :  { %11665 = vmatpush1.bf16.msra.mxu0 %v15223_v24  ;;  %11697 = vmatpush1.bf16.msra.mxu1 %v15226_v38 }
0x155c   :  { %11667 = vmatprep.subr.bf16.mxu0 %v15231_v32  ;;  %11699 = vmatprep.subr.bf16.mxu1 %v15233_v5 }
0x155f   :  { %11669 = vmatpush1.bf16.msra.mxu0 %v15235_v49  ;;  %11701 = vmatpush1.bf16.msra.mxu1 %v15238_v0 }
0x1560   :  { %11671 = vmatprep.subr.bf16.mxu0 %v15243_v51  ;;  %11703 = vmatprep.subr.bf16.mxu1 %v15245_v52 }
0x1563   :  { %11673 = vmatpush1.bf16.msra.mxu0 %v15247_v43  ;;  %11705 = vmatpush1.bf16.msra.mxu1 %v15250_v59 }
0x1564   :  { %11675 = vmatprep.subr.bf16.mxu0 %v15255_v4  ;;  %11707 = vmatprep.subr.bf16.mxu1 %v15257_v9 }
0x1567   :  { %11677 = vmatpush1.bf16.msra.mxu0 %v15259_v1  ;;  %11709 = vmatpush1.bf16.msra.mxu1 %v15262_v42 }
0x1568   :  { %11679 = vmatprep.subr.bf16.mxu0 %v15266_v37  ;;  %11711 = vmatprep.subr.bf16.mxu1 %v15269_v48 }
0x156b   :  { %11681 = vmatpush1.bf16.msra.mxu0 %v15271_v29  ;;  %11713 = vmatpush1.bf16.msra.mxu1 %v15274_v20 }
0x156c   :  { %11683 = vmatprep.subr.bf16.mxu0 %v15277_v30  ;;  %11715 = vmatprep.subr.bf16.mxu1 %v15279_v17 }
0x156f   :  { %11685 = vmatpush1.bf16.msra.mxu0 %v15282_v58  ;;  %11717 = vmatpush1.bf16.msra.mxu1 %v15286_v27 }
0x1570   :  { %11687 = vmatprep.subr.bf16.mxu0 %v15288_v62  ;;  %11719 = vmatprep.subr.bf16.mxu1 %v15291_v3 }
0x1573   :  { %11689 = vmatpush1.bf16.msra.mxu0 %v15294_v34  ;;  %11721 = vmatpush1.bf16.msra.mxu1 %v15298_v45 }
0x1574   :  { %11723 = vmatprep.subr.bf16.mxu0 %v15207_v56  ;;  %11755 = vmatprep.subr.bf16.mxu1 %v15209_v7 }
0x1629   :  { %v6542_v63 = vpop.f32.mrb[42].mxu0  ;;  %v6613_v11 = vpop.f32.mrb[42].mxu1 }
0x162a   :  { %v12556_v15 = vadd.f32 %v6542_v63, %v15093_v36  ;;  %v6544_v22 = vpop.f32.mrb[43].mxu0  ;;  %v6615_v41 = vpop.f32.mrb[43].mxu1  ;;  %v12572_v26 = vadd.f32 %v6613_v11, %v15105_v53 }
0x162b   :  { %v12557_v44 = vadd.f32 %v6544_v22, %v15096_v28  ;;  %v12573_v57 = vadd.f32 %v6615_v41, %v15101_v18 }
0x162c   :  { %v9851_v40 = vmul.f32 -1.442695, %v12556_v15 }
0x162d   :  { %v9852_v16 = vmul.f32 -1.442695, %v12557_v44  ;;  %v9853_v55 = vmul.f32 -1.442695, %v12573_v57 }
0x162e   :  { %13086 = vpow2.f32 %v9851_v40 }
0x162f   :  { %13088 = vpow2.f32 %v9852_v16 }
0x1630   :  { %13090 = vpow2.f32 %v9853_v55  ;;  %v7156_v55 = vld [vmem:[#allocation15 + $0x10] sm:$0xff] }
0x1631   :  { %13092 = vtanh.f32 %v12572_v26  ;;  %v7160_v26 = vld [vmem:[#allocation15 + $0x30] sm:$0xff] }
0x1638   :  { %v13087_v56 = vpop.eup %13086 }
0x1639   :  { %v13089_v25 = vpop.eup %13088  ;;  %v6625_v7 = vadd.f32 1.0, %v13087_v56  ;;  %v7163_v56 = vld [vmem:[#allocation15 + $0x48] sm:$0xff] }
0x163a   :  { %v6631_v2 = vadd.f32 1.0, %v13089_v25  ;;  %v13091_v50 = vpop.eup %13090 }
0x163b   :  { %13094 = vrcp.f32 %v6625_v7  ;;  %v13093_v61 = vpop.eup %13092  ;;  %v6638_v44 = vadd.f32 1.0, %v13091_v50  ;;  %v7167_v7 = vld [vmem:[#allocation15 + $0x68] sm:$0xff]  ;;  %v7169_v50 = vld [vmem:[#allocation15 + $0x78] sm:$0xff] }
0x163c   :  { %13096 = vrcp.f32 %v6631_v2  ;;  %v7165_v2 = vld [vmem:[#allocation15 + $0x58] sm:$0xff] }
0x163d   :  { %13098 = vrcp.f32 %v6638_v44  ;;  %v7166_v44 = vld [vmem:[#allocation15 + $0x60] sm:$0xff] }
0x1645   :  { %v13095_v63 = vpop.eup %13094 }
0x1646   :  { %v13097_v15 = vpop.eup %13096  ;;  %v6642_v22 = vmul.f32 %v13095_v63, %v13093_v61 }
0x1647   :  { %v6641_v40 = vmul.f32 %v13097_v15, %v15356_v33  ;;  %v13099_v11 = vpop.eup %13098  ;;  %v7158_v33 = vld [vmem:[#allocation15 + $0x20] sm:$0xff]  ;;  %v11852_v15 = vpack.c.bf16 %v7160_v26, %v7156_v55 }
0x1648   :  { %v7186_v55 = vld [vmem:[#allocation15 + $0x100] sm:$0xff] }
0x1649   :  { %v15402_v41 = vadd.f32 %v6642_v22, %v6641_v40  ;;  %v7162_v22 = vld [vmem:[#allocation15 + $0x40] sm:$0xff] }
0x164a   :  { %v7190_v26 = vld [vmem:[#allocation15 + $0x120] sm:$0xff] }
0x164b   :  { %13100 = vtanh.f32 %v15402_v41 }
0x1655   :  { %v13101_v16 = vpop.eup %13100 }
0x1656   :  { %v15405_v57 = vmul.f32 %v13101_v16, %v13099_v11  ;;  %v7168_v11 = vld [vmem:[#allocation15 + $0x70] sm:$0xff]  ;;  %v7171_v16 = vld [vmem:[#allocation15 + $0x88] sm:$0xff] }
0x1658   :  { %6785 = vmatmul.mubr.f32.vlgmr.msra.gmra.mrb[44].mxu0 %v15405_v57  ;;  %6856 = vmatmul.mubr.f32.vlgmr.msra.gmra.mrb[44].mxu1 %v15405_v57 }
0x1659   :  { %11725 = vmatpush1.bf16.msra.mxu0 %v15211_v8  ;;  %11757 = vmatpush1.bf16.msra.mxu1 %v15214_v60  ;;  %v7155_v8 = vld [vmem:[#allocation15 + $0x8] sm:$0xff] }
0x165a   :  { %11727 = vmatprep.subr.bf16.mxu0 %v15219_v47  ;;  %11759 = vmatprep.subr.bf16.mxu1 %v15221_v35  ;;  %v7159_v60 = vld [vmem:[#allocation15 + $0x28] sm:$0xff]  ;;  %v7157_v47 = vld [vmem:[#allocation15 + $0x18] sm:$0xff] }
0x165b   :  { %7028 = vmatprep.mubr.f32.mxu0 %v16212_v31  ;;  %7099 = vmatprep.mubr.f32.mxu1 %v16212_v31  ;;  %v11786_v35 = vpack.c.bf16 %v7159_v60, %v7155_v8  ;;  %v11790_v8 = vpack.c.bf16 %v7167_v7, %v7163_v56  ;;  %v11854_v60 = vpack.c.bf16 %v7169_v50, %v7165_v2  ;;  %v7188_v7 = vld [vmem:[#allocation15 + $0x110] sm:$0xff]  ;;  %v7195_v50 = vld [vmem:[#allocation15 + $0x148] sm:$0xff] }
0x165c   :  { %v7192_v2 = vld [vmem:[#allocation15 + $0x130] sm:$0xff] }
0x165d   :  { %11729 = vmatpush1.bf16.msra.mxu0 %v15223_v24  ;;  %11761 = vmatpush1.bf16.msra.mxu1 %v15226_v38  ;;  %v7161_v24 = vld [vmem:[#allocation15 + $0x38] sm:$0xff] }
0x165e   :  { %11731 = vmatprep.subr.bf16.mxu0 %v15231_v32  ;;  %11763 = vmatprep.subr.bf16.mxu1 %v15233_v5  ;;  %v11850_v38 = vpack.c.bf16 %v7161_v24, %v7157_v47  ;;  %v7175_v47 = vld [vmem:[#allocation15 + $0xa8] sm:$0xff]  ;;  %v7177_v24 = vld [vmem:[#allocation15 + $0xb8] sm:$0xff] }
0x1661   :  { %11733 = vmatpush1.bf16.msra.mxu0 %v15235_v49  ;;  %11765 = vmatpush1.bf16.msra.mxu1 %v15238_v0 }
0x1662   :  { %11735 = vmatprep.subr.bf16.mxu0 %v15243_v51  ;;  %11767 = vmatprep.subr.bf16.mxu1 %v15245_v52 }
0x1665   :  { %11737 = vmatpush1.bf16.msra.mxu0 %v15247_v43  ;;  %11769 = vmatpush1.bf16.msra.mxu1 %v15250_v59 }
0x1666   :  { %11739 = vmatprep.subr.bf16.mxu0 %v15255_v4  ;;  %11771 = vmatprep.subr.bf16.mxu1 %v15257_v9 }
0x1669   :  { %11741 = vmatpush1.bf16.msra.mxu0 %v15259_v1  ;;  %11773 = vmatpush1.bf16.msra.mxu1 %v15262_v42 }
0x166a   :  { %11743 = vmatprep.subr.bf16.mxu0 %v15266_v37  ;;  %11775 = vmatprep.subr.bf16.mxu1 %v15269_v48 }
0x166d   :  { %11745 = vmatpush1.bf16.msra.mxu0 %v15271_v29  ;;  %11777 = vmatpush1.bf16.msra.mxu1 %v15274_v20 }
0x166e   :  { %11747 = vmatprep.subr.bf16.mxu0 %v15277_v30  ;;  %11779 = vmatprep.subr.bf16.mxu1 %v15279_v17 }
0x1671   :  { %11749 = vmatpush1.bf16.msra.mxu0 %v15282_v58  ;;  %11781 = vmatpush1.bf16.msra.mxu1 %v15286_v27 }
0x1672   :  { %11751 = vmatprep.subr.bf16.mxu0 %v15288_v62  ;;  %11783 = vmatprep.subr.bf16.mxu1 %v15291_v3 }
0x1675   :  { %11753 = vmatpush1.bf16.msra.mxu0 %v15294_v34  ;;  %11785 = vmatpush1.bf16.msra.mxu1 %v15298_v45  ;;  %v7154_v45 = vld [vmem:[#allocation15] sm:$0xff] }
0x1676   :  { %11787 = vmatprep.subr.bf16.mxu0 %v11786_v35  ;;  %11851 = vmatprep.subr.bf16.mxu1 %v11850_v38  ;;  %v11788_v63 = vpack.c.bf16 %v7158_v33, %v7154_v45  ;;  %v7173_v35 = vld [vmem:[#allocation15 + $0x98] sm:$0xff]  ;;  %v11792_v38 = vpack.c.bf16 %v7166_v44, %v7162_v22  ;;  %v11804_v22 = vpack.c.bf16 %v7190_v26, %v7186_v55 }
0x1677   :  { %v11868_v44 = vpack.c.bf16 %v7192_v2, %v7188_v7 }
0x172b   :  { %v6786_v32 = vpop.f32.mrb[44].mxu0  ;;  %v6857_v5 = vpop.f32.mrb[44].mxu1 }
0x172c   :  { %v12558_v49 = vadd.f32 %v6786_v32, %v15093_v36  ;;  %v6788_v0 = vpop.f32.mrb[45].mxu0  ;;  %v6859_v51 = vpop.f32.mrb[45].mxu1  ;;  %v12574_v1 = vadd.f32 %v6857_v5, %v15105_v53  ;;  %v7170_v5 = vld [vmem:[#allocation15 + $0x80] sm:$0xff] }
0x172d   :  { %v12559_v52 = vadd.f32 %v6788_v0, %v15096_v28  ;;  %v12575_v4 = vadd.f32 %v6859_v51, %v15101_v18  ;;  %v11794_v0 = vpack.c.bf16 %v7175_v47, %v7171_v16  ;;  %v11858_v51 = vpack.c.bf16 %v7177_v24, %v7173_v35  ;;  %v7200_v47 = vld [vmem:[#allocation15 + $0x170] sm:$0xff]  ;;  %v7203_v35 = vld [vmem:[#allocation15 + $0x188] sm:$0xff] }
0x172e   :  { %v9854_v43 = vmul.f32 -1.442695, %v12558_v49  ;;  %v7174_v49 = vld [vmem:[#allocation15 + $0xa0] sm:$0xff]  ;;  %v7207_v24 = vld [vmem:[#allocation15 + $0x1a8] sm:$0xff] }
0x172f   :  { %v9855_v59 = vmul.f32 -1.442695, %v12559_v52  ;;  %v9856_v9 = vmul.f32 -1.442695, %v12575_v4  ;;  %v7172_v52 = vld [vmem:[#allocation15 + $0x90] sm:$0xff]  ;;  %v7183_v4 = vld [vmem:[#allocation15 + $0xe8] sm:$0xff] }
0x1730   :  { %13102 = vpow2.f32 %v9854_v43  ;;  %v7176_v43 = vld [vmem:[#allocation15 + $0xb0] sm:$0xff] }
0x1731   :  { %13104 = vpow2.f32 %v9855_v59  ;;  %v7179_v59 = vld [vmem:[#allocation15 + $0xc8] sm:$0xff] }
0x1732   :  { %13106 = vpow2.f32 %v9856_v9  ;;  %v7181_v9 = vld [vmem:[#allocation15 + $0xd8] sm:$0xff] }
0x1733   :  { %13108 = vtanh.f32 %v12574_v1  ;;  %v7185_v1 = vld [vmem:[#allocation15 + $0xf8] sm:$0xff] }
0x173a   :  { %v13103_v42 = vpop.eup %13102 }
0x173b   :  { %v13105_v37 = vpop.eup %13104  ;;  %v6869_v48 = vadd.f32 1.0, %v13103_v42  ;;  %v11796_v42 = vpack.c.bf16 %v7174_v49, %v7170_v5 }
0x173c   :  { %v6875_v29 = vadd.f32 1.0, %v13105_v37  ;;  %v13107_v20 = vpop.eup %13106  ;;  %v11860_v37 = vpack.c.bf16 %v7176_v43, %v7172_v52  ;;  %v11810_v52 = vpack.c.bf16 %v7207_v24, %v7203_v35  ;;  %v7228_v35 = vld [vmem:[#allocation15 + $0x250] sm:$0xff] }
0x173d   :  { %13110 = vrcp.f32 %v6869_v48  ;;  %v13109_v30 = vpop.eup %13108  ;;  %v6882_v62 = vadd.f32 1.0, %v13107_v20  ;;  %v7178_v48 = vld [vmem:[#allocation15 + $0xc0] sm:$0xff]  ;;  %v11798_v20 = vpack.c.bf16 %v7183_v4, %v7179_v59  ;;  %v7204_v59 = vld [vmem:[#allocation15 + $0x190] sm:$0xff] }
0x173e   :  { %13112 = vrcp.f32 %v6875_v29  ;;  %v7182_v29 = vld [vmem:[#allocation15 + $0xe0] sm:$0xff]  ;;  %v7208_v4 = vld [vmem:[#allocation15 + $0x1b0] sm:$0xff] }
0x173f   :  { %13114 = vrcp.f32 %v6882_v62  ;;  %v7189_v62 = vld [vmem:[#allocation15 + $0x118] sm:$0xff]  ;;  %v11800_v45 = vpack.c.bf16 %v7182_v29, %v7178_v48  ;;  %v11876_v29 = vpack.c.bf16 %v7208_v4, %v7204_v59  ;;  %v7232_v24 = vld [vmem:[#allocation15 + $0x270] sm:$0xff] }
0x1747   :  { %v13111_v17 = vpop.eup %13110 }
0x1748   :  { %v13113_v58 = vpop.eup %13112  ;;  %v6886_v27 = vmul.f32 %v13111_v17, %v13109_v30  ;;  %v7180_v30 = vld [vmem:[#allocation15 + $0xd0] sm:$0xff] }
0x1749   :  { %v6885_v3 = vmul.f32 %v13113_v58, %v15402_v41  ;;  %v13115_v25 = vpop.eup %13114  ;;  %v7164_v41 = vld [vmem:[#allocation15 + $0x50] sm:$0xff]  ;;  %v7187_v58 = vld [vmem:[#allocation15 + $0x108] sm:$0xff] }
0x174a   :  { %v11856_v32 = vpack.c.bf16 %v7168_v11, %v7164_v41  ;;  %v7184_v17 = vld [vmem:[#allocation15 + $0xf0] sm:$0xff]  ;;  %v7194_v41 = vld [vmem:[#allocation15 + $0x140] sm:$0xff] }
0x174b   :  { %v15446_v34 = vadd.f32 %v6886_v27, %v6885_v3  ;;  %v7191_v27 = vld [vmem:[#allocation15 + $0x128] sm:$0xff]  ;;  %v7193_v3 = vld [vmem:[#allocation15 + $0x138] sm:$0xff]  ;;  %v11864_v33 = vpack.c.bf16 %v7184_v17, %v7180_v30  ;;  %v7198_v11 = vld [vmem:[#allocation15 + $0x160] sm:$0xff] }
0x174c   :  { %v11802_v56 = vpack.c.bf16 %v7191_v27, %v7187_v58  ;;  %v11808_v5 = vpack.c.bf16 %v7198_v11, %v7194_v41  ;;  %v7212_v58 = vld [vmem:[#allocation15 + $0x1d0] sm:$0xff] }
0x174d   :  { %13116 = vtanh.f32 %v15446_v34  ;;  %v7216_v27 = vld [vmem:[#allocation15 + $0x1f0] sm:$0xff] }
0x174e   :  { %v11880_v26 = vpack.c.bf16 %v7216_v27, %v7212_v58 }
0x1757   :  { %v13117_v61 = vpop.eup %13116 }
0x1758   :  { %v15449_v40 = vmul.f32 %v13117_v61, %v13115_v25  ;;  %v11866_v25 = vpack.c.bf16 %v7193_v3, %v7189_v62  ;;  %v7199_v61 = vld [vmem:[#allocation15 + $0x168] sm:$0xff] }
0x1759   :  { %v11806_v16 = vpack.c.bf16 %v7199_v61, %v7195_v50  ;;  %v7219_v62 = vld [vmem:[#allocation15 + $0x208] sm:$0xff]  ;;  %v7220_v50 = vld [vmem:[#allocation15 + $0x210] sm:$0xff] }
0x175a   :  { %7029 = vmatmul.mubr.f32.vlgmr.msra.gmra.mrb[46].mxu0 %v15449_v40  ;;  %7100 = vmatmul.mubr.f32.vlgmr.msra.gmra.mrb[46].mxu1 %v15449_v40  ;;  %v7223_v3 = vld [vmem:[#allocation15 + $0x228] sm:$0xff]  ;;  %v7224_v61 = vld [vmem:[#allocation15 + $0x230] sm:$0xff] }
0x175b   :  { %11789 = vmatpush1.bf16.msra.mxu0 %v11788_v63  ;;  %11853 = vmatpush1.bf16.msra.mxu1 %v11852_v15  ;;  %v7197_v63 = vld [vmem:[#allocation15 + $0x158] sm:$0xff]  ;;  %v11818_v7 = vpack.c.bf16 %v7223_v3, %v7219_v62  ;;  %v11884_v11 = vpack.c.bf16 %v7224_v61, %v7220_v50  ;;  %v7244_v62 = vld [vmem:[#allocation15 + $0x2d0] sm:$0xff] }
0x175c   :  { %7368 = vmatprep.mubr.f32.mxu0 %v14925_v13  ;;  %7481 = vmatprep.mubr.f32.mxu1 %v14925_v13  ;;  %v11862_v13 = vpack.c.bf16 %v7185_v1, %v7181_v9  ;;  %v7201_v15 = vld [vmem:[#allocation15 + $0x178] sm:$0xff]  ;;  %v7211_v9 = vld [vmem:[#allocation15 + $0x1c8] sm:$0xff]  ;;  %v7248_v3 = vld [vmem:[#allocation15 + $0x2f0] sm:$0xff] }
0x175d   :  { %11791 = vmatprep.subr.bf16.mxu0 %v11790_v8  ;;  %11855 = vmatprep.subr.bf16.mxu1 %v11854_v60  ;;  %v11870_v8 = vpack.c.bf16 %v7201_v15, %v7197_v63  ;;  %v7196_v60 = vld [vmem:[#allocation15 + $0x150] sm:$0xff]  ;;  %v7215_v1 = vld [vmem:[#allocation15 + $0x1e8] sm:$0xff] }
0x175e   :  { %v11872_v49 = vpack.c.bf16 %v7200_v47, %v7196_v60  ;;  %v11814_v30 = vpack.c.bf16 %v7215_v1, %v7211_v9  ;;  %v7227_v63 = vld [vmem:[#allocation15 + $0x248] sm:$0xff]  ;;  %v7236_v9 = vld [vmem:[#allocation15 + $0x290] sm:$0xff] }
0x175f   :  { %11793 = vmatpush1.bf16.msra.mxu0 %v11792_v38  ;;  %11857 = vmatpush1.bf16.msra.mxu1 %v11856_v32  ;;  %v7205_v38 = vld [vmem:[#allocation15 + $0x198] sm:$0xff]  ;;  %v7231_v15 = vld [vmem:[#allocation15 + $0x268] sm:$0xff]  ;;  %v7240_v1 = vld [vmem:[#allocation15 + $0x2b0] sm:$0xff] }
0x1760   :  { %11795 = vmatprep.subr.bf16.mxu0 %v11794_v0  ;;  %11859 = vmatprep.subr.bf16.mxu1 %v11858_v51  ;;  %v7209_v32 = vld [vmem:[#allocation15 + $0x1b8] sm:$0xff]  ;;  %v7202_v0 = vld [vmem:[#allocation15 + $0x180] sm:$0xff]  ;;  %v11822_v60 = vpack.c.bf16 %v7231_v15, %v7227_v63  ;;  %v7252_v63 = vld [vmem:[#allocation15 + $0x310] sm:$0xff] }
0x1761   :  { %v7206_v51 = vld [vmem:[#allocation15 + $0x1a0] sm:$0xff]  ;;  %v11874_v43 = vpack.c.bf16 %v7209_v32, %v7205_v38  ;;  %v7235_v38 = vld [vmem:[#allocation15 + $0x288] sm:$0xff]  ;;  %v7256_v15 = vld [vmem:[#allocation15 + $0x330] sm:$0xff] }
0x1762   :  { %v11812_v48 = vpack.c.bf16 %v7206_v51, %v7202_v0  ;;  %v7239_v32 = vld [vmem:[#allocation15 + $0x2a8] sm:$0xff]  ;;  %v11888_v51 = vpack.c.bf16 %v7232_v24, %v7228_v35 }
0x1763   :  { %11797 = vmatpush1.bf16.msra.mxu0 %v11796_v42  ;;  %11861 = vmatpush1.bf16.msra.mxu1 %v11860_v37  ;;  %v7213_v42 = vld [vmem:[#allocation15 + $0x1d8] sm:$0xff]  ;;  %v11826_v59 = vpack.c.bf16 %v7239_v32, %v7235_v38  ;;  %v7260_v38 = vld [vmem:[#allocation15 + $0x350] sm:$0xff] }
0x1764   :  { %11799 = vmatprep.subr.bf16.mxu0 %v11798_v20  ;;  %11863 = vmatprep.subr.bf16.mxu1 %v11862_v13  ;;  %v7217_v37 = vld [vmem:[#allocation15 + $0x1f8] sm:$0xff]  ;;  %v7210_v20 = vld [vmem:[#allocation15 + $0x1c0] sm:$0xff]  ;;  %v7264_v32 = vld [vmem:[#allocation15 + $0x370] sm:$0xff] }
0x1765   :  { %v7214_v13 = vld [vmem:[#allocation15 + $0x1e0] sm:$0xff]  ;;  %v11878_v17 = vpack.c.bf16 %v7217_v37, %v7213_v42  ;;  %v7243_v42 = vld [vmem:[#allocation15 + $0x2c8] sm:$0xff] }
0x1766   :  { %v11816_v55 = vpack.c.bf16 %v7214_v13, %v7210_v20  ;;  %v7247_v37 = vld [vmem:[#allocation15 + $0x2e8] sm:$0xff]  ;;  %v11892_v13 = vpack.c.bf16 %v7240_v1, %v7236_v9 }
0x1767   :  { %11801 = vmatpush1.bf16.msra.mxu0 %v11800_v45  ;;  %11865 = vmatpush1.bf16.msra.mxu1 %v11864_v33  ;;  %v7221_v45 = vld [vmem:[#allocation15 + $0x218] sm:$0xff]  ;;  %v11830_v58 = vpack.c.bf16 %v7247_v37, %v7243_v42  ;;  %v7268_v42 = vld [vmem:[#allocation15 + $0x390] sm:$0xff] }
0x1768   :  { %11803 = vmatprep.subr.bf16.mxu0 %v11802_v56  ;;  %11867 = vmatprep.subr.bf16.mxu1 %v11866_v25  ;;  %v7225_v33 = vld [vmem:[#allocation15 + $0x238] sm:$0xff]  ;;  %v7218_v56 = vld [vmem:[#allocation15 + $0x200] sm:$0xff]  ;;  %v7272_v37 = vld [vmem:[#allocation15 + $0x3b0] sm:$0xff] }
0x1769   :  { %v7222_v25 = vld [vmem:[#allocation15 + $0x220] sm:$0xff]  ;;  %v11882_v2 = vpack.c.bf16 %v7225_v33, %v7221_v45  ;;  %v7251_v45 = vld [vmem:[#allocation15 + $0x308] sm:$0xff] }
0x176a   :  { %v11820_v41 = vpack.c.bf16 %v7222_v25, %v7218_v56  ;;  %v7255_v33 = vld [vmem:[#allocation15 + $0x328] sm:$0xff]  ;;  %v11896_v25 = vpack.c.bf16 %v7248_v3, %v7244_v62 }
0x176b   :  { %11805 = vmatpush1.bf16.msra.mxu0 %v11804_v22  ;;  %11869 = vmatpush1.bf16.msra.mxu1 %v11868_v44  ;;  %v7229_v22 = vld [vmem:[#allocation15 + $0x258] sm:$0xff]  ;;  %v11834_v50 = vpack.c.bf16 %v7255_v33, %v7251_v45  ;;  %v7276_v45 = vld [vmem:[#allocation15 + $0x3d0] sm:$0xff] }
0x176c   :  { %11807 = vmatprep.subr.bf16.mxu0 %v11806_v16  ;;  %11871 = vmatprep.subr.bf16.mxu1 %v11870_v8  ;;  %v7233_v44 = vld [vmem:[#allocation15 + $0x278] sm:$0xff]  ;;  %v7226_v16 = vld [vmem:[#allocation15 + $0x240] sm:$0xff]  ;;  %v7280_v33 = vld [vmem:[#allocation15 + $0x3f0] sm:$0xff] }
0x176d   :  { %v7230_v8 = vld [vmem:[#allocation15 + $0x260] sm:$0xff]  ;;  %v11886_v47 = vpack.c.bf16 %v7233_v44, %v7229_v22  ;;  %v7259_v22 = vld [vmem:[#allocation15 + $0x348] sm:$0xff] }
0x176e   :  { %v11824_v0 = vpack.c.bf16 %v7230_v8, %v7226_v16  ;;  %v7263_v44 = vld [vmem:[#allocation15 + $0x368] sm:$0xff]  ;;  %v11900_v8 = vpack.c.bf16 %v7256_v15, %v7252_v63  ;;  %v7574_v63 = vld [vmem:[#allocation17 + $0x20] sm:$0xff] }
0x176f   :  { %11809 = vmatpush1.bf16.msra.mxu0 %v11808_v5  ;;  %11873 = vmatpush1.bf16.msra.mxu1 %v11872_v49  ;;  %v7237_v5 = vld [vmem:[#allocation15 + $0x298] sm:$0xff]  ;;  %v11838_v35 = vpack.c.bf16 %v7263_v44, %v7259_v22  ;;  %v7579_v22 = vld [vmem:[#allocation17 + $0x48] sm:$0xff]  ;;  %v7572_v44 = vld [vmem:[#allocation17 + $0x10] sm:$0xff] }
0x1770   :  { %11811 = vmatprep.subr.bf16.mxu0 %v11810_v52  ;;  %11875 = vmatprep.subr.bf16.mxu1 %v11874_v43  ;;  %v7241_v49 = vld [vmem:[#allocation15 + $0x2b8] sm:$0xff]  ;;  %v7234_v52 = vld [vmem:[#allocation15 + $0x280] sm:$0xff] }
0x1771   :  { %v7238_v43 = vld [vmem:[#allocation15 + $0x2a0] sm:$0xff]  ;;  %v11890_v4 = vpack.c.bf16 %v7241_v49, %v7237_v5  ;;  %v7267_v5 = vld [vmem:[#allocation15 + $0x388] sm:$0xff] }
0x1772   :  { %v11828_v20 = vpack.c.bf16 %v7238_v43, %v7234_v52  ;;  %v7271_v49 = vld [vmem:[#allocation15 + $0x3a8] sm:$0xff]  ;;  %v11904_v43 = vpack.c.bf16 %v7264_v32, %v7260_v38 }
0x1773   :  { %11813 = vmatpush1.bf16.msra.mxu0 %v11812_v48  ;;  %11877 = vmatpush1.bf16.msra.mxu1 %v11876_v29  ;;  %v7245_v48 = vld [vmem:[#allocation15 + $0x2d8] sm:$0xff]  ;;  %v11842_v9 = vpack.c.bf16 %v7271_v49, %v7267_v5  ;;  %v7587_v5 = vld [vmem:[#allocation17 + $0x88] sm:$0xff]  ;;  %v7580_v49 = vld [vmem:[#allocation17 + $0x50] sm:$0xff] }
0x1774   :  { %11815 = vmatprep.subr.bf16.mxu0 %v11814_v30  ;;  %11879 = vmatprep.subr.bf16.mxu1 %v11878_v17  ;;  %v7249_v29 = vld [vmem:[#allocation15 + $0x2f8] sm:$0xff]  ;;  %v7242_v30 = vld [vmem:[#allocation15 + $0x2c0] sm:$0xff] }
0x1775   :  { %v7246_v17 = vld [vmem:[#allocation15 + $0x2e0] sm:$0xff]  ;;  %v11894_v27 = vpack.c.bf16 %v7249_v29, %v7245_v48  ;;  %v7275_v48 = vld [vmem:[#allocation15 + $0x3c8] sm:$0xff] }
0x1776   :  { %v11832_v56 = vpack.c.bf16 %v7246_v17, %v7242_v30  ;;  %v7279_v29 = vld [vmem:[#allocation15 + $0x3e8] sm:$0xff]  ;;  %v11908_v17 = vpack.c.bf16 %v7272_v37, %v7268_v42  ;;  %v7588_v37 = vld [vmem:[#allocation17 + $0x90] sm:$0xff] }
0x1777   :  { %11817 = vmatpush1.bf16.msra.mxu0 %v11816_v55  ;;  %11881 = vmatpush1.bf16.msra.mxu1 %v11880_v26  ;;  %v7253_v55 = vld [vmem:[#allocation15 + $0x318] sm:$0xff]  ;;  %v11846_v62 = vpack.c.bf16 %v7279_v29, %v7275_v48  ;;  %v7595_v48 = vld [vmem:[#allocation17 + $0xc8] sm:$0xff] }
0x1778   :  { %11819 = vmatprep.subr.bf16.mxu0 %v11818_v7  ;;  %11883 = vmatprep.subr.bf16.mxu1 %v11882_v2  ;;  %v7257_v26 = vld [vmem:[#allocation15 + $0x338] sm:$0xff]  ;;  %v7250_v7 = vld [vmem:[#allocation15 + $0x300] sm:$0xff]  ;;  %v7599_v29 = vld [vmem:[#allocation17 + $0xe8] sm:$0xff] }
0x1779   :  { %v7254_v2 = vld [vmem:[#allocation15 + $0x320] sm:$0xff]  ;;  %v11898_v61 = vpack.c.bf16 %v7257_v26, %v7253_v55  ;;  %v7571_v55 = vld [vmem:[#allocation17 + $0x8] sm:$0xff] }
0x177a   :  { %v11836_v16 = vpack.c.bf16 %v7254_v2, %v7250_v7  ;;  %v7575_v26 = vld [vmem:[#allocation17 + $0x28] sm:$0xff]  ;;  %v11912_v2 = vpack.c.bf16 %v7280_v33, %v7276_v45 }
0x177b   :  { %11821 = vmatpush1.bf16.msra.mxu0 %v11820_v41  ;;  %11885 = vmatpush1.bf16.msra.mxu1 %v11884_v11  ;;  %v7261_v41 = vld [vmem:[#allocation15 + $0x358] sm:$0xff]  ;;  %v7603_v45 = vld [vmem:[#allocation17 + $0x108] sm:$0xff] }
0x177c   :  { %11823 = vmatprep.subr.bf16.mxu0 %v11822_v60  ;;  %11887 = vmatprep.subr.bf16.mxu1 %v11886_v47  ;;  %v7265_v11 = vld [vmem:[#allocation15 + $0x378] sm:$0xff]  ;;  %v7258_v60 = vld [vmem:[#allocation15 + $0x340] sm:$0xff]  ;;  %v7607_v33 = vld [vmem:[#allocation17 + $0x128] sm:$0xff] }
0x177d   :  { %v7262_v47 = vld [vmem:[#allocation15 + $0x360] sm:$0xff]  ;;  %v11902_v24 = vpack.c.bf16 %v7265_v11, %v7261_v41  ;;  %v7576_v41 = vld [vmem:[#allocation17 + $0x30] sm:$0xff]  ;;  %v7583_v11 = vld [vmem:[#allocation17 + $0x68] sm:$0xff] }
0x177e   :  { %v11840_v52 = vpack.c.bf16 %v7262_v47, %v7258_v60  ;;  %v15463_v47 = vpack.c.bf16 %v7576_v41, %v7572_v44  ;;  %v15465_v38 = vpack.c.bf16 %v7583_v11, %v7579_v22  ;;  %v7611_v22 = vld [vmem:[#allocation17 + $0x148] sm:$0xff]  ;;  %v7613_v41 = vld [vmem:[#allocation17 + $0x158] sm:$0xff] }
0x177f   :  { %11825 = vmatpush1.bf16.msra.mxu0 %v11824_v0  ;;  %11889 = vmatpush1.bf16.msra.mxu1 %v11888_v51  ;;  %v7269_v0 = vld [vmem:[#allocation15 + $0x398] sm:$0xff]  ;;  %v7615_v44 = vld [vmem:[#allocation17 + $0x168] sm:$0xff] }
0x1780   :  { %11827 = vmatprep.subr.bf16.mxu0 %v11826_v59  ;;  %11891 = vmatprep.subr.bf16.mxu1 %v11890_v4  ;;  %v7273_v51 = vld [vmem:[#allocation15 + $0x3b8] sm:$0xff]  ;;  %v7266_v59 = vld [vmem:[#allocation15 + $0x380] sm:$0xff] }
0x1781   :  { %v7270_v4 = vld [vmem:[#allocation15 + $0x3a0] sm:$0xff]  ;;  %v11906_v1 = vpack.c.bf16 %v7273_v51, %v7269_v0  ;;  %v7584_v0 = vld [vmem:[#allocation17 + $0x70] sm:$0xff]  ;;  %v7591_v51 = vld [vmem:[#allocation17 + $0xa8] sm:$0xff] }
0x1782   :  { %v11844_v30 = vpack.c.bf16 %v7270_v4, %v7266_v59  ;;  %v15477_v4 = vpack.c.bf16 %v7584_v0, %v7580_v49  ;;  %v7617_v11 = vld [vmem:[#allocation17 + $0x178] sm:$0xff]  ;;  %v7612_v49 = vld [vmem:[#allocation17 + $0x150] sm:$0xff]  ;;  %v7619_v0 = vld [vmem:[#allocation17 + $0x188] sm:$0xff] }
0x1783   :  { %11829 = vmatpush1.bf16.msra.mxu0 %v11828_v20  ;;  %11893 = vmatpush1.bf16.msra.mxu1 %v11892_v13  ;;  %v7277_v20 = vld [vmem:[#allocation15 + $0x3d8] sm:$0xff] }
0x1784   :  { %11831 = vmatprep.subr.bf16.mxu0 %v11830_v58  ;;  %11895 = vmatprep.subr.bf16.mxu1 %v11894_v27  ;;  %v7281_v13 = vld [vmem:[#allocation15 + $0x3f8] sm:$0xff]  ;;  %v7274_v58 = vld [vmem:[#allocation15 + $0x3c0] sm:$0xff] }
0x1785   :  { %v7278_v27 = vld [vmem:[#allocation15 + $0x3e0] sm:$0xff]  ;;  %v11910_v3 = vpack.c.bf16 %v7281_v13, %v7277_v20  ;;  %v7597_v20 = vld [vmem:[#allocation17 + $0xd8] sm:$0xff] }
0x1786   :  { %v11848_v7 = vpack.c.bf16 %v7278_v27, %v7274_v58  ;;  %v7601_v13 = vld [vmem:[#allocation17 + $0xf8] sm:$0xff]  ;;  %v7594_v58 = vld [vmem:[#allocation17 + $0xc0] sm:$0xff] }
0x1787   :  { %11833 = vmatpush1.bf16.msra.mxu0 %v11832_v56  ;;  %11897 = vmatpush1.bf16.msra.mxu1 %v11896_v25  ;;  %v7573_v56 = vld [vmem:[#allocation17 + $0x18] sm:$0xff]  ;;  %v7598_v27 = vld [vmem:[#allocation17 + $0xe0] sm:$0xff] }
0x1788   :  { %11835 = vmatprep.subr.bf16.mxu0 %v11834_v50  ;;  %11899 = vmatprep.subr.bf16.mxu1 %v11898_v61  ;;  %v7577_v25 = vld [vmem:[#allocation17 + $0x38] sm:$0xff]  ;;  %v15455_v50 = vpack.c.bf16 %v7575_v26, %v7571_v55  ;;  %v7570_v61 = vld [vmem:[#allocation17] sm:$0xff] }
0x1789   :  { %v15457_v15 = vpack.c.bf16 %v7577_v25, %v7573_v56  ;;  %v15460_v60 = vpack.c.bf16 %v7574_v63, %v7570_v61  ;;  %v7605_v55 = vld [vmem:[#allocation17 + $0x118] sm:$0xff]  ;;  %v15507_v56 = vpack.c.bf16 %v7598_v27, %v7594_v58  ;;  %v7604_v63 = vld [vmem:[#allocation17 + $0x110] sm:$0xff]  ;;  %v7627_v58 = vld [vmem:[#allocation17 + $0x1c8] sm:$0xff] }
0x178a   :  { %v7609_v26 = vld [vmem:[#allocation17 + $0x138] sm:$0xff]  ;;  %v16223_v27 = vld [vmem:[#allocation26_spill] sm:$0xff] }
0x178b   :  { %11837 = vmatpush1.bf16.msra.mxu0 %v11836_v16  ;;  %11901 = vmatpush1.bf16.msra.mxu1 %v11900_v8  ;;  %v7581_v16 = vld [vmem:[#allocation17 + $0x58] sm:$0xff]  ;;  %v15515_v61 = vpack.c.bf16 %v7609_v26, %v7605_v55 }
0x178c   :  { %11839 = vmatprep.subr.bf16.mxu0 %v11838_v35  ;;  %11903 = vmatprep.subr.bf16.mxu1 %v11902_v24  ;;  %v7585_v8 = vld [vmem:[#allocation17 + $0x78] sm:$0xff]  ;;  %v7578_v35 = vld [vmem:[#allocation17 + $0x40] sm:$0xff] }
0x178d   :  { %v7582_v24 = vld [vmem:[#allocation17 + $0x60] sm:$0xff]  ;;  %v15467_v32 = vpack.c.bf16 %v7585_v8, %v7581_v16 }
0x178e   :  { %v15475_v59 = vpack.c.bf16 %v7582_v24, %v7578_v35  ;;  %v7610_v35 = vld [vmem:[#allocation17 + $0x140] sm:$0xff] }
0x178f   :  { %11841 = vmatpush1.bf16.msra.mxu0 %v11840_v52  ;;  %11905 = vmatpush1.bf16.msra.mxu1 %v11904_v43  ;;  %v7589_v52 = vld [vmem:[#allocation17 + $0x98] sm:$0xff]  ;;  %v7614_v24 = vld [vmem:[#allocation17 + $0x160] sm:$0xff] }
0x1790   :  { %11843 = vmatprep.subr.bf16.mxu0 %v11842_v9  ;;  %11907 = vmatprep.subr.bf16.mxu1 %v11906_v1  ;;  %v7593_v43 = vld [vmem:[#allocation17 + $0xb8] sm:$0xff]  ;;  %v7586_v9 = vld [vmem:[#allocation17 + $0x80] sm:$0xff] }
0x1791   :  { %v7590_v1 = vld [vmem:[#allocation17 + $0xa0] sm:$0xff]  ;;  %v15483_v42 = vpack.c.bf16 %v7593_v43, %v7589_v52  ;;  %v7621_v52 = vld [vmem:[#allocation17 + $0x198] sm:$0xff] }
0x1792   :  { %v7625_v43 = vld [vmem:[#allocation17 + $0x1b8] sm:$0xff] }
0x1793   :  { %11845 = vmatpush1.bf16.msra.mxu0 %v11844_v30  ;;  %11909 = vmatpush1.bf16.msra.mxu1 %v11908_v17  ;;  %v15491_v30 = vpack.c.bf16 %v7590_v1, %v7586_v9  ;;  %v16222_v9 = vld [vmem:[#allocation31_spill] sm:$0xff]  ;;  %v15539_v1 = vpack.c.bf16 %v7614_v24, %v7610_v35 }
0x1794   :  { %11847 = vmatprep.subr.bf16.mxu0 %v11846_v62  ;;  %11911 = vmatprep.subr.bf16.mxu1 %v11910_v3  ;;  %v15499_v62 = vpack.c.bf16 %v7601_v13, %v7597_v20  ;;  %v7596_v3 = vld [vmem:[#allocation17 + $0xd0] sm:$0xff] }
0x1795   :  { %v7620_v20 = vld [vmem:[#allocation17 + $0x190] sm:$0xff] }
0x1796   :  { %v7624_v13 = vld [vmem:[#allocation17 + $0x1b0] sm:$0xff] }
0x1797   :  { %11849 = vmatpush1.bf16.msra.mxu0 %v11848_v7  ;;  %11913 = vmatpush1.bf16.msra.mxu1 %v11912_v2  ;;  %v7602_v7 = vld [vmem:[#allocation17 + $0x100] sm:$0xff]  ;;  %v15557_v26 = vpack.c.bf16 %v7624_v13, %v7620_v20 }
0x1798   :  { %11915 = vmatprep.subr.bf16.mxu0 %v15455_v50  ;;  %11947 = vmatprep.subr.bf16.mxu1 %v15457_v15  ;;  %v7606_v2 = vld [vmem:[#allocation17 + $0x120] sm:$0xff] }
0x1799   :  { %v15523_v16 = vpack.c.bf16 %v7606_v2, %v7602_v7  ;;  %v7626_v7 = vld [vmem:[#allocation17 + $0x1c0] sm:$0xff] }
0x179a   :  { %7369 = vmatmul.mubr.f32.vlgmr.msra.gmra.mrb[48].mxu0 %v14050_v39  ;;  %7482 = vmatmul.mubr.f32.vlgmr.msra.gmra.mrb[48].mxu1 %v14050_v39  ;;  %v15481_v39 = vpack.c.bf16 %v7591_v51, %v7587_v5  ;;  %v15531_v5 = vpack.c.bf16 %v7617_v11, %v7613_v41  ;;  %v7623_v51 = vld [vmem:[#allocation17 + $0x1a8] sm:$0xff]  ;;  %v16226_v11 = vld [vmem:[#allocation29_spill] sm:$0xff] }
0x179b   :  { %7374 = vmatprep.mubr.f32.mxu0 %v14910_v54  ;;  %7487 = vmatprep.mubr.f32.mxu1 %v14910_v54  ;;  %v7592_v54 = vld [vmem:[#allocation17 + $0xb0] sm:$0xff]  ;;  %v16225_v41 = vld [vmem:[#allocation27_spill] sm:$0xff] }
0x179c   :  { %11917 = vmatpush1.bf16.msra.mxu0 %v15460_v60  ;;  %11949 = vmatpush1.bf16.msra.mxu1 %v15463_v47  ;;  %v15493_v17 = vpack.c.bf16 %v7592_v54, %v7588_v37  ;;  %v7618_v54 = vld [vmem:[#allocation17 + $0x180] sm:$0xff] }
0x179d   :  { %11919 = vmatprep.subr.bf16.mxu0 %v15465_v38  ;;  %11951 = vmatprep.subr.bf16.mxu1 %v15467_v32 }
0x179e   :  { %7375 = vmatmul.mubr.f32.gmra.mrb[50].mxu0 %v14094_v21  ;;  %7488 = vmatmul.mubr.f32.gmra.mrb[50].mxu1 %v14094_v21  ;;  %v15497_v21 = vpack.c.bf16 %v7599_v29, %v7595_v48  ;;  %v7622_v48 = vld [vmem:[#allocation17 + $0x1a0] sm:$0xff]  ;;  %v15547_v29 = vpack.c.bf16 %v7625_v43, %v7621_v52 }
0x179f   :  { %7380 = vmatprep.mubr.f32.mxu0 %v14882_v19  ;;  %7493 = vmatprep.mubr.f32.mxu1 %v14882_v19  ;;  %v7600_v19 = vld [vmem:[#allocation17 + $0xf0] sm:$0xff]  ;;  %v15555_v55 = vpack.c.bf16 %v7622_v48, %v7618_v54 }
0x17a0   :  { %11921 = vmatpush1.bf16.msra.mxu0 %v15475_v59  ;;  %11953 = vmatpush1.bf16.msra.mxu1 %v15477_v4  ;;  %v15509_v25 = vpack.c.bf16 %v7600_v19, %v7596_v3  ;;  %v7631_v3 = vld [vmem:[#allocation17 + $0x1e8] sm:$0xff]  ;;  %v7629_v19 = vld [vmem:[#allocation17 + $0x1d8] sm:$0xff] }
0x17a1   :  { %11923 = vmatprep.subr.bf16.mxu0 %v15481_v39  ;;  %11955 = vmatprep.subr.bf16.mxu1 %v15483_v42  ;;  %v15561_v2 = vpack.c.bf16 %v7631_v3, %v7627_v58 }
0x17a2   :  { %7381 = vmatmul.mubr.f32.gmra.mrb[52].mxu0 %v14158_v12  ;;  %7494 = vmatmul.mubr.f32.gmra.mrb[52].mxu1 %v14158_v12  ;;  %v15513_v12 = vpack.c.bf16 %v7607_v33, %v7603_v45  ;;  %v7633_v45 = vld [vmem:[#allocation17 + $0x1f8] sm:$0xff]  ;;  %v16224_v33 = vld [vmem:[#allocation30_spill] sm:$0xff] }
0x17a3   :  { %7386 = vmatprep.mubr.f32.mxu0 %v14837_v10  ;;  %7499 = vmatprep.mubr.f32.mxu1 %v14837_v10  ;;  %v7608_v10 = vld [vmem:[#allocation17 + $0x130] sm:$0xff] }
0x17a4   :  { %11925 = vmatpush1.bf16.msra.mxu0 %v15491_v30  ;;  %11957 = vmatpush1.bf16.msra.mxu1 %v15493_v17  ;;  %v15525_v8 = vpack.c.bf16 %v7608_v10, %v7604_v63  ;;  %v15563_v63 = vpack.c.bf16 %v7633_v45, %v7629_v19  ;;  %v7630_v10 = vld [vmem:[#allocation17 + $0x1e0] sm:$0xff] }
0x17a5   :  { %11927 = vmatprep.subr.bf16.mxu0 %v15497_v21  ;;  %11959 = vmatprep.subr.bf16.mxu1 %v15499_v62  ;;  %v15571_v35 = vpack.c.bf16 %v7630_v10, %v7626_v7 }
0x17a6   :  { %7387 = vmatmul.mubr.f32.gmra.mrb[54].mxu0 %v14252_v46  ;;  %7500 = vmatmul.mubr.f32.gmra.mrb[54].mxu1 %v14252_v46  ;;  %v15529_v46 = vpack.c.bf16 %v7615_v44, %v7611_v22  ;;  %v7628_v22 = vld [vmem:[#allocation17 + $0x1d0] sm:$0xff] }
0x17a7   :  { %7392 = vmatprep.mubr.f32.mxu0 %v14791_v6  ;;  %7505 = vmatprep.mubr.f32.mxu1 %v14791_v6  ;;  %v7616_v6 = vld [vmem:[#allocation17 + $0x170] sm:$0xff] }
0x17a8   :  { %11929 = vmatpush1.bf16.msra.mxu0 %v15507_v56  ;;  %11961 = vmatpush1.bf16.msra.mxu1 %v15509_v25  ;;  %v15541_v37 = vpack.c.bf16 %v7616_v6, %v7612_v49  ;;  %v7632_v44 = vld [vmem:[#allocation17 + $0x1f0] sm:$0xff] }
0x17a9   :  { %11931 = vmatprep.subr.bf16.mxu0 %v15513_v12  ;;  %11963 = vmatprep.subr.bf16.mxu1 %v15515_v61  ;;  %v15573_v24 = vpack.c.bf16 %v7632_v44, %v7628_v22  ;;  %v16227_v49 = vld [vmem:[#allocation28_spill] sm:$0xff] }
0x17aa   :  { %7393 = vmatmul.mubr.f32.gmra.mrb[56].mxu0 %v14298_v23  ;;  %7506 = vmatmul.mubr.f32.gmra.mrb[56].mxu1 %v14298_v23  ;;  %v15545_v23 = vpack.c.bf16 %v7623_v51, %v7619_v0 }
0x17ab   :  { %7398 = vmatprep.mubr.f32.mxu0 %v16222_v9  ;;  %7511 = vmatprep.mubr.f32.mxu1 %v16222_v9 }
0x17ac   :  { %11933 = vmatpush1.bf16.msra.mxu0 %v15523_v16  ;;  %11965 = vmatpush1.bf16.msra.mxu1 %v15525_v8 }
0x17ad   :  { %11935 = vmatprep.subr.bf16.mxu0 %v15529_v46  ;;  %11967 = vmatprep.subr.bf16.mxu1 %v15531_v5 }
0x17ae   :  { %7399 = vmatmul.mubr.f32.gmra.mrb[58].mxu0 %v16223_v27  ;;  %7512 = vmatmul.mubr.f32.gmra.mrb[58].mxu1 %v16223_v27 }
0x17af   :  { %7404 = vmatprep.mubr.f32.mxu0 %v16224_v33  ;;  %7517 = vmatprep.mubr.f32.mxu1 %v16224_v33 }
0x17b0   :  { %11937 = vmatpush1.bf16.msra.mxu0 %v15539_v1  ;;  %11969 = vmatpush1.bf16.msra.mxu1 %v15541_v37 }
0x17b1   :  { %11939 = vmatprep.subr.bf16.mxu0 %v15545_v23  ;;  %11971 = vmatprep.subr.bf16.mxu1 %v15547_v29 }
0x17b2   :  { %7405 = vmatmul.mubr.f32.gmra.mrb[60].mxu0 %v16225_v41  ;;  %7518 = vmatmul.mubr.f32.gmra.mrb[60].mxu1 %v16225_v41  ;;  %v7282_v41 = vld [vmem:[%s16164_s12] sm:$0xf] }
0x17b3   :  { %7410 = vmatprep.mubr.f32.mxu0 %v16226_v11  ;;  %7523 = vmatprep.mubr.f32.mxu1 %v16226_v11  ;;  %v16228_v11 = vld [vmem:[#allocation22_spill] sm:$0xff] }
0x17b4   :  { %11941 = vmatpush1.bf16.msra.mxu0 %v15555_v55  ;;  %11973 = vmatpush1.bf16.msra.mxu1 %v15557_v26 }
0x17b5   :  { %11943 = vmatprep.subr.bf16.mxu0 %v15561_v2  ;;  %11975 = vmatprep.subr.bf16.mxu1 %v15563_v63 }
0x17b6   :  { %7411 = vmatmul.mubr.f32.gmra.mrb[62].mxu0 %v16227_v49  ;;  %7524 = vmatmul.mubr.f32.gmra.mrb[62].mxu1 %v16227_v49  ;;  %v15632_v49 = vrot.slane %v7282_v41, %v16228_v11 }
0x17b7   :  { %7698 = vmatprep.mubr.f32.mxu0 %v16212_v31  ;;  %7769 = vmatprep.mubr.f32.mxu1 %v16212_v31 }
0x17b8   :  { %11945 = vmatpush1.bf16.msra.mxu0 %v15571_v35  ;;  %11977 = vmatpush1.bf16.msra.mxu1 %v15573_v24 }
0x17b9   :  { %11979 = vmatprep.subr.bf16.mxu0 %v15455_v50  ;;  %12011 = vmatprep.subr.bf16.mxu1 %v15457_v15 }
0x17be   :  { %7699 = vmatmul.mubr.f32.vlgmr.msra.gmra.mrb[62].mxu0 %v16212_v31  ;;  %7770 = vmatmul.mubr.f32.vlgmr.msra.gmra.mrb[62].mxu1 %v16212_v31 }
0x17bf   :  { %11981 = vmatpush1.bf16.msra.mxu0 %v15460_v60  ;;  %12013 = vmatpush1.bf16.msra.mxu1 %v15463_v47 }
0x17c0   :  { %11983 = vmatprep.subr.bf16.mxu0 %v15465_v38  ;;  %12015 = vmatprep.subr.bf16.mxu1 %v15467_v32 }
0x17c1   :  { %7941 = vmatprep.mubr.f32.mxu0 %v16212_v31  ;;  %8012 = vmatprep.mubr.f32.mxu1 %v16212_v31 }
0x17c3   :  { %11985 = vmatpush1.bf16.msra.mxu0 %v15475_v59  ;;  %12017 = vmatpush1.bf16.msra.mxu1 %v15477_v4 }
0x17c4   :  { %11987 = vmatprep.subr.bf16.mxu0 %v15481_v39  ;;  %12019 = vmatprep.subr.bf16.mxu1 %v15483_v42 }
0x17c7   :  { %11989 = vmatpush1.bf16.msra.mxu0 %v15491_v30  ;;  %12021 = vmatpush1.bf16.msra.mxu1 %v15493_v17 }
0x17c8   :  { %11991 = vmatprep.subr.bf16.mxu0 %v15497_v21  ;;  %12023 = vmatprep.subr.bf16.mxu1 %v15499_v62 }
0x17cb   :  { %11993 = vmatpush1.bf16.msra.mxu0 %v15507_v56  ;;  %12025 = vmatpush1.bf16.msra.mxu1 %v15509_v25 }
0x17cc   :  { %11995 = vmatprep.subr.bf16.mxu0 %v15513_v12  ;;  %12027 = vmatprep.subr.bf16.mxu1 %v15515_v61 }
0x17cf   :  { %11997 = vmatpush1.bf16.msra.mxu0 %v15523_v16  ;;  %12029 = vmatpush1.bf16.msra.mxu1 %v15525_v8 }
0x17d0   :  { %11999 = vmatprep.subr.bf16.mxu0 %v15529_v46  ;;  %12031 = vmatprep.subr.bf16.mxu1 %v15531_v5 }
0x17d3   :  { %12001 = vmatpush1.bf16.msra.mxu0 %v15539_v1  ;;  %12033 = vmatpush1.bf16.msra.mxu1 %v15541_v37 }
0x17d4   :  { %12003 = vmatprep.subr.bf16.mxu0 %v15545_v23  ;;  %12035 = vmatprep.subr.bf16.mxu1 %v15547_v29 }
0x17d7   :  { %12005 = vmatpush1.bf16.msra.mxu0 %v15555_v55  ;;  %12037 = vmatpush1.bf16.msra.mxu1 %v15557_v26 }
0x17d8   :  { %12007 = vmatprep.subr.bf16.mxu0 %v15561_v2  ;;  %12039 = vmatprep.subr.bf16.mxu1 %v15563_v63 }
0x17db   :  { %12009 = vmatpush1.bf16.msra.mxu0 %v15571_v35  ;;  %12041 = vmatpush1.bf16.msra.mxu1 %v15573_v24 }
0x17dc   :  { %12043 = vmatprep.subr.bf16.mxu0 %v15455_v50  ;;  %12075 = vmatprep.subr.bf16.mxu1 %v15457_v15 }
0x182d   :  { %v7030_v6 = vpop.f32.mrb[46].mxu0  ;;  %v7101_v0 = vpop.f32.mrb[46].mxu1 }
0x182e   :  { %v12560_v51 = vadd.f32 %v7030_v6, %v15093_v36  ;;  %v7032_v52 = vpop.f32.mrb[47].mxu0  ;;  %v7103_v43 = vpop.f32.mrb[47].mxu1  ;;  %v12576_v58 = vadd.f32 %v7101_v0, %v15105_v53  ;;  %v16229_v6 = vld [vmem:[#allocation23_spill] sm:$0xff] }
0x182f   :  { %v12561_v9 = vadd.f32 %v7032_v52, %v15096_v28  ;;  %v12577_v20 = vadd.f32 %v7103_v43, %v15101_v18  ;;  %v15635_v0 = vrot.slane %v7282_v41, %v16229_v6 }
0x1830   :  { %v9857_v54 = vmul.f32 -1.442695, %v12560_v51 }
0x1831   :  { %v9858_v48 = vmul.f32 -1.442695, %v12561_v9  ;;  %v9859_v13 = vmul.f32 -1.442695, %v12577_v20 }
0x1832   :  { %13118 = vpow2.f32 %v9857_v54 }
0x1833   :  { %13120 = vpow2.f32 %v9858_v48 }
0x1834   :  { %13122 = vpow2.f32 %v9859_v13  ;;  %v16230_v13 = vld [vmem:[#allocation24_spill] sm:$0xff] }
0x1835   :  { %13124 = vtanh.f32 %v12576_v58  ;;  %v15640_v58 = vrot.slane %v7282_v41, %v16230_v13 }
0x183c   :  { %v13119_v50 = vpop.eup %13118 }
0x183d   :  { %v13121_v27 = vpop.eup %13120  ;;  %v7113_v15 = vadd.f32 1.0, %v13119_v50 }
0x183e   :  { %v7119_v3 = vadd.f32 1.0, %v13121_v27  ;;  %v13123_v36 = vpop.eup %13122  ;;  %v16231_v27 = vld [vmem:[#allocation25_spill] sm:$0xff] }
0x183f   :  { %13126 = vrcp.f32 %v7113_v15  ;;  %v13125_v19 = vpop.eup %13124  ;;  %v7126_v7 = vadd.f32 1.0, %v13123_v36  ;;  %v15644_v15 = vrot.slane %v7282_v41, %v16231_v27 }
0x1840   :  { %13128 = vrcp.f32 %v7119_v3 }
0x1841   :  { %13130 = vrcp.f32 %v7126_v7 }
0x1849   :  { %v13127_v28 = vpop.eup %13126 }
0x184a   :  { %v13129_v45 = vpop.eup %13128  ;;  %v7130_v33 = vmul.f32 %v13127_v28, %v13125_v19 }
0x184b   :  { %v7129_v10 = vmul.f32 %v13129_v45, %v15446_v34  ;;  %v13131_v53 = vpop.eup %13130 }
0x184d   :  { %v7131_v18 = vadd.f32 %v7130_v33, %v7129_v10 }
0x184f   :  { %13132 = vtanh.f32 %v7131_v18 }
0x1859   :  { %v13133_v22 = vpop.eup %13132 }
0x185a   :  { %v15626_v44 = vmul.f32 %v13133_v22, %v13131_v53 }
0x1891   :  { %v7700_v51 = vpop.f32.mrb[62].mxu0  ;;  %v7771_v52 = vpop.f32.mrb[62].mxu1 }
0x1892   :  { %v12592_v34 = vadd.f32 %v7700_v51, %v15632_v49  ;;  %v7702_v43 = vpop.f32.mrb[63].mxu0  ;;  %v7773_v9 = vpop.f32.mrb[63].mxu1  ;;  %v12608_v36 = vadd.f32 %v7771_v52, %v15644_v15 }
0x1893   :  { %v12593_v54 = vadd.f32 %v7702_v43, %v15635_v0  ;;  %v12609_v50 = vadd.f32 %v7773_v9, %v15640_v58 }
0x1894   :  { %v9860_v48 = vmul.f32 -1.442695, %v12592_v34 }
0x1895   :  { %v9861_v20 = vmul.f32 -1.442695, %v12593_v54  ;;  %v9862_v3 = vmul.f32 -1.442695, %v12609_v50 }
0x1896   :  { %13134 = vpow2.f32 %v9860_v48 }
0x1897   :  { %13136 = vpow2.f32 %v9861_v20 }
0x1898   :  { %13138 = vpow2.f32 %v9862_v3 }
0x1899   :  { %13140 = vtanh.f32 %v12608_v36 }
0x18a0   :  { %v13135_v19 = vpop.eup %13134 }
0x18a1   :  { %v13137_v28 = vpop.eup %13136  ;;  %v7783_v45 = vadd.f32 1.0, %v13135_v19 }
0x18a2   :  { %v7789_v33 = vadd.f32 1.0, %v13137_v28  ;;  %v13139_v7 = vpop.eup %13138 }
0x18a3   :  { %13142 = vrcp.f32 %v7783_v45  ;;  %v13141_v10 = vpop.eup %13140  ;;  %v7796_v11 = vadd.f32 1.0, %v13139_v7  ;;  %v8300_v7 = vld [vmem:[#allocation17 + $0x8] sm:$0xff] }
0x18a4   :  { %13144 = vrcp.f32 %v7789_v33 }
0x18a5   :  { %13146 = vrcp.f32 %v7796_v11  ;;  %v8299_v11 = vld [vmem:[#allocation17] sm:$0xff] }
0x18ad   :  { %v13143_v18 = vpop.eup %13142 }
0x18ae   :  { %v13145_v53 = vpop.eup %13144  ;;  %v7800_v22 = vmul.f32 %v13143_v18, %v13141_v10  ;;  %v8304_v10 = vld [vmem:[#allocation17 + $0x28] sm:$0xff]  ;;  %v8302_v18 = vld [vmem:[#allocation17 + $0x18] sm:$0xff] }
0x18af   :  { %v7799_v6 = vmul.f32 0.0, %v13145_v53  ;;  %v13147_v51 = vpop.eup %13146  ;;  %v15700_v53 = vpack.c.bf16 %v8304_v10, %v8300_v7  ;;  %v8328_v7 = vld [vmem:[#allocation17 + $0xe8] sm:$0xff] }
0x18b1   :  { %v15647_v41 = vadd.f32 %v7800_v22, %v7799_v6  ;;  %v8306_v22 = vld [vmem:[#allocation17 + $0x38] sm:$0xff]  ;;  %v8303_v6 = vld [vmem:[#allocation17 + $0x20] sm:$0xff] }
0x18b3   :  { %13148 = vtanh.f32 %v15647_v41 }
0x18bd   :  { %v13149_v52 = vpop.eup %13148 }
0x18be   :  { %v15650_v34 = vmul.f32 %v13149_v52, %v13147_v51  ;;  %v15704_v51 = vpack.c.bf16 %v8303_v6, %v8299_v11  ;;  %v8301_v52 = vld [vmem:[#allocation17 + $0x10] sm:$0xff]  ;;  %v8331_v11 = vld [vmem:[#allocation17 + $0x100] sm:$0xff] }
0x18bf   :  { %v8335_v6 = vld [vmem:[#allocation17 + $0x120] sm:$0xff] }
0x18c0   :  { %7942 = vmatmul.mubr.f32.vlgmr.msra.gmra.mrb[60].mxu0 %v15650_v34  ;;  %8013 = vmatmul.mubr.f32.vlgmr.msra.gmra.mrb[60].mxu1 %v15650_v34 }
0x18c1   :  { %12045 = vmatpush1.bf16.msra.mxu0 %v15460_v60  ;;  %12077 = vmatpush1.bf16.msra.mxu1 %v15463_v47 }
0x18c2   :  { %12047 = vmatprep.subr.bf16.mxu0 %v15465_v38  ;;  %12079 = vmatprep.subr.bf16.mxu1 %v15467_v32 }
0x18c3   :  { %8184 = vmatprep.mubr.f32.mxu0 %v16212_v31  ;;  %8255 = vmatprep.mubr.f32.mxu1 %v16212_v31 }
0x18c5   :  { %12049 = vmatpush1.bf16.msra.mxu0 %v15475_v59  ;;  %12081 = vmatpush1.bf16.msra.mxu1 %v15477_v4 }
0x18c6   :  { %12051 = vmatprep.subr.bf16.mxu0 %v15481_v39  ;;  %12083 = vmatprep.subr.bf16.mxu1 %v15483_v42 }
0x18c9   :  { %12053 = vmatpush1.bf16.msra.mxu0 %v15491_v30  ;;  %12085 = vmatpush1.bf16.msra.mxu1 %v15493_v17 }
0x18ca   :  { %12055 = vmatprep.subr.bf16.mxu0 %v15497_v21  ;;  %12087 = vmatprep.subr.bf16.mxu1 %v15499_v62 }
0x18cd   :  { %12057 = vmatpush1.bf16.msra.mxu0 %v15507_v56  ;;  %12089 = vmatpush1.bf16.msra.mxu1 %v15509_v25 }
0x18ce   :  { %12059 = vmatprep.subr.bf16.mxu0 %v15513_v12  ;;  %12091 = vmatprep.subr.bf16.mxu1 %v15515_v61 }
0x18d1   :  { %12061 = vmatpush1.bf16.msra.mxu0 %v15523_v16  ;;  %12093 = vmatpush1.bf16.msra.mxu1 %v15525_v8 }
0x18d2   :  { %12063 = vmatprep.subr.bf16.mxu0 %v15529_v46  ;;  %12095 = vmatprep.subr.bf16.mxu1 %v15531_v5 }
0x18d5   :  { %12065 = vmatpush1.bf16.msra.mxu0 %v15539_v1  ;;  %12097 = vmatpush1.bf16.msra.mxu1 %v15541_v37 }
0x18d6   :  { %12067 = vmatprep.subr.bf16.mxu0 %v15545_v23  ;;  %12099 = vmatprep.subr.bf16.mxu1 %v15547_v29 }
0x18d9   :  { %12069 = vmatpush1.bf16.msra.mxu0 %v15555_v55  ;;  %12101 = vmatpush1.bf16.msra.mxu1 %v15557_v26 }
0x18da   :  { %12071 = vmatprep.subr.bf16.mxu0 %v15561_v2  ;;  %12103 = vmatprep.subr.bf16.mxu1 %v15563_v63 }
0x18dd   :  { %12073 = vmatpush1.bf16.msra.mxu0 %v15571_v35  ;;  %12105 = vmatpush1.bf16.msra.mxu1 %v15573_v24 }
0x18de   :  { %12107 = vmatprep.subr.bf16.mxu0 %v15700_v53 }
0x1993   :  { %v7943_v60 = vpop.f32.mrb[60].mxu0  ;;  %v8014_v47 = vpop.f32.mrb[60].mxu1 }
0x1994   :  { %v12590_v38 = vadd.f32 %v7943_v60, %v15632_v49  ;;  %v7945_v32 = vpop.f32.mrb[61].mxu0  ;;  %v8016_v59 = vpop.f32.mrb[61].mxu1  ;;  %v12606_v56 = vadd.f32 %v8014_v47, %v15644_v15  ;;  %v8305_v60 = vld [vmem:[#allocation17 + $0x30] sm:$0xff] }
0x1995   :  { %v12591_v4 = vadd.f32 %v7945_v32, %v15635_v0  ;;  %v12607_v17 = vadd.f32 %v8016_v59, %v15640_v58  ;;  %v15707_v47 = vpack.c.bf16 %v8305_v60, %v8301_v52  ;;  %v8312_v32 = vld [vmem:[#allocation17 + $0x68] sm:$0xff]  ;;  %v8310_v59 = vld [vmem:[#allocation17 + $0x58] sm:$0xff]  ;;  %v15744_v52 = vpack.c.bf16 %v8335_v6, %v8331_v11 }
0x1996   :  { %v9863_v39 = vmul.f32 -1.442695, %v12590_v38  ;;  %v8308_v38 = vld [vmem:[#allocation17 + $0x48] sm:$0xff]  ;;  %v8577_v11 = vld [vmem:[#allocation17 + $0x118] sm:$0xff] }
0x1997   :  { %v9864_v30 = vmul.f32 -1.442695, %v12591_v4  ;;  %v9865_v21 = vmul.f32 -1.442695, %v12607_v17  ;;  %v15712_v4 = vpack.c.bf16 %v8312_v32, %v8308_v38  ;;  %v8311_v17 = vld [vmem:[#allocation17 + $0x60] sm:$0xff] }
0x1998   :  { %13150 = vpow2.f32 %v9863_v39  ;;  %v8314_v39 = vld [vmem:[#allocation17 + $0x78] sm:$0xff] }
0x1999   :  { %13152 = vpow2.f32 %v9864_v30  ;;  %v8307_v30 = vld [vmem:[#allocation17 + $0x40] sm:$0xff] }
0x199a   :  { %13154 = vpow2.f32 %v9865_v21  ;;  %v15714_v21 = vpack.c.bf16 %v8314_v39, %v8310_v59 }
0x199b   :  { %13156 = vtanh.f32 %v12606_v56  ;;  %v15716_v56 = vpack.c.bf16 %v8311_v17, %v8307_v30 }
0x19a2   :  { %v13151_v16 = vpop.eup %13150 }
0x19a3   :  { %v13153_v43 = vpop.eup %13152  ;;  %v8026_v9 = vadd.f32 1.0, %v13151_v16  ;;  %v8309_v16 = vld [vmem:[#allocation17 + $0x50] sm:$0xff] }
0x19a4   :  { %v8032_v54 = vadd.f32 1.0, %v13153_v43  ;;  %v13155_v48 = vpop.eup %13154  ;;  %v8313_v43 = vld [vmem:[#allocation17 + $0x70] sm:$0xff] }
0x19a5   :  { %13158 = vrcp.f32 %v8026_v9  ;;  %v13157_v20 = vpop.eup %13156  ;;  %v8039_v3 = vadd.f32 1.0, %v13155_v48  ;;  %v15719_v9 = vpack.c.bf16 %v8313_v43, %v8309_v16  ;;  %v8320_v48 = vld [vmem:[#allocation17 + $0xa8] sm:$0xff] }
0x19a6   :  { %13160 = vrcp.f32 %v8032_v54  ;;  %v8316_v54 = vld [vmem:[#allocation17 + $0x88] sm:$0xff] }
0x19a7   :  { %13162 = vrcp.f32 %v8039_v3 }
0x19af   :  { %v13159_v13 = vpop.eup %13158 }
0x19b0   :  { %v13161_v50 = vpop.eup %13160  ;;  %v8043_v27 = vmul.f32 %v13159_v13, %v13157_v20  ;;  %v15724_v20 = vpack.c.bf16 %v8320_v48, %v8316_v54  ;;  %v8315_v13 = vld [vmem:[#allocation17 + $0x80] sm:$0xff]  ;;  %v8565_v54 = vld [vmem:[#allocation17 + $0xb8] sm:$0xff] }
0x19b1   :  { %v8042_v36 = vmul.f32 %v13161_v50, %v15647_v41  ;;  %v13163_v28 = vpop.eup %13162  ;;  %v15702_v41 = vpack.c.bf16 %v8306_v22, %v8302_v18  ;;  %v8319_v50 = vld [vmem:[#allocation17 + $0xa0] sm:$0xff] }
0x19b2   :  { %v15727_v3 = vpack.c.bf16 %v8319_v50, %v8315_v13  ;;  %v8323_v18 = vld [vmem:[#allocation17 + $0xc0] sm:$0xff]  ;;  %v8569_v13 = vld [vmem:[#allocation17 + $0xd8] sm:$0xff] }
0x19b3   :  { %v15691_v19 = vadd.f32 %v8043_v27, %v8042_v36  ;;  %12139 = vmatprep.subr.bf16.mxu1 %v15702_v41  ;;  %v8317_v27 = vld [vmem:[#allocation17 + $0x90] sm:$0xff]  ;;  %v8327_v22 = vld [vmem:[#allocation17 + $0xe0] sm:$0xff]  ;;  %v8573_v50 = vld [vmem:[#allocation17 + $0xf8] sm:$0xff] }
0x19b4   :  { %v8321_v36 = vld [vmem:[#allocation17 + $0xb0] sm:$0xff] }
0x19b5   :  { %13164 = vtanh.f32 %v15691_v19 }
0x19bf   :  { %v13165_v45 = vpop.eup %13164 }
0x19c0   :  { %v15694_v33 = vmul.f32 %v13165_v45, %v13163_v28  ;;  %v15730_v28 = vpack.c.bf16 %v8321_v36, %v8317_v27  ;;  %v8324_v45 = vld [vmem:[#allocation17 + $0xc8] sm:$0xff]  ;;  %v15790_v27 = vpack.c.bf16 %v8573_v50, %v8569_v13  ;;  %v8568_v36 = vld [vmem:[#allocation17 + $0xd0] sm:$0xff] }
0x19c1   :  { %v15734_v10 = vpack.c.bf16 %v8328_v7, %v8324_v45  ;;  %v8572_v45 = vld [vmem:[#allocation17 + $0xf0] sm:$0xff] }
0x19c2   :  { %8185 = vmatmul.mubr.f32.vlgmr.msra.gmra.mrb[58].mxu0 %v15694_v33  ;;  %8256 = vmatmul.mubr.f32.vlgmr.msra.gmra.mrb[58].mxu1 %v15694_v33  ;;  %v15792_v7 = vpack.c.bf16 %v8572_v45, %v8568_v36  ;;  %v8596_v50 = vld [vmem:[#allocation17 + $0x1b0] sm:$0xff]  ;;  %v8599_v36 = vld [vmem:[#allocation17 + $0x1c8] sm:$0xff] }
0x19c3   :  { %8427 = vmatprep.mubr.f32.mxu0 %v16212_v31  ;;  %8498 = vmatprep.mubr.f32.mxu1 %v16212_v31  ;;  %v8603_v45 = vld [vmem:[#allocation17 + $0x1e8] sm:$0xff] }
0x19c4   :  { %12109 = vmatpush1.bf16.msra.mxu0 %v15704_v51  ;;  %12141 = vmatpush1.bf16.msra.mxu1 %v15707_v47 }
0x19c5   :  { %12111 = vmatprep.subr.bf16.mxu0 %v15712_v4  ;;  %12143 = vmatprep.subr.bf16.mxu1 %v15714_v21 }
0x19c8   :  { %12113 = vmatpush1.bf16.msra.mxu0 %v15716_v56  ;;  %12145 = vmatpush1.bf16.msra.mxu1 %v15719_v9 }
0x19c9   :  { %12147 = vmatprep.subr.bf16.mxu1 %v15483_v42  ;;  %12115 = vmatprep.subr.bf16.mxu0 %v15724_v20  ;;  %v15737_v42 = vpack.c.bf16 %v8327_v22, %v8323_v18  ;;  %v8575_v18 = vld [vmem:[#allocation17 + $0x108] sm:$0xff] }
0x19ca   :  { %v8579_v22 = vld [vmem:[#allocation17 + $0x128] sm:$0xff] }
0x19cb   :  { %v15796_v6 = vpack.c.bf16 %v8579_v22, %v8575_v18  ;;  %v15827_v22 = vpack.c.bf16 %v8603_v45, %v8599_v36 }
0x19cc   :  { %12117 = vmatpush1.bf16.msra.mxu0 %v15727_v3  ;;  %12149 = vmatpush1.bf16.msra.mxu1 %v15730_v28 }
0x19cd   :  { %12151 = vmatprep.subr.bf16.mxu1 %v15499_v62  ;;  %12119 = vmatprep.subr.bf16.mxu0 %v15734_v10 }
0x19d0   :  { %12121 = vmatpush1.bf16.msra.mxu0 %v15737_v42  ;;  %12153 = vmatpush1.bf16.msra.mxu1 %v15509_v25 }
0x19d1   :  { %12123 = vmatprep.subr.bf16.mxu0 %v15513_v12  ;;  %12155 = vmatprep.subr.bf16.mxu1 %v15515_v61 }
0x19d4   :  { %12125 = vmatpush1.bf16.msra.mxu0 %v15744_v52  ;;  %12157 = vmatpush1.bf16.msra.mxu1 %v15525_v8 }
0x19d5   :  { %12127 = vmatprep.subr.bf16.mxu0 %v15529_v46  ;;  %12159 = vmatprep.subr.bf16.mxu1 %v15531_v5 }
0x19d8   :  { %12129 = vmatpush1.bf16.msra.mxu0 %v15539_v1  ;;  %12161 = vmatpush1.bf16.msra.mxu1 %v15541_v37 }
0x19d9   :  { %12131 = vmatprep.subr.bf16.mxu0 %v15545_v23  ;;  %12163 = vmatprep.subr.bf16.mxu1 %v15547_v29 }
0x19dc   :  { %12133 = vmatpush1.bf16.msra.mxu0 %v15555_v55  ;;  %12165 = vmatpush1.bf16.msra.mxu1 %v15557_v26 }
0x19dd   :  { %12135 = vmatprep.subr.bf16.mxu0 %v15561_v2  ;;  %12167 = vmatprep.subr.bf16.mxu1 %v15563_v63 }
0x19e0   :  { %12137 = vmatpush1.bf16.msra.mxu0 %v15571_v35  ;;  %12169 = vmatpush1.bf16.msra.mxu1 %v15573_v24 }
0x19e1   :  { %12171 = vmatprep.subr.bf16.mxu0 %v15700_v53  ;;  %12203 = vmatprep.subr.bf16.mxu1 %v15702_v41 }
0x1a95   :  { %v8186_v62 = vpop.f32.mrb[58].mxu0  ;;  %v8257_v25 = vpop.f32.mrb[58].mxu1 }
0x1a96   :  { %v12588_v12 = vadd.f32 %v8186_v62, %v15632_v49  ;;  %v8188_v61 = vpop.f32.mrb[59].mxu0  ;;  %v8259_v8 = vpop.f32.mrb[59].mxu1  ;;  %v12604_v29 = vadd.f32 %v8257_v25, %v15644_v15  ;;  %v8581_v62 = vld [vmem:[#allocation17 + $0x138] sm:$0xff]  ;;  %v8576_v25 = vld [vmem:[#allocation17 + $0x110] sm:$0xff] }
0x1a97   :  { %v12589_v46 = vadd.f32 %v8188_v61, %v15635_v0  ;;  %v12605_v37 = vadd.f32 %v8259_v8, %v15640_v58  ;;  %v15798_v61 = vpack.c.bf16 %v8581_v62, %v8577_v11  ;;  %v8601_v11 = vld [vmem:[#allocation17 + $0x1d8] sm:$0xff] }
0x1a98   :  { %v9866_v5 = vmul.f32 -1.442695, %v12588_v12  ;;  %v8580_v12 = vld [vmem:[#allocation17 + $0x130] sm:$0xff]  ;;  %v8605_v62 = vld [vmem:[#allocation17 + $0x1f8] sm:$0xff] }
0x1a99   :  { %v9867_v1 = vmul.f32 -1.442695, %v12589_v46  ;;  %v9868_v23 = vmul.f32 -1.442695, %v12605_v37  ;;  %v15800_v8 = vpack.c.bf16 %v8580_v12, %v8576_v25  ;;  %v8583_v46 = vld [vmem:[#allocation17 + $0x148] sm:$0xff]  ;;  %v8598_v25 = vld [vmem:[#allocation17 + $0x1c0] sm:$0xff]  ;;  %v15830_v12 = vpack.c.bf16 %v8605_v62, %v8601_v11 }
0x1a9a   :  { %13166 = vpow2.f32 %v9866_v5  ;;  %v8587_v5 = vld [vmem:[#allocation17 + $0x168] sm:$0xff] }
0x1a9b   :  { %13168 = vpow2.f32 %v9867_v1  ;;  %v8585_v1 = vld [vmem:[#allocation17 + $0x158] sm:$0xff]  ;;  %v15805_v37 = vpack.c.bf16 %v8587_v5, %v8583_v46  ;;  %v8602_v46 = vld [vmem:[#allocation17 + $0x1e0] sm:$0xff]  ;;  %v8600_v5 = vld [vmem:[#allocation17 + $0x1d0] sm:$0xff] }
0x1a9c   :  { %13170 = vpow2.f32 %v9868_v23  ;;  %v8589_v23 = vld [vmem:[#allocation17 + $0x178] sm:$0xff] }
0x1a9d   :  { %13172 = vtanh.f32 %v12604_v29  ;;  %v8582_v29 = vld [vmem:[#allocation17 + $0x140] sm:$0xff] }
0x1aa4   :  { %v13167_v55 = vpop.eup %13166 }
0x1aa5   :  { %v13169_v26 = vpop.eup %13168  ;;  %v8269_v2 = vadd.f32 1.0, %v13167_v55  ;;  %v8586_v55 = vld [vmem:[#allocation17 + $0x160] sm:$0xff] }
0x1aa6   :  { %v8275_v63 = vadd.f32 1.0, %v13169_v26  ;;  %v13171_v35 = vpop.eup %13170  ;;  %v15808_v26 = vpack.c.bf16 %v8589_v23, %v8585_v1  ;;  %v8604_v1 = vld [vmem:[#allocation17 + $0x1f0] sm:$0xff]  ;;  %v15833_v23 = vpack.c.bf16 %v8602_v46, %v8598_v25 }
0x1aa7   :  { %13174 = vrcp.f32 %v8269_v2  ;;  %v13173_v24 = vpop.eup %13172  ;;  %v8282_v59 = vadd.f32 1.0, %v13171_v35  ;;  %v15810_v2 = vpack.c.bf16 %v8586_v55, %v8582_v29  ;;  %v8588_v35 = vld [vmem:[#allocation17 + $0x170] sm:$0xff]  ;;  %v15837_v29 = vpack.c.bf16 %v8604_v1, %v8600_v5 }
0x1aa8   :  { %13176 = vrcp.f32 %v8275_v63  ;;  %v8584_v63 = vld [vmem:[#allocation17 + $0x150] sm:$0xff] }
0x1aa9   :  { %13178 = vrcp.f32 %v8282_v59  ;;  %v8597_v59 = vld [vmem:[#allocation17 + $0x1b8] sm:$0xff] }
0x1ab1   :  { %v13175_v60 = vpop.eup %13174 }
0x1ab2   :  { %v13177_v38 = vpop.eup %13176  ;;  %v8286_v32 = vmul.f32 %v13175_v60, %v13173_v24  ;;  %v8591_v24 = vld [vmem:[#allocation17 + $0x188] sm:$0xff]  ;;  %v15813_v60 = vpack.c.bf16 %v8588_v35, %v8584_v63 }
0x1ab3   :  { %v8285_v39 = vmul.f32 %v13177_v38, %v15691_v19  ;;  %v13179_v17 = vpop.eup %13178  ;;  %v8561_v19 = vld [vmem:[#allocation17 + $0x98] sm:$0xff]  ;;  %v8595_v38 = vld [vmem:[#allocation17 + $0x1a8] sm:$0xff] }
0x1ab4   :  { %v15786_v48 = vpack.c.bf16 %v8565_v54, %v8561_v19  ;;  %v8594_v19 = vld [vmem:[#allocation17 + $0x1a0] sm:$0xff]  ;;  %v8592_v54 = vld [vmem:[#allocation17 + $0x190] sm:$0xff] }
0x1ab5   :  { %v15767_v30 = vadd.f32 %v8286_v32, %v8285_v39  ;;  %v8593_v32 = vld [vmem:[#allocation17 + $0x198] sm:$0xff]  ;;  %v15816_v39 = vpack.c.bf16 %v8595_v38, %v8591_v24  ;;  %v15825_v18 = vpack.c.bf16 %v8596_v50, %v8592_v54 }
0x1ab7   :  { %13180 = vtanh.f32 %v15767_v30 }
0x1ac1   :  { %v13181_v16 = vpop.eup %13180 }
0x1ac2   :  { %v15770_v43 = vmul.f32 %v13181_v16, %v13179_v17  ;;  %v15818_v17 = vpack.c.bf16 %v8597_v59, %v8593_v32  ;;  %v8590_v16 = vld [vmem:[#allocation17 + $0x180] sm:$0xff] }
0x1ac3   :  { %v15821_v13 = vpack.c.bf16 %v8594_v19, %v8590_v16 }
0x1ac4   :  { %8428 = vmatmul.mubr.f32.vlgmr.msra.gmra.mrb[56].mxu0 %v15770_v43  ;;  %8499 = vmatmul.mubr.f32.vlgmr.msra.gmra.mrb[56].mxu1 %v15770_v43 }
0x1ac5   :  { %12173 = vmatpush1.bf16.msra.mxu0 %v15704_v51  ;;  %12205 = vmatpush1.bf16.msra.mxu1 %v15707_v47 }
0x1ac6   :  { %12175 = vmatprep.subr.bf16.mxu0 %v15712_v4  ;;  %12207 = vmatprep.subr.bf16.mxu1 %v15714_v21 }
0x1ac7   :  { %8670 = vmatprep.mubr.f32.mxu0 %v16212_v31  ;;  %8741 = vmatprep.mubr.f32.mxu1 %v16212_v31 }
0x1ac9   :  { %12177 = vmatpush1.bf16.msra.mxu0 %v15716_v56  ;;  %12209 = vmatpush1.bf16.msra.mxu1 %v15719_v9 }
0x1aca   :  { %12179 = vmatprep.subr.bf16.mxu0 %v15724_v20  ;;  %12211 = vmatprep.subr.bf16.mxu1 %v15786_v48 }
0x1acd   :  { %12181 = vmatpush1.bf16.msra.mxu0 %v15727_v3  ;;  %12213 = vmatpush1.bf16.msra.mxu1 %v15730_v28 }
0x1ace   :  { %12183 = vmatprep.subr.bf16.mxu0 %v15734_v10  ;;  %12215 = vmatprep.subr.bf16.mxu1 %v15790_v27 }
0x1ad1   :  { %12185 = vmatpush1.bf16.msra.mxu0 %v15737_v42  ;;  %12217 = vmatpush1.bf16.msra.mxu1 %v15792_v7 }
0x1ad2   :  { %12187 = vmatprep.subr.bf16.mxu0 %v15796_v6  ;;  %12219 = vmatprep.subr.bf16.mxu1 %v15798_v61 }
0x1ad5   :  { %12189 = vmatpush1.bf16.msra.mxu0 %v15744_v52  ;;  %12221 = vmatpush1.bf16.msra.mxu1 %v15800_v8 }
0x1ad6   :  { %12191 = vmatprep.subr.bf16.mxu0 %v15805_v37  ;;  %12223 = vmatprep.subr.bf16.mxu1 %v15808_v26 }
0x1ad9   :  { %12193 = vmatpush1.bf16.msra.mxu0 %v15810_v2  ;;  %12225 = vmatpush1.bf16.msra.mxu1 %v15813_v60 }
0x1ada   :  { %12195 = vmatprep.subr.bf16.mxu0 %v15816_v39  ;;  %12227 = vmatprep.subr.bf16.mxu1 %v15818_v17 }
0x1add   :  { %12197 = vmatpush1.bf16.msra.mxu0 %v15821_v13  ;;  %12229 = vmatpush1.bf16.msra.mxu1 %v15825_v18 }
0x1ade   :  { %12199 = vmatprep.subr.bf16.mxu0 %v15827_v22  ;;  %12231 = vmatprep.subr.bf16.mxu1 %v15830_v12 }
0x1ae1   :  { %12201 = vmatpush1.bf16.msra.mxu0 %v15833_v23  ;;  %12233 = vmatpush1.bf16.msra.mxu1 %v15837_v29 }
0x1ae2   :  { %12235 = vmatprep.subr.bf16.mxu0 %v15700_v53  ;;  %12267 = vmatprep.subr.bf16.mxu1 %v15702_v41 }
0x1b97   :  { %v8429_v55 = vpop.f32.mrb[56].mxu0  ;;  %v8500_v63 = vpop.f32.mrb[56].mxu1 }
0x1b98   :  { %v12586_v35 = vadd.f32 %v8429_v55, %v15632_v49  ;;  %v8431_v24 = vpop.f32.mrb[57].mxu0  ;;  %v8502_v38 = vpop.f32.mrb[57].mxu1  ;;  %v12602_v50 = vadd.f32 %v8500_v63, %v15644_v15 }
0x1b99   :  { %v12587_v32 = vadd.f32 %v8431_v24, %v15635_v0  ;;  %v12603_v19 = vadd.f32 %v8502_v38, %v15640_v58 }
0x1b9a   :  { %v9869_v59 = vmul.f32 -1.442695, %v12586_v35 }
0x1b9b   :  { %v9870_v16 = vmul.f32 -1.442695, %v12587_v32  ;;  %v9871_v54 = vmul.f32 -1.442695, %v12603_v19 }
0x1b9c   :  { %13182 = vpow2.f32 %v9869_v59 }
0x1b9d   :  { %13184 = vpow2.f32 %v9870_v16 }
0x1b9e   :  { %13186 = vpow2.f32 %v9871_v54 }
0x1b9f   :  { %13188 = vtanh.f32 %v12602_v50 }
0x1ba6   :  { %v13183_v36 = vpop.eup %13182 }
0x1ba7   :  { %v13185_v45 = vpop.eup %13184  ;;  %v8512_v11 = vadd.f32 1.0, %v13183_v36 }
0x1ba8   :  { %v8518_v62 = vadd.f32 1.0, %v13185_v45  ;;  %v13187_v25 = vpop.eup %13186 }
0x1ba9   :  { %13190 = vrcp.f32 %v8512_v11  ;;  %v13189_v46 = vpop.eup %13188  ;;  %v8525_v35 = vadd.f32 1.0, %v13187_v25 }
0x1baa   :  { %13192 = vrcp.f32 %v8518_v62 }
0x1bab   :  { %13194 = vrcp.f32 %v8525_v35 }
0x1bb3   :  { %v13191_v5 = vpop.eup %13190 }
0x1bb4   :  { %v13193_v1 = vpop.eup %13192  ;;  %v8529_v55 = vmul.f32 %v13191_v5, %v13189_v46 }
0x1bb5   :  { %v8528_v24 = vmul.f32 %v13193_v1, %v15767_v30  ;;  %v13195_v63 = vpop.eup %13194 }
0x1bb7   :  { %v15849_v38 = vadd.f32 %v8529_v55, %v8528_v24 }
0x1bb9   :  { %13196 = vtanh.f32 %v15849_v38 }
0x1bc3   :  { %v13197_v32 = vpop.eup %13196 }
0x1bc4   :  { %v15852_v59 = vmul.f32 %v13197_v32, %v13195_v63 }
0x1bc6   :  { %8671 = vmatmul.mubr.f32.vlgmr.msra.gmra.mrb[54].mxu0 %v15852_v59  ;;  %8742 = vmatmul.mubr.f32.vlgmr.msra.gmra.mrb[54].mxu1 %v15852_v59 }
0x1bc7   :  { %12237 = vmatpush1.bf16.msra.mxu0 %v15704_v51  ;;  %12269 = vmatpush1.bf16.msra.mxu1 %v15707_v47 }
0x1bc8   :  { %12239 = vmatprep.subr.bf16.mxu0 %v15712_v4  ;;  %12271 = vmatprep.subr.bf16.mxu1 %v15714_v21 }
0x1bc9   :  { %8913 = vmatprep.mubr.f32.mxu0 %v16212_v31  ;;  %8984 = vmatprep.mubr.f32.mxu1 %v16212_v31 }
0x1bcb   :  { %12241 = vmatpush1.bf16.msra.mxu0 %v15716_v56  ;;  %12273 = vmatpush1.bf16.msra.mxu1 %v15719_v9 }
0x1bcc   :  { %12243 = vmatprep.subr.bf16.mxu0 %v15724_v20  ;;  %12275 = vmatprep.subr.bf16.mxu1 %v15786_v48 }
0x1bcf   :  { %12245 = vmatpush1.bf16.msra.mxu0 %v15727_v3  ;;  %12277 = vmatpush1.bf16.msra.mxu1 %v15730_v28 }
0x1bd0   :  { %12247 = vmatprep.subr.bf16.mxu0 %v15734_v10  ;;  %12279 = vmatprep.subr.bf16.mxu1 %v15790_v27 }
0x1bd3   :  { %12249 = vmatpush1.bf16.msra.mxu0 %v15737_v42  ;;  %12281 = vmatpush1.bf16.msra.mxu1 %v15792_v7 }
0x1bd4   :  { %12251 = vmatprep.subr.bf16.mxu0 %v15796_v6  ;;  %12283 = vmatprep.subr.bf16.mxu1 %v15798_v61 }
0x1bd7   :  { %12253 = vmatpush1.bf16.msra.mxu0 %v15744_v52  ;;  %12285 = vmatpush1.bf16.msra.mxu1 %v15800_v8 }
0x1bd8   :  { %12255 = vmatprep.subr.bf16.mxu0 %v15805_v37  ;;  %12287 = vmatprep.subr.bf16.mxu1 %v15808_v26 }
0x1bdb   :  { %12257 = vmatpush1.bf16.msra.mxu0 %v15810_v2  ;;  %12289 = vmatpush1.bf16.msra.mxu1 %v15813_v60 }
0x1bdc   :  { %12259 = vmatprep.subr.bf16.mxu0 %v15816_v39  ;;  %12291 = vmatprep.subr.bf16.mxu1 %v15818_v17 }
0x1bdf   :  { %12261 = vmatpush1.bf16.msra.mxu0 %v15821_v13  ;;  %12293 = vmatpush1.bf16.msra.mxu1 %v15825_v18 }
0x1be0   :  { %12263 = vmatprep.subr.bf16.mxu0 %v15827_v22  ;;  %12295 = vmatprep.subr.bf16.mxu1 %v15830_v12 }
0x1be3   :  { %12265 = vmatpush1.bf16.msra.mxu0 %v15833_v23  ;;  %12297 = vmatpush1.bf16.msra.mxu1 %v15837_v29 }
0x1be4   :  { %12299 = vmatprep.subr.bf16.mxu0 %v15700_v53  ;;  %12331 = vmatprep.subr.bf16.mxu1 %v15702_v41 }
0x1c99   :  { %v8672_v30 = vpop.f32.mrb[54].mxu0  ;;  %v8743_v16 = vpop.f32.mrb[54].mxu1 }
0x1c9a   :  { %v12584_v19 = vadd.f32 %v8672_v30, %v15632_v49  ;;  %v8674_v54 = vpop.f32.mrb[55].mxu0  ;;  %v8745_v50 = vpop.f32.mrb[55].mxu1  ;;  %v12600_v46 = vadd.f32 %v8743_v16, %v15644_v15 }
0x1c9b   :  { %v12585_v36 = vadd.f32 %v8674_v54, %v15635_v0  ;;  %v12601_v62 = vadd.f32 %v8745_v50, %v15640_v58 }
0x1c9c   :  { %v9872_v45 = vmul.f32 -1.442695, %v12584_v19 }
0x1c9d   :  { %v9873_v11 = vmul.f32 -1.442695, %v12585_v36  ;;  %v9874_v25 = vmul.f32 -1.442695, %v12601_v62 }
0x1c9e   :  { %13198 = vpow2.f32 %v9872_v45 }
0x1c9f   :  { %13200 = vpow2.f32 %v9873_v11 }
0x1ca0   :  { %13202 = vpow2.f32 %v9874_v25 }
0x1ca1   :  { %13204 = vtanh.f32 %v12600_v46 }
0x1ca8   :  { %v13199_v53 = vpop.eup %13198 }
0x1ca9   :  { %v13201_v5 = vpop.eup %13200  ;;  %v8755_v41 = vadd.f32 1.0, %v13199_v53 }
0x1caa   :  { %v8761_v1 = vadd.f32 1.0, %v13201_v5  ;;  %v13203_v55 = vpop.eup %13202 }
0x1cab   :  { %13206 = vrcp.f32 %v8755_v41  ;;  %v13205_v35 = vpop.eup %13204  ;;  %v8768_v30 = vadd.f32 1.0, %v13203_v55 }
0x1cac   :  { %13208 = vrcp.f32 %v8761_v1 }
0x1cad   :  { %13210 = vrcp.f32 %v8768_v30  ;;  %v9276_v30 = vld [vmem:[#allocation17 + $0x28] sm:$0xff] }
0x1cb5   :  { %v13207_v24 = vpop.eup %13206 }
0x1cb6   :  { %v13209_v63 = vpop.eup %13208  ;;  %v8772_v32 = vmul.f32 %v13207_v24, %v13205_v35 }
0x1cb7   :  { %v8771_v19 = vmul.f32 %v13209_v63, %v15849_v38  ;;  %v13211_v16 = vpop.eup %13210 }
0x1cb9   :  { %v15895_v54 = vadd.f32 %v8772_v32, %v8771_v19  ;;  %v9272_v32 = vld [vmem:[#allocation17 + $0x8] sm:$0xff]  ;;  %v9274_v19 = vld [vmem:[#allocation17 + $0x18] sm:$0xff] }
0x1cbb   :  { %13212 = vtanh.f32 %v15895_v54 }
0x1cc5   :  { %v13213_v50 = vpop.eup %13212 }
0x1cc6   :  { %v15898_v36 = vmul.f32 %v13213_v50, %v13211_v16  ;;  %v9278_v16 = vld [vmem:[#allocation17 + $0x38] sm:$0xff]  ;;  %v9271_v50 = vld [vmem:[#allocation17] sm:$0xff] }
0x1cc8   :  { %8914 = vmatmul.mubr.f32.vlgmr.msra.gmra.mrb[52].mxu0 %v15898_v36  ;;  %8985 = vmatmul.mubr.f32.vlgmr.msra.gmra.mrb[52].mxu1 %v15898_v36 }
0x1cc9   :  { %12301 = vmatpush1.bf16.msra.mxu0 %v15704_v51  ;;  %12333 = vmatpush1.bf16.msra.mxu1 %v15707_v47 }
0x1cca   :  { %12303 = vmatprep.subr.bf16.mxu0 %v15712_v4  ;;  %12335 = vmatprep.subr.bf16.mxu1 %v15714_v21 }
0x1ccb   :  { %9156 = vmatprep.mubr.f32.mxu0 %v16212_v31  ;;  %9227 = vmatprep.mubr.f32.mxu1 %v16212_v31 }
0x1ccd   :  { %12305 = vmatpush1.bf16.msra.mxu0 %v15716_v56  ;;  %12337 = vmatpush1.bf16.msra.mxu1 %v15719_v9 }
0x1cce   :  { %12307 = vmatprep.subr.bf16.mxu0 %v15724_v20  ;;  %12339 = vmatprep.subr.bf16.mxu1 %v15786_v48 }
0x1cd1   :  { %12309 = vmatpush1.bf16.msra.mxu0 %v15727_v3  ;;  %12341 = vmatpush1.bf16.msra.mxu1 %v15730_v28 }
0x1cd2   :  { %12311 = vmatprep.subr.bf16.mxu0 %v15734_v10  ;;  %12343 = vmatprep.subr.bf16.mxu1 %v15790_v27 }
0x1cd5   :  { %12313 = vmatpush1.bf16.msra.mxu0 %v15737_v42  ;;  %12345 = vmatpush1.bf16.msra.mxu1 %v15792_v7 }
0x1cd6   :  { %12315 = vmatprep.subr.bf16.mxu0 %v15796_v6  ;;  %12347 = vmatprep.subr.bf16.mxu1 %v15798_v61 }
0x1cd9   :  { %12317 = vmatpush1.bf16.msra.mxu0 %v15744_v52  ;;  %12349 = vmatpush1.bf16.msra.mxu1 %v15800_v8 }
0x1cda   :  { %12319 = vmatprep.subr.bf16.mxu0 %v15805_v37  ;;  %12351 = vmatprep.subr.bf16.mxu1 %v15808_v26 }
0x1cdd   :  { %12321 = vmatpush1.bf16.msra.mxu0 %v15810_v2  ;;  %12353 = vmatpush1.bf16.msra.mxu1 %v15813_v60 }
0x1cde   :  { %12323 = vmatprep.subr.bf16.mxu0 %v15816_v39  ;;  %12355 = vmatprep.subr.bf16.mxu1 %v15818_v17 }
0x1ce1   :  { %12325 = vmatpush1.bf16.msra.mxu0 %v15821_v13  ;;  %12357 = vmatpush1.bf16.msra.mxu1 %v15825_v18 }
0x1ce2   :  { %12327 = vmatprep.subr.bf16.mxu0 %v15827_v22  ;;  %12359 = vmatprep.subr.bf16.mxu1 %v15830_v12 }
0x1ce5   :  { %12329 = vmatpush1.bf16.msra.mxu0 %v15833_v23  ;;  %12361 = vmatpush1.bf16.msra.mxu1 %v15837_v29 }
0x1d9b   :  { %v8915_v51 = vpop.f32.mrb[52].mxu0  ;;  %v8986_v47 = vpop.f32.mrb[52].mxu1 }
0x1d9c   :  { %v12582_v4 = vadd.f32 %v8915_v51, %v15632_v49  ;;  %v8917_v21 = vpop.f32.mrb[53].mxu0  ;;  %v8988_v56 = vpop.f32.mrb[53].mxu1  ;;  %v12598_v42 = vadd.f32 %v8986_v47, %v15644_v15  ;;  %v9275_v51 = vld [vmem:[#allocation17 + $0x20] sm:$0xff]  ;;  %v12394_v47 = vpack.c.bf16 %v9278_v16, %v9274_v19  ;;  %v9300_v16 = vld [vmem:[#allocation17 + $0xe8] sm:$0xff] }
0x1d9d   :  { %v12583_v9 = vadd.f32 %v8917_v21, %v15635_v0  ;;  %v12599_v28 = vadd.f32 %v8988_v56, %v15640_v58  ;;  %v9273_v21 = vld [vmem:[#allocation17 + $0x10] sm:$0xff] }
0x1d9e   :  { %v9875_v20 = vmul.f32 -1.442695, %v12582_v4  ;;  %v12364_v4 = vpack.c.bf16 %v9275_v51, %v9271_v50  ;;  %v9277_v56 = vld [vmem:[#allocation17 + $0x30] sm:$0xff]  ;;  %12395 = vmatprep.subr.bf16.mxu1 %v12394_v47  ;;  %v9295_v51 = vld [vmem:[#allocation17 + $0xc0] sm:$0xff] }
0x1d9f   :  { %v9876_v3 = vmul.f32 -1.442695, %v12583_v9  ;;  %v9877_v10 = vmul.f32 -1.442695, %v12599_v28  ;;  %v12396_v9 = vpack.c.bf16 %v9277_v56, %v9273_v21  ;;  %v9282_v28 = vld [vmem:[#allocation17 + $0x58] sm:$0xff]  ;;  %v9299_v47 = vld [vmem:[#allocation17 + $0xe0] sm:$0xff] }
0x1da0   :  { %13214 = vpow2.f32 %v9875_v20  ;;  %v9280_v20 = vld [vmem:[#allocation17 + $0x48] sm:$0xff]  ;;  %v9307_v21 = vld [vmem:[#allocation17 + $0x120] sm:$0xff] }
0x1da1   :  { %13216 = vpow2.f32 %v9876_v3  ;;  %v9284_v3 = vld [vmem:[#allocation17 + $0x68] sm:$0xff] }
0x1da2   :  { %13218 = vpow2.f32 %v9877_v10  ;;  %v12366_v10 = vpack.c.bf16 %v9284_v3, %v9280_v20 }
0x1da3   :  { %13220 = vtanh.f32 %v12598_v42  ;;  %v9286_v42 = vld [vmem:[#allocation17 + $0x78] sm:$0xff] }
0x1daa   :  { %v13215_v52 = vpop.eup %13214 }
0x1dab   :  { %v13217_v38 = vpop.eup %13216  ;;  %v8998_v45 = vadd.f32 1.0, %v13215_v52  ;;  %v9279_v52 = vld [vmem:[#allocation17 + $0x40] sm:$0xff] }
0x1dac   :  { %v9004_v11 = vadd.f32 1.0, %v13217_v38  ;;  %v13219_v62 = vpop.eup %13218  ;;  %v9283_v38 = vld [vmem:[#allocation17 + $0x60] sm:$0xff] }
0x1dad   :  { %13222 = vrcp.f32 %v8998_v45  ;;  %v13221_v25 = vpop.eup %13220  ;;  %v9011_v41 = vadd.f32 1.0, %v13219_v62  ;;  %v12398_v45 = vpack.c.bf16 %v9286_v42, %v9282_v28  ;;  %v9281_v62 = vld [vmem:[#allocation17 + $0x50] sm:$0xff] }
0x1dae   :  { %13224 = vrcp.f32 %v9004_v11  ;;  %v12368_v11 = vpack.c.bf16 %v9283_v38, %v9279_v52 }
0x1daf   :  { %13226 = vrcp.f32 %v9011_v41 }
0x1db7   :  { %v13223_v46 = vpop.eup %13222 }
0x1db8   :  { %v13225_v53 = vpop.eup %13224  ;;  %v9015_v5 = vmul.f32 %v13223_v46, %v13221_v25  ;;  %v9285_v25 = vld [vmem:[#allocation17 + $0x70] sm:$0xff] }
0x1db9   :  { %v9014_v1 = vmul.f32 %v13225_v53, %v15895_v54  ;;  %v13227_v35 = vpop.eup %13226  ;;  %v12362_v54 = vpack.c.bf16 %v9276_v30, %v9272_v32  ;;  %v12400_v46 = vpack.c.bf16 %v9285_v25, %v9281_v62  ;;  %v9288_v53 = vld [vmem:[#allocation17 + $0x88] sm:$0xff]  ;;  %v9293_v30 = vld [vmem:[#allocation17 + $0xb0] sm:$0xff]  ;;  %v9524_v25 = vld [vmem:[%s16165_s13] sm:$0xff] }
0x1dbb   :  { %v15939_v55 = vadd.f32 %v9015_v5, %v9014_v1  ;;  %12363 = vmatprep.subr.bf16.mxu0 %v12362_v54  ;;  %v9292_v5 = vld [vmem:[#allocation17 + $0xa8] sm:$0xff]  ;;  %v9287_v1 = vld [vmem:[#allocation17 + $0x80] sm:$0xff] }
0x1dbc   :  { %v12370_v41 = vpack.c.bf16 %v9292_v5, %v9288_v53  ;;  %v9296_v54 = vld [vmem:[#allocation17 + $0xc8] sm:$0xff]  ;;  %v9542_v5 = vld [vmem:[%s16165_s13 + $0x90] sm:$0xff] }
0x1dbd   :  { %13228 = vtanh.f32 %v15939_v55  ;;  %v12374_v50 = vpack.c.bf16 %v9300_v16, %v9296_v54  ;;  %v9528_v16 = vld [vmem:[%s16165_s13 + $0x20] sm:$0xff] }
0x1dc7   :  { %v13229_v24 = vpop.eup %13228 }
0x1dc8   :  { %v15942_v63 = vmul.f32 %v13229_v24, %v13227_v35  ;;  %v9291_v35 = vld [vmem:[#allocation17 + $0xa0] sm:$0xff]  ;;  %v9289_v24 = vld [vmem:[#allocation17 + $0x90] sm:$0xff] }
0x1dc9   :  { %v12372_v32 = vpack.c.bf16 %v9291_v35, %v9287_v1  ;;  %v12404_v19 = vpack.c.bf16 %v9293_v30, %v9289_v24  ;;  %v9526_v35 = vld [vmem:[%s16165_s13 + $0x10] sm:$0xff]  ;;  %v9527_v24 = vld [vmem:[%s16165_s13 + $0x18] sm:$0xff]  ;;  %v9544_v30 = vld [vmem:[%s16165_s13 + $0xa0] sm:$0xff] }
0x1dca   :  { %9157 = vmatmul.mubr.f32.vlgmr.msra.gmra.mrb[50].mxu0 %v15942_v63  ;;  %9228 = vmatmul.mubr.f32.vlgmr.msra.gmra.mrb[50].mxu1 %v15942_v63 }
0x1dcb   :  { %9399 = vmatprep.mubr.f32.mxu0 %v16212_v31  ;;  %9470 = vmatprep.mubr.f32.mxu1 %v16212_v31 }
0x1dcc   :  { %12365 = vmatpush1.bf16.msra.mxu0 %v12364_v4  ;;  %12397 = vmatpush1.bf16.msra.mxu1 %v12396_v9  ;;  %v12376_v4 = vpack.c.bf16 %v9299_v47, %v9295_v51  ;;  %v9546_v47 = vld [vmem:[%s16165_s13 + $0xb0] sm:$0xff] }
0x1dcd   :  { %12367 = vmatprep.subr.bf16.mxu0 %v12366_v10  ;;  %12399 = vmatprep.subr.bf16.mxu1 %v12398_v45 }
0x1dd0   :  { %12369 = vmatpush1.bf16.msra.mxu0 %v12368_v11  ;;  %12401 = vmatpush1.bf16.msra.mxu1 %v12400_v46  ;;  %v9540_v11 = vld [vmem:[%s16165_s13 + $0x80] sm:$0xff]  ;;  %v9525_v46 = vld [vmem:[%s16165_s13 + $0x8] sm:$0xff] }
0x1dd1   :  { %12403 = vmatprep.subr.bf16.mxu1 %v15786_v48  ;;  %12371 = vmatprep.subr.bf16.mxu0 %v12370_v41  ;;  %v9303_v48 = vld [vmem:[#allocation17 + $0x100] sm:$0xff]  ;;  %v12428_v53 = vpack.c.bf16 %v9525_v46, %v9524_v25  ;;  %v9543_v41 = vld [vmem:[%s16165_s13 + $0x98] sm:$0xff] }
0x1dd2   :  { %v12380_v56 = vpack.c.bf16 %v9307_v21, %v9303_v48  ;;  %v12430_v1 = vpack.c.bf16 %v9543_v41, %v9542_v5  ;;  %v9530_v21 = vld [vmem:[%s16165_s13 + $0x30] sm:$0xff] }
0x1dd4   :  { %12373 = vmatpush1.bf16.msra.mxu0 %v12372_v32  ;;  %12405 = vmatpush1.bf16.msra.mxu1 %v12404_v19  ;;  %v12432_v32 = vpack.c.bf16 %v9527_v24, %v9526_v35  ;;  %v9545_v19 = vld [vmem:[%s16165_s13 + $0xa8] sm:$0xff] }
0x1dd5   :  { %12407 = vmatprep.subr.bf16.mxu1 %v15790_v27  ;;  %12375 = vmatprep.subr.bf16.mxu0 %v12374_v50  ;;  %v12434_v54 = vpack.c.bf16 %v9545_v19, %v9544_v30  ;;  %v9529_v50 = vld [vmem:[%s16165_s13 + $0x28] sm:$0xff] }
0x1dd6   :  { %v12436_v51 = vpack.c.bf16 %v9529_v50, %v9528_v16 }
0x1dd8   :  { %12377 = vmatpush1.bf16.msra.mxu0 %v12376_v4  ;;  %12409 = vmatpush1.bf16.msra.mxu1 %v15792_v7  ;;  %v9547_v4 = vld [vmem:[%s16165_s13 + $0xb8] sm:$0xff] }
0x1dd9   :  { %12379 = vmatprep.subr.bf16.mxu0 %v15796_v6  ;;  %12411 = vmatprep.subr.bf16.mxu1 %v15798_v61  ;;  %v12438_v48 = vpack.c.bf16 %v9547_v4, %v9546_v47 }
0x1ddc   :  { %12381 = vmatpush1.bf16.msra.mxu0 %v12380_v56  ;;  %12413 = vmatpush1.bf16.msra.mxu1 %v15800_v8  ;;  %v9531_v56 = vld [vmem:[%s16165_s13 + $0x38] sm:$0xff] }
0x1ddd   :  { %12383 = vmatprep.subr.bf16.mxu0 %v15805_v37  ;;  %12415 = vmatprep.subr.bf16.mxu1 %v15808_v26 }
0x1de0   :  { %12385 = vmatpush1.bf16.msra.mxu0 %v15810_v2  ;;  %12417 = vmatpush1.bf16.msra.mxu1 %v15813_v60 }
0x1de1   :  { %12387 = vmatprep.subr.bf16.mxu0 %v15816_v39  ;;  %12419 = vmatprep.subr.bf16.mxu1 %v15818_v17 }
0x1de4   :  { %12389 = vmatpush1.bf16.msra.mxu0 %v15821_v13  ;;  %12421 = vmatpush1.bf16.msra.mxu1 %v15825_v18 }
0x1de5   :  { %12391 = vmatprep.subr.bf16.mxu0 %v15827_v22  ;;  %12423 = vmatprep.subr.bf16.mxu1 %v15830_v12 }
0x1de8   :  { %12393 = vmatpush1.bf16.msra.mxu0 %v15833_v23  ;;  %12425 = vmatpush1.bf16.msra.mxu1 %v15837_v29 }
0x1e9d   :  { %v9158_v27 = vpop.f32.mrb[50].mxu0  ;;  %v9229_v7 = vpop.f32.mrb[50].mxu1 }
0x1e9e   :  { %v12580_v6 = vadd.f32 %v9158_v27, %v15632_v49  ;;  %v9160_v61 = vpop.f32.mrb[51].mxu0  ;;  %v9231_v8 = vpop.f32.mrb[51].mxu1  ;;  %v12596_v17 = vadd.f32 %v9229_v7, %v15644_v15  ;;  %v12440_v27 = vpack.c.bf16 %v9531_v56, %v9530_v21  ;;  %v9548_v7 = vld [vmem:[%s16165_s13 + $0xc0] sm:$0xff] }
0x1e9f   :  { %v12581_v37 = vadd.f32 %v9160_v61, %v15635_v0  ;;  %v12597_v60 = vadd.f32 %v9231_v8, %v15640_v58  ;;  %v9532_v61 = vld [vmem:[%s16165_s13 + $0x40] sm:$0xff] }
0x1ea0   :  { %v9878_v26 = vmul.f32 -1.442695, %v12580_v6  ;;  %v9549_v6 = vld [vmem:[%s16165_s13 + $0xc8] sm:$0xff] }
0x1ea1   :  { %v9879_v2 = vmul.f32 -1.442695, %v12581_v37  ;;  %v9880_v39 = vmul.f32 -1.442695, %v12597_v60  ;;  %v12442_v8 = vpack.c.bf16 %v9549_v6, %v9548_v7  ;;  %v9533_v37 = vld [vmem:[%s16165_s13 + $0x48] sm:$0xff]  ;;  %v16233_v7 = vld [vmem:[#allocation33_spill] sm:$0xff] }
0x1ea2   :  { %13230 = vpow2.f32 %v9878_v26  ;;  %v9550_v26 = vld [vmem:[%s16165_s13 + $0xd0] sm:$0xff]  ;;  %v12444_v60 = vpack.c.bf16 %v9533_v37, %v9532_v61  ;;  %v16234_v6 = vld [vmem:[#allocation34_spill] sm:$0xff]  ;;  %v9692_v61 = vld [vmem:[%s16167_s15 + $0x38] sm:$0xff] }
0x1ea3   :  { %13232 = vpow2.f32 %v9879_v2  ;;  %v9551_v2 = vld [vmem:[%s16165_s13 + $0xd8] sm:$0xff]  ;;  %v9693_v37 = vld [vmem:[%s16167_s15 + $0x40] sm:$0xff] }
0x1ea4   :  { %13234 = vpow2.f32 %v9880_v39  ;;  %v12446_v39 = vpack.c.bf16 %v9551_v2, %v9550_v26  ;;  %v9694_v26 = vld [vmem:[%s16167_s15 + $0x48] sm:$0xff] }
0x1ea5   :  { %13236 = vtanh.f32 %v12596_v17  ;;  %v9534_v17 = vld [vmem:[%s16165_s13 + $0x50] sm:$0xff]  ;;  %v12471_v2 = vpack.c.bf16 %v9694_v26, %v9693_v37 }
0x1eac   :  { %v13231_v13 = vpop.eup %13230 }
0x1ead   :  { %v13233_v18 = vpop.eup %13232  ;;  %v9241_v22 = vadd.f32 1.0, %v13231_v13  ;;  %v9535_v13 = vld [vmem:[%s16165_s13 + $0x58] sm:$0xff] }
0x1eae   :  { %v9247_v12 = vadd.f32 1.0, %v13233_v18  ;;  %v13235_v23 = vpop.eup %13234  ;;  %v9552_v18 = vld [vmem:[%s16165_s13 + $0xe0] sm:$0xff] }
0x1eaf   :  { %13238 = vrcp.f32 %v9241_v22  ;;  %v13237_v29 = vpop.eup %13236  ;;  %v9254_v28 = vadd.f32 1.0, %v13235_v23  ;;  %v9553_v22 = vld [vmem:[%s16165_s13 + $0xe8] sm:$0xff] }
0x1eb0   :  { %13240 = vrcp.f32 %v9247_v12  ;;  %v12448_v12 = vpack.c.bf16 %v9535_v13, %v9534_v17  ;;  %v12450_v23 = vpack.c.bf16 %v9553_v22, %v9552_v18  ;;  %v9697_v13 = vld [vmem:[%s16167_s15 + $0x60] sm:$0xff]  ;;  %v9698_v18 = vld [vmem:[%s16167_s15 + $0x68] sm:$0xff] }
0x1eb1   :  { %13242 = vrcp.f32 %v9254_v28  ;;  %v12477_v22 = vpack.c.bf16 %v9698_v18, %v9697_v13 }
0x1eb9   :  { %v13239_v9 = vpop.eup %13238 }
0x1eba   :  { %v13241_v20 = vpop.eup %13240  ;;  %v9258_v3 = vmul.f32 %v13239_v9, %v13237_v29  ;;  %v9536_v29 = vld [vmem:[%s16165_s13 + $0x60] sm:$0xff]  ;;  %v9537_v9 = vld [vmem:[%s16165_s13 + $0x68] sm:$0xff] }
0x1ebb   :  { %v9257_v10 = vmul.f32 %v13241_v20, %v15939_v55  ;;  %v13243_v52 = vpop.eup %13242  ;;  %v9541_v55 = vld [vmem:[%s16165_s13 + $0x88] sm:$0xff]  ;;  %v9554_v20 = vld [vmem:[%s16165_s13 + $0xf0] sm:$0xff]  ;;  %v12452_v28 = vpack.c.bf16 %v9537_v9, %v9536_v29 }
0x1ebc   :  { %v12426_v62 = vpack.c.bf16 %v9541_v55, %v9540_v11 }
0x1ebd   :  { %v15971_v42 = vadd.f32 %v9258_v3, %v9257_v10  ;;  %v9555_v3 = vld [vmem:[%s16165_s13 + $0xf8] sm:$0xff] }
0x1ebe   :  { %12427 = vmatprep.subr.bf16.mxu0 %v12426_v62  ;;  %v12454_v10 = vpack.c.bf16 %v9555_v3, %v9554_v20 }
0x1ebf   :  { %13244 = vtanh.f32 %v15971_v42 }
0x1ec9   :  { %v13245_v38 = vpop.eup %13244 }
0x1eca   :  { %v15974_v45 = vmul.f32 %v13245_v38, %v13243_v52  ;;  %v9538_v52 = vld [vmem:[%s16165_s13 + $0x70] sm:$0xff]  ;;  %v9539_v38 = vld [vmem:[%s16165_s13 + $0x78] sm:$0xff] }
0x1ecb   :  { %v12456_v11 = vpack.c.bf16 %v9539_v38, %v9538_v52 }
0x1ecc   :  { %9400 = vmatmul.mubr.f32.vlgmr.msra.gmra.mrb[48].mxu0 %v15974_v45  ;;  %9471 = vmatmul.mubr.f32.vlgmr.msra.gmra.mrb[48].mxu1 %v15974_v45 }
0x1ecd   :  { %12429 = vmatpush3.bf16.msra.mxu0 %v12428_v53  ;;  %9991 = vmatprep.mubr.msk.f32.mxu1 %vm13435_vm0, %v16212_v31 }
0x1ece   :  { %12431 = vmatprep.subr.bf16.mxu0 %v12430_v1 }
0x1ed1   :  { %12433 = vmatpush3.bf16.msra.mxu0 %v12432_v32 }
0x1ed2   :  { %12435 = vmatprep.subr.bf16.mxu0 %v12434_v54 }
0x1ed5   :  { %12437 = vmatpush3.bf16.msra.mxu0 %v12436_v51 }
0x1ed6   :  { %12439 = vmatprep.subr.bf16.mxu0 %v12438_v48 }
0x1ed9   :  { %12441 = vmatpush3.bf16.msra.mxu0 %v12440_v27  ;;  %v16232_v27 = vld [vmem:[#allocation32_spill] sm:$0xff] }
0x1eda   :  { %12443 = vmatprep.subr.bf16.mxu0 %v12442_v8 }
0x1edd   :  { %12445 = vmatpush3.bf16.msra.mxu0 %v12444_v60  ;;  %v9695_v60 = vld [vmem:[%s16167_s15 + $0x50] sm:$0xff] }
0x1ede   :  { %12447 = vmatprep.subr.bf16.mxu0 %v12446_v39  ;;  %v9696_v39 = vld [vmem:[%s16167_s15 + $0x58] sm:$0xff] }
0x1edf   :  { %v12474_v17 = vpack.c.bf16 %v9696_v39, %v9695_v60 }
0x1ee1   :  { %12449 = vmatpush3.bf16.msra.mxu0 %v12448_v12  ;;  %v9699_v12 = vld [vmem:[%s16167_s15 + $0x70] sm:$0xff] }
0x1ee2   :  { %12451 = vmatprep.subr.bf16.mxu0 %v12450_v23  ;;  %v9700_v23 = vld [vmem:[%s16167_s15 + $0x78] sm:$0xff] }
0x1ee3   :  { %v12480_v29 = vpack.c.bf16 %v9700_v23, %v9699_v12 }
0x1ee5   :  { %12453 = vmatpush3.bf16.msra.mxu0 %v12452_v28  ;;  %v9884_v28 = vld [vmem:[%s16166_s14] ss:$0 sm:$0xff] }
0x1ee6   :  { %12455 = vmatprep.subr.bf16.mxu0 %v12454_v10 }
0x1ee9   :  { %12457 = vmatpush3.bf16.msra.mxu0 %v12456_v11 }
0x1f9f   :  { %v9401_v55 = vpop.f32.mrb[48].mxu0  ;;  %v9472_v62 = vpop.f32.mrb[48].mxu1 }
0x1fa0   :  { %v12578_v25 = vadd.f32 %v9401_v55, %v15632_v49  ;;  %v9403_v46 = vpop.f32.mrb[49].mxu0  ;;  %v9474_v53 = vpop.f32.mrb[49].mxu1  ;;  %v12594_v32 = vadd.f32 %v9472_v62, %v15644_v15 }
0x1fa1   :  { %v12579_v5 = vadd.f32 %v9403_v46, %v15635_v0  ;;  %v12595_v35 = vadd.f32 %v9474_v53, %v15640_v58 }
0x1fa2   :  { %v9881_v41 = vmul.f32 -1.442695, %v12578_v25 }
0x1fa3   :  { %v9882_v1 = vmul.f32 -1.442695, %v12579_v5  ;;  %v9883_v24 = vmul.f32 -1.442695, %v12595_v35 }
0x1fa4   :  { %13246 = vpow2.f32 %v9881_v41 }
0x1fa5   :  { %13248 = vpow2.f32 %v9882_v1 }
0x1fa6   :  { %13250 = vpow2.f32 %v9883_v24 }
0x1fa7   :  { %13252 = vtanh.f32 %v12594_v32 }
0x1fae   :  { %v13247_v30 = vpop.eup %13246 }
0x1faf   :  { %v13249_v19 = vpop.eup %13248  ;;  %v9484_v54 = vadd.f32 1.0, %v13247_v30 }
0x1fb0   :  { %v9490_v16 = vadd.f32 1.0, %v13249_v19  ;;  %v13251_v49 = vpop.eup %13250 }
0x1fb1   :  { %13254 = vrcp.f32 %v9484_v54  ;;  %v13253_v50 = vpop.eup %13252  ;;  %v9497_v4 = vadd.f32 1.0, %v13251_v49 }
0x1fb2   :  { %13256 = vrcp.f32 %v9490_v16 }
0x1fb3   :  { %13258 = vrcp.f32 %v9497_v4 }
0x1fbb   :  { %v13255_v0 = vpop.eup %13254 }
0x1fbc   :  { %v13257_v51 = vpop.eup %13256  ;;  %v9501_v47 = vmul.f32 %v13255_v0, %v13253_v50 }
0x1fbd   :  { %v9500_v48 = vmul.f32 %v13257_v51, %v15971_v42  ;;  %v13259_v15 = vpop.eup %13258  ;;  %v16235_v42 = vld [vmem:[#allocation35_spill] sm:$0xff] }
0x1fbf   :  { %v9502_v58 = vadd.f32 %v9501_v47, %v9500_v48 }
0x1fc1   :  { %13260 = vtanh.f32 %v9502_v58 }
0x1fcb   :  { %v13261_v21 = vpop.eup %13260 }
0x1fcc   :  { %v9504_v56 = vmul.f32 %v13261_v21, %v13259_v15 }
0x1fce   :  { %9627 = vmatprep.mubr.f32.mxu0 %v9504_v56 }
0x1fcf   :  { %9628 = vmatmul.mubr.f32.vlgmr.msra.gmra.mrb[64].mxu0 %v16232_v27 }
0x1fd0   :  { %9632 = vmatprep.mubr.f32.mxu0 %v15974_v45  ;;  %v9691_v45 = vld [vmem:[%s16167_s15 + $0x30] sm:$0xff] }
0x1fd1   :  { %v12468_v8 = vpack.c.bf16 %v9692_v61, %v9691_v45  ;;  %v9885_v45 = vld [vmem:[%s16168_s16] ss:$0 sm:$0xff] }
0x1fd3   :  { %9633 = vmatmul.mubr.f32.gmra.mrb[66].mxu0 %v16233_v7 }
0x1fd4   :  { %9637 = vmatprep.mubr.f32.mxu0 %v15942_v63 }
0x1fd7   :  { %9638 = vmatmul.mubr.f32.gmra.mrb[68].mxu0 %v16234_v6 }
0x1fd8   :  { %9642 = vmatprep.mubr.f32.mxu0 %v15898_v36  ;;  %v9685_v36 = vld [vmem:[%s16167_s15] sm:$0xff] }
0x1fdb   :  { %9643 = vmatmul.mubr.f32.gmra.mrb[70].mxu0 %v16235_v42 }
0x1fdc   :  { %9647 = vmatprep.mubr.f32.mxu0 %v15852_v59 }
0x1fdf   :  { %9648 = vmatmul.mubr.f32.gmra.mrb[72].mxu0 %v15359_v14  ;;  %v9686_v14 = vld [vmem:[%s16167_s15 + $0x8] sm:$0xff] }
0x1fe0   :  { %9652 = vmatprep.mubr.f32.mxu0 %v15770_v43  ;;  %v12459_v59 = vpack.c.bf16 %v9686_v14, %v9685_v36  ;;  %v13434_v43 = vmov 0.0|0.0  }
0x1fe1   :  { %12458 = vmatprep.subr.bf16.mxu1 %v13434_v43 }
0x1fe2   :  { %12460 = vmatpush3.bf16.msra.mxu1 %v12459_v59 }
0x1fe3   :  { %9653 = vmatmul.mubr.f32.gmra.mrb[74].mxu0 %v15405_v57  ;;  %12461 = vmatprep.subr.bf16.mxu1 %v13434_v43  ;;  %v9687_v57 = vld [vmem:[%s16167_s15 + $0x10] sm:$0xff] }
0x1fe4   :  { %9657 = vmatprep.mubr.f32.mxu0 %v15694_v33  ;;  %v9690_v33 = vld [vmem:[%s16167_s15 + $0x28] sm:$0xff] }
0x1fe7   :  { %9658 = vmatmul.mubr.f32.gmra.mrb[76].mxu0 %v15449_v40  ;;  %v9688_v40 = vld [vmem:[%s16167_s15 + $0x18] sm:$0xff] }
0x1fe8   :  { %9662 = vmatprep.mubr.f32.mxu0 %v15650_v34  ;;  %v9689_v34 = vld [vmem:[%s16167_s15 + $0x20] sm:$0xff] }
0x1fe9   :  { %v12465_v63 = vpack.c.bf16 %v9690_v33, %v9689_v34 }
0x1feb   :  { %9663 = vmatmul.mubr.f32.gmra.mrb[78].mxu0 %v15626_v44  ;;  %v12462_v44 = vpack.c.bf16 %v9688_v40, %v9687_v57 }
0x1fed   :  { %12463 = vmatpush3.bf16.msra.mxu1 %v12462_v44 }
0x1fee   :  { %12464 = vmatprep.subr.bf16.mxu1 %v13434_v43 }
0x1ff1   :  { %12466 = vmatpush3.bf16.msra.mxu1 %v12465_v63 }
0x1ff2   :  { %12467 = vmatprep.subr.bf16.mxu1 %v13434_v43 }
0x1ff5   :  { %12469 = vmatpush3.bf16.msra.mxu1 %v12468_v8 }
0x1ff6   :  { %12470 = vmatprep.subr.bf16.mxu1 %v13434_v43 }
0x1ff9   :  { %12472 = vmatpush3.bf16.msra.mxu1 %v12471_v2 }
0x1ffa   :  { %12473 = vmatprep.subr.bf16.mxu1 %v13434_v43 }
0x1ffd   :  { %12475 = vmatpush3.bf16.msra.mxu1 %v12474_v17 }
0x1ffe   :  { %12476 = vmatprep.subr.bf16.mxu1 %v13434_v43 }
0x2001   :  { %12478 = vmatpush3.bf16.msra.mxu1 %v12477_v22 }
0x2002   :  { %12479 = vmatprep.subr.bf16.mxu1 %v13434_v43 }
0x2005   :  { %12481 = vmatpush3.bf16.msra.mxu1 %v12480_v29 }
0x20a2   :  { %v9918_v9 = vpop.f32.mrb[64].mxu0 }
0x20a3   :  { %v9919_v20 = vpop.f32.mrb[65].mxu0 }
0x20a4   :  { %v9920_v3 = vadd.f32 %v9919_v20, %v9918_v9 }
0x20a6   :  { %v9921_v10 = vpop.f32.mrb[66].mxu0  ;;  %v9630_v38 = vadd.f32 %v9920_v3, %v9884_v28 }
0x20a7   :  { %v9922_v52 = vpop.f32.mrb[67].mxu0 }
0x20a8   :  { %v9923_v11 = vadd.f32 %v9922_v52, %v9921_v10  ;;  %v9668_v46 = vmax.f32 %v9630_v38, 0.0 }
0x20aa   :  { %v9635_v55 = vadd.f32 %v9923_v11, %v9884_v28  ;;  %v9924_v62 = vpop.f32.mrb[68].mxu0 }
0x20ab   :  { %v9925_v25 = vpop.f32.mrb[69].mxu0 }
0x20ac   :  { %v9669_v53 = vmax.f32 %v9635_v55, 0.0  ;;  %v9926_v5 = vadd.f32 %v9925_v25, %v9924_v62 }
0x20ae   :  { %v9676_v41 = vadd.f32 %v9669_v53, %v9668_v46  ;;  %v9640_v1 = vadd.f32 %v9926_v5, %v9884_v28  ;;  %v9927_v31 = vpop.f32.mrb[70].mxu0 }
0x20af   :  { %v9928_v35 = vpop.f32.mrb[71].mxu0 }
0x20b0   :  { %v9670_v24 = vmax.f32 %v9640_v1, 0.0  ;;  %v9929_v32 = vadd.f32 %v9928_v35, %v9927_v31 }
0x20b2   :  { %v9677_v30 = vadd.f32 %v9676_v41, %v9670_v24  ;;  %v9645_v19 = vadd.f32 %v9929_v32, %v9884_v28  ;;  %v9930_v54 = vpop.f32.mrb[72].mxu0 }
0x20b3   :  { %v9931_v16 = vpop.f32.mrb[73].mxu0 }
0x20b4   :  { %v9671_v49 = vmax.f32 %v9645_v19, 0.0  ;;  %v9932_v50 = vadd.f32 %v9931_v16, %v9930_v54 }
0x20b6   :  { %v9678_v0 = vadd.f32 %v9677_v30, %v9671_v49  ;;  %v9650_v51 = vadd.f32 %v9932_v50, %v9884_v28  ;;  %v9933_v47 = vpop.f32.mrb[74].mxu0 }
0x20b7   :  { %v9934_v4 = vpop.f32.mrb[75].mxu0 }
0x20b8   :  { %v9672_v48 = vmax.f32 %v9650_v51, 0.0  ;;  %v9935_v58 = vadd.f32 %v9934_v4, %v9933_v47 }
0x20ba   :  { %v9679_v15 = vadd.f32 %v9678_v0, %v9672_v48  ;;  %v9655_v21 = vadd.f32 %v9935_v58, %v9884_v28  ;;  %v9936_v56 = vpop.f32.mrb[76].mxu0 }
0x20bb   :  { %v9937_v27 = vpop.f32.mrb[77].mxu0 }
0x20bc   :  { %v9673_v7 = vmax.f32 %v9655_v21, 0.0  ;;  %v9938_v6 = vadd.f32 %v9937_v27, %v9936_v56 }
0x20be   :  { %v9680_v42 = vadd.f32 %v9679_v15, %v9673_v7  ;;  %v9660_v36 = vadd.f32 %v9938_v6, %v9884_v28  ;;  %v9939_v14 = vpop.f32.mrb[78].mxu0 }
0x20bf   :  { %v9940_v59 = vpop.f32.mrb[79].mxu0 }
0x20c0   :  { %v9674_v43 = vmax.f32 %v9660_v36, 0.0  ;;  %v9941_v57 = vadd.f32 %v9940_v59, %v9939_v14 }
0x20c2   :  { %v9681_v40 = vadd.f32 %v9680_v42, %v9674_v43  ;;  %v9665_v44 = vadd.f32 %v9941_v57, %v9884_v28 }
0x20c4   :  { %v9675_v34 = vmax.f32 %v9665_v44, 0.0 }
0x20c6   :  { %v9682_v33 = vadd.f32 %v9681_v40, %v9675_v34 }
0x20c8   :  { %v9684_v63 = vmul.f32 0.125, %v9682_v33 }
0x20ca   :  { %9992 = vmatmul.mubr.f32.vlgmr.msra.gmra.mrb[64].mxu1 %v9684_v63 }
0x219d   :  { %v9774_v61 = vpop.f32.mrb[64].mxu1 }
0x219e   :  { %v9775_v8 = vadd.f32 %v9885_v45, %v9774_v61  ;;  %v9993_v37 = vpop.f32.mrb[65].mxu1 }
0x21a0   :  { %9779 = vst.msk [vmem:[%s16169_s17] sm:$0xff] %vm9778_vm1, %v9775_v8 }
0x21a1   :  { %9784 = vsyncpa [#allocation8], 1 }
0x21a2   :  { %9785 = vsyncpa [#allocation10], 1 }
0x21a3   :  { %9786 = vsyncpa [#allocation13], 1 }
0x21a4   :  { %9787 = vsyncpa [#allocation16], 1 }

</bundles_post_ra>
